<compile_context>
chip_gen: v6e
topology: v6e:2x2x1
jax: 0.10.0
libtpu: 0.0.40
codegen_flags: <defaults>
</compile_context>

<pallas_src>
import jax
import jax.numpy as jnp
from jax import lax
from jax.experimental import pallas as pl
from jax.experimental.pallas import tpu as pltpu


def _fused_conv_kernel(p_ref, w1_ref, w2_ref, b2_ref, o_ref):
    # p_ref:  (Kp, tm)  transposed im2col patches (+ trailing ones row: b1 folded into W1)
    # w1_ref: (C1, Kp)  conv1 weights augmented with the bias column (VMEM-resident)
    # w2_ref: (C2, C1)  conv2 (1x1) weights (VMEM-resident)
    # b2_ref: (C2, 1)   conv2 bias (kept f32; cheap VPU broadcast add)
    # o_ref:  (C2, tm)  lane-dense output tile
    h = jnp.dot(w1_ref[...], p_ref[...], preferred_element_type=jnp.float32)  # conv1 (+b1)
    h = jnp.maximum(h, 0.0).astype(w2_ref.dtype)                              # relu(v1)
    o = jnp.dot(w2_ref[...], h, preferred_element_type=jnp.float32) + b2_ref[...]
    o_ref[...] = jnp.maximum(o, 0.0).astype(o_ref.dtype)                      # relu(v3)


def _pick_tm(hw, n, tm_max=2048):
    """Largest 128-multiple spatial tile <= tm_max.  Batch-aware: only shrink when the
    TOTAL grid (n * spatial steps) would drop below 2 (keeps both v7x TensorCores busy);
    otherwise bigger lane-dense tiles amortise the ~0.35 us per-step overhead."""
    hw128 = pl.cdiv(hw, 128) * 128
    tm = min(tm_max, hw128)
    while tm > 128 and n * pl.cdiv(hw128, tm) < 2:
        tm = max(128, ((tm // 2) // 128) * 128)
    return tm


def fused_model_forward(x_nchw, w1_oihw, b1, w2_oihw, b2, *, tm=None,
                        use_bf16=False, out_dtype=jnp.float32):
    """x_nchw: (N, Cin, H, W) float32. Returns (N, C2, H, W) in out_dtype (NCHW)."""
    N, Cin, H, W = x_nchw.shape
    C1 = w1_oihw.shape[0]                         # 128
    C2 = w2_oihw.shape[0]                         # 512
    KH, KW = w1_oihw.shape[2], w1_oihw.shape[3]   # 3, 3
    K = KH * KW * Cin
    Kp = K + 1                                    # +1 "ones" tap row -> b1 folded into W1
    HW = H * W

    if tm is None:
        tm = _pick_tm(HW, N)
    HWp = pl.cdiv(HW, tm) * tm                    # pad spatial length to a tile multiple

    compute_dtype = jnp.bfloat16 if use_bf16 else jnp.float32
    in_bytes = jnp.dtype(compute_dtype).itemsize

    # ---- glue: transposed im2col (padding=1, stride=1), tap order (dy, dx, cin) ----
    # Cheap: the input has a single channel, so this is ~9x a tiny image.
    x_pad = jnp.pad(x_nchw, ((0, 0), (0, 0), (1, 1), (1, 1)))      # (N, Cin, H+2, W+2)
    cols = []
    for dy in range(KH):
        for dx in range(KW):
            for c in range(Cin):
                cols.append(x_pad[:, c, dy:dy + H, dx:dx + W])     # (N, H, W)
    patches_t = jnp.stack(cols, axis=1).reshape(N, K, HW)          # (N, K, H*W)
    ones_row = jnp.ones((N, 1, HW), patches_t.dtype)               # bias tap
    patches_t = jnp.concatenate([patches_t, ones_row], axis=1)     # (N, Kp, H*W)
    if HWp != HW:
        patches_t = jnp.pad(patches_t, ((0, 0), (0, 0), (0, HWp - HW)))
    patches_t = patches_t.astype(compute_dtype)

    # ---- weights in channels-major matmul form (ordering matches taps: dy, dx, cin) ----
    w1_mat = jnp.transpose(w1_oihw, (0, 2, 3, 1)).reshape(C1, K)   # (C1, K)
    w1_mat = jnp.concatenate([w1_mat, b1.reshape(C1, 1)], axis=1)  # (C1, Kp) bias folded
    w1_mat = w1_mat.astype(compute_dtype)
    w2_mat = w2_oihw.reshape(C2, C1).astype(compute_dtype)         # (C2, C1) (1x1 conv)
    b2_col = b2.reshape(C2, 1).astype(jnp.float32)

    grid = (N, HWp // tm)

    # Advisory cost hint for XLA scheduling of the custom call.
    cost = pl.CostEstimate(
        flops=2 * N * HWp * (C1 * Kp + C2 * C1),
        transcendentals=0,
        bytes_accessed=(N * HWp * (Kp * in_bytes + C2 * jnp.dtype(out_dtype).itemsize)
                        + (C1 * Kp + C2 * C1) * in_bytes + C2 * 4),
    )

    # Explicit VMEM budget: big lane-dense tiles overrun v5e's 16 MiB default scoped
    # limit; cap the request well under v7x's 64 MiB physical VMEM.
    vmem_need = (2 * Kp * tm * in_bytes                 # patches double buffer
                 + 2 * C2 * tm * jnp.dtype(out_dtype).itemsize   # output double buffer
                 + C1 * 128 * in_bytes                  # w1 (lane padded)
                 + C2 * C1 * in_bytes                   # w2
                 + C2 * 128 * 4)                        # b2 (lane padded)
    vmem_limit = int(min(max(32 * 1024 * 1024, 2 * vmem_need), 56 * 1024 * 1024))

    def run(single_buffer_weights):
        # Weight/bias index_maps are constant across the grid -> the second pipeline
        # buffer is dead VMEM; request single buffering for them.
        wkw = {"pipeline_mode": pl.Buffered(1)} if single_buffer_weights else {}
        return pl.pallas_call(
            _fused_conv_kernel,
            out_shape=jax.ShapeDtypeStruct((N, C2, HWp), out_dtype),
            grid=grid,
            in_specs=[
                pl.BlockSpec((None, Kp, tm), lambda n, j: (n, 0, j)),  # patches tile
                pl.BlockSpec((C1, Kp), lambda n, j: (0, 0), **wkw),    # w1 (+b1 column)
                pl.BlockSpec((C2, C1), lambda n, j: (0, 0), **wkw),    # w2
                pl.BlockSpec((C2, 1), lambda n, j: (0, 0), **wkw),     # b2
            ],
            out_specs=pl.BlockSpec((None, C2, tm), lambda n, j: (n, 0, j)),
            compiler_params=pltpu.CompilerParams(
                dimension_semantics=("parallel", "parallel"),
                vmem_limit_bytes=vmem_limit),
            cost_estimate=cost,
        )(patches_t, w1_mat, w2_mat, b2_col)

    try:
        out = run(single_buffer_weights=True)
    except Exception:
        # Fallback if this jax build rejects Buffered(1) in pallas_call BlockSpecs.
        out = run(single_buffer_weights=False)

    if HWp != HW:
        out = out[:, :, :HW]
    return out.reshape(N, C2, H, W)               # NCHW directly — no transpose needed


def _reference(x_nchw, w1, b1, w2, b2):
    dn = ("NCHW", "OIHW", "NCHW")
    v1 = lax.conv_general_dilated(x_nchw, w1, (1, 1), "SAME", dimension_numbers=dn)
    v1 = v1 + b1.reshape(1, -1, 1, 1)
    v2 = jnp.maximum(v1, 0.0)
    v3 = lax.conv_general_dilated(v2, w2, (1, 1), "VALID", dimension_numbers=dn)
    v3 = v3 + b2.reshape(1, -1, 1, 1)
    return jnp.maximum(v3, 0.0)


if __name__ == "__main__":
    key = jax.random.PRNGKey(0)
    k_x, k_w1, k_b1, k_w2, k_b2 = jax.random.split(key, 5)

    # Small shapes consistent with the module (1 input channel, 3x3 then 1x1 conv).
    N, Cin, H, W = 2, 1, 32, 32
    C1, C2 = 128, 512

    x = jax.random.normal(k_x, (N, Cin, H, W), dtype=jnp.float32)
    w1 = 0.1 * jax.random.normal(k_w1, (C1, Cin, 3, 3), dtype=jnp.float32)
    b1 = 0.1 * jax.random.normal(k_b1, (C1,), dtype=jnp.float32)
    w2 = 0.05 * jax.random.normal(k_w2, (C2, C1, 1, 1), dtype=jnp.float32)
    b2 = 0.05 * jax.random.normal(k_b2, (C2,), dtype=jnp.float32)

    ref = jax.block_until_ready(_reference(x, w1, b1, w2, b2))

    # Default f32 path: exact parity with the reference.
    out = jax.block_until_ready(fused_model_forward(x, w1, b1, w2, b2))
    assert out.shape == (N, C2, H, W)
    assert jnp.allclose(out, ref, rtol=1e-4, atol=1e-4), "f32 mismatch vs reference"

    # Opt-in bf16 MXU path (numerics-visible: 128-deep bf16 contraction, f32 accum).
    out_bf16 = jax.block_until_ready(fused_model_forward(x, w1, b1, w2, b2, use_bf16=True))
    assert jnp.allclose(out_bf16, ref, rtol=5e-2, atol=5e-2), "bf16 mismatch vs reference"

    print("KERNEL_OK")
</pallas_src>

<mosaic_0001>
module attributes {stable_mosaic.version = 11 : i64} {
  func.func @_fused_conv_kernel(%arg0: i32, %arg1: i32, %arg2: memref<1x10x1024xf32, #tpu.memory_space<vmem>>, %arg3: memref<128x10xf32, #tpu.memory_space<vmem>>, %arg4: memref<512x128xf32, #tpu.memory_space<vmem>>, %arg5: memref<512x1xf32, #tpu.memory_space<vmem>>, %arg6: memref<1x512x1024xf32, #tpu.memory_space<vmem>>) attributes {dimension_semantics = [#tpu.dimension_semantics<parallel>, #tpu.dimension_semantics<parallel>], iteration_bounds = array<i64: 2, 1>, scalar_prefetch = 0 : i64, scratch_operands = 0 : i64, tpu.core_type = #tpu.core_type<tc>, window_params = [{transform_indices = @transform_0, window_bounds = array<i64: 1, 10, 1024>}, {pipeline_mode = #tpu.pipeline_mode<synchronous>, transform_indices = @transform_1, window_bounds = array<i64: 128, 10>}, {pipeline_mode = #tpu.pipeline_mode<synchronous>, transform_indices = @transform_2, window_bounds = array<i64: 512, 128>}, {pipeline_mode = #tpu.pipeline_mode<synchronous>, transform_indices = @transform_3, window_bounds = array<i64: 512, 1>}, {transform_indices = @transform_4, window_bounds = array<i64: 1, 512, 1024>}]} {
    %c0 = arith.constant 0 : index
    %c0_0 = arith.constant 0 : index
    %0 = vector.load %arg3[%c0, %c0_0] : memref<128x10xf32, #tpu.memory_space<vmem>>, vector<128x10xf32>
    %c0_1 = arith.constant 0 : index
    %c0_2 = arith.constant 0 : index
    %c0_3 = arith.constant 0 : index
    %1 = vector.load %arg2[%c0_1, %c0_2, %c0_3] : memref<1x10x1024xf32, #tpu.memory_space<vmem>>, vector<1x10x1024xf32>
    %2 = vector.shape_cast %1 : vector<1x10x1024xf32> to vector<10x1024xf32>
    %cst = arith.constant dense<0.000000e+00> : vector<128x1024xf32>
    %3 = tpu.matmul %0, %2, %cst {dimension_numbers = #tpu.dot_dimension_numbers<[1], [0], [0], [1], [0, 0, 1, 1], [], []>} : vector<128x10xf32>, vector<10x1024xf32>, vector<128x1024xf32> -> vector<128x1024xf32>
    %cst_4 = arith.constant 0.000000e+00 : f32
    %4 = vector.broadcast %cst_4 : f32 to vector<128x1024xf32>
    %5 = arith.maximumf %3, %4 : vector<128x1024xf32>
    %c0_5 = arith.constant 0 : index
    %c0_6 = arith.constant 0 : index
    %6 = vector.load %arg4[%c0_5, %c0_6] : memref<512x128xf32, #tpu.memory_space<vmem>>, vector<512x128xf32>
    %cst_7 = arith.constant dense<0.000000e+00> : vector<512x1024xf32>
    %7 = tpu.matmul %6, %5, %cst_7 {dimension_numbers = #tpu.dot_dimension_numbers<[1], [0], [0], [1], [0, 0, 1, 1], [], []>} : vector<512x128xf32>, vector<128x1024xf32>, vector<512x1024xf32> -> vector<512x1024xf32>
    %c0_8 = arith.constant 0 : index
    %c0_9 = arith.constant 0 : index
    %8 = vector.load %arg5[%c0_8, %c0_9] : memref<512x1xf32, #tpu.memory_space<vmem>>, vector<512x1xf32>
    %9 = vector.broadcast %8 : vector<512x1xf32> to vector<512x1024xf32>
    %10 = arith.addf %7, %9 : vector<512x1024xf32>
    %cst_10 = arith.constant 0.000000e+00 : f32
    %11 = vector.broadcast %cst_10 : f32 to vector<512x1024xf32>
    %12 = arith.maximumf %10, %11 : vector<512x1024xf32>
    %c0_11 = arith.constant 0 : index
    %c0_12 = arith.constant 0 : index
    %c0_13 = arith.constant 0 : index
    %13 = vector.load %arg6[%c0_11, %c0_12, %c0_13] : memref<1x512x1024xf32, #tpu.memory_space<vmem>>, vector<1x512x1024xf32>
    %14 = vector.shape_cast %13 : vector<1x512x1024xf32> to vector<512x1024xf32>
    %15 = vector.shape_cast %12 : vector<512x1024xf32> to vector<1x512x1024xf32>
    tpu.vector_store %arg6[%c0_11, %c0_12, %c0_13], %15 {strides = array<i32>} : memref<1x512x1024xf32, #tpu.memory_space<vmem>>, vector<1x512x1024xf32>,
    return
  }
  func.func @transform_0(%arg0: i32, %arg1: i32) -> (i32, i32, i32) {
    %c0_i32 = arith.constant 0 : i32
    %c0_i32_0 = arith.constant 0 : i32
    return %arg0, %c0_i32, %arg1 : i32, i32, i32
  }
  func.func @transform_1(%arg0: i32, %arg1: i32) -> (i32, i32) {
    %c0_i32 = arith.constant 0 : i32
    %c0_i32_0 = arith.constant 0 : i32
    %c0_i32_1 = arith.constant 0 : i32
    return %c0_i32, %c0_i32_0 : i32, i32
  }
  func.func @transform_2(%arg0: i32, %arg1: i32) -> (i32, i32) {
    %c0_i32 = arith.constant 0 : i32
    %c0_i32_0 = arith.constant 0 : i32
    %c0_i32_1 = arith.constant 0 : i32
    return %c0_i32, %c0_i32_0 : i32, i32
  }
  func.func @transform_3(%arg0: i32, %arg1: i32) -> (i32, i32) {
    %c0_i32 = arith.constant 0 : i32
    %c0_i32_0 = arith.constant 0 : i32
    %c0_i32_1 = arith.constant 0 : i32
    return %c0_i32, %c0_i32_0 : i32, i32
  }
  func.func @transform_4(%arg0: i32, %arg1: i32) -> (i32, i32, i32) {
    %c0_i32 = arith.constant 0 : i32
    %c0_i32_0 = arith.constant 0 : i32
    return %arg0, %c0_i32, %arg1 : i32, i32, i32
  }
}

module attributes {stable_mosaic.version = 11 : i64} {
  func.func @_fused_conv_kernel(%arg0: i32, %arg1: i32, %arg2: memref<1x10x1024xf32, #tpu.memory_space<vmem>>, %arg3: memref<128x10xf32, #tpu.memory_space<vmem>>, %arg4: memref<512x128xf32, #tpu.memory_space<vmem>>, %arg5: memref<512x1xf32, #tpu.memory_space<vmem>>, %arg6: memref<1x512x1024xf32, #tpu.memory_space<vmem>>) attributes {dimension_semantics = [#tpu.dimension_semantics<parallel>, #tpu.dimension_semantics<parallel>], iteration_bounds = array<i64: 2, 1>, scalar_prefetch = 0 : i64, scratch_operands = 0 : i64, tpu.core_type = #tpu.core_type<tc>, window_params = [{transform_indices = @transform_0, window_bounds = array<i64: 1, 10, 1024>}, {pipeline_mode = #tpu.pipeline_mode<synchronous>, transform_indices = @transform_1, window_bounds = array<i64: 128, 10>}, {pipeline_mode = #tpu.pipeline_mode<synchronous>, transform_indices = @transform_2, window_bounds = array<i64: 512, 128>}, {pipeline_mode = #tpu.pipeline_mode<synchronous>, transform_indices = @transform_3, window_bounds = array<i64: 512, 1>}, {transform_indices = @transform_4, window_bounds = array<i64: 1, 512, 1024>}]} {
    %c0 = arith.constant 0 : index
    %c0_0 = arith.constant 0 : index
    %0 = vector.load %arg3[%c0, %c0_0] : memref<128x10xf32, #tpu.memory_space<vmem>>, vector<128x10xf32>
    %c0_1 = arith.constant 0 : index
    %c0_2 = arith.constant 0 : index
    %c0_3 = arith.constant 0 : index
    %1 = vector.load %arg2[%c0_1, %c0_2, %c0_3] : memref<1x10x1024xf32, #tpu.memory_space<vmem>>, vector<1x10x1024xf32>
    %2 = vector.shape_cast %1 : vector<1x10x1024xf32> to vector<10x1024xf32>
    %cst = arith.constant dense<0.000000e+00> : vector<128x1024xf32>
    %3 = tpu.matmul %0, %2, %cst {dimension_numbers = #tpu.dot_dimension_numbers<[1], [0], [0], [1], [0, 0, 1, 1], [], []>} : vector<128x10xf32>, vector<10x1024xf32>, vector<128x1024xf32> -> vector<128x1024xf32>
    %cst_4 = arith.constant 0.000000e+00 : f32
    %4 = vector.broadcast %cst_4 : f32 to vector<128x1024xf32>
    %5 = arith.maximumf %3, %4 : vector<128x1024xf32>
    %c0_5 = arith.constant 0 : index
    %c0_6 = arith.constant 0 : index
    %6 = vector.load %arg4[%c0_5, %c0_6] : memref<512x128xf32, #tpu.memory_space<vmem>>, vector<512x128xf32>
    %cst_7 = arith.constant dense<0.000000e+00> : vector<512x1024xf32>
    %7 = tpu.matmul %6, %5, %cst_7 {dimension_numbers = #tpu.dot_dimension_numbers<[1], [0], [0], [1], [0, 0, 1, 1], [], []>} : vector<512x128xf32>, vector<128x1024xf32>, vector<512x1024xf32> -> vector<512x1024xf32>
    %c0_8 = arith.constant 0 : index
    %c0_9 = arith.constant 0 : index
    %8 = vector.load %arg5[%c0_8, %c0_9] : memref<512x1xf32, #tpu.memory_space<vmem>>, vector<512x1xf32>
    %9 = vector.broadcast %8 : vector<512x1xf32> to vector<512x1024xf32>
    %10 = arith.addf %7, %9 : vector<512x1024xf32>
    %cst_10 = arith.constant 0.000000e+00 : f32
    %11 = vector.broadcast %cst_10 : f32 to vector<512x1024xf32>
    %12 = arith.maximumf %10, %11 : vector<512x1024xf32>
    %c0_11 = arith.constant 0 : index
    %c0_12 = arith.constant 0 : index
    %c0_13 = arith.constant 0 : index
    %13 = vector.load %arg6[%c0_11, %c0_12, %c0_13] : memref<1x512x1024xf32, #tpu.memory_space<vmem>>, vector<1x512x1024xf32>
    %14 = vector.shape_cast %13 : vector<1x512x1024xf32> to vector<512x1024xf32>
    %15 = vector.shape_cast %12 : vector<512x1024xf32> to vector<1x512x1024xf32>
    tpu.vector_store %arg6[%c0_11, %c0_12, %c0_13], %15 {strides = array<i32>} : memref<1x512x1024xf32, #tpu.memory_space<vmem>>, vector<1x512x1024xf32>,
    return
  }
  func.func @transform_0(%arg0: i32, %arg1: i32) -> (i32, i32, i32) {
    %c0_i32 = arith.constant 0 : i32
    %c0_i32_0 = arith.constant 0 : i32
    return %arg0, %c0_i32, %arg1 : i32, i32, i32
  }
  func.func @transform_1(%arg0: i32, %arg1: i32) -> (i32, i32) {
    %c0_i32 = arith.constant 0 : i32
    %c0_i32_0 = arith.constant 0 : i32
    %c0_i32_1 = arith.constant 0 : i32
    return %c0_i32, %c0_i32_0 : i32, i32
  }
  func.func @transform_2(%arg0: i32, %arg1: i32) -> (i32, i32) {
    %c0_i32 = arith.constant 0 : i32
    %c0_i32_0 = arith.constant 0 : i32
    %c0_i32_1 = arith.constant 0 : i32
    return %c0_i32, %c0_i32_0 : i32, i32
  }
  func.func @transform_3(%arg0: i32, %arg1: i32) -> (i32, i32) {
    %c0_i32 = arith.constant 0 : i32
    %c0_i32_0 = arith.constant 0 : i32
    %c0_i32_1 = arith.constant 0 : i32
    return %c0_i32, %c0_i32_0 : i32, i32
  }
  func.func @transform_4(%arg0: i32, %arg1: i32) -> (i32, i32, i32) {
    %c0_i32 = arith.constant 0 : i32
    %c0_i32_0 = arith.constant 0 : i32
    return %arg0, %c0_i32, %arg1 : i32, i32, i32
  }
}

</mosaic_0001>

<bundles_post_ra>
// kernel: tpu_custom_call.1
= control target key start
LH: loop header
LB: loop body
LE: loop exit
PB: predicated region body
PF: predicated region fallthrough
CT: control target
= control target key end

     0   :  { %9 = vsyncpa [#allocation3], 0  ;;  %s7221_s0 = inlined_call_operand.vmem [shape: f32[2,10,1024], index: 0, kind: input, shape index: {}]   ;;  %s7222_s1 = inlined_call_operand.vmem [shape: f32[128,10], index: 1, kind: input, shape index: {}]   ;;  %s7223_s2 = inlined_call_operand.hbm [shape: f32[512,128], index: 2, kind: input, shape index: {}]   ;;  %s7224_s3 = inlined_call_operand.vmem [shape: f32[512,1], index: 3, kind: input, shape index: {}]   ;;  %s7225_s4 = inlined_call_operand.hbm [shape: f32[2,512,1024], index: 4, kind: output, shape index: {}]  }
   0x1   :  { %10 = vsyncpa [#allocation4], 0 }
   0x2   :  { %12 = vsyncpa [#allocation4 + $0x1], 0  ;;  %s4863_s15 = smov 0   ;;  %s4865_s16 = smov 0  }
   0x3   :  { %s4867_s17 = smov 0   ;;  %s4869_s18 = smov 0  }
   0x4   :  { %s4871_s19 = smov 0   ;;  %s4873_s20 = smov 0  }
   0x5 LB: > { %s4495_s21 = sadd.s32 4294967295, %s4828_s20   ;;  %s4496_s22 = sadd.s32 4294967294, %s4828_s20   ;;  %s4828_s20 = sphi %s4873_s20, %s18_s20   ;;  %s4824_s19 = sphi %s4871_s19, %s7359_s19   ;;  %s4820_s18 = sphi %s4869_s18, %s7358_s18   ;;  %s4816_s17 = sphi %s4867_s17, %s7357_s17   ;;  %s4812_s16 = sphi %s4865_s16, %s7356_s16   ;;  %s4808_s15 = sphi %s4863_s15, %s7355_s15  }
   0x6   : > { %s30_s23 = sadd.s32 1, %s4824_s19  ;;  %s130_s24 = sadd.s32 1, %s4816_s17 }
   0x7   : > { %p32_p0 = scmp.ge.s32.totalorder %s30_s23, 2  ;;  %p140_p1 = scmp.ne.s32.totalorder %s4816_s17, %s4812_s16 }
   0x8   : > { %p141_p2 = scmp.eq.s32.totalorder %s4495_s21, 1  ;;  %p146_p3 = scmp.ne.s32.totalorder %s4812_s16, %s4808_s15 }
   0x9   : > { %s7361_s23 = smov (%p32_p0, %s30_s23), 0  ;;  %p147_p5 = scmp.eq.s32.totalorder %s4496_s22, 1 }
   0xa   : > { %p4903_p4 = por %p141_p2, %p140_p1  ;;  %s125_s26 = ssub.s32 %s4824_s19, %s7361_s23 }
   0xb   : > { %p4497_p6 = scmp.ge.s32.totalorder %s4828_s20, 1  ;;  %p128_p7 = scmp.eq.s32.totalorder %s125_s26, 0 }
   0xc   : > { %p4910_p8 = por %p147_p5, %p146_p3  ;;  %p154_p9 = scmp.lt.s32.totalorder %s4828_s20, 3 }
   0xd   : > { %s4916_s28 = scalar_select %p128_p7, %s4816_s17, %s130_s24  }
   0xe   : > { %p4918_p10 = pnand %p4497_p6, %p154_p9  ;;  %p4922_p11 = scmp.eq.s32.totalorder %s4495_s21, 0 }
   0xf   : > { %s4830_s5 = smov [#allocation2]  }
  0x10   : > { %p4590_p12 = pneg %p4918_p10  ;;  %s169_s6 = sshll.u32 %s4830_s5, 4  ;;  %s170_s6 = int_to_ptr.vmem [resolvable:$true] %s169_s6 }
  0x11   : > { %s4733_s7 = scalar_lea.vmem %s170_s6, 8192  ;;  %p4741_p5 = scmp.lt.s32.totalorder %s170_s6, %s170_s6 }
  0x12   : > { %p4591_p13 = pnand %p4922_p11, %p4590_p12  ;;  %p4734_p1 = scmp.ne.s32.totalorder %s170_s6, %s4733_s7 }
  0x13   : > { %p4742_p6 = scmp.lt.s32.totalorder %s4733_s7, %s4733_s7 }
  0x14   : > { %p4724_p0 = pneg %p4591_p13 }
  0x15   : > { %p4743_p7 = por %p4742_p6, %p4741_p5 }
  0x16   : > { %p4736_p2 = pnand %p4734_p1, %p4724_p0 }
  0x18   : > { %p4737_p3 = pneg %p4736_p2 }
  0x1a   : > { %p4744_p9 = pnand %p4743_p7, %p4737_p3 }
  0x1c   : > { %4747 = shalt.err (!%p4744_p9)
}
  0x1d   : > { %s4831_s8 = smov 128   ;;  %s4832_s9 = smov 8  }
  0x1e   : > { %4593 = dma.hbm_to_vmem [thread:$0]  (!%p4591_p13), %s7223_s2, 8192, %s170_s6, [#allocation3], %s4831_s8, %s4831_s8, %s4832_s9  }
  0x1f   : > { %201 = sbr.rel (%p4918_p10) target bundleno = 1074 (0x432), region = 36 }
  0x24   : > { %4799 = dma.done.wait (%p4922_p11), [#allocation3], 8192  }
  0x25   : > { %4801 = vsyncadd (%p4922_p11), [#allocation3], 4294959104  ;;  %p232_p12 = scmp.lt.s32.totalorder %s4820_s18, 1  ;;  %v7226_v0 = vmov 0.0   ;;  %vm323_vm0 = vcmask 1041408   ;;  %v4963_v9 = vld [vmem:[%s7222_s1] sm:$0xff] }
  0x26   : > { %412 = vmatprep.mubr.f32.mxu0 %v7226_v0  ;;  %573 = vmatprep.mubr.f32.mxu1 %v7226_v0  ;;  %vm274_vm1 = vcmask 80896   ;;  %v4974_v10 = vld [vmem:[%s7222_s1 + $0x8] sm:$0xff]  ;;  %v4989_v15 = vld [vmem:[%s7222_s1 + $0x10] sm:$0xff]  ;;  %v5008_v20 = vld [vmem:[%s7222_s1 + $0x18] sm:$0xff]  ;;  %s228_s5 = sand.u32 1, %s4812_s16   ;;  %s4583_s30 = sshll.u32 %s4820_s18, 16 }
  0x27   : > { %s233_s12 = scalar_select %p232_p12, %s4820_s18, 1  ;;  %v5019_v21 = vld [vmem:[%s7222_s1 + $0x20] sm:$0xff]  ;;  %v5030_v22 = vld [vmem:[%s7222_s1 + $0x28] sm:$0xff]  ;;  %v5041_v23 = vld [vmem:[%s7222_s1 + $0x30] sm:$0xff] }
  0x28   : > { %v5052_v24 = vld [vmem:[%s7222_s1 + $0x38] sm:$0xff]  ;;  %v5063_v25 = vld [vmem:[%s7222_s1 + $0x40] sm:$0xff]  ;;  %v5074_v26 = vld [vmem:[%s7222_s1 + $0x48] sm:$0xff]  ;;  %s4502_s8 = sshll.u32 %s228_s5, 12  ;;  %s7166_s9 = scalar_lea.hbm %s7225_s4, %s4583_s30 }
  0x29   : > { %s4582_s13 = sshll.u32 %s233_s12, 7  ;;  %v5085_v27 = vld [vmem:[%s7222_s1 + $0x50] sm:$0xff]  ;;  %v5096_v28 = vld [vmem:[%s7222_s1 + $0x58] sm:$0xff]  ;;  %v5107_v29 = vld [vmem:[%s7222_s1 + $0x60] sm:$0xff]  ;;  %s7176_s18 = scalar_lea.sflag [#allocation4], %s228_s5 }
  0x2a   : > { %s4946_s22 = scalar_lea.vmem %s7221_s0, %s4582_s13  ;;  %v5118_v30 = vld [vmem:[%s7222_s1 + $0x68] sm:$0xff]  ;;  %v5129_v31 = vld [vmem:[%s7222_s1 + $0x70] sm:$0xff]  ;;  %v5140_v32 = vld [vmem:[%s7222_s1 + $0x78] sm:$0xff]  ;;  %s5850_s13 = scalar_lea.vmem [#allocation5], %s4502_s8 }
  0x2b   : > { %v267_v1 = vld [vmem:[%s4946_s22 + $0x48] sm:$0x3]  ;;  %v269_v2 = vld [vmem:[%s4946_s22 + $0x58] sm:$0x3]  ;;  %v266_v3 = vld [vmem:[%s4946_s22 + $0x40] sm:$0x3] }
  0x2c   : > { %4505 = vmatprep.subr.msk.mxu0 %vm323_vm0, %v267_v1  ;;  %4523 = vmatprep.subr.msk.mxu1 %vm323_vm0, %v269_v2  ;;  %v268_v4 = vld [vmem:[%s4946_s22 + $0x50] sm:$0x3]  ;;  %v259_v5 = vld [vmem:[%s4946_s22 + $0x8] sm:$0xff]  ;;  %v261_v6 = vld [vmem:[%s4946_s22 + $0x18] sm:$0xff]  ;;  %s4404_s6 = sshll.u32 %s5850_s13, 4  ;;  %s4835_s11 = smov [#allocation5]   ;;  %s7168_s6 = int_to_ptr.vmem [resolvable:$true] %s4404_s6 }
  0x2d   : > { %4506 = vmatpush1.msk.msra.mxu0 %vm323_vm0, %v266_v3  ;;  %4524 = vmatpush1.msk.msra.mxu1 %vm323_vm0, %v268_v4  ;;  %v258_v7 = vld [vmem:[%s4946_s22] sm:$0xff]  ;;  %v260_v8 = vld [vmem:[%s4946_s22 + $0x10] sm:$0xff]  ;;  %v271_v11 = vld [vmem:[%s4946_s22 + $0x68] sm:$0x3]  ;;  %s4748_s10 = scalar_lea.vmem %s7168_s6, 65536  ;;  %s4752_s12 = sshll.u32 %s4835_s11, 4  ;;  %s4753_s12 = int_to_ptr.vmem [resolvable:$false] %s4752_s12 }
  0x2e   : > { %378 = vmatprep.subr.mxu0 %v259_v5  ;;  %539 = vmatprep.subr.mxu1 %v261_v6  ;;  %v273_v12 = vld [vmem:[%s4946_s22 + $0x78] sm:$0x3]  ;;  %v270_v13 = vld [vmem:[%s4946_s22 + $0x60] sm:$0x3]  ;;  %v272_v14 = vld [vmem:[%s4946_s22 + $0x70] sm:$0x3]  ;;  %p4749_p10 = scmp.ne.s32.totalorder %s7168_s6, %s4748_s10  ;;  %p4755_p0 = scmp.lt.s32.totalorder %s7168_s6, %s4753_s12 }
  0x2f   : > { %379 = vmatpush1.msra.mxu0 %v258_v7  ;;  %540 = vmatpush1.msra.mxu1 %v260_v8  ;;  %v263_v16 = vld [vmem:[%s4946_s22 + $0x28] sm:$0xff]  ;;  %v265_v17 = vld [vmem:[%s4946_s22 + $0x38] sm:$0xff]  ;;  %v262_v18 = vld [vmem:[%s4946_s22 + $0x20] sm:$0xff]  ;;  %s4754_s14 = scalar_lea.vmem %s4753_s12, 131072 }
  0x30   : > { %4507 = vmatmul.mubr.msk.f32.vlgmr.msra.gmra.mxu0 %vm274_vm1, %v4963_v9  ;;  %4525 = vmatmul.mubr.msk.f32.vlgmr.msra.gmra.mxu1 %vm274_vm1, %v4963_v9  ;;  %v264_v19 = vld [vmem:[%s4946_s22 + $0x30] sm:$0xff]  ;;  %p4750_p11 = pnand %p4749_p10, %p4903_p4  ;;  %p4756_p1 = scmp.lt.s32.totalorder %s4754_s14, %s4748_s10 }
  0x31   : > { %418 = vmatprep.mubr.f32.mxu0 %v7226_v0  ;;  %579 = vmatprep.mubr.f32.mxu1 %v7226_v0 }
  0x32   : > { %4541 = vmatprep.subr.msk.mxu0 %vm323_vm0, %v271_v11  ;;  %4559 = vmatprep.subr.msk.mxu1 %vm323_vm0, %v273_v12  ;;  %p4751_p13 = pneg %p4750_p11  ;;  %p4757_p2 = por %p4756_p1, %p4755_p0 }
  0x33   : > { %4542 = vmatpush1.msk.msra.mxu0 %vm323_vm0, %v270_v13  ;;  %4560 = vmatpush1.msk.msra.mxu1 %vm323_vm0, %v272_v14 }
  0x34   : > { %4508 = vmatmul.mubr.msk.f32.gmra.mxu0 %vm274_vm1, %v4974_v10  ;;  %4526 = vmatmul.mubr.msk.f32.gmra.mxu1 %vm274_vm1, %v4974_v10  ;;  %p4758_p3 = pnand %p4757_p2, %p4751_p13 }
  0x35   : > { %424 = vmatprep.mubr.f32.mxu0 %v7226_v0  ;;  %585 = vmatprep.mubr.f32.mxu1 %v7226_v0 }
  0x36   : > { %700 = vmatprep.subr.mxu0 %v263_v16  ;;  %861 = vmatprep.subr.mxu1 %v265_v17 }
  0x37   : > { %701 = vmatpush1.msra.mxu0 %v262_v18  ;;  %862 = vmatpush1.msra.mxu1 %v264_v19 }
  0x38   : > { %4509 = vmatmul.mubr.msk.f32.gmra.mxu0 %vm274_vm1, %v4989_v15  ;;  %4527 = vmatmul.mubr.msk.f32.gmra.mxu1 %vm274_vm1, %v4989_v15 }
  0x39   : > { %430 = vmatprep.mubr.f32.mxu0 %v7226_v0  ;;  %591 = vmatprep.mubr.f32.mxu1 %v7226_v0 }
  0x3c   : > { %4510 = vmatmul.mubr.msk.f32.gmra.mxu0 %vm274_vm1, %v5008_v20  ;;  %4528 = vmatmul.mubr.msk.f32.gmra.mxu1 %vm274_vm1, %v5008_v20 }
  0x3d   : > { %436 = vmatprep.mubr.f32.mxu0 %v7226_v0  ;;  %597 = vmatprep.mubr.f32.mxu1 %v7226_v0 }
  0x40   : > { %4511 = vmatmul.mubr.msk.f32.gmra.mxu0 %vm274_vm1, %v5019_v21  ;;  %4529 = vmatmul.mubr.msk.f32.gmra.mxu1 %vm274_vm1, %v5019_v21 }
  0x41   : > { %442 = vmatprep.mubr.f32.mxu0 %v7226_v0  ;;  %603 = vmatprep.mubr.f32.mxu1 %v7226_v0 }
  0x44   : > { %4512 = vmatmul.mubr.msk.f32.gmra.mxu0 %vm274_vm1, %v5030_v22  ;;  %4530 = vmatmul.mubr.msk.f32.gmra.mxu1 %vm274_vm1, %v5030_v22 }
  0x45   : > { %448 = vmatprep.mubr.f32.mxu0 %v7226_v0  ;;  %609 = vmatprep.mubr.f32.mxu1 %v7226_v0 }
  0x48   : > { %4513 = vmatmul.mubr.msk.f32.gmra.mxu0 %vm274_vm1, %v5041_v23  ;;  %4531 = vmatmul.mubr.msk.f32.gmra.mxu1 %vm274_vm1, %v5041_v23 }
  0x49   : > { %454 = vmatprep.mubr.f32.mxu0 %v7226_v0  ;;  %615 = vmatprep.mubr.f32.mxu1 %v7226_v0 }
  0x4c   : > { %4514 = vmatmul.mubr.msk.f32.gmra.mxu0 %vm274_vm1, %v5052_v24  ;;  %4532 = vmatmul.mubr.msk.f32.gmra.mxu1 %vm274_vm1, %v5052_v24 }
  0x4d   : > { %460 = vmatprep.mubr.f32.mxu0 %v7226_v0  ;;  %621 = vmatprep.mubr.f32.mxu1 %v7226_v0 }
  0x50   : > { %4515 = vmatmul.mubr.msk.f32.gmra.mxu0 %vm274_vm1, %v5063_v25  ;;  %4533 = vmatmul.mubr.msk.f32.gmra.mxu1 %vm274_vm1, %v5063_v25 }
  0x51   : > { %466 = vmatprep.mubr.f32.mxu0 %v7226_v0  ;;  %627 = vmatprep.mubr.f32.mxu1 %v7226_v0 }
  0x54   : > { %4516 = vmatmul.mubr.msk.f32.gmra.mxu0 %vm274_vm1, %v5074_v26  ;;  %4534 = vmatmul.mubr.msk.f32.gmra.mxu1 %vm274_vm1, %v5074_v26 }
  0x55   : > { %472 = vmatprep.mubr.f32.mxu0 %v7226_v0  ;;  %633 = vmatprep.mubr.f32.mxu1 %v7226_v0 }
  0x58   : > { %4517 = vmatmul.mubr.msk.f32.gmra.mxu0 %vm274_vm1, %v5085_v27  ;;  %4535 = vmatmul.mubr.msk.f32.gmra.mxu1 %vm274_vm1, %v5085_v27 }
  0x59   : > { %478 = vmatprep.mubr.f32.mxu0 %v7226_v0  ;;  %639 = vmatprep.mubr.f32.mxu1 %v7226_v0 }
  0x5c   : > { %4518 = vmatmul.mubr.msk.f32.gmra.mxu0 %vm274_vm1, %v5096_v28  ;;  %4536 = vmatmul.mubr.msk.f32.gmra.mxu1 %vm274_vm1, %v5096_v28 }
  0x5d   : > { %484 = vmatprep.mubr.f32.mxu0 %v7226_v0  ;;  %645 = vmatprep.mubr.f32.mxu1 %v7226_v0 }
  0x60   : > { %4519 = vmatmul.mubr.msk.f32.gmra.mxu0 %vm274_vm1, %v5107_v29  ;;  %4537 = vmatmul.mubr.msk.f32.gmra.mxu1 %vm274_vm1, %v5107_v29 }
  0x61   : > { %490 = vmatprep.mubr.f32.mxu0 %v7226_v0  ;;  %651 = vmatprep.mubr.f32.mxu1 %v7226_v0 }
  0x64   : > { %4520 = vmatmul.mubr.msk.f32.gmra.mxu0 %vm274_vm1, %v5118_v30  ;;  %4538 = vmatmul.mubr.msk.f32.gmra.mxu1 %vm274_vm1, %v5118_v30 }
  0x65   : > { %496 = vmatprep.mubr.f32.mxu0 %v7226_v0  ;;  %657 = vmatprep.mubr.f32.mxu1 %v7226_v0 }
  0x68   : > { %4521 = vmatmul.mubr.msk.f32.gmra.mxu0 %vm274_vm1, %v5129_v31  ;;  %4539 = vmatmul.mubr.msk.f32.gmra.mxu1 %vm274_vm1, %v5129_v31 }
  0x69   : > { %502 = vmatprep.mubr.f32.mxu0 %v7226_v0  ;;  %663 = vmatprep.mubr.f32.mxu1 %v7226_v0 }
  0x6c   : > { %4522 = vmatmul.mubr.msk.f32.gmra.mxu0 %vm274_vm1, %v5140_v32  ;;  %4540 = vmatmul.mubr.msk.f32.gmra.mxu1 %vm274_vm1, %v5140_v32 }
  0x6d   : > { %734 = vmatprep.mubr.f32.mxu0 %v7226_v0  ;;  %895 = vmatprep.mubr.f32.mxu1 %v7226_v0 }
  0x70   : > { %4543 = vmatmul.mubr.msk.f32.vlgmr.msra.gmra.mxu0 %vm274_vm1, %v4963_v9  ;;  %4561 = vmatmul.mubr.msk.f32.vlgmr.msra.gmra.mxu1 %vm274_vm1, %v4963_v9 }
  0x71   : > { %740 = vmatprep.mubr.f32.mxu0 %v7226_v0  ;;  %901 = vmatprep.mubr.f32.mxu1 %v7226_v0 }
  0x74   : > { %4544 = vmatmul.mubr.msk.f32.gmra.mxu0 %vm274_vm1, %v4974_v10  ;;  %4562 = vmatmul.mubr.msk.f32.gmra.mxu1 %vm274_vm1, %v4974_v10 }
  0x75   : > { %746 = vmatprep.mubr.f32.mxu0 %v7226_v0  ;;  %907 = vmatprep.mubr.f32.mxu1 %v7226_v0 }
  0x78   : > { %4545 = vmatmul.mubr.msk.f32.gmra.mxu0 %vm274_vm1, %v4989_v15  ;;  %4563 = vmatmul.mubr.msk.f32.gmra.mxu1 %vm274_vm1, %v4989_v15 }
  0x79   : > { %752 = vmatprep.mubr.f32.mxu0 %v7226_v0  ;;  %913 = vmatprep.mubr.f32.mxu1 %v7226_v0 }
  0x7c   : > { %4546 = vmatmul.mubr.msk.f32.gmra.mxu0 %vm274_vm1, %v5008_v20  ;;  %4564 = vmatmul.mubr.msk.f32.gmra.mxu1 %vm274_vm1, %v5008_v20 }
  0x7d   : > { %758 = vmatprep.mubr.f32.mxu0 %v7226_v0  ;;  %919 = vmatprep.mubr.f32.mxu1 %v7226_v0 }
  0x80   : > { %4547 = vmatmul.mubr.msk.f32.gmra.mxu0 %vm274_vm1, %v5019_v21  ;;  %4565 = vmatmul.mubr.msk.f32.gmra.mxu1 %vm274_vm1, %v5019_v21 }
  0x81   : > { %764 = vmatprep.mubr.f32.mxu0 %v7226_v0  ;;  %925 = vmatprep.mubr.f32.mxu1 %v7226_v0 }
  0x84   : > { %4548 = vmatmul.mubr.msk.f32.gmra.mxu0 %vm274_vm1, %v5030_v22  ;;  %4566 = vmatmul.mubr.msk.f32.gmra.mxu1 %vm274_vm1, %v5030_v22 }
  0x85   : > { %770 = vmatprep.mubr.f32.mxu0 %v7226_v0  ;;  %931 = vmatprep.mubr.f32.mxu1 %v7226_v0 }
  0x88   : > { %4549 = vmatmul.mubr.msk.f32.gmra.mxu0 %vm274_vm1, %v5041_v23  ;;  %4567 = vmatmul.mubr.msk.f32.gmra.mxu1 %vm274_vm1, %v5041_v23 }
  0x89   : > { %776 = vmatprep.mubr.f32.mxu0 %v7226_v0  ;;  %937 = vmatprep.mubr.f32.mxu1 %v7226_v0 }
  0x8c   : > { %4550 = vmatmul.mubr.msk.f32.gmra.mxu0 %vm274_vm1, %v5052_v24  ;;  %4568 = vmatmul.mubr.msk.f32.gmra.mxu1 %vm274_vm1, %v5052_v24  ;;  %v4834_v24 = vmov 0  }
  0x8d   : > { %782 = vmatprep.mubr.f32.mxu0 %v7226_v0  ;;  %943 = vmatprep.mubr.f32.mxu1 %v7226_v0 }
  0x8e   : > { %4656 = vset.pattern.permute.xlu0 %v4834_v24  ;;  %4657 = vset.pattern.permute.xlu1 %v4834_v24 }
  0x90   : > { %4551 = vmatmul.mubr.msk.f32.gmra.mxu0 %vm274_vm1, %v5063_v25  ;;  %4569 = vmatmul.mubr.msk.f32.gmra.mxu1 %vm274_vm1, %v5063_v25  ;;  %v1184_v25 = vld [vmem:[%s7224_s3] sm:$0xff] }
  0x91   : > { %788 = vmatprep.mubr.f32.mxu0 %v7226_v0  ;;  %949 = vmatprep.mubr.f32.mxu1 %v7226_v0 }
  0x92   : > { %1250 = vperm.xlu0 %4656, %v1184_v25  }
  0x94   : > { %4552 = vmatmul.mubr.msk.f32.gmra.mxu0 %vm274_vm1, %v5074_v26  ;;  %4570 = vmatmul.mubr.msk.f32.gmra.mxu1 %vm274_vm1, %v5074_v26 }
  0x95   : > { %794 = vmatprep.mubr.f32.mxu0 %v7226_v0  ;;  %955 = vmatprep.mubr.f32.mxu1 %v7226_v0 }
  0x98   : > { %4553 = vmatmul.mubr.msk.f32.gmra.mxu0 %vm274_vm1, %v5085_v27  ;;  %4571 = vmatmul.mubr.msk.f32.gmra.mxu1 %vm274_vm1, %v5085_v27 }
  0x99   : > { %800 = vmatprep.mubr.f32.mxu0 %v7226_v0  ;;  %961 = vmatprep.mubr.f32.mxu1 %v7226_v0 }
  0x9c   : > { %4554 = vmatmul.mubr.msk.f32.gmra.mxu0 %vm274_vm1, %v5096_v28  ;;  %4572 = vmatmul.mubr.msk.f32.gmra.mxu1 %vm274_vm1, %v5096_v28 }
  0x9d   : > { %806 = vmatprep.mubr.f32.mxu0 %v7226_v0  ;;  %967 = vmatprep.mubr.f32.mxu1 %v7226_v0 }
  0xa0   : > { %4555 = vmatmul.mubr.msk.f32.gmra.mxu0 %vm274_vm1, %v5107_v29  ;;  %4573 = vmatmul.mubr.msk.f32.gmra.mxu1 %vm274_vm1, %v5107_v29 }
  0xa1   : > { %812 = vmatprep.mubr.f32.mxu0 %v7226_v0  ;;  %973 = vmatprep.mubr.f32.mxu1 %v7226_v0 }
  0xa4   : > { %4556 = vmatmul.mubr.msk.f32.gmra.mxu0 %vm274_vm1, %v5118_v30  ;;  %4574 = vmatmul.mubr.msk.f32.gmra.mxu1 %vm274_vm1, %v5118_v30  ;;  %v1185_v30 = vld [vmem:[%s7224_s3 + $0x8] sm:$0xff] }
  0xa5   : > { %818 = vmatprep.mubr.f32.mxu0 %v7226_v0  ;;  %979 = vmatprep.mubr.f32.mxu1 %v7226_v0 }
  0xa6   : > { %1255 = vperm.xlu0 %4656, %v1185_v30  }
  0xa8   : > { %4557 = vmatmul.mubr.msk.f32.gmra.mxu0 %vm274_vm1, %v5129_v31  ;;  %4575 = vmatmul.mubr.msk.f32.gmra.mxu1 %vm274_vm1, %v5129_v31 }
  0xa9   : > { %824 = vmatprep.mubr.f32.mxu0 %v7226_v0  ;;  %985 = vmatprep.mubr.f32.mxu1 %v7226_v0 }
  0xac   : > { %4558 = vmatmul.mubr.msk.f32.gmra.mxu0 %vm274_vm1, %v5140_v32  ;;  %4576 = vmatmul.mubr.msk.f32.gmra.mxu1 %vm274_vm1, %v5140_v32 }
  0xad   : > { %1632 = vmatprep.mubr.f32.mxu0 %v7226_v0  ;;  %2081 = vmatprep.mubr.f32.mxu1 %v7226_v0 }
  0xf0   : > { %v5244_v33 = vpop.f32.mrf.mxu0  ;;  %v5246_v34 = vpop.f32.mrf.mxu1 }
  0xf1   : > { %7266 = vst [vmem:[#allocation8_spill] sm:$0xff] %v5244_v33  ;;  %7267 = vst [vmem:[#allocation9_spill] sm:$0xff] %v5246_v34  ;;  %v1186_v33 = vld [vmem:[%s7224_s3 + $0x10] sm:$0xff] }
  0xf2   : > { %v5248_v35 = vpop.f32.mrf.mxu0  ;;  %v5250_v36 = vpop.f32.mrf.mxu1  ;;  %1260 = vperm.xlu1 %4657, %v1186_v33  }
  0xf3   : > { %7268 = vst [vmem:[#allocation10_spill] sm:$0xff] %v5248_v35  ;;  %7269 = vst [vmem:[#allocation11_spill] sm:$0xff] %v5250_v36 }
  0xf4   : > { %v5252_v37 = vpop.f32.mrf.mxu0  ;;  %v5254_v38 = vpop.f32.mrf.mxu1 }
  0xf5   : > { %7270 = vst [vmem:[#allocation12_spill] sm:$0xff] %v5252_v37  ;;  %7271 = vst [vmem:[#allocation13_spill] sm:$0xff] %v5254_v38 }
  0xf6   : > { %v5256_v39 = vpop.f32.mrf.mxu0  ;;  %v5258_v40 = vpop.f32.mrf.mxu1 }
  0xf7   : > { %7272 = vst [vmem:[#allocation14_spill] sm:$0xff] %v5256_v39  ;;  %7273 = vst [vmem:[#allocation15_spill] sm:$0xff] %v5258_v40 }
  0xf8   : > { %v5260_v41 = vpop.f32.mrf.mxu0  ;;  %v5262_v42 = vpop.f32.mrf.mxu1 }
  0xf9   : > { %7274 = vst [vmem:[#allocation16_spill] sm:$0xff] %v5260_v41  ;;  %7275 = vst [vmem:[#allocation17_spill] sm:$0xff] %v5262_v42 }
  0xfa   : > { %v5264_v43 = vpop.f32.mrf.mxu0  ;;  %v5266_v44 = vpop.f32.mrf.mxu1 }
  0xfb   : > { %7276 = vst [vmem:[#allocation18_spill] sm:$0xff] %v5264_v43  ;;  %7277 = vst [vmem:[#allocation19_spill] sm:$0xff] %v5266_v44 }
  0xfc   : > { %v5268_v45 = vpop.f32.mrf.mxu0  ;;  %v5270_v46 = vpop.f32.mrf.mxu1 }
  0xfd   : > { %7278 = vst [vmem:[#allocation20_spill] sm:$0xff] %v5270_v46 }
  0xfe   : > { %v5272_v47 = vpop.f32.mrf.mxu0  ;;  %v5274_v48 = vpop.f32.mrf.mxu1 }
 0x100   : > { %v5276_v49 = vpop.f32.mrf.mxu0  ;;  %v5278_v50 = vpop.f32.mrf.mxu1 }
 0x102   : > { %v5280_v51 = vpop.f32.mrf.mxu0  ;;  %v5282_v52 = vpop.f32.mrf.mxu1 }
 0x104   : > { %v5284_v53 = vpop.f32.mrf.mxu0  ;;  %v5286_v54 = vpop.f32.mrf.mxu1 }
 0x106   : > { %v5288_v55 = vpop.f32.mrf.mxu0  ;;  %v5290_v56 = vpop.f32.mrf.mxu1 }
 0x108   : > { %v5292_v57 = vpop.f32.mrf.mxu0  ;;  %v5294_v58 = vpop.f32.mrf.mxu1 }
 0x10a   : > { %v5296_v59 = vpop.f32.mrf.mxu0  ;;  %v5298_v60 = vpop.f32.mrf.mxu1 }
 0x10c   : > { %v5300_v61 = vpop.f32.mrf.mxu0  ;;  %v5302_v62 = vpop.f32.mrf.mxu1 }
 0x10e   : > { %v5304_v63 = vpop.f32.mrf.mxu0  ;;  %v5306_v1 = vpop.f32.mrf.mxu1 }
 0x110   : > { %v5308_v2 = vpop.f32.mrf.mxu0  ;;  %v5310_v3 = vpop.f32.mrf.mxu1 }
 0x112   : > { %v5312_v4 = vpop.f32.mrf.mxu0  ;;  %v5314_v5 = vpop.f32.mrf.mxu1 }
 0x114   : > { %v5316_v6 = vpop.f32.mrf.mxu0  ;;  %v5318_v7 = vpop.f32.mrf.mxu1 }
 0x116   : > { %v5320_v8 = vpop.f32.mrf.mxu0  ;;  %v5322_v9 = vpop.f32.mrf.mxu1 }
 0x118   : > { %v5324_v10 = vpop.f32.mrf.mxu0  ;;  %v5326_v11 = vpop.f32.mrf.mxu1 }
 0x11a   : > { %v5328_v12 = vpop.f32.mrf.mxu0  ;;  %v5330_v13 = vpop.f32.mrf.mxu1 }
 0x11c   : > { %v5332_v14 = vpop.f32.mrf.mxu0  ;;  %v5334_v15 = vpop.f32.mrf.mxu1 }
 0x11e   : > { %v5336_v16 = vpop.f32.mrf.mxu0  ;;  %v5338_v17 = vpop.f32.mrf.mxu1 }
 0x120   : > { %v5340_v18 = vpop.f32.mrf.mxu0  ;;  %v5342_v19 = vpop.f32.mrf.mxu1 }
 0x122   : > { %v488_v20 = vpop.f32.mrf.mxu0  ;;  %v649_v21 = vpop.f32.mrf.mxu1 }
 0x124   : > { %v492_v22 = vpop.f32.mrf.mxu0  ;;  %v653_v23 = vpop.f32.mrf.mxu1 }
 0x126   : > { %v494_v26 = vpop.f32.mrf.mxu0  ;;  %v655_v27 = vpop.f32.mrf.mxu1 }
 0x127   : > { %v1097_v33 = vmax.f32 %v494_v26, 0.0 }
 0x128   : > { %v498_v28 = vpop.f32.mrf.mxu0  ;;  %v659_v29 = vpop.f32.mrf.mxu1 }
 0x129   : > { %v1104_v30 = vmax.f32 %v498_v28, 0.0  ;;  %v1106_v44 = vmax.f32 %v659_v29, 0.0  ;;  %v1091_v28 = vmax.f32 %v649_v21, 0.0  ;;  %v1088_v29 = vmax.f32 %v5340_v18, 0.0 }
 0x12a   : > { %v500_v31 = vpop.f32.mrf.mxu0  ;;  %v661_v32 = vpop.f32.mrf.mxu1 }
 0x12b   : > { %v1105_v42 = vmax.f32 %v500_v31, 0.0  ;;  %v1107_v41 = vmax.f32 %v661_v32, 0.0 }
 0x12c   : > { %v504_v0 = vpop.f32.mrf.mxu0  ;;  %v665_v34 = vpop.f32.mrf.mxu1 }
 0x12d   : > { %v1112_v38 = vmax.f32 %v504_v0, 0.0  ;;  %v1114_v37 = vmax.f32 %v665_v34, 0.0  ;;  %v1096_v0 = vmax.f32 %v492_v22, 0.0  ;;  %v1098_v34 = vmax.f32 %v653_v23, 0.0 }
 0x12e   : > { %v506_v36 = vpop.f32.mrf.mxu0  ;;  %v667_v24 = vpop.f32.mrf.mxu1  ;;  %v1083_v22 = vmax.f32 %v5338_v17, 0.0  ;;  %v1075_v23 = vmax.f32 %v5330_v13, 0.0  ;;  %v1074_v17 = vmax.f32 %v5326_v11, 0.0  ;;  %v1066_v13 = vmax.f32 %v5318_v7, 0.0 }
 0x12f   : > { %v1113_v35 = vmax.f32 %v506_v36, 0.0  ;;  %v1115_v25 = vmax.f32 %v667_v24, 0.0  ;;  %v1099_v36 = vmax.f32 %v655_v27, 0.0  ;;  %v1067_v27 = vmax.f32 %v5322_v9, 0.0 }
 0x130   : > { %v5353_v40 = vpop.f32.mrf.mxu0  ;;  %v5355_v39 = vpop.f32.mrf.mxu1  ;;  %v1057_v11 = vmax.f32 %v5312_v4, 0.0  ;;  %v1058_v9 = vmax.f32 %v5310_v3, 0.0  ;;  %v1049_v7 = vmax.f32 %v5304_v63, 0.0  ;;  %v1048_v4 = vmax.f32 %v5300_v61, 0.0 }
 0x131   : > { %7279 = vst [vmem:[#allocation21_spill] sm:$0xff] %v5353_v40  ;;  %7280 = vst [vmem:[#allocation22_spill] sm:$0xff] %v5355_v39  ;;  %1568 = vmatprep.subr.mxu0 %v1113_v35  ;;  %2017 = vmatprep.subr.mxu1 %v1115_v25  ;;  %v1089_v35 = vmax.f32 %v488_v20, 0.0  ;;  %v1082_v20 = vmax.f32 %v5334_v15, 0.0  ;;  %v1065_v15 = vmax.f32 %v5320_v8, 0.0  ;;  %v1059_v25 = vmax.f32 %v5314_v5, 0.0 }
 0x132   : > { %v5357_v43 = vpop.f32.mrf.mxu0  ;;  %v5359_v46 = vpop.f32.mrf.mxu1  ;;  %1569 = vmatpush1.msra.mxu0 %v1112_v38  ;;  %2018 = vmatpush1.msra.mxu1 %v1114_v37  ;;  %v1090_v37 = vmax.f32 %v5342_v19, 0.0  ;;  %v1073_v19 = vmax.f32 %v5328_v12, 0.0  ;;  %v1064_v12 = vmax.f32 %v5316_v6, 0.0  ;;  %v1056_v8 = vmax.f32 %v5308_v2, 0.0 }
 0x133   : > { %7281 = vst [vmem:[#allocation23_spill] sm:$0xff] %v5357_v43  ;;  %7282 = vst [vmem:[#allocation24_spill] sm:$0xff] %v5359_v46  ;;  %1570 = vmatprep.subr.mxu0 %v1105_v42  ;;  %2019 = vmatprep.subr.mxu1 %v1107_v41  ;;  %v1081_v41 = vmax.f32 %v5336_v16, 0.0  ;;  %v1072_v16 = vmax.f32 %v5324_v10, 0.0  ;;  %v1050_v5 = vmax.f32 %v5302_v62, 0.0  ;;  %v1041_v3 = vmax.f32 %v5296_v59, 0.0 }
 0x134   : > { %v5361_v24 = vpop.f32.mrf.mxu0  ;;  %v5363_v31 = vpop.f32.mrf.mxu1  ;;  %1571 = vmatpush1.msra.mxu0 %v1104_v30  ;;  %2020 = vmatpush1.msra.mxu1 %v1106_v44  ;;  %v1080_v44 = vmax.f32 %v5332_v14, 0.0  ;;  %v1040_v63 = vmax.f32 %v5292_v57, 0.0  ;;  %v1033_v62 = vmax.f32 %v5288_v55, 0.0  ;;  %v1032_v59 = vmax.f32 %v5284_v53, 0.0  ;;  %v1201_v43 = vld [vmem:[%s7224_s3 + $0x88] sm:$0xff] }
 0x135   : > { %7283 = vst [vmem:[#allocation25_spill] sm:$0xff] %v5361_v24  ;;  %7284 = vst [vmem:[#allocation26_spill] sm:$0xff] %v5363_v31  ;;  %1572 = vmatprep.subr.mxu0 %v1097_v33  ;;  %2021 = vmatprep.subr.mxu1 %v1099_v36  ;;  %v1051_v33 = vmax.f32 %v5306_v1, 0.0  ;;  %v1042_v1 = vmax.f32 %v5294_v58, 0.0  ;;  %v1025_v58 = vmax.f32 %v5280_v51, 0.0  ;;  %v1024_v55 = vmax.f32 %v5276_v49, 0.0 }
 0x136   : > { %v5367_v38 = vpop.f32.mrf.mxu0  ;;  %v5369_v42 = vpop.f32.mrf.mxu1  ;;  %1573 = vmatpush1.msra.mxu0 %v1096_v0  ;;  %2022 = vmatpush1.msra.mxu1 %v1098_v34  ;;  %v1043_v0 = vmax.f32 %v5298_v60, 0.0  ;;  %v1034_v60 = vmax.f32 %v5286_v54, 0.0  ;;  %v1017_v54 = vmax.f32 %v5272_v47, 0.0  ;;  %v1016_v51 = vmax.f32 %v5268_v45, 0.0  ;;  %v7296_v47 = vld [vmem:[#allocation16_spill] sm:$0xff] }
 0x137   : > { %7285 = vst [vmem:[#allocation27_spill] sm:$0xff] %v5367_v38  ;;  %7286 = vst [vmem:[#allocation28_spill] sm:$0xff] %v5369_v42  ;;  %1574 = vmatprep.subr.mxu0 %v1089_v35  ;;  %2023 = vmatprep.subr.mxu1 %v1091_v28  ;;  %v1035_v35 = vmax.f32 %v5290_v56, 0.0  ;;  %v1026_v56 = vmax.f32 %v5278_v50, 0.0  ;;  %v7294_v50 = vld [vmem:[#allocation18_spill] sm:$0xff] }
 0x138   : > { %v5375_v21 = vpop.f32.mrf.mxu0  ;;  %v5377_v18 = vpop.f32.mrf.mxu1  ;;  %1575 = vmatpush1.msra.mxu0 %v1088_v29  ;;  %2024 = vmatpush1.msra.mxu1 %v1090_v37  ;;  %v1027_v29 = vmax.f32 %v5282_v52, 0.0  ;;  %v7293_v52 = vld [vmem:[#allocation20_spill] sm:$0xff] }
 0x139   : > { %7287 = vst [vmem:[#allocation29_spill] sm:$0xff] %v5375_v21  ;;  %7288 = vst [vmem:[#allocation30_spill] sm:$0xff] %v5377_v18  ;;  %1576 = vmatprep.subr.mxu0 %v1081_v41  ;;  %2025 = vmatprep.subr.mxu1 %v1083_v22  ;;  %v1019_v41 = vmax.f32 %v5274_v48, 0.0  ;;  %v1018_v22 = vmax.f32 %v7293_v52, 0.0  ;;  %v1008_v48 = vmax.f32 %v7296_v47, 0.0  ;;  %v1190_v47 = vld [vmem:[%s7224_s3 + $0x30] sm:$0xff] }
 0x13a   : > { %v5383_v26 = vpop.f32.mrf.mxu0  ;;  %v5385_v14 = vpop.f32.mrf.mxu1  ;;  %1577 = vmatpush1.msra.mxu0 %v1080_v44  ;;  %2026 = vmatpush1.msra.mxu1 %v1082_v20  ;;  %v1009_v20 = vmax.f32 %v7294_v50, 0.0  ;;  %v1121_v50 = vld [vmem:[#allocation2 + $0x8] sm:$0xff] }
 0x13b   : > { %7289 = vst [vmem:[#allocation31_spill] sm:$0xff] %v5383_v26  ;;  %7290 = vst [vmem:[#allocation32_spill] sm:$0xff] %v5385_v14  ;;  %1578 = vmatprep.subr.mxu0 %v1073_v19  ;;  %2027 = vmatprep.subr.mxu1 %v1075_v23  ;;  %v7295_v19 = vld [vmem:[#allocation19_spill] sm:$0xff] }
 0x13c   : > { %v5391_v32 = vpop.f32.mrf.mxu0  ;;  %v5393_v10 = vpop.f32.mrf.mxu1  ;;  %1579 = vmatpush1.msra.mxu0 %v1072_v16  ;;  %2028 = vmatpush1.msra.mxu1 %v1074_v17  ;;  %v1011_v23 = vmax.f32 %v7295_v19, 0.0  ;;  %v7297_v16 = vld [vmem:[#allocation17_spill] sm:$0xff] }
 0x13d   : > { %7291 = vst [vmem:[#allocation33_spill] sm:$0xff] %v5391_v32  ;;  %7292 = vst [vmem:[#allocation34_spill] sm:$0xff] %v5393_v10  ;;  %1580 = vmatprep.subr.mxu0 %v1065_v15  ;;  %2029 = vmatprep.subr.mxu1 %v1067_v27  ;;  %v1010_v17 = vmax.f32 %v7297_v16, 0.0  ;;  %v7298_v27 = vld [vmem:[#allocation14_spill] sm:$0xff] }
 0x13e   : > { %v5399_v30 = vpop.f32.mrf.mxu0  ;;  %v5401_v6 = vpop.f32.mrf.mxu1  ;;  %1581 = vmatpush1.msra.mxu0 %v1064_v12  ;;  %2030 = vmatpush1.msra.mxu1 %v1066_v13  ;;  %v1001_v12 = vmax.f32 %v7298_v27, 0.0  ;;  %v7299_v13 = vld [vmem:[#allocation15_spill] sm:$0xff] }
 0x13f   : > { %1582 = vmatprep.subr.mxu0 %v1057_v11  ;;  %2031 = vmatprep.subr.mxu1 %v1059_v25  ;;  %v1003_v11 = vmax.f32 %v7299_v13, 0.0  ;;  %v7300_v25 = vld [vmem:[#allocation12_spill] sm:$0xff]  ;;  %v1191_v13 = vld [vmem:[%s7224_s3 + $0x38] sm:$0xff] }
 0x140   : > { %v5407_v36 = vpop.f32.mrf.mxu0  ;;  %v5409_v2 = vpop.f32.mrf.mxu1  ;;  %1583 = vmatpush1.msra.mxu0 %v1056_v8  ;;  %2032 = vmatpush1.msra.mxu1 %v1058_v9  ;;  %v1000_v8 = vmax.f32 %v7300_v25, 0.0  ;;  %v7301_v9 = vld [vmem:[#allocation13_spill] sm:$0xff] }
 0x141   : > { %1584 = vmatprep.subr.mxu0 %v1049_v7  ;;  %2033 = vmatprep.subr.mxu1 %v1051_v33  ;;  %v1002_v7 = vmax.f32 %v7301_v9, 0.0  ;;  %v1123_v9 = vld [vmem:[#allocation2 + $0x18] sm:$0xff] }
 0x142   : > { %v5415_v34 = vpop.f32.mrf.mxu0  ;;  %v5417_v61 = vpop.f32.mrf.mxu1  ;;  %1585 = vmatpush1.msra.mxu0 %v1048_v4  ;;  %2034 = vmatpush1.msra.mxu1 %v1050_v5  ;;  %v7302_v5 = vld [vmem:[#allocation10_spill] sm:$0xff] }
 0x143   : > { %1586 = vmatprep.subr.mxu0 %v1041_v3  ;;  %2035 = vmatprep.subr.mxu1 %v1043_v0  ;;  %v993_v3 = vmax.f32 %v7302_v5, 0.0  ;;  %v7303_v0 = vld [vmem:[#allocation11_spill] sm:$0xff] }
 0x144   : > { %v5423_v28 = vpop.f32.mrf.mxu0  ;;  %v5425_v57 = vpop.f32.mrf.mxu1  ;;  %1587 = vmatpush1.msra.mxu0 %v1040_v63  ;;  %2036 = vmatpush1.msra.mxu1 %v1042_v1  ;;  %v995_v63 = vmax.f32 %v7303_v0, 0.0  ;;  %v7304_v1 = vld [vmem:[#allocation8_spill] sm:$0xff]  ;;  %v1194_v0 = vld [vmem:[%s7224_s3 + $0x50] sm:$0xff] }
 0x145   : > { %1588 = vmatprep.subr.mxu0 %v1033_v62  ;;  %2037 = vmatprep.subr.mxu1 %v1035_v35  ;;  %v992_v62 = vmax.f32 %v7304_v1, 0.0  ;;  %v7305_v35 = vld [vmem:[#allocation9_spill] sm:$0xff] }
 0x146   : > { %v5431_v37 = vpop.f32.mrf.mxu0  ;;  %v5433_v53 = vpop.f32.mrf.mxu1  ;;  %1589 = vmatpush1.msra.mxu0 %v1032_v59  ;;  %2038 = vmatpush1.msra.mxu1 %v1034_v60  ;;  %v994_v59 = vmax.f32 %v7305_v35, 0.0 }
 0x147   : > { %1590 = vmatprep.subr.mxu0 %v1025_v58  ;;  %2039 = vmatprep.subr.mxu1 %v1027_v29  ;;  %v1120_v29 = vld [vmem:[#allocation2] sm:$0xff] }
 0x148   : > { %v5439_v44 = vpop.f32.mrf.mxu0  ;;  %v5441_v49 = vpop.f32.mrf.mxu1  ;;  %1591 = vmatpush1.msra.mxu0 %v1024_v55  ;;  %2040 = vmatpush1.msra.mxu1 %v1026_v56 }
 0x149   : > { %1592 = vmatprep.subr.mxu0 %v1017_v54  ;;  %2041 = vmatprep.subr.mxu1 %v1019_v41  ;;  %v1187_v54 = vld [vmem:[%s7224_s3 + $0x18] sm:$0xff]  ;;  %v1188_v41 = vld [vmem:[%s7224_s3 + $0x20] sm:$0xff] }
 0x14a   : > { %v5447_v15 = vpop.f32.mrf.mxu0  ;;  %v5449_v45 = vpop.f32.mrf.mxu1  ;;  %1593 = vmatpush1.msra.mxu0 %v1016_v51  ;;  %2042 = vmatpush1.msra.mxu1 %v1018_v22  ;;  %v7306_v22 = vmov 0.0  }
 0x14b   : > { %1594 = vmatprep.subr.mxu0 %v1009_v20  ;;  %2043 = vmatprep.subr.mxu1 %v1011_v23  ;;  %v1189_v23 = vld [vmem:[%s7224_s3 + $0x28] sm:$0xff] }
 0x14c   : > { %v5455_v33 = vpop.f32.mrf.mxu0  ;;  %v5457_v4 = vpop.f32.mrf.mxu1  ;;  %1595 = vmatpush1.msra.mxu0 %v1008_v48  ;;  %2044 = vmatpush1.msra.mxu1 %v1010_v17  ;;  %v1122_v17 = vld [vmem:[#allocation2 + $0x10] sm:$0xff] }
 0x14d   : > { %1596 = vmatprep.subr.mxu0 %v1001_v12  ;;  %2045 = vmatprep.subr.mxu1 %v1003_v11  ;;  %v1192_v11 = vld [vmem:[%s7224_s3 + $0x40] sm:$0xff] }
 0x14e   : > { %v5463_v60 = vpop.f32.mrf.mxu0  ;;  %v5465_v58 = vpop.f32.mrf.mxu1  ;;  %1597 = vmatpush1.msra.mxu0 %v1000_v8  ;;  %2046 = vmatpush1.msra.mxu1 %v1002_v7 }
 0x14f   : > { %1598 = vmatprep.subr.mxu0 %v993_v3  ;;  %2047 = vmatprep.subr.mxu1 %v995_v63  ;;  %v1193_v3 = vld [vmem:[%s7224_s3 + $0x48] sm:$0xff] }
 0x150   : > { %v5467_v55 = vpop.f32.mrf.mxu0  ;;  %v5469_v56 = vpop.f32.mrf.mxu1  ;;  %1599 = vmatpush1.msra.mxu0 %v992_v62  ;;  %2048 = vmatpush1.msra.mxu1 %v994_v59  ;;  %v1124_v62 = vld [vmem:[#allocation2 + $0x20] sm:$0xff] }
 0x151   : > { %1633 = vmatmul.mubr.f32.vlgmr.msra.gmra.mxu0 %v1120_v29  ;;  %2082 = vmatmul.mubr.f32.vlgmr.msra.gmra.mxu1 %v1120_v29  ;;  %v1195_v29 = vld [vmem:[%s7224_s3 + $0x58] sm:$0xff] }
 0x152   : > { %v5477_v51 = vpop.f32.mrf.mxu0  ;;  %v5479_v52 = vpop.f32.mrf.mxu1  ;;  %1638 = vmatprep.mubr.f32.mxu0 %v7306_v22  ;;  %2087 = vmatprep.mubr.f32.mxu1 %v7306_v22 }
 0x153   : > { %1265 = vperm.xlu1 %4657, %v1187_v54   ;;  %1270 = vperm.xlu0 %4656, %v1188_v41   ;;  %v1196_v54 = vld [vmem:[%s7224_s3 + $0x60] sm:$0xff] }
 0x154   : > { %v5483_v20 = vpop.f32.mrf.mxu0  ;;  %v5485_v19 = vpop.f32.mrf.mxu1 }
 0x155   : > { %1639 = vmatmul.mubr.f32.gmra.mxu0 %v1121_v50  ;;  %2088 = vmatmul.mubr.f32.gmra.mxu1 %v1121_v50 }
 0x156   : > { %v5493_v48 = vpop.f32.mrf.mxu0  ;;  %v5495_v16 = vpop.f32.mrf.mxu1  ;;  %1644 = vmatprep.mubr.f32.mxu0 %v7306_v22  ;;  %2093 = vmatprep.mubr.f32.mxu1 %v7306_v22 }
 0x157   : > { %1275 = vperm.xlu1 %4657, %v1189_v23   ;;  %1280 = vperm.xlu0 %4656, %v1190_v47   ;;  %v1125_v23 = vld [vmem:[#allocation2 + $0x28] sm:$0xff] }
 0x158   : > { %v5499_v27 = vpop.f32.mrf.mxu0  ;;  %v5501_v12 = vpop.f32.mrf.mxu1 }
 0x159   : > { %1645 = vmatmul.mubr.f32.gmra.mxu0 %v1122_v17  ;;  %2094 = vmatmul.mubr.f32.gmra.mxu1 %v1122_v17 }
 0x15a   : > { %v5509_v25 = vpop.f32.mrf.mxu0  ;;  %v5511_v8 = vpop.f32.mrf.mxu1  ;;  %1650 = vmatprep.mubr.f32.mxu0 %v7306_v22  ;;  %2099 = vmatprep.mubr.f32.mxu1 %v7306_v22 }
 0x15b   : > { %1285 = vperm.xlu1 %4657, %v1191_v13   ;;  %1290 = vperm.xlu0 %4656, %v1192_v11   ;;  %v1197_v13 = vld [vmem:[%s7224_s3 + $0x68] sm:$0xff]  ;;  %v1198_v11 = vld [vmem:[%s7224_s3 + $0x70] sm:$0xff] }
 0x15c   : > { %v5515_v7 = vpop.f32.mrf.mxu0  ;;  %v5517_v5 = vpop.f32.mrf.mxu1 }
 0x15d   : > { %1651 = vmatmul.mubr.f32.gmra.mxu0 %v1123_v9  ;;  %2100 = vmatmul.mubr.f32.gmra.mxu1 %v1123_v9 }
 0x15e   : > { %v5525_v63 = vpop.f32.mrf.mxu0  ;;  %v5527_v1 = vpop.f32.mrf.mxu1  ;;  %1656 = vmatprep.mubr.f32.mxu0 %v7306_v22  ;;  %2105 = vmatprep.mubr.f32.mxu1 %v7306_v22 }
 0x15f   : > { %1295 = vperm.xlu1 %4657, %v1193_v3   ;;  %1300 = vperm.xlu0 %4656, %v1194_v0   ;;  %v1126_v0 = vld [vmem:[#allocation2 + $0x30] sm:$0xff] }
 0x160   : > { %v5531_v35 = vpop.f32.mrf.mxu0  ;;  %v5533_v59 = vpop.f32.mrf.mxu1 }
 0x161   : > { %1657 = vmatmul.mubr.f32.gmra.mxu0 %v1124_v62  ;;  %2106 = vmatmul.mubr.f32.gmra.mxu1 %v1124_v62 }
 0x162   : > { %v5541_v41 = vpop.f32.mrf.mxu0  ;;  %v5543_v50 = vpop.f32.mrf.mxu1  ;;  %1662 = vmatprep.mubr.f32.mxu0 %v7306_v22  ;;  %2111 = vmatprep.mubr.f32.mxu1 %v7306_v22 }
 0x163   : > { %1305 = vperm.xlu1 %4657, %v1195_v29   ;;  %1310 = vperm.xlu0 %4656, %v1196_v54   ;;  %v1199_v54 = vld [vmem:[%s7224_s3 + $0x78] sm:$0xff] }
 0x164   : > { %v5547_v47 = vpop.f32.mrf.mxu0  ;;  %v5549_v17 = vpop.f32.mrf.mxu1 }
 0x165   : > { %1663 = vmatmul.mubr.f32.gmra.mxu0 %v1125_v23  ;;  %2112 = vmatmul.mubr.f32.gmra.mxu1 %v1125_v23  ;;  %v1200_v23 = vld [vmem:[%s7224_s3 + $0x80] sm:$0xff] }
 0x166   : > { %v5557_v9 = vpop.f32.mrf.mxu0  ;;  %v5559_v3 = vpop.f32.mrf.mxu1  ;;  %1668 = vmatprep.mubr.f32.mxu0 %v7306_v22  ;;  %2117 = vmatprep.mubr.f32.mxu1 %v7306_v22 }
 0x167   : > { %1315 = vperm.xlu1 %4657, %v1197_v13   ;;  %1320 = vperm.xlu0 %4656, %v1198_v11   ;;  %v1127_v13 = vld [vmem:[#allocation2 + $0x38] sm:$0xff]  ;;  %v1101_v10 = vmax.f32 %v5557_v9, 0.0  ;;  %v1103_v32 = vmax.f32 %v5559_v3, 0.0  ;;  %v7310_v9 = vld [vmem:[#allocation32_spill] sm:$0xff] }
 0x168   : > { %v820_v62 = vpop.f32.mrf.mxu0  ;;  %v981_v29 = vpop.f32.mrf.mxu1  ;;  %v1015_v3 = vmax.f32 %v7310_v9, 0.0  ;;  %v1150_v9 = vld [vmem:[#allocation2 + $0xf0] sm:$0xff] }
 0x169   : > { %1669 = vmatmul.mubr.f32.gmra.mxu0 %v1126_v0  ;;  %2118 = vmatmul.mubr.f32.gmra.mxu1 %v1126_v0  ;;  %v1202_v0 = vld [vmem:[%s7224_s3 + $0x90] sm:$0xff]  ;;  %v1110_v26 = vmax.f32 %v981_v29, 0.0 }
 0x16a   : > { %v822_v39 = vpop.f32.mrf.mxu0  ;;  %v983_v40 = vpop.f32.mrf.mxu1  ;;  %1674 = vmatprep.mubr.f32.mxu0 %v7306_v22  ;;  %2123 = vmatprep.mubr.f32.mxu1 %v7306_v22 }
 0x16b   : > { %1325 = vperm.xlu1 %4657, %v1199_v54   ;;  %1330 = vperm.xlu0 %4656, %v1200_v23   ;;  %v1128_v54 = vld [vmem:[#allocation2 + $0x40] sm:$0xff]  ;;  %v1109_v21 = vmax.f32 %v822_v39, 0.0  ;;  %v1111_v14 = vmax.f32 %v983_v40, 0.0  ;;  %v1102_v39 = vmax.f32 %v5549_v17, 0.0  ;;  %v1093_v40 = vmax.f32 %v5541_v41, 0.0 }
 0x16c   : > { %v826_v11 = vpop.f32.mrf.mxu0  ;;  %v987_v46 = vpop.f32.mrf.mxu1  ;;  %v1038_v41 = vmax.f32 %v5425_v57, 0.0  ;;  %v1023_v57 = vmax.f32 %v5401_v6, 0.0 }
 0x16d   : > { %1675 = vmatmul.mubr.f32.gmra.mxu0 %v1127_v13  ;;  %2124 = vmatmul.mubr.f32.gmra.mxu1 %v1127_v13  ;;  %v1116_v23 = vmax.f32 %v826_v11, 0.0  ;;  %v1118_v42 = vmax.f32 %v987_v46, 0.0  ;;  %v1108_v13 = vmax.f32 %v820_v62, 0.0  ;;  %v1129_v46 = vld [vmem:[#allocation2 + $0x48] sm:$0xff]  ;;  %v7312_v62 = vld [vmem:[#allocation30_spill] sm:$0xff]  ;;  %v7313_v11 = vld [vmem:[#allocation27_spill] sm:$0xff] }
 0x16e   : > { %v828_v31 = vpop.f32.mrf.mxu0  ;;  %v989_v24 = vpop.f32.mrf.mxu1  ;;  %1680 = vmatprep.mubr.f32.mxu0 %v7306_v22  ;;  %2129 = vmatprep.mubr.f32.mxu1 %v7306_v22  ;;  %v1014_v29 = vmax.f32 %v7312_v62, 0.0  ;;  %v1152_v62 = vld [vmem:[#allocation2 + $0x100] sm:$0xff] }
 0x16f   : > { %v1117_v38 = vmax.f32 %v828_v31, 0.0  ;;  %v1119_v18 = vmax.f32 %v989_v24, 0.0  ;;  %1335 = vperm.xlu1 %4657, %v1201_v43   ;;  %1340 = vperm.xlu0 %4656, %v1202_v0   ;;  %v1100_v43 = vmax.f32 %v5547_v47, 0.0  ;;  %v1095_v24 = vmax.f32 %v5543_v50, 0.0  ;;  %v7308_v47 = vld [vmem:[#allocation34_spill] sm:$0xff] }
 0x170   : > { %v1092_v31 = vmax.f32 %v5531_v35, 0.0  ;;  %v1070_v35 = vmax.f32 %v5485_v19, 0.0  ;;  %v1055_v19 = vmax.f32 %v5465_v58, 0.0  ;;  %v1046_v58 = vmax.f32 %v5441_v49, 0.0 }
 0x171   : > { %1681 = vmatmul.mubr.f32.gmra.mxu0 %v1128_v54  ;;  %2130 = vmatmul.mubr.f32.gmra.mxu1 %v1128_v54  ;;  %v1031_v49 = vmax.f32 %v5417_v61, 0.0  ;;  %v7307_v61 = vld [vmem:[#allocation33_spill] sm:$0xff]  ;;  %v1022_v17 = vmax.f32 %v7308_v47, 0.0  ;;  %v1005_v0 = vmax.f32 %v7313_v11, 0.0  ;;  %v7314_v54 = vld [vmem:[#allocation28_spill] sm:$0xff] }
 0x172   : > { %2466 = vmatprep.subr.mxu0 %v1117_v38  ;;  %2915 = vmatprep.subr.mxu1 %v1119_v18  ;;  %v1094_v38 = vmax.f32 %v5533_v59, 0.0  ;;  %v1130_v18 = vld [vmem:[#allocation2 + $0x50] sm:$0xff]  ;;  %v1054_v59 = vmax.f32 %v5457_v4, 0.0  ;;  %v1039_v4 = vmax.f32 %v5433_v53, 0.0  ;;  %v1030_v53 = vmax.f32 %v5409_v2, 0.0  ;;  %v1148_v47 = vld [vmem:[#allocation2 + $0xe0] sm:$0xff] }
 0x173   : > { %2467 = vmatpush1.msra.mxu0 %v1116_v23  ;;  %2916 = vmatpush1.msra.mxu1 %v1118_v42  ;;  %v1085_v42 = vmax.f32 %v5525_v63, 0.0  ;;  %v1076_v63 = vmax.f32 %v5499_v27, 0.0  ;;  %v1061_v27 = vmax.f32 %v5477_v51, 0.0  ;;  %v1132_v51 = vld [vmem:[#allocation2 + $0x60] sm:$0xff]  ;;  %v1020_v50 = vmax.f32 %v7307_v61, 0.0  ;;  %v1225_v61 = vld [vmem:[%s7224_s3 + $0x148] sm:$0xff] }
 0x174   : > { %2468 = vmatprep.subr.mxu0 %v1109_v21  ;;  %2917 = vmatprep.subr.mxu1 %v1111_v14  ;;  %v1087_v21 = vmax.f32 %v5527_v1, 0.0  ;;  %v1084_v14 = vmax.f32 %v5515_v7, 0.0  ;;  %v1078_v1 = vmax.f32 %v5501_v12, 0.0  ;;  %v1069_v7 = vmax.f32 %v5493_v48, 0.0  ;;  %v1153_v11 = vld [vmem:[#allocation2 + $0x108] sm:$0xff] }
 0x175   : > { %1686 = vmatprep.mubr.f32.mxu0 %v7306_v22  ;;  %2135 = vmatprep.mubr.f32.mxu1 %v7306_v22  ;;  %v1063_v12 = vmax.f32 %v5479_v52, 0.0  ;;  %v1060_v48 = vmax.f32 %v5467_v55, 0.0  ;;  %v1052_v52 = vmax.f32 %v5455_v33, 0.0  ;;  %v1045_v55 = vmax.f32 %v5447_v15, 0.0  ;;  %v1133_v15 = vld [vmem:[#allocation2 + $0x68] sm:$0xff] }
 0x176   : > { %2469 = vmatpush1.msra.mxu0 %v1108_v13  ;;  %2918 = vmatpush1.msra.mxu1 %v1110_v26  ;;  %v1086_v26 = vmax.f32 %v5517_v5, 0.0  ;;  %v1071_v5 = vmax.f32 %v5495_v16, 0.0  ;;  %v1062_v16 = vmax.f32 %v5469_v56, 0.0  ;;  %v1047_v56 = vmax.f32 %v5449_v45, 0.0  ;;  %v1135_v13 = vld [vmem:[#allocation2 + $0x78] sm:$0xff] }
 0x177   : > { %1687 = vmatmul.mubr.f32.gmra.mxu0 %v1129_v46  ;;  %2136 = vmatmul.mubr.f32.gmra.mxu1 %v1129_v46  ;;  %v1037_v33 = vmax.f32 %v5431_v37, 0.0  ;;  %v1036_v45 = vmax.f32 %v5423_v28, 0.0  ;;  %v1028_v37 = vmax.f32 %v5407_v36, 0.0  ;;  %v1021_v28 = vmax.f32 %v5399_v30, 0.0  ;;  %v7309_v36 = vld [vmem:[#allocation31_spill] sm:$0xff]  ;;  %v7311_v30 = vld [vmem:[#allocation29_spill] sm:$0xff] }
 0x178   : > { %2470 = vmatprep.subr.mxu0 %v1101_v10  ;;  %2919 = vmatprep.subr.mxu1 %v1103_v32  ;;  %v1077_v10 = vmax.f32 %v5509_v25, 0.0  ;;  %v1079_v32 = vmax.f32 %v5511_v8, 0.0  ;;  %v1131_v25 = vld [vmem:[#allocation2 + $0x58] sm:$0xff]  ;;  %v1068_v8 = vmax.f32 %v5483_v20, 0.0  ;;  %v1053_v20 = vmax.f32 %v5463_v60, 0.0  ;;  %v7315_v46 = vld [vmem:[#allocation25_spill] sm:$0xff] }
 0x179   : > { %2471 = vmatpush1.msra.mxu0 %v1100_v43  ;;  %2920 = vmatpush1.msra.mxu1 %v1102_v39  ;;  %v1044_v60 = vmax.f32 %v5439_v44, 0.0  ;;  %v1029_v44 = vmax.f32 %v5415_v34, 0.0  ;;  %v1134_v34 = vld [vmem:[#allocation2 + $0x70] sm:$0xff]  ;;  %v1013_v2 = vmax.f32 %v7309_v36, 0.0  ;;  %v1012_v6 = vmax.f32 %v7311_v30, 0.0  ;;  %v1149_v36 = vld [vmem:[#allocation2 + $0xe8] sm:$0xff] }
 0x17a   : > { %2472 = vmatprep.subr.mxu0 %v1093_v40  ;;  %2921 = vmatprep.subr.mxu1 %v1095_v24  ;;  %v1007_v23 = vmax.f32 %v7314_v54, 0.0  ;;  %v1004_v43 = vmax.f32 %v7315_v46, 0.0  ;;  %v7316_v39 = vld [vmem:[#allocation26_spill] sm:$0xff]  ;;  %v7317_v24 = vld [vmem:[#allocation23_spill] sm:$0xff] }
 0x17b   : > { %1692 = vmatprep.mubr.f32.mxu0 %v7306_v22  ;;  %2141 = vmatprep.mubr.f32.mxu1 %v7306_v22  ;;  %v1006_v40 = vmax.f32 %v7316_v39, 0.0  ;;  %v1151_v30 = vld [vmem:[#allocation2 + $0xf8] sm:$0xff]  ;;  %v1154_v54 = vld [vmem:[#allocation2 + $0x110] sm:$0xff] }
 0x17c   : > { %2473 = vmatpush1.msra.mxu0 %v1092_v31  ;;  %2922 = vmatpush1.msra.mxu1 %v1094_v38  ;;  %v997_v31 = vmax.f32 %v7317_v24, 0.0  ;;  %v7318_v38 = vld [vmem:[#allocation24_spill] sm:$0xff]  ;;  %v1234_v46 = vld [vmem:[%s7224_s3 + $0x190] sm:$0xff]  ;;  %v1235_v39 = vld [vmem:[%s7224_s3 + $0x198] sm:$0xff] }
 0x17d   : > { %1693 = vmatmul.mubr.f32.gmra.mxu0 %v1130_v18  ;;  %2142 = vmatmul.mubr.f32.gmra.mxu1 %v1130_v18  ;;  %v1236_v24 = vld [vmem:[%s7224_s3 + $0x1a0] sm:$0xff] }
 0x17e   : > { %2474 = vmatprep.subr.mxu0 %v1085_v42  ;;  %2923 = vmatprep.subr.mxu1 %v1087_v21  ;;  %v999_v42 = vmax.f32 %v7318_v38, 0.0  ;;  %v7319_v21 = vld [vmem:[#allocation21_spill] sm:$0xff] }
 0x17f   : > { %2475 = vmatpush1.msra.mxu0 %v1084_v14  ;;  %2924 = vmatpush1.msra.mxu1 %v1086_v26  ;;  %v996_v18 = vmax.f32 %v7319_v21, 0.0  ;;  %v7320_v14 = vld [vmem:[#allocation22_spill] sm:$0xff]  ;;  %v1237_v38 = vld [vmem:[%s7224_s3 + $0x1a8] sm:$0xff] }
 0x180   : > { %2476 = vmatprep.subr.mxu0 %v1077_v10  ;;  %2925 = vmatprep.subr.mxu1 %v1079_v32  ;;  %v998_v26 = vmax.f32 %v7320_v14, 0.0  ;;  %v1136_v10 = vld [vmem:[#allocation2 + $0x80] sm:$0xff]  ;;  %v1203_v32 = vld [vmem:[%s7224_s3 + $0x98] sm:$0xff]  ;;  %v1238_v21 = vld [vmem:[%s7224_s3 + $0x1b0] sm:$0xff] }
 0x181   : > { %1698 = vmatprep.mubr.f32.mxu0 %v7306_v22  ;;  %2147 = vmatprep.mubr.f32.mxu1 %v7306_v22  ;;  %v1239_v14 = vld [vmem:[%s7224_s3 + $0x1b8] sm:$0xff] }
 0x182   : > { %2477 = vmatpush1.msra.mxu0 %v1076_v63  ;;  %2926 = vmatpush1.msra.mxu1 %v1078_v1  ;;  %v1204_v63 = vld [vmem:[%s7224_s3 + $0xa0] sm:$0xff]  ;;  %v1137_v1 = vld [vmem:[#allocation2 + $0x88] sm:$0xff] }
 0x183   : > { %1699 = vmatmul.mubr.f32.gmra.mxu0 %v1131_v25  ;;  %2148 = vmatmul.mubr.f32.gmra.mxu1 %v1131_v25  ;;  %v1138_v25 = vld [vmem:[#allocation2 + $0x90] sm:$0xff] }
 0x184   : > { %2478 = vmatprep.subr.mxu0 %v1069_v7  ;;  %2927 = vmatprep.subr.mxu1 %v1071_v5  ;;  %v1205_v7 = vld [vmem:[%s7224_s3 + $0xa8] sm:$0xff]  ;;  %v1206_v5 = vld [vmem:[%s7224_s3 + $0xb0] sm:$0xff] }
 0x185   : > { %2479 = vmatpush1.msra.mxu0 %v1068_v8  ;;  %2928 = vmatpush1.msra.mxu1 %v1070_v35  ;;  %v1207_v8 = vld [vmem:[%s7224_s3 + $0xb8] sm:$0xff]  ;;  %v1208_v35 = vld [vmem:[%s7224_s3 + $0xc0] sm:$0xff] }
 0x186   : > { %2480 = vmatprep.subr.mxu0 %v1061_v27  ;;  %2929 = vmatprep.subr.mxu1 %v1063_v12  ;;  %v1139_v27 = vld [vmem:[#allocation2 + $0x98] sm:$0xff]  ;;  %v1209_v12 = vld [vmem:[%s7224_s3 + $0xc8] sm:$0xff] }
 0x187   : > { %1704 = vmatprep.mubr.f32.mxu0 %v7306_v22  ;;  %2153 = vmatprep.mubr.f32.mxu1 %v7306_v22 }
 0x188   : > { %2481 = vmatpush1.msra.mxu0 %v1060_v48  ;;  %2930 = vmatpush1.msra.mxu1 %v1062_v16  ;;  %v1210_v48 = vld [vmem:[%s7224_s3 + $0xd0] sm:$0xff]  ;;  %v1140_v16 = vld [vmem:[#allocation2 + $0xa0] sm:$0xff] }
 0x189   : > { %1705 = vmatmul.mubr.f32.gmra.mxu0 %v1132_v51  ;;  %2154 = vmatmul.mubr.f32.gmra.mxu1 %v1132_v51  ;;  %v1141_v51 = vld [vmem:[#allocation2 + $0xa8] sm:$0xff] }
 0x18a   : > { %2482 = vmatprep.subr.mxu0 %v1053_v20  ;;  %2931 = vmatprep.subr.mxu1 %v1055_v19  ;;  %v1211_v20 = vld [vmem:[%s7224_s3 + $0xd8] sm:$0xff]  ;;  %v1212_v19 = vld [vmem:[%s7224_s3 + $0xe0] sm:$0xff] }
 0x18b   : > { %2483 = vmatpush1.msra.mxu0 %v1052_v52  ;;  %2932 = vmatpush1.msra.mxu1 %v1054_v59  ;;  %v1213_v52 = vld [vmem:[%s7224_s3 + $0xe8] sm:$0xff]  ;;  %v1214_v59 = vld [vmem:[%s7224_s3 + $0xf0] sm:$0xff] }
 0x18c   : > { %2484 = vmatprep.subr.mxu0 %v1045_v55  ;;  %2933 = vmatprep.subr.mxu1 %v1047_v56  ;;  %v1142_v55 = vld [vmem:[#allocation2 + $0xb0] sm:$0xff]  ;;  %v1215_v56 = vld [vmem:[%s7224_s3 + $0xf8] sm:$0xff] }
 0x18d   : > { %1710 = vmatprep.mubr.f32.mxu0 %v7306_v22  ;;  %2159 = vmatprep.mubr.f32.mxu1 %v7306_v22 }
 0x18e   : > { %2485 = vmatpush1.msra.mxu0 %v1044_v60  ;;  %2934 = vmatpush1.msra.mxu1 %v1046_v58  ;;  %v1216_v60 = vld [vmem:[%s7224_s3 + $0x100] sm:$0xff]  ;;  %v1143_v58 = vld [vmem:[#allocation2 + $0xb8] sm:$0xff] }
 0x18f   : > { %1711 = vmatmul.mubr.f32.gmra.mxu0 %v1133_v15  ;;  %2160 = vmatmul.mubr.f32.gmra.mxu1 %v1133_v15  ;;  %v1144_v15 = vld [vmem:[#allocation2 + $0xc0] sm:$0xff] }
 0x190   : > { %2486 = vmatprep.subr.mxu0 %v1037_v33  ;;  %2935 = vmatprep.subr.mxu1 %v1039_v4  ;;  %v1217_v33 = vld [vmem:[%s7224_s3 + $0x108] sm:$0xff]  ;;  %v1218_v4 = vld [vmem:[%s7224_s3 + $0x110] sm:$0xff] }
 0x191   : > { %2487 = vmatpush1.msra.mxu0 %v1036_v45  ;;  %2936 = vmatpush1.msra.mxu1 %v1038_v41  ;;  %v1219_v45 = vld [vmem:[%s7224_s3 + $0x118] sm:$0xff]  ;;  %v1220_v41 = vld [vmem:[%s7224_s3 + $0x120] sm:$0xff] }
 0x192   : > { %2488 = vmatprep.subr.mxu0 %v1029_v44  ;;  %2937 = vmatprep.subr.mxu1 %v1031_v49  ;;  %v1145_v44 = vld [vmem:[#allocation2 + $0xc8] sm:$0xff] }
 0x193   : > { %1716 = vmatprep.mubr.f32.mxu0 %v7306_v22  ;;  %2165 = vmatprep.mubr.f32.mxu1 %v7306_v22  ;;  %v1221_v49 = vld [vmem:[%s7224_s3 + $0x128] sm:$0xff] }
 0x194   : > { %2489 = vmatpush1.msra.mxu0 %v1028_v37  ;;  %2938 = vmatpush1.msra.mxu1 %v1030_v53  ;;  %v1222_v37 = vld [vmem:[%s7224_s3 + $0x130] sm:$0xff] }
 0x195   : > { %1717 = vmatmul.mubr.f32.gmra.mxu0 %v1134_v34  ;;  %2166 = vmatmul.mubr.f32.gmra.mxu1 %v1134_v34  ;;  %v1146_v53 = vld [vmem:[#allocation2 + $0xd0] sm:$0xff]  ;;  %v1147_v34 = vld [vmem:[#allocation2 + $0xd8] sm:$0xff] }
 0x196   : > { %2490 = vmatprep.subr.mxu0 %v1021_v28  ;;  %2939 = vmatprep.subr.mxu1 %v1023_v57  ;;  %v1223_v28 = vld [vmem:[%s7224_s3 + $0x138] sm:$0xff]  ;;  %v1224_v57 = vld [vmem:[%s7224_s3 + $0x140] sm:$0xff] }
 0x197   : > { %2491 = vmatpush1.msra.mxu0 %v1020_v50  ;;  %2940 = vmatpush1.msra.mxu1 %v1022_v17  ;;  %v1226_v50 = vld [vmem:[%s7224_s3 + $0x150] sm:$0xff]  ;;  %v1227_v17 = vld [vmem:[%s7224_s3 + $0x158] sm:$0xff] }
 0x198   : > { %2492 = vmatprep.subr.mxu0 %v1013_v2  ;;  %2941 = vmatprep.subr.mxu1 %v1015_v3  ;;  %v1228_v2 = vld [vmem:[%s7224_s3 + $0x160] sm:$0xff]  ;;  %v1229_v3 = vld [vmem:[%s7224_s3 + $0x168] sm:$0xff] }
 0x199   : > { %1722 = vmatprep.mubr.f32.mxu0 %v7306_v22  ;;  %2171 = vmatprep.mubr.f32.mxu1 %v7306_v22 }
 0x19a   : > { %2493 = vmatpush1.msra.mxu0 %v1012_v6  ;;  %2942 = vmatpush1.msra.mxu1 %v1014_v29  ;;  %v1230_v6 = vld [vmem:[%s7224_s3 + $0x170] sm:$0xff]  ;;  %v1231_v29 = vld [vmem:[%s7224_s3 + $0x178] sm:$0xff] }
 0x19b   : > { %1723 = vmatmul.mubr.f32.gmra.mxu0 %v1135_v13  ;;  %2172 = vmatmul.mubr.f32.gmra.mxu1 %v1135_v13  ;;  %v1155_v13 = vld [vmem:[#allocation2 + $0x118] sm:$0xff] }
 0x19c   : > { %2494 = vmatprep.subr.mxu0 %v1005_v0  ;;  %2943 = vmatprep.subr.mxu1 %v1007_v23  ;;  %v1232_v0 = vld [vmem:[%s7224_s3 + $0x180] sm:$0xff]  ;;  %v1233_v23 = vld [vmem:[%s7224_s3 + $0x188] sm:$0xff] }
 0x19d   : > { %2495 = vmatpush1.msra.mxu0 %v1004_v43  ;;  %2944 = vmatpush1.msra.mxu1 %v1006_v40  ;;  %v1156_v43 = vld [vmem:[#allocation2 + $0x120] sm:$0xff]  ;;  %v1157_v40 = vld [vmem:[#allocation2 + $0x128] sm:$0xff] }
 0x19e   : > { %2496 = vmatprep.subr.mxu0 %v997_v31  ;;  %2945 = vmatprep.subr.mxu1 %v999_v42  ;;  %v1158_v31 = vld [vmem:[#allocation2 + $0x130] sm:$0xff]  ;;  %v1159_v42 = vld [vmem:[#allocation2 + $0x138] sm:$0xff] }
 0x19f   : > { %1728 = vmatprep.mubr.f32.mxu0 %v7306_v22  ;;  %2177 = vmatprep.mubr.f32.mxu1 %v7306_v22 }
 0x1a0   : > { %2497 = vmatpush1.msra.mxu0 %v996_v18  ;;  %2946 = vmatpush1.msra.mxu1 %v998_v26  ;;  %v1160_v18 = vld [vmem:[#allocation2 + $0x140] sm:$0xff]  ;;  %v1161_v26 = vld [vmem:[#allocation2 + $0x148] sm:$0xff] }
 0x1a1   : > { %1729 = vmatmul.mubr.f32.gmra.mxu0 %v1136_v10  ;;  %2178 = vmatmul.mubr.f32.gmra.mxu1 %v1136_v10  ;;  %v1240_v10 = vld [vmem:[%s7224_s3 + $0x1c0] sm:$0xff] }
 0x1a2   : > { %1734 = vmatprep.mubr.f32.mxu0 %v7306_v22  ;;  %2183 = vmatprep.mubr.f32.mxu1 %v7306_v22 }
 0x1a3   : > { %1345 = vperm.xlu1 %4657, %v1203_v32   ;;  %1350 = vperm.xlu0 %4656, %v1204_v63   ;;  %v1162_v32 = vld [vmem:[#allocation2 + $0x150] sm:$0xff]  ;;  %v1241_v63 = vld [vmem:[%s7224_s3 + $0x1c8] sm:$0xff] }
 0x1a5   : > { %1735 = vmatmul.mubr.f32.gmra.mxu0 %v1137_v1  ;;  %2184 = vmatmul.mubr.f32.gmra.mxu1 %v1137_v1  ;;  %v1163_v1 = vld [vmem:[#allocation2 + $0x158] sm:$0xff] }
 0x1a6   : > { %1740 = vmatprep.mubr.f32.mxu0 %v7306_v22  ;;  %2189 = vmatprep.mubr.f32.mxu1 %v7306_v22 }
 0x1a7   : > { %1355 = vperm.xlu1 %4657, %v1205_v7   ;;  %1360 = vperm.xlu0 %4656, %v1206_v5   ;;  %v5822_v7 = vpop.permute.xlu0 %1250  ;;  %v1242_v5 = vld [vmem:[%s7224_s3 + $0x1d0] sm:$0xff] }
 0x1a9   : > { %1741 = vmatmul.mubr.f32.gmra.mxu0 %v1138_v25  ;;  %2190 = vmatmul.mubr.f32.gmra.mxu1 %v1138_v25  ;;  %v1164_v25 = vld [vmem:[#allocation2 + $0x160] sm:$0xff] }
 0x1aa   : > { %1746 = vmatprep.mubr.f32.mxu0 %v7306_v22  ;;  %2195 = vmatprep.mubr.f32.mxu1 %v7306_v22 }
 0x1ab   : > { %1365 = vperm.xlu1 %4657, %v1207_v8   ;;  %1370 = vperm.xlu0 %4656, %v1208_v35  }
 0x1ad   : > { %1747 = vmatmul.mubr.f32.gmra.mxu0 %v1139_v27  ;;  %2196 = vmatmul.mubr.f32.gmra.mxu1 %v1139_v27  ;;  %v1243_v27 = vld [vmem:[%s7224_s3 + $0x1d8] sm:$0xff] }
 0x1ae   : > { %1752 = vmatprep.mubr.f32.mxu0 %v7306_v22  ;;  %2201 = vmatprep.mubr.f32.mxu1 %v7306_v22 }
 0x1af   : > { %1375 = vperm.xlu1 %4657, %v1209_v12   ;;  %1380 = vperm.xlu0 %4656, %v1210_v48   ;;  %v1165_v12 = vld [vmem:[#allocation2 + $0x168] sm:$0xff] }
 0x1b1   : > { %1753 = vmatmul.mubr.f32.gmra.mxu0 %v1140_v16  ;;  %2202 = vmatmul.mubr.f32.gmra.mxu1 %v1140_v16 }
 0x1b2   : > { %1758 = vmatprep.mubr.f32.mxu0 %v7306_v22  ;;  %2207 = vmatprep.mubr.f32.mxu1 %v7306_v22 }
 0x1b3   : > { %1385 = vperm.xlu1 %4657, %v1211_v20   ;;  %1390 = vperm.xlu0 %4656, %v1212_v19   ;;  %v5839_v20 = vpop.permute.xlu0 %1255 }
 0x1b5   : > { %1759 = vmatmul.mubr.f32.gmra.mxu0 %v1141_v51  ;;  %2208 = vmatmul.mubr.f32.gmra.mxu1 %v1141_v51 }
 0x1b6   : > { %1764 = vmatprep.mubr.f32.mxu0 %v7306_v22  ;;  %2213 = vmatprep.mubr.f32.mxu1 %v7306_v22 }
 0x1b7   : > { %1395 = vperm.xlu1 %4657, %v1213_v52   ;;  %1400 = vperm.xlu0 %4656, %v1214_v59  }
 0x1b9   : > { %1765 = vmatmul.mubr.f32.gmra.mxu0 %v1142_v55  ;;  %2214 = vmatmul.mubr.f32.gmra.mxu1 %v1142_v55 }
 0x1ba   : > { %1770 = vmatprep.mubr.f32.mxu0 %v7306_v22  ;;  %2219 = vmatprep.mubr.f32.mxu1 %v7306_v22 }
 0x1bb   : > { %1405 = vperm.xlu1 %4657, %v1215_v56   ;;  %1410 = vperm.xlu0 %4656, %v1216_v60   ;;  %v5843_v60 = vpop.permute.xlu1 %1260 }
 0x1bd   : > { %1771 = vmatmul.mubr.f32.gmra.mxu0 %v1143_v58  ;;  %2220 = vmatmul.mubr.f32.gmra.mxu1 %v1143_v58 }
 0x1be   : > { %1776 = vmatprep.mubr.f32.mxu0 %v7306_v22  ;;  %2225 = vmatprep.mubr.f32.mxu1 %v7306_v22 }
 0x1bf   : > { %1415 = vperm.xlu1 %4657, %v1217_v33   ;;  %1420 = vperm.xlu0 %4656, %v1218_v4   ;;  %v1244_v4 = vld [vmem:[%s7224_s3 + $0x1e0] sm:$0xff] }
 0x1c1   : > { %1777 = vmatmul.mubr.f32.gmra.mxu0 %v1144_v15  ;;  %2226 = vmatmul.mubr.f32.gmra.mxu1 %v1144_v15  ;;  %v1166_v15 = vld [vmem:[#allocation2 + $0x170] sm:$0xff] }
 0x1c2   : > { %1782 = vmatprep.mubr.f32.mxu0 %v7306_v22  ;;  %2231 = vmatprep.mubr.f32.mxu1 %v7306_v22 }
 0x1c3   : > { %1425 = vperm.xlu1 %4657, %v1219_v45   ;;  %1430 = vperm.xlu0 %4656, %v1220_v41  }
 0x1c5   : > { %1783 = vmatmul.mubr.f32.gmra.mxu0 %v1145_v44  ;;  %2232 = vmatmul.mubr.f32.gmra.mxu1 %v1145_v44 }
 0x1c6   : > { %1788 = vmatprep.mubr.f32.mxu0 %v7306_v22  ;;  %2237 = vmatprep.mubr.f32.mxu1 %v7306_v22 }
 0x1c7   : > { %1435 = vperm.xlu1 %4657, %v1221_v49   ;;  %1440 = vperm.xlu0 %4656, %v1222_v37  }
 0x1c9   : > { %1789 = vmatmul.mubr.f32.gmra.mxu0 %v1146_v53  ;;  %2238 = vmatmul.mubr.f32.gmra.mxu1 %v1146_v53 }
 0x1ca   : > { %1794 = vmatprep.mubr.f32.mxu0 %v7306_v22  ;;  %2243 = vmatprep.mubr.f32.mxu1 %v7306_v22 }
 0x1cb   : > { %1445 = vperm.xlu1 %4657, %v1223_v28   ;;  %1450 = vperm.xlu0 %4656, %v1224_v57  }
 0x1cd   : > { %1795 = vmatmul.mubr.f32.gmra.mxu0 %v1147_v34  ;;  %2244 = vmatmul.mubr.f32.gmra.mxu1 %v1147_v34 }
 0x1ce   : > { %1800 = vmatprep.mubr.f32.mxu0 %v7306_v22  ;;  %2249 = vmatprep.mubr.f32.mxu1 %v7306_v22 }
 0x1cf   : > { %1455 = vperm.xlu1 %4657, %v1225_v61   ;;  %1460 = vperm.xlu0 %4656, %v1226_v50  }
 0x1d1   : > { %1801 = vmatmul.mubr.f32.gmra.mxu0 %v1148_v47  ;;  %2250 = vmatmul.mubr.f32.gmra.mxu1 %v1148_v47 }
 0x1d2   : > { %1806 = vmatprep.mubr.f32.mxu0 %v7306_v22  ;;  %2255 = vmatprep.mubr.f32.mxu1 %v7306_v22 }
 0x1d3   : > { %1465 = vperm.xlu1 %4657, %v1227_v17   ;;  %1470 = vperm.xlu0 %4656, %v1228_v2   ;;  %v1245_v17 = vld [vmem:[%s7224_s3 + $0x1e8] sm:$0xff] }
 0x1d5   : > { %1807 = vmatmul.mubr.f32.gmra.mxu0 %v1149_v36  ;;  %2256 = vmatmul.mubr.f32.gmra.mxu1 %v1149_v36  ;;  %v1167_v36 = vld [vmem:[#allocation2 + $0x178] sm:$0xff] }
 0x1d6   : > { %1812 = vmatprep.mubr.f32.mxu0 %v7306_v22  ;;  %2261 = vmatprep.mubr.f32.mxu1 %v7306_v22 }
 0x1d7   : > { %1475 = vperm.xlu1 %4657, %v1229_v3   ;;  %1480 = vperm.xlu0 %4656, %v1230_v6   ;;  %v5869_v6 = vpop.permute.xlu1 %1265 }
 0x1d9   : > { %1813 = vmatmul.mubr.f32.gmra.mxu0 %v1150_v9  ;;  %2262 = vmatmul.mubr.f32.gmra.mxu1 %v1150_v9 }
 0x1da   : > { %1818 = vmatprep.mubr.f32.mxu0 %v7306_v22  ;;  %2267 = vmatprep.mubr.f32.mxu1 %v7306_v22 }
 0x1db   : > { %1485 = vperm.xlu1 %4657, %v1231_v29   ;;  %1490 = vperm.xlu0 %4656, %v1232_v0  }
 0x1dd   : > { %1819 = vmatmul.mubr.f32.gmra.mxu0 %v1151_v30  ;;  %2268 = vmatmul.mubr.f32.gmra.mxu1 %v1151_v30 }
 0x1de   : > { %1824 = vmatprep.mubr.f32.mxu0 %v7306_v22  ;;  %2273 = vmatprep.mubr.f32.mxu1 %v7306_v22 }
 0x1df   : > { %1495 = vperm.xlu1 %4657, %v1233_v23   ;;  %1500 = vperm.xlu0 %4656, %v1234_v46  }
 0x1e1   : > { %1825 = vmatmul.mubr.f32.gmra.mxu0 %v1152_v62  ;;  %2274 = vmatmul.mubr.f32.gmra.mxu1 %v1152_v62 }
 0x1e2   : > { %1830 = vmatprep.mubr.f32.mxu0 %v7306_v22  ;;  %2279 = vmatprep.mubr.f32.mxu1 %v7306_v22 }
 0x1e3   : > { %1505 = vperm.xlu1 %4657, %v1235_v39   ;;  %1510 = vperm.xlu0 %4656, %v1236_v24   ;;  %v1168_v39 = vld [vmem:[#allocation2 + $0x180] sm:$0xff] }
 0x1e5   : > { %1831 = vmatmul.mubr.f32.gmra.mxu0 %v1153_v11  ;;  %2280 = vmatmul.mubr.f32.gmra.mxu1 %v1153_v11 }
 0x1e6   : > { %1836 = vmatprep.mubr.f32.mxu0 %v7306_v22  ;;  %2285 = vmatprep.mubr.f32.mxu1 %v7306_v22 }
 0x1e7   : > { %1515 = vperm.xlu1 %4657, %v1237_v38   ;;  %1520 = vperm.xlu0 %4656, %v1238_v21  }
 0x1e9   : > { %1837 = vmatmul.mubr.f32.gmra.mxu0 %v1154_v54  ;;  %2286 = vmatmul.mubr.f32.gmra.mxu1 %v1154_v54 }
 0x1ea   : > { %1842 = vmatprep.mubr.f32.mxu0 %v7306_v22  ;;  %2291 = vmatprep.mubr.f32.mxu1 %v7306_v22 }
 0x1eb   : > { %1525 = vperm.xlu1 %4657, %v1239_v14   ;;  %1530 = vperm.xlu0 %4656, %v1240_v10  }
 0x1ed   : > { %1843 = vmatmul.mubr.f32.gmra.mxu0 %v1155_v13  ;;  %2292 = vmatmul.mubr.f32.gmra.mxu1 %v1155_v13 }
 0x1ee   : > { %1848 = vmatprep.mubr.f32.mxu0 %v7306_v22  ;;  %2297 = vmatprep.mubr.f32.mxu1 %v7306_v22 }
 0x1ef   : > { %1535 = vperm.xlu1 %4657, %v1241_v63   ;;  %1540 = vperm.xlu0 %4656, %v1242_v5   ;;  %v1247_v5 = vld [vmem:[%s7224_s3 + $0x1f8] sm:$0xff] }
 0x1f1   : > { %1849 = vmatmul.mubr.f32.gmra.mxu0 %v1156_v43  ;;  %2298 = vmatmul.mubr.f32.gmra.mxu1 %v1156_v43  ;;  %v1246_v43 = vld [vmem:[%s7224_s3 + $0x1f0] sm:$0xff] }
 0x1f2   : > { %1854 = vmatprep.mubr.f32.mxu0 %v7306_v22  ;;  %2303 = vmatprep.mubr.f32.mxu1 %v7306_v22 }
 0x1f3   : > { %1545 = vperm.xlu1 %4657, %v1243_v27   ;;  %1550 = vperm.xlu0 %4656, %v1244_v4  }
 0x1f5   : > { %1855 = vmatmul.mubr.f32.gmra.mxu0 %v1157_v40  ;;  %2304 = vmatmul.mubr.f32.gmra.mxu1 %v1157_v40 }
 0x1f6   : > { %1860 = vmatprep.mubr.f32.mxu0 %v7306_v22  ;;  %2309 = vmatprep.mubr.f32.mxu1 %v7306_v22 }
 0x1f7   : > { %1555 = vperm.xlu1 %4657, %v1245_v17   ;;  %1560 = vperm.xlu0 %4656, %v1246_v43  }
 0x1f9   : > { %1861 = vmatmul.mubr.f32.gmra.mxu0 %v1158_v31  ;;  %2310 = vmatmul.mubr.f32.gmra.mxu1 %v1158_v31 }
 0x1fa   : > { %1866 = vmatprep.mubr.f32.mxu0 %v7306_v22  ;;  %2315 = vmatprep.mubr.f32.mxu1 %v7306_v22 }
 0x1fb   : > { %1565 = vperm.xlu1 %4657, %v1247_v5  }
 0x1fd   : > { %1867 = vmatmul.mubr.f32.gmra.mxu0 %v1159_v42  ;;  %2316 = vmatmul.mubr.f32.gmra.mxu1 %v1159_v42  ;;  %v5884_v42 = vpop.permute.xlu0 %1270 }
 0x1fe   : > { %1872 = vmatprep.mubr.f32.mxu0 %v7306_v22  ;;  %2321 = vmatprep.mubr.f32.mxu1 %v7306_v22 }
 0x201   : > { %1873 = vmatmul.mubr.f32.gmra.mxu0 %v1160_v18  ;;  %2322 = vmatmul.mubr.f32.gmra.mxu1 %v1160_v18 }
 0x202   : > { %1878 = vmatprep.mubr.f32.mxu0 %v7306_v22  ;;  %2327 = vmatprep.mubr.f32.mxu1 %v7306_v22 }
 0x205   : > { %1879 = vmatmul.mubr.f32.gmra.mxu0 %v1161_v26  ;;  %2328 = vmatmul.mubr.f32.gmra.mxu1 %v1161_v26 }
 0x206   : > { %1884 = vmatprep.mubr.f32.mxu0 %v7306_v22  ;;  %2333 = vmatprep.mubr.f32.mxu1 %v7306_v22 }
 0x209   : > { %1885 = vmatmul.mubr.f32.gmra.mxu0 %v1162_v32  ;;  %2334 = vmatmul.mubr.f32.gmra.mxu1 %v1162_v32 }
 0x20a   : > { %1890 = vmatprep.mubr.f32.mxu0 %v7306_v22  ;;  %2339 = vmatprep.mubr.f32.mxu1 %v7306_v22 }
 0x20d   : > { %1891 = vmatmul.mubr.f32.gmra.mxu0 %v1163_v1  ;;  %2340 = vmatmul.mubr.f32.gmra.mxu1 %v1163_v1 }
 0x20e   : > { %1896 = vmatprep.mubr.f32.mxu0 %v7306_v22  ;;  %2345 = vmatprep.mubr.f32.mxu1 %v7306_v22 }
 0x211   : > { %1897 = vmatmul.mubr.f32.gmra.mxu0 %v1164_v25  ;;  %2346 = vmatmul.mubr.f32.gmra.mxu1 %v1164_v25  ;;  %v1634_v8 = vpop.f32.mrf.mxu0  ;;  %v2083_v35 = vpop.f32.mrf.mxu1  ;;  %v1169_v25 = vld [vmem:[#allocation2 + $0x188] sm:$0xff] }
 0x212   : > { %1902 = vmatprep.mubr.f32.mxu0 %v7306_v22  ;;  %2351 = vmatprep.mubr.f32.mxu1 %v7306_v22  ;;  %v1635_v48 = vadd.f32 %v1634_v8, %v5822_v7  ;;  %v2084_v16 = vadd.f32 %v2083_v35, %v5822_v7 }
 0x213   : > { %v1636_v19 = vpop.f32.mrf.mxu0  ;;  %v2085_v51 = vpop.f32.mrf.mxu1 }
 0x214   : > { %v1637_v52 = vadd.f32 %v1636_v19, %v5822_v7  ;;  %v2086_v59 = vadd.f32 %v2085_v51, %v5822_v7  ;;  %v3364_v55 = vmax.f32 %v1635_v48, 0.0  ;;  %v3366_v56 = vmax.f32 %v2084_v16, 0.0  ;;  %v5899_v48 = vpop.permute.xlu1 %1275 }
 0x215   : > { %1903 = vmatmul.mubr.f32.gmra.mxu0 %v1165_v12  ;;  %2352 = vmatmul.mubr.f32.gmra.mxu1 %v1165_v12  ;;  %v1640_v58 = vpop.f32.mrf.mxu0  ;;  %v2089_v33 = vpop.f32.mrf.mxu1 }
 0x216   : > { %1908 = vmatprep.mubr.f32.mxu0 %v7306_v22  ;;  %2357 = vmatprep.mubr.f32.mxu1 %v7306_v22  ;;  %v3365_v45 = vmax.f32 %v1637_v52, 0.0  ;;  %v3367_v41 = vmax.f32 %v2086_v59, 0.0  ;;  %3876 = vst [vmem:[%s5850_s13] sm:$0xff] %v3364_v55  ;;  %3878 = vst [vmem:[%s5850_s13 + $0x10] sm:$0xff] %v3366_v56  ;;  %v1641_v44 = vadd.f32 %v1640_v58, %v5839_v20 }
 0x217   : > { %v2090_v49 = vadd.f32 %v2089_v33, %v5839_v20  ;;  %v1642_v37 = vpop.f32.mrf.mxu0  ;;  %v2091_v53 = vpop.f32.mrf.mxu1  ;;  %v1170_v33 = vld [vmem:[#allocation2 + $0x190] sm:$0xff] }
 0x218   : > { %3877 = vst [vmem:[%s5850_s13 + $0x8] sm:$0xff] %v3365_v45  ;;  %3879 = vst [vmem:[%s5850_s13 + $0x18] sm:$0xff] %v3367_v41  ;;  %v1643_v28 = vadd.f32 %v1642_v37, %v5839_v20  ;;  %v2092_v57 = vadd.f32 %v2091_v53, %v5839_v20  ;;  %v3372_v34 = vmax.f32 %v1641_v44, 0.0  ;;  %v5911_v44 = vpop.permute.xlu0 %1280 }
 0x219   : > { %v3374_v61 = vmax.f32 %v2090_v49, 0.0  ;;  %1909 = vmatmul.mubr.f32.gmra.mxu0 %v1166_v15  ;;  %2358 = vmatmul.mubr.f32.gmra.mxu1 %v1166_v15  ;;  %v1646_v50 = vpop.f32.mrf.mxu0  ;;  %v2095_v47 = vpop.f32.mrf.mxu1 }
 0x21a   : > { %1914 = vmatprep.mubr.f32.mxu0 %v7306_v22  ;;  %2363 = vmatprep.mubr.f32.mxu1 %v7306_v22  ;;  %v3373_v2 = vmax.f32 %v1643_v28, 0.0  ;;  %v3375_v9 = vmax.f32 %v2092_v57, 0.0  ;;  %3884 = vst [vmem:[%s5850_s13 + $0x40] sm:$0xff] %v3372_v34  ;;  %v1647_v3 = vadd.f32 %v1646_v50, %v5843_v60  ;;  %v2096_v30 = vadd.f32 %v2095_v47, %v5843_v60  ;;  %v1171_v47 = vld [vmem:[#allocation2 + $0x198] sm:$0xff] }
 0x21b   : > { %3886 = vst [vmem:[%s5850_s13 + $0x50] sm:$0xff] %v3374_v61  ;;  %v1648_v62 = vpop.f32.mrf.mxu0  ;;  %v2097_v29 = vpop.f32.mrf.mxu1 }
 0x21c   : > { %3885 = vst [vmem:[%s5850_s13 + $0x48] sm:$0xff] %v3373_v2  ;;  %3887 = vst [vmem:[%s5850_s13 + $0x58] sm:$0xff] %v3375_v9  ;;  %v1649_v11 = vadd.f32 %v1648_v62, %v5843_v60  ;;  %v2098_v0 = vadd.f32 %v2097_v29, %v5843_v60  ;;  %v3380_v54 = vmax.f32 %v1647_v3, 0.0  ;;  %v3382_v23 = vmax.f32 %v2096_v30, 0.0  ;;  %v5923_v3 = vpop.permute.xlu1 %1285 }
 0x21d   : > { %1915 = vmatmul.mubr.f32.gmra.mxu0 %v1167_v36  ;;  %2364 = vmatmul.mubr.f32.gmra.mxu1 %v1167_v36  ;;  %v1652_v13 = vpop.f32.mrf.mxu0  ;;  %v2101_v46 = vpop.f32.mrf.mxu1 }
 0x21e   : > { %1920 = vmatprep.mubr.f32.mxu0 %v7306_v22  ;;  %2369 = vmatprep.mubr.f32.mxu1 %v7306_v22  ;;  %v3381_v40 = vmax.f32 %v1649_v11, 0.0  ;;  %v3383_v24 = vmax.f32 %v2098_v0, 0.0  ;;  %3892 = vst [vmem:[%s5850_s13 + $0x80] sm:$0xff] %v3380_v54  ;;  %3894 = vst [vmem:[%s5850_s13 + $0x90] sm:$0xff] %v3382_v23  ;;  %v1653_v31 = vadd.f32 %v1652_v13, %v5869_v6 }
 0x21f   : > { %v2102_v38 = vadd.f32 %v2101_v46, %v5869_v6  ;;  %v1654_v21 = vpop.f32.mrf.mxu0  ;;  %v2103_v18 = vpop.f32.mrf.mxu1  ;;  %v1172_v46 = vld [vmem:[#allocation2 + $0x1a0] sm:$0xff] }
 0x220   : > { %3893 = vst [vmem:[%s5850_s13 + $0x88] sm:$0xff] %v3381_v40  ;;  %3895 = vst [vmem:[%s5850_s13 + $0x98] sm:$0xff] %v3383_v24  ;;  %v1655_v14 = vadd.f32 %v1654_v21, %v5869_v6  ;;  %v2104_v26 = vadd.f32 %v2103_v18, %v5869_v6  ;;  %v3388_v10 = vmax.f32 %v1653_v31, 0.0  ;;  %v5935_v31 = vpop.permute.xlu0 %1290 }
 0x221   : > { %v3390_v32 = vmax.f32 %v2102_v38, 0.0  ;;  %1921 = vmatmul.mubr.f32.gmra.mxu0 %v1168_v39  ;;  %2370 = vmatmul.mubr.f32.gmra.mxu1 %v1168_v39  ;;  %v1658_v63 = vpop.f32.mrf.mxu0  ;;  %v2107_v1 = vpop.f32.mrf.mxu1 }
 0x222   : > { %1926 = vmatprep.mubr.f32.mxu0 %v7306_v22  ;;  %2375 = vmatprep.mubr.f32.mxu1 %v7306_v22  ;;  %v3389_v8 = vmax.f32 %v1655_v14, 0.0  ;;  %v3391_v35 = vmax.f32 %v2104_v26, 0.0  ;;  %3900 = vst [vmem:[%s5850_s13 + $0xc0] sm:$0xff] %v3388_v10  ;;  %v1659_v27 = vadd.f32 %v1658_v63, %v5884_v42  ;;  %v2108_v12 = vadd.f32 %v2107_v1, %v5884_v42  ;;  %v1173_v1 = vld [vmem:[#allocation2 + $0x1a8] sm:$0xff] }
 0x223   : > { %3902 = vst [vmem:[%s5850_s13 + $0xd0] sm:$0xff] %v3390_v32  ;;  %v1660_v16 = vpop.f32.mrf.mxu0  ;;  %v2109_v19 = vpop.f32.mrf.mxu1 }
 0x224   : > { %3901 = vst [vmem:[%s5850_s13 + $0xc8] sm:$0xff] %v3389_v8  ;;  %3903 = vst [vmem:[%s5850_s13 + $0xd8] sm:$0xff] %v3391_v35  ;;  %v1661_v51 = vadd.f32 %v1660_v16, %v5884_v42  ;;  %v2110_v52 = vadd.f32 %v2109_v19, %v5884_v42  ;;  %v3396_v59 = vmax.f32 %v1659_v27, 0.0  ;;  %v3398_v55 = vmax.f32 %v2108_v12, 0.0 }
 0x225   : > { %1927 = vmatmul.mubr.f32.gmra.mxu0 %v1169_v25  ;;  %2376 = vmatmul.mubr.f32.gmra.mxu1 %v1169_v25  ;;  %v1664_v56 = vpop.f32.mrf.mxu0  ;;  %v2113_v58 = vpop.f32.mrf.mxu1 }
 0x226   : > { %1932 = vmatprep.mubr.f32.mxu0 %v7306_v22  ;;  %2381 = vmatprep.mubr.f32.mxu1 %v7306_v22  ;;  %v3397_v4 = vmax.f32 %v1661_v51, 0.0  ;;  %v3399_v15 = vmax.f32 %v2110_v52, 0.0  ;;  %3908 = vst [vmem:[%s5850_s13 + $0x100] sm:$0xff] %v3396_v59  ;;  %3910 = vst [vmem:[%s5850_s13 + $0x110] sm:$0xff] %v3398_v55  ;;  %v1665_v45 = vadd.f32 %v1664_v56, %v5899_v48  ;;  %v5951_v59 = vpop.permute.xlu1 %1295  ;;  %v1174_v55 = vld [vmem:[#allocation2 + $0x1b0] sm:$0xff] }
 0x227   : > { %v2114_v41 = vadd.f32 %v2113_v58, %v5899_v48  ;;  %v1666_v49 = vpop.f32.mrf.mxu0  ;;  %v2115_v37 = vpop.f32.mrf.mxu1 }
 0x228   : > { %3909 = vst [vmem:[%s5850_s13 + $0x108] sm:$0xff] %v3397_v4  ;;  %3911 = vst [vmem:[%s5850_s13 + $0x118] sm:$0xff] %v3399_v15  ;;  %v1667_v53 = vadd.f32 %v1666_v49, %v5899_v48  ;;  %v2116_v28 = vadd.f32 %v2115_v37, %v5899_v48  ;;  %v3404_v57 = vmax.f32 %v1665_v45, 0.0  ;;  %v1175_v37 = vld [vmem:[#allocation2 + $0x1b8] sm:$0xff] }
 0x229   : > { %v3406_v34 = vmax.f32 %v2114_v41, 0.0  ;;  %1933 = vmatmul.mubr.f32.gmra.mxu0 %v1170_v33  ;;  %2382 = vmatmul.mubr.f32.gmra.mxu1 %v1170_v33  ;;  %v1670_v61 = vpop.f32.mrf.mxu0  ;;  %v2119_v50 = vpop.f32.mrf.mxu1 }
 0x22a   : > { %1938 = vmatprep.mubr.f32.mxu0 %v7306_v22  ;;  %2387 = vmatprep.mubr.f32.mxu1 %v7306_v22  ;;  %v3405_v17 = vmax.f32 %v1667_v53, 0.0  ;;  %v3407_v36 = vmax.f32 %v2116_v28, 0.0  ;;  %3916 = vst [vmem:[%s5850_s13 + $0x140] sm:$0xff] %v3404_v57  ;;  %v1671_v2 = vadd.f32 %v1670_v61, %v5911_v44  ;;  %v2120_v9 = vadd.f32 %v2119_v50, %v5911_v44  ;;  %v5965_v61 = vpop.permute.xlu0 %1300 }
 0x22b   : > { %3918 = vst [vmem:[%s5850_s13 + $0x150] sm:$0xff] %v3406_v34  ;;  %v1672_v30 = vpop.f32.mrf.mxu0  ;;  %v2121_v62 = vpop.f32.mrf.mxu1 }
 0x22c   : > { %3917 = vst [vmem:[%s5850_s13 + $0x148] sm:$0xff] %v3405_v17  ;;  %3919 = vst [vmem:[%s5850_s13 + $0x158] sm:$0xff] %v3407_v36  ;;  %v1673_v29 = vadd.f32 %v1672_v30, %v5911_v44  ;;  %v2122_v11 = vadd.f32 %v2121_v62, %v5911_v44  ;;  %v3412_v0 = vmax.f32 %v1671_v2, 0.0  ;;  %v3414_v54 = vmax.f32 %v2120_v9, 0.0  ;;  %v1176_v2 = vld [vmem:[#allocation2 + $0x1c0] sm:$0xff] }
 0x22d   : > { %1939 = vmatmul.mubr.f32.gmra.mxu0 %v1171_v47  ;;  %2388 = vmatmul.mubr.f32.gmra.mxu1 %v1171_v47  ;;  %v1676_v23 = vpop.f32.mrf.mxu0  ;;  %v2125_v13 = vpop.f32.mrf.mxu1 }
 0x22e   : > { %1944 = vmatprep.mubr.f32.mxu0 %v7306_v22  ;;  %2393 = vmatprep.mubr.f32.mxu1 %v7306_v22  ;;  %v3413_v43 = vmax.f32 %v1673_v29, 0.0  ;;  %v3415_v39 = vmax.f32 %v2122_v11, 0.0  ;;  %3924 = vst [vmem:[%s5850_s13 + $0x180] sm:$0xff] %v3412_v0  ;;  %3926 = vst [vmem:[%s5850_s13 + $0x190] sm:$0xff] %v3414_v54  ;;  %v1677_v40 = vadd.f32 %v1676_v23, %v5923_v3 }
 0x22f   : > { %v2126_v24 = vadd.f32 %v2125_v13, %v5923_v3  ;;  %v1678_v38 = vpop.f32.mrf.mxu0  ;;  %v2127_v21 = vpop.f32.mrf.mxu1 }
 0x230   : > { %3925 = vst [vmem:[%s5850_s13 + $0x188] sm:$0xff] %v3413_v43  ;;  %3927 = vst [vmem:[%s5850_s13 + $0x198] sm:$0xff] %v3415_v39  ;;  %v1679_v18 = vadd.f32 %v1678_v38, %v5923_v3  ;;  %v2128_v14 = vadd.f32 %v2127_v21, %v5923_v3  ;;  %v3420_v26 = vmax.f32 %v1677_v40, 0.0  ;;  %v5977_v13 = vpop.permute.xlu1 %1305 }
 0x231   : > { %v3422_v10 = vmax.f32 %v2126_v24, 0.0  ;;  %1945 = vmatmul.mubr.f32.gmra.mxu0 %v1172_v46  ;;  %2394 = vmatmul.mubr.f32.gmra.mxu1 %v1172_v46  ;;  %v1682_v32 = vpop.f32.mrf.mxu0  ;;  %v2131_v63 = vpop.f32.mrf.mxu1  ;;  %v1177_v46 = vld [vmem:[#allocation2 + $0x1c8] sm:$0xff] }
 0x232   : > { %1950 = vmatprep.mubr.f32.mxu0 %v7306_v22  ;;  %2399 = vmatprep.mubr.f32.mxu1 %v7306_v22  ;;  %v3421_v5 = vmax.f32 %v1679_v18, 0.0  ;;  %v3423_v25 = vmax.f32 %v2128_v14, 0.0  ;;  %3932 = vst [vmem:[%s5850_s13 + $0x1c0] sm:$0xff] %v3420_v26  ;;  %v1683_v8 = vadd.f32 %v1682_v32, %v5935_v31  ;;  %v2132_v35 = vadd.f32 %v2131_v63, %v5935_v31  ;;  %v1178_v26 = vld [vmem:[#allocation2 + $0x1d0] sm:$0xff] }
 0x233   : > { %3934 = vst [vmem:[%s5850_s13 + $0x1d0] sm:$0xff] %v3422_v10  ;;  %v1684_v27 = vpop.f32.mrf.mxu0  ;;  %v2133_v12 = vpop.f32.mrf.mxu1 }
 0x234   : > { %3933 = vst [vmem:[%s5850_s13 + $0x1c8] sm:$0xff] %v3421_v5  ;;  %3935 = vst [vmem:[%s5850_s13 + $0x1d8] sm:$0xff] %v3423_v25  ;;  %v1685_v16 = vadd.f32 %v1684_v27, %v5935_v31  ;;  %v2134_v19 = vadd.f32 %v2133_v12, %v5935_v31  ;;  %v3428_v51 = vmax.f32 %v1683_v8, 0.0  ;;  %v3430_v52 = vmax.f32 %v2132_v35, 0.0  ;;  %v5991_v5 = vpop.permute.xlu0 %1310  ;;  %v1179_v12 = vld [vmem:[#allocation2 + $0x1d8] sm:$0xff] }
 0x235   : > { %1951 = vmatmul.mubr.f32.gmra.mxu0 %v1173_v1  ;;  %2400 = vmatmul.mubr.f32.gmra.mxu1 %v1173_v1 }
 0x236   : > { %1956 = vmatprep.mubr.f32.mxu0 %v7306_v22  ;;  %2405 = vmatprep.mubr.f32.mxu1 %v7306_v22  ;;  %v3429_v56 = vmax.f32 %v1685_v16, 0.0  ;;  %v3431_v58 = vmax.f32 %v2134_v19, 0.0  ;;  %3940 = vst [vmem:[%s5850_s13 + $0x200] sm:$0xff] %v3428_v51  ;;  %3942 = vst [vmem:[%s5850_s13 + $0x210] sm:$0xff] %v3430_v52 }
 0x237   : > { %v1688_v33 = vpop.f32.mrf.mxu0  ;;  %v2137_v4 = vpop.f32.mrf.mxu1 }
 0x238   : > { %3941 = vst [vmem:[%s5850_s13 + $0x208] sm:$0xff] %v3429_v56  ;;  %3943 = vst [vmem:[%s5850_s13 + $0x218] sm:$0xff] %v3431_v58  ;;  %v1689_v15 = vadd.f32 %v1688_v33, %v5951_v59  ;;  %v2138_v45 = vadd.f32 %v2137_v4, %v5951_v59  ;;  %v6003_v4 = vpop.permute.xlu1 %1315 }
 0x239   : > { %1957 = vmatmul.mubr.f32.gmra.mxu0 %v1174_v55  ;;  %2406 = vmatmul.mubr.f32.gmra.mxu1 %v1174_v55  ;;  %v1690_v41 = vpop.f32.mrf.mxu0  ;;  %v2139_v49 = vpop.f32.mrf.mxu1 }
 0x23a   : > { %1962 = vmatprep.mubr.f32.mxu0 %v7306_v22  ;;  %2411 = vmatprep.mubr.f32.mxu1 %v7306_v22  ;;  %v1691_v53 = vadd.f32 %v1690_v41, %v5951_v59  ;;  %v2140_v28 = vadd.f32 %v2139_v49, %v5951_v59  ;;  %v3436_v57 = vmax.f32 %v1689_v15, 0.0  ;;  %v3438_v34 = vmax.f32 %v2138_v45, 0.0  ;;  %v1180_v15 = vld [vmem:[#allocation2 + $0x1e0] sm:$0xff] }
 0x23c   : > { %v3437_v50 = vmax.f32 %v1691_v53, 0.0  ;;  %v3439_v47 = vmax.f32 %v2140_v28, 0.0  ;;  %3948 = vst [vmem:[%s5850_s13 + $0x240] sm:$0xff] %v3436_v57  ;;  %3950 = vst [vmem:[%s5850_s13 + $0x250] sm:$0xff] %v3438_v34 }
 0x23d   : > { %1963 = vmatmul.mubr.f32.gmra.mxu0 %v1175_v37  ;;  %2412 = vmatmul.mubr.f32.gmra.mxu1 %v1175_v37  ;;  %v1694_v17 = vpop.f32.mrf.mxu0  ;;  %v2143_v36 = vpop.f32.mrf.mxu1 }
 0x23e   : > { %1968 = vmatprep.mubr.f32.mxu0 %v7306_v22  ;;  %2417 = vmatprep.mubr.f32.mxu1 %v7306_v22  ;;  %3949 = vst [vmem:[%s5850_s13 + $0x248] sm:$0xff] %v3437_v50  ;;  %3951 = vst [vmem:[%s5850_s13 + $0x258] sm:$0xff] %v3439_v47  ;;  %v1695_v9 = vadd.f32 %v1694_v17, %v5965_v61  ;;  %v2144_v30 = vadd.f32 %v2143_v36, %v5965_v61  ;;  %v1181_v50 = vld [vmem:[#allocation2 + $0x1e8] sm:$0xff] }
 0x23f   : > { %v1696_v62 = vpop.f32.mrf.mxu0  ;;  %v2145_v29 = vpop.f32.mrf.mxu1 }
 0x240   : > { %v1697_v11 = vadd.f32 %v1696_v62, %v5965_v61  ;;  %v2146_v0 = vadd.f32 %v2145_v29, %v5965_v61  ;;  %v3444_v54 = vmax.f32 %v1695_v9, 0.0  ;;  %v3446_v23 = vmax.f32 %v2144_v30, 0.0  ;;  %v6017_v9 = vpop.permute.xlu0 %1320 }
 0x241   : > { %1969 = vmatmul.mubr.f32.gmra.mxu0 %v1176_v2  ;;  %2418 = vmatmul.mubr.f32.gmra.mxu1 %v1176_v2 }
 0x242   : > { %1974 = vmatprep.mubr.f32.mxu0 %v7306_v22  ;;  %2423 = vmatprep.mubr.f32.mxu1 %v7306_v22  ;;  %v3445_v43 = vmax.f32 %v1697_v11, 0.0  ;;  %v3447_v39 = vmax.f32 %v2146_v0, 0.0  ;;  %3956 = vst [vmem:[%s5850_s13 + $0x280] sm:$0xff] %v3444_v54  ;;  %3958 = vst [vmem:[%s5850_s13 + $0x290] sm:$0xff] %v3446_v23  ;;  %v1182_v0 = vld [vmem:[#allocation2 + $0x1f0] sm:$0xff] }
 0x243   : > { %v1700_v40 = vpop.f32.mrf.mxu0  ;;  %v2149_v24 = vpop.f32.mrf.mxu1 }
 0x244   : > { %3957 = vst [vmem:[%s5850_s13 + $0x288] sm:$0xff] %v3445_v43  ;;  %3959 = vst [vmem:[%s5850_s13 + $0x298] sm:$0xff] %v3447_v39  ;;  %v1701_v38 = vadd.f32 %v1700_v40, %v5977_v13  ;;  %v2150_v21 = vadd.f32 %v2149_v24, %v5977_v13 }
 0x245   : > { %1975 = vmatmul.mubr.f32.gmra.mxu0 %v1177_v46  ;;  %2424 = vmatmul.mubr.f32.gmra.mxu1 %v1177_v46  ;;  %v1702_v18 = vpop.f32.mrf.mxu0  ;;  %v2151_v14 = vpop.f32.mrf.mxu1 }
 0x246   : > { %1980 = vmatprep.mubr.f32.mxu0 %v7306_v22  ;;  %2429 = vmatprep.mubr.f32.mxu1 %v7306_v22  ;;  %v1703_v10 = vadd.f32 %v1702_v18, %v5977_v13  ;;  %v2152_v32 = vadd.f32 %v2151_v14, %v5977_v13  ;;  %v3452_v63 = vmax.f32 %v1701_v38, 0.0  ;;  %v3454_v1 = vmax.f32 %v2150_v21, 0.0  ;;  %v6029_v21 = vpop.permute.xlu1 %1325  ;;  %v1183_v18 = vld [vmem:[#allocation2 + $0x1f8] sm:$0xff] }
 0x248   : > { %v3453_v25 = vmax.f32 %v1703_v10, 0.0  ;;  %v3455_v8 = vmax.f32 %v2152_v32, 0.0  ;;  %3964 = vst [vmem:[%s5850_s13 + $0x2c0] sm:$0xff] %v3452_v63  ;;  %3966 = vst [vmem:[%s5850_s13 + $0x2d0] sm:$0xff] %v3454_v1 }
 0x249   : > { %1981 = vmatmul.mubr.f32.gmra.mxu0 %v1178_v26  ;;  %2430 = vmatmul.mubr.f32.gmra.mxu1 %v1178_v26  ;;  %v1706_v35 = vpop.f32.mrf.mxu0  ;;  %v2155_v27 = vpop.f32.mrf.mxu1 }
 0x24a   : > { %1986 = vmatprep.mubr.f32.mxu0 %v7306_v22  ;;  %2435 = vmatprep.mubr.f32.mxu1 %v7306_v22  ;;  %3965 = vst [vmem:[%s5850_s13 + $0x2c8] sm:$0xff] %v3453_v25  ;;  %3967 = vst [vmem:[%s5850_s13 + $0x2d8] sm:$0xff] %v3455_v8  ;;  %v1707_v16 = vadd.f32 %v1706_v35, %v5991_v5  ;;  %v2156_v19 = vadd.f32 %v2155_v27, %v5991_v5 }
 0x24b   : > { %v1708_v51 = vpop.f32.mrf.mxu0  ;;  %v2157_v52 = vpop.f32.mrf.mxu1 }
 0x24c   : > { %v1709_v55 = vadd.f32 %v1708_v51, %v5991_v5  ;;  %v2158_v56 = vadd.f32 %v2157_v52, %v5991_v5  ;;  %v3460_v58 = vmax.f32 %v1707_v16, 0.0  ;;  %v3462_v33 = vmax.f32 %v2156_v19, 0.0  ;;  %v6043_v19 = vpop.permute.xlu0 %1330 }
 0x24d   : > { %1987 = vmatmul.mubr.f32.gmra.mxu0 %v1179_v12  ;;  %2436 = vmatmul.mubr.f32.gmra.mxu1 %v1179_v12 }
 0x24e   : > { %1992 = vmatprep.mubr.f32.mxu0 %v7306_v22  ;;  %2441 = vmatprep.mubr.f32.mxu1 %v7306_v22  ;;  %v3461_v45 = vmax.f32 %v1709_v55, 0.0  ;;  %v3463_v41 = vmax.f32 %v2158_v56, 0.0  ;;  %3972 = vst [vmem:[%s5850_s13 + $0x300] sm:$0xff] %v3460_v58  ;;  %3974 = vst [vmem:[%s5850_s13 + $0x310] sm:$0xff] %v3462_v33  ;;  %v4658_v58 = vld [vmem:[#allocation2] sm:$0xff] }
 0x24f   : > { %v1712_v49 = vpop.f32.mrf.mxu0  ;;  %v2161_v37 = vpop.f32.mrf.mxu1 }
 0x250   : > { %3973 = vst [vmem:[%s5850_s13 + $0x308] sm:$0xff] %v3461_v45  ;;  %3975 = vst [vmem:[%s5850_s13 + $0x318] sm:$0xff] %v3463_v41  ;;  %v1713_v53 = vadd.f32 %v1712_v49, %v6003_v4  ;;  %v2162_v28 = vadd.f32 %v2161_v37, %v6003_v4  ;;  %v6053_v45 = vpop.permute.xlu1 %1335 }
 0x251   : > { %1993 = vmatmul.mubr.f32.gmra.mxu0 %v1180_v15  ;;  %2442 = vmatmul.mubr.f32.gmra.mxu1 %v1180_v15  ;;  %v1714_v57 = vpop.f32.mrf.mxu0  ;;  %v2163_v34 = vpop.f32.mrf.mxu1 }
 0x252   : > { %1998 = vmatprep.mubr.f32.mxu0 %v7306_v22  ;;  %2447 = vmatprep.mubr.f32.mxu1 %v7306_v22  ;;  %v1715_v47 = vadd.f32 %v1714_v57, %v6003_v4  ;;  %v2164_v17 = vadd.f32 %v2163_v34, %v6003_v4  ;;  %v3468_v36 = vmax.f32 %v1713_v53, 0.0  ;;  %v3470_v2 = vmax.f32 %v2162_v28, 0.0 }
 0x254   : > { %v3469_v30 = vmax.f32 %v1715_v47, 0.0  ;;  %v3471_v62 = vmax.f32 %v2164_v17, 0.0  ;;  %3980 = vst [vmem:[%s5850_s13 + $0x340] sm:$0xff] %v3468_v36  ;;  %3982 = vst [vmem:[%s5850_s13 + $0x350] sm:$0xff] %v3470_v2  ;;  %v4659_v47 = vld [vmem:[#allocation2 + $0x8] sm:$0xff] }
 0x255   : > { %1999 = vmatmul.mubr.f32.gmra.mxu0 %v1181_v50  ;;  %2448 = vmatmul.mubr.f32.gmra.mxu1 %v1181_v50  ;;  %v1718_v29 = vpop.f32.mrf.mxu0  ;;  %v2167_v11 = vpop.f32.mrf.mxu1 }
 0x256   : > { %2004 = vmatprep.mubr.f32.mxu0 %v7306_v22  ;;  %2453 = vmatprep.mubr.f32.mxu1 %v7306_v22  ;;  %3981 = vst [vmem:[%s5850_s13 + $0x348] sm:$0xff] %v3469_v30  ;;  %3983 = vst [vmem:[%s5850_s13 + $0x358] sm:$0xff] %v3471_v62  ;;  %v1719_v54 = vadd.f32 %v1718_v29, %v6017_v9  ;;  %v2168_v23 = vadd.f32 %v2167_v11, %v6017_v9  ;;  %v6063_v62 = vpop.permute.xlu0 %1340 }
 0x257   : > { %v1720_v46 = vpop.f32.mrf.mxu0  ;;  %v2169_v43 = vpop.f32.mrf.mxu1 }
 0x258   : > { %v1721_v39 = vadd.f32 %v1720_v46, %v6017_v9  ;;  %v2170_v40 = vadd.f32 %v2169_v43, %v6017_v9  ;;  %v3476_v24 = vmax.f32 %v1719_v54, 0.0  ;;  %v3478_v38 = vmax.f32 %v2168_v23, 0.0 }
 0x259   : > { %2005 = vmatmul.mubr.f32.gmra.mxu0 %v1182_v0  ;;  %2454 = vmatmul.mubr.f32.gmra.mxu1 %v1182_v0 }
 0x25a   : > { %2010 = vmatprep.mubr.f32.mxu0 %v7306_v22  ;;  %2459 = vmatprep.mubr.f32.mxu1 %v7306_v22  ;;  %v3477_v14 = vmax.f32 %v1721_v39, 0.0  ;;  %v3479_v26 = vmax.f32 %v2170_v40, 0.0  ;;  %3988 = vst [vmem:[%s5850_s13 + $0x380] sm:$0xff] %v3476_v24  ;;  %3990 = vst [vmem:[%s5850_s13 + $0x390] sm:$0xff] %v3478_v38  ;;  %v4660_v40 = vld [vmem:[#allocation2 + $0x10] sm:$0xff] }
 0x25b   : > { %v1724_v10 = vpop.f32.mrf.mxu0  ;;  %v2173_v32 = vpop.f32.mrf.mxu1 }
 0x25c   : > { %3989 = vst [vmem:[%s5850_s13 + $0x388] sm:$0xff] %v3477_v14  ;;  %3991 = vst [vmem:[%s5850_s13 + $0x398] sm:$0xff] %v3479_v26  ;;  %v1725_v63 = vadd.f32 %v1724_v10, %v6029_v21  ;;  %v2174_v1 = vadd.f32 %v2173_v32, %v6029_v21  ;;  %v6075_v26 = vpop.permute.xlu1 %1345 }
 0x25d   : > { %2011 = vmatmul.mubr.f32.gmra.mxu0 %v1183_v18  ;;  %2460 = vmatmul.mubr.f32.gmra.mxu1 %v1183_v18  ;;  %v1726_v25 = vpop.f32.mrf.mxu0  ;;  %v2175_v8 = vpop.f32.mrf.mxu1 }
 0x25e   : > { %2530 = vmatprep.mubr.f32.mxu0 %v7306_v22  ;;  %2979 = vmatprep.mubr.f32.mxu1 %v7306_v22  ;;  %v1727_v35 = vadd.f32 %v1726_v25, %v6029_v21  ;;  %v2176_v27 = vadd.f32 %v2175_v8, %v6029_v21  ;;  %v3484_v12 = vmax.f32 %v1725_v63, 0.0  ;;  %v3486_v16 = vmax.f32 %v2174_v1, 0.0 }
 0x260   : > { %v3485_v51 = vmax.f32 %v1727_v35, 0.0  ;;  %v3487_v52 = vmax.f32 %v2176_v27, 0.0  ;;  %3996 = vst [vmem:[%s5850_s13 + $0x3c0] sm:$0xff] %v3484_v12  ;;  %3998 = vst [vmem:[%s5850_s13 + $0x3d0] sm:$0xff] %v3486_v16  ;;  %v4661_v12 = vld [vmem:[#allocation2 + $0x18] sm:$0xff] }
 0x261   : > { %v1730_v55 = vpop.f32.mrf.mxu0  ;;  %v2179_v56 = vpop.f32.mrf.mxu1  ;;  %2531 = vmatmul.mubr.f32.vlgmr.msra.gmra.mxu0 %v4658_v58  ;;  %2980 = vmatmul.mubr.f32.vlgmr.msra.gmra.mxu1 %v4658_v58 }
 0x262   : > { %2536 = vmatprep.mubr.f32.mxu0 %v7306_v22  ;;  %2985 = vmatprep.mubr.f32.mxu1 %v7306_v22  ;;  %3997 = vst [vmem:[%s5850_s13 + $0x3c8] sm:$0xff] %v3485_v51  ;;  %3999 = vst [vmem:[%s5850_s13 + $0x3d8] sm:$0xff] %v3487_v52  ;;  %v1731_v33 = vadd.f32 %v1730_v55, %v6043_v19  ;;  %v2180_v15 = vadd.f32 %v2179_v56, %v6043_v19  ;;  %v6087_v56 = vpop.permute.xlu0 %1350 }
 0x263   : > { %v1732_v41 = vpop.f32.mrf.mxu0  ;;  %v2181_v49 = vpop.f32.mrf.mxu1 }
 0x264   : > { %v1733_v37 = vadd.f32 %v1732_v41, %v6043_v19  ;;  %v2182_v53 = vadd.f32 %v2181_v49, %v6043_v19  ;;  %v3492_v28 = vmax.f32 %v1731_v33, 0.0  ;;  %v3494_v57 = vmax.f32 %v2180_v15, 0.0 }
 0x265   : > { %v1736_v34 = vpop.f32.mrf.mxu0  ;;  %v2185_v50 = vpop.f32.mrf.mxu1  ;;  %2537 = vmatmul.mubr.f32.gmra.mxu0 %v4659_v47  ;;  %2986 = vmatmul.mubr.f32.gmra.mxu1 %v4659_v47 }
 0x266   : > { %2542 = vmatprep.mubr.f32.mxu0 %v7306_v22  ;;  %2991 = vmatprep.mubr.f32.mxu1 %v7306_v22  ;;  %v3493_v17 = vmax.f32 %v1733_v37, 0.0  ;;  %v3495_v36 = vmax.f32 %v2182_v53, 0.0  ;;  %4004 = vst [vmem:[%s5850_s13 + $0x400] sm:$0xff] %v3492_v28  ;;  %4006 = vst [vmem:[%s5850_s13 + $0x410] sm:$0xff] %v3494_v57  ;;  %v1737_v2 = vadd.f32 %v1736_v34, %v6053_v45  ;;  %v4662_v57 = vld [vmem:[#allocation2 + $0x20] sm:$0xff] }
 0x267   : > { %v2186_v30 = vadd.f32 %v2185_v50, %v6053_v45  ;;  %v1738_v29 = vpop.f32.mrf.mxu0  ;;  %v2187_v11 = vpop.f32.mrf.mxu1 }
 0x268   : > { %4005 = vst [vmem:[%s5850_s13 + $0x408] sm:$0xff] %v3493_v17  ;;  %4007 = vst [vmem:[%s5850_s13 + $0x418] sm:$0xff] %v3495_v36  ;;  %v1739_v0 = vadd.f32 %v1738_v29, %v6053_v45  ;;  %v2188_v54 = vadd.f32 %v2187_v11, %v6053_v45  ;;  %v3500_v23 = vmax.f32 %v1737_v2, 0.0  ;;  %v6099_v36 = vpop.permute.xlu1 %1355 }
 0x269   : > { %v3502_v46 = vmax.f32 %v2186_v30, 0.0  ;;  %v1742_v43 = vpop.f32.mrf.mxu0  ;;  %v2191_v39 = vpop.f32.mrf.mxu1  ;;  %2543 = vmatmul.mubr.f32.gmra.mxu0 %v4660_v40  ;;  %2992 = vmatmul.mubr.f32.gmra.mxu1 %v4660_v40 }
 0x26a   : > { %2548 = vmatprep.mubr.f32.mxu0 %v7306_v22  ;;  %2997 = vmatprep.mubr.f32.mxu1 %v7306_v22  ;;  %v3501_v24 = vmax.f32 %v1739_v0, 0.0  ;;  %v3503_v38 = vmax.f32 %v2188_v54, 0.0  ;;  %4012 = vst [vmem:[%s5850_s13 + $0x440] sm:$0xff] %v3500_v23  ;;  %v1743_v18 = vadd.f32 %v1742_v43, %v6063_v62  ;;  %v2192_v14 = vadd.f32 %v2191_v39, %v6063_v62  ;;  %v4663_v43 = vld [vmem:[#allocation2 + $0x28] sm:$0xff] }
 0x26b   : > { %4014 = vst [vmem:[%s5850_s13 + $0x450] sm:$0xff] %v3502_v46  ;;  %v1744_v10 = vpop.f32.mrf.mxu0  ;;  %v2193_v32 = vpop.f32.mrf.mxu1 }
 0x26c   : > { %4013 = vst [vmem:[%s5850_s13 + $0x448] sm:$0xff] %v3501_v24  ;;  %4015 = vst [vmem:[%s5850_s13 + $0x458] sm:$0xff] %v3503_v38  ;;  %v1745_v63 = vadd.f32 %v1744_v10, %v6063_v62  ;;  %v2194_v1 = vadd.f32 %v2193_v32, %v6063_v62  ;;  %v3508_v25 = vmax.f32 %v1743_v18, 0.0  ;;  %v3510_v8 = vmax.f32 %v2192_v14, 0.0  ;;  %v6111_v18 = vpop.permute.xlu0 %1360 }
 0x26d   : > { %v1748_v35 = vpop.f32.mrf.mxu0  ;;  %v2197_v27 = vpop.f32.mrf.mxu1  ;;  %2549 = vmatmul.mubr.f32.gmra.mxu0 %v4661_v12  ;;  %2998 = vmatmul.mubr.f32.gmra.mxu1 %v4661_v12 }
 0x26e   : > { %2554 = vmatprep.mubr.f32.mxu0 %v7306_v22  ;;  %3003 = vmatprep.mubr.f32.mxu1 %v7306_v22  ;;  %v3509_v16 = vmax.f32 %v1745_v63, 0.0  ;;  %v3511_v51 = vmax.f32 %v2194_v1, 0.0  ;;  %4020 = vst [vmem:[%s5850_s13 + $0x480] sm:$0xff] %v3508_v25  ;;  %4022 = vst [vmem:[%s5850_s13 + $0x490] sm:$0xff] %v3510_v8  ;;  %v1749_v52 = vadd.f32 %v1748_v35, %v6075_v26 }
 0x26f   : > { %v2198_v55 = vadd.f32 %v2197_v27, %v6075_v26  ;;  %v1750_v58 = vpop.f32.mrf.mxu0  ;;  %v2199_v33 = vpop.f32.mrf.mxu1  ;;  %v4664_v27 = vld [vmem:[#allocation2 + $0x30] sm:$0xff] }
 0x270   : > { %4021 = vst [vmem:[%s5850_s13 + $0x488] sm:$0xff] %v3509_v16  ;;  %4023 = vst [vmem:[%s5850_s13 + $0x498] sm:$0xff] %v3511_v51  ;;  %v1751_v15 = vadd.f32 %v1750_v58, %v6075_v26  ;;  %v2200_v41 = vadd.f32 %v2199_v33, %v6075_v26  ;;  %v3516_v49 = vmax.f32 %v1749_v52, 0.0 }
 0x271   : > { %v3518_v37 = vmax.f32 %v2198_v55, 0.0  ;;  %v1754_v53 = vpop.f32.mrf.mxu0  ;;  %v2203_v28 = vpop.f32.mrf.mxu1  ;;  %2555 = vmatmul.mubr.f32.gmra.mxu0 %v4662_v57  ;;  %3004 = vmatmul.mubr.f32.gmra.mxu1 %v4662_v57  ;;  %v4665_v57 = vld [vmem:[#allocation2 + $0x38] sm:$0xff] }
 0x272   : > { %2560 = vmatprep.mubr.f32.mxu0 %v7306_v22  ;;  %3009 = vmatprep.mubr.f32.mxu1 %v7306_v22  ;;  %v3517_v34 = vmax.f32 %v1751_v15, 0.0  ;;  %v3519_v50 = vmax.f32 %v2200_v41, 0.0  ;;  %4028 = vst [vmem:[%s5850_s13 + $0x4c0] sm:$0xff] %v3516_v49  ;;  %v1755_v47 = vadd.f32 %v1754_v53, %v6087_v56  ;;  %v2204_v17 = vadd.f32 %v2203_v28, %v6087_v56  ;;  %v6123_v55 = vpop.permute.xlu1 %1365 }
 0x273   : > { %4030 = vst [vmem:[%s5850_s13 + $0x4d0] sm:$0xff] %v3518_v37  ;;  %v1756_v2 = vpop.f32.mrf.mxu0  ;;  %v2205_v30 = vpop.f32.mrf.mxu1 }
 0x274   : > { %4029 = vst [vmem:[%s5850_s13 + $0x4c8] sm:$0xff] %v3517_v34  ;;  %4031 = vst [vmem:[%s5850_s13 + $0x4d8] sm:$0xff] %v3519_v50  ;;  %v1757_v29 = vadd.f32 %v1756_v2, %v6087_v56  ;;  %v2206_v11 = vadd.f32 %v2205_v30, %v6087_v56  ;;  %v3524_v0 = vmax.f32 %v1755_v47, 0.0  ;;  %v3526_v54 = vmax.f32 %v2204_v17, 0.0  ;;  %v6135_v2 = vpop.permute.xlu0 %1370 }
 0x275   : > { %v1760_v23 = vpop.f32.mrf.mxu0  ;;  %v2209_v46 = vpop.f32.mrf.mxu1  ;;  %2561 = vmatmul.mubr.f32.gmra.mxu0 %v4663_v43  ;;  %3010 = vmatmul.mubr.f32.gmra.mxu1 %v4663_v43 }
 0x276   : > { %2566 = vmatprep.mubr.f32.mxu0 %v7306_v22  ;;  %3015 = vmatprep.mubr.f32.mxu1 %v7306_v22  ;;  %v3525_v39 = vmax.f32 %v1757_v29, 0.0  ;;  %v3527_v40 = vmax.f32 %v2206_v11, 0.0  ;;  %4036 = vst [vmem:[%s5850_s13 + $0x500] sm:$0xff] %v3524_v0  ;;  %4038 = vst [vmem:[%s5850_s13 + $0x510] sm:$0xff] %v3526_v54  ;;  %v1761_v24 = vadd.f32 %v1760_v23, %v6099_v36 }
 0x277   : > { %v2210_v38 = vadd.f32 %v2209_v46, %v6099_v36  ;;  %v1762_v14 = vpop.f32.mrf.mxu0  ;;  %v2211_v10 = vpop.f32.mrf.mxu1 }
 0x278   : > { %4037 = vst [vmem:[%s5850_s13 + $0x508] sm:$0xff] %v3525_v39  ;;  %4039 = vst [vmem:[%s5850_s13 + $0x518] sm:$0xff] %v3527_v40  ;;  %v1763_v32 = vadd.f32 %v1762_v14, %v6099_v36  ;;  %v2212_v63 = vadd.f32 %v2211_v10, %v6099_v36  ;;  %v3532_v1 = vmax.f32 %v1761_v24, 0.0  ;;  %v4666_v39 = vld [vmem:[#allocation2 + $0x40] sm:$0xff]  ;;  %v6147_v10 = vpop.permute.xlu1 %1375 }
 0x279   : > { %v3534_v25 = vmax.f32 %v2210_v38, 0.0  ;;  %v1766_v8 = vpop.f32.mrf.mxu0  ;;  %v2215_v35 = vpop.f32.mrf.mxu1  ;;  %2567 = vmatmul.mubr.f32.gmra.mxu0 %v4664_v27  ;;  %3016 = vmatmul.mubr.f32.gmra.mxu1 %v4664_v27 }
 0x27a   : > { %2572 = vmatprep.mubr.f32.mxu0 %v7306_v22  ;;  %3021 = vmatprep.mubr.f32.mxu1 %v7306_v22  ;;  %v3533_v12 = vmax.f32 %v1763_v32, 0.0  ;;  %v3535_v16 = vmax.f32 %v2212_v63, 0.0  ;;  %4044 = vst [vmem:[%s5850_s13 + $0x540] sm:$0xff] %v3532_v1  ;;  %v1767_v51 = vadd.f32 %v1766_v8, %v6111_v18  ;;  %v2216_v52 = vadd.f32 %v2215_v35, %v6111_v18 }
 0x27b   : > { %4046 = vst [vmem:[%s5850_s13 + $0x550] sm:$0xff] %v3534_v25  ;;  %v1768_v58 = vpop.f32.mrf.mxu0  ;;  %v2217_v33 = vpop.f32.mrf.mxu1 }
 0x27c   : > { %4045 = vst [vmem:[%s5850_s13 + $0x548] sm:$0xff] %v3533_v12  ;;  %4047 = vst [vmem:[%s5850_s13 + $0x558] sm:$0xff] %v3535_v16  ;;  %v1769_v15 = vadd.f32 %v1768_v58, %v6111_v18  ;;  %v2218_v41 = vadd.f32 %v2217_v33, %v6111_v18  ;;  %v3540_v49 = vmax.f32 %v1767_v51, 0.0  ;;  %v3542_v37 = vmax.f32 %v2216_v52, 0.0  ;;  %v4667_v16 = vld [vmem:[#allocation2 + $0x48] sm:$0xff] }
 0x27d   : > { %v1772_v53 = vpop.f32.mrf.mxu0  ;;  %v2221_v28 = vpop.f32.mrf.mxu1  ;;  %2573 = vmatmul.mubr.f32.gmra.mxu0 %v4665_v57  ;;  %3022 = vmatmul.mubr.f32.gmra.mxu1 %v4665_v57 }
 0x27e   : > { %2578 = vmatprep.mubr.f32.mxu0 %v7306_v22  ;;  %3027 = vmatprep.mubr.f32.mxu1 %v7306_v22  ;;  %v3541_v34 = vmax.f32 %v1769_v15, 0.0  ;;  %v3543_v50 = vmax.f32 %v2218_v41, 0.0  ;;  %4052 = vst [vmem:[%s5850_s13 + $0x580] sm:$0xff] %v3540_v49  ;;  %4054 = vst [vmem:[%s5850_s13 + $0x590] sm:$0xff] %v3542_v37  ;;  %v1773_v47 = vadd.f32 %v1772_v53, %v6123_v55  ;;  %v6159_v15 = vpop.permute.xlu0 %1380 }
 0x27f   : > { %v2222_v17 = vadd.f32 %v2221_v28, %v6123_v55  ;;  %v1774_v30 = vpop.f32.mrf.mxu0  ;;  %v2223_v29 = vpop.f32.mrf.mxu1 }
 0x280   : > { %4053 = vst [vmem:[%s5850_s13 + $0x588] sm:$0xff] %v3541_v34  ;;  %4055 = vst [vmem:[%s5850_s13 + $0x598] sm:$0xff] %v3543_v50  ;;  %v1775_v11 = vadd.f32 %v1774_v30, %v6123_v55  ;;  %v2224_v0 = vadd.f32 %v2223_v29, %v6123_v55  ;;  %v3548_v54 = vmax.f32 %v1773_v47, 0.0  ;;  %v4668_v47 = vld [vmem:[#allocation2 + $0x50] sm:$0xff] }
 0x281   : > { %v3550_v23 = vmax.f32 %v2222_v17, 0.0  ;;  %v1778_v46 = vpop.f32.mrf.mxu0  ;;  %v2227_v43 = vpop.f32.mrf.mxu1  ;;  %2579 = vmatmul.mubr.f32.gmra.mxu0 %v4666_v39  ;;  %3028 = vmatmul.mubr.f32.gmra.mxu1 %v4666_v39 }
 0x282   : > { %2584 = vmatprep.mubr.f32.mxu0 %v7306_v22  ;;  %3033 = vmatprep.mubr.f32.mxu1 %v7306_v22  ;;  %v3549_v40 = vmax.f32 %v1775_v11, 0.0  ;;  %v3551_v24 = vmax.f32 %v2224_v0, 0.0  ;;  %4060 = vst [vmem:[%s5850_s13 + $0x5c0] sm:$0xff] %v3548_v54  ;;  %v1779_v38 = vadd.f32 %v1778_v46, %v6135_v2  ;;  %v2228_v14 = vadd.f32 %v2227_v43, %v6135_v2  ;;  %v6171_v0 = vpop.permute.xlu1 %1385 }
 0x283   : > { %4062 = vst [vmem:[%s5850_s13 + $0x5d0] sm:$0xff] %v3550_v23  ;;  %v1780_v32 = vpop.f32.mrf.mxu0  ;;  %v2229_v63 = vpop.f32.mrf.mxu1 }
 0x284   : > { %4061 = vst [vmem:[%s5850_s13 + $0x5c8] sm:$0xff] %v3549_v40  ;;  %4063 = vst [vmem:[%s5850_s13 + $0x5d8] sm:$0xff] %v3551_v24  ;;  %v1781_v1 = vadd.f32 %v1780_v32, %v6135_v2  ;;  %v2230_v25 = vadd.f32 %v2229_v63, %v6135_v2  ;;  %v3556_v8 = vmax.f32 %v1779_v38, 0.0  ;;  %v3558_v35 = vmax.f32 %v2228_v14, 0.0  ;;  %v4669_v14 = vld [vmem:[#allocation2 + $0x58] sm:$0xff] }
 0x285   : > { %v1784_v27 = vpop.f32.mrf.mxu0  ;;  %v2233_v12 = vpop.f32.mrf.mxu1  ;;  %2585 = vmatmul.mubr.f32.gmra.mxu0 %v4667_v16  ;;  %3034 = vmatmul.mubr.f32.gmra.mxu1 %v4667_v16 }
 0x286   : > { %2590 = vmatprep.mubr.f32.mxu0 %v7306_v22  ;;  %3039 = vmatprep.mubr.f32.mxu1 %v7306_v22  ;;  %v3557_v51 = vmax.f32 %v1781_v1, 0.0  ;;  %v3559_v52 = vmax.f32 %v2230_v25, 0.0  ;;  %4068 = vst [vmem:[%s5850_s13 + $0x600] sm:$0xff] %v3556_v8  ;;  %4070 = vst [vmem:[%s5850_s13 + $0x610] sm:$0xff] %v3558_v35  ;;  %v1785_v58 = vadd.f32 %v1784_v27, %v6147_v10  ;;  %v6183_v8 = vpop.permute.xlu0 %1390 }
 0x287   : > { %v2234_v33 = vadd.f32 %v2233_v12, %v6147_v10  ;;  %v1786_v41 = vpop.f32.mrf.mxu0  ;;  %v2235_v49 = vpop.f32.mrf.mxu1 }
 0x288   : > { %4069 = vst [vmem:[%s5850_s13 + $0x608] sm:$0xff] %v3557_v51  ;;  %4071 = vst [vmem:[%s5850_s13 + $0x618] sm:$0xff] %v3559_v52  ;;  %v1787_v37 = vadd.f32 %v1786_v41, %v6147_v10  ;;  %v2236_v53 = vadd.f32 %v2235_v49, %v6147_v10  ;;  %v3564_v28 = vmax.f32 %v1785_v58, 0.0  ;;  %v4670_v41 = vld [vmem:[#allocation2 + $0x60] sm:$0xff] }
 0x289   : > { %v3566_v57 = vmax.f32 %v2234_v33, 0.0  ;;  %v1790_v34 = vpop.f32.mrf.mxu0  ;;  %v2239_v50 = vpop.f32.mrf.mxu1  ;;  %2591 = vmatmul.mubr.f32.gmra.mxu0 %v4668_v47  ;;  %3040 = vmatmul.mubr.f32.gmra.mxu1 %v4668_v47 }
 0x28a   : > { %2596 = vmatprep.mubr.f32.mxu0 %v7306_v22  ;;  %3045 = vmatprep.mubr.f32.mxu1 %v7306_v22  ;;  %v3565_v17 = vmax.f32 %v1787_v37, 0.0  ;;  %v3567_v30 = vmax.f32 %v2236_v53, 0.0  ;;  %4076 = vst [vmem:[%s5850_s13 + $0x640] sm:$0xff] %v3564_v28  ;;  %v1791_v29 = vadd.f32 %v1790_v34, %v6159_v15  ;;  %v2240_v11 = vadd.f32 %v2239_v50, %v6159_v15 }
 0x28b   : > { %4078 = vst [vmem:[%s5850_s13 + $0x650] sm:$0xff] %v3566_v57  ;;  %v1792_v54 = vpop.f32.mrf.mxu0  ;;  %v2241_v23 = vpop.f32.mrf.mxu1 }
 0x28c   : > { %4077 = vst [vmem:[%s5850_s13 + $0x648] sm:$0xff] %v3565_v17  ;;  %4079 = vst [vmem:[%s5850_s13 + $0x658] sm:$0xff] %v3567_v30  ;;  %v1793_v46 = vadd.f32 %v1792_v54, %v6159_v15  ;;  %v2242_v43 = vadd.f32 %v2241_v23, %v6159_v15  ;;  %v3572_v39 = vmax.f32 %v1791_v29, 0.0  ;;  %v3574_v40 = vmax.f32 %v2240_v11, 0.0  ;;  %v6195_v57 = vpop.permute.xlu1 %1395  ;;  %v4671_v23 = vld [vmem:[#allocation2 + $0x68] sm:$0xff] }
 0x28d   : > { %v1796_v24 = vpop.f32.mrf.mxu0  ;;  %v2245_v38 = vpop.f32.mrf.mxu1  ;;  %2597 = vmatmul.mubr.f32.gmra.mxu0 %v4669_v14  ;;  %3046 = vmatmul.mubr.f32.gmra.mxu1 %v4669_v14 }
 0x28e   : > { %2602 = vmatprep.mubr.f32.mxu0 %v7306_v22  ;;  %3051 = vmatprep.mubr.f32.mxu1 %v7306_v22  ;;  %v3573_v32 = vmax.f32 %v1793_v46, 0.0  ;;  %v3575_v63 = vmax.f32 %v2242_v43, 0.0  ;;  %4084 = vst [vmem:[%s5850_s13 + $0x680] sm:$0xff] %v3572_v39  ;;  %4086 = vst [vmem:[%s5850_s13 + $0x690] sm:$0xff] %v3574_v40  ;;  %v1797_v1 = vadd.f32 %v1796_v24, %v6171_v0  ;;  %v6207_v24 = vpop.permute.xlu0 %1400 }
 0x28f   : > { %v2246_v25 = vadd.f32 %v2245_v38, %v6171_v0  ;;  %v1798_v35 = vpop.f32.mrf.mxu0  ;;  %v2247_v27 = vpop.f32.mrf.mxu1 }
 0x290   : > { %4085 = vst [vmem:[%s5850_s13 + $0x688] sm:$0xff] %v3573_v32  ;;  %4087 = vst [vmem:[%s5850_s13 + $0x698] sm:$0xff] %v3575_v63  ;;  %v1799_v12 = vadd.f32 %v1798_v35, %v6171_v0  ;;  %v2248_v16 = vadd.f32 %v2247_v27, %v6171_v0  ;;  %v3580_v51 = vmax.f32 %v1797_v1, 0.0 }
 0x291   : > { %v3582_v52 = vmax.f32 %v2246_v25, 0.0  ;;  %v1802_v58 = vpop.f32.mrf.mxu0  ;;  %v2251_v33 = vpop.f32.mrf.mxu1  ;;  %2603 = vmatmul.mubr.f32.gmra.mxu0 %v4670_v41  ;;  %3052 = vmatmul.mubr.f32.gmra.mxu1 %v4670_v41 }
 0x292   : > { %2608 = vmatprep.mubr.f32.mxu0 %v7306_v22  ;;  %3057 = vmatprep.mubr.f32.mxu1 %v7306_v22  ;;  %v3581_v49 = vmax.f32 %v1799_v12, 0.0  ;;  %v3583_v37 = vmax.f32 %v2248_v16, 0.0  ;;  %4092 = vst [vmem:[%s5850_s13 + $0x6c0] sm:$0xff] %v3580_v51  ;;  %v1803_v53 = vadd.f32 %v1802_v58, %v6183_v8  ;;  %v2252_v28 = vadd.f32 %v2251_v33, %v6183_v8  ;;  %v4672_v12 = vld [vmem:[#allocation2 + $0x70] sm:$0xff]  ;;  %v6219_v33 = vpop.permute.xlu1 %1405 }
 0x293   : > { %4094 = vst [vmem:[%s5850_s13 + $0x6d0] sm:$0xff] %v3582_v52  ;;  %v1804_v34 = vpop.f32.mrf.mxu0  ;;  %v2253_v50 = vpop.f32.mrf.mxu1 }
 0x294   : > { %4093 = vst [vmem:[%s5850_s13 + $0x6c8] sm:$0xff] %v3581_v49  ;;  %4095 = vst [vmem:[%s5850_s13 + $0x6d8] sm:$0xff] %v3583_v37  ;;  %v1805_v47 = vadd.f32 %v1804_v34, %v6183_v8  ;;  %v2254_v17 = vadd.f32 %v2253_v50, %v6183_v8  ;;  %v3588_v30 = vmax.f32 %v1803_v53, 0.0  ;;  %v3590_v29 = vmax.f32 %v2252_v28, 0.0 }
 0x295   : > { %v1808_v11 = vpop.f32.mrf.mxu0  ;;  %v2257_v54 = vpop.f32.mrf.mxu1  ;;  %2609 = vmatmul.mubr.f32.gmra.mxu0 %v4671_v23  ;;  %3058 = vmatmul.mubr.f32.gmra.mxu1 %v4671_v23 }
 0x296   : > { %2614 = vmatprep.mubr.f32.mxu0 %v7306_v22  ;;  %3063 = vmatprep.mubr.f32.mxu1 %v7306_v22  ;;  %v3589_v46 = vmax.f32 %v1805_v47, 0.0  ;;  %v3591_v43 = vmax.f32 %v2254_v17, 0.0  ;;  %4100 = vst [vmem:[%s5850_s13 + $0x700] sm:$0xff] %v3588_v30  ;;  %4102 = vst [vmem:[%s5850_s13 + $0x710] sm:$0xff] %v3590_v29  ;;  %v1809_v39 = vadd.f32 %v1808_v11, %v6195_v57  ;;  %v4673_v17 = vld [vmem:[#allocation2 + $0x78] sm:$0xff]  ;;  %v6231_v23 = vpop.permute.xlu0 %1410 }
 0x297   : > { %v2258_v40 = vadd.f32 %v2257_v54, %v6195_v57  ;;  %v1810_v38 = vpop.f32.mrf.mxu0  ;;  %v2259_v14 = vpop.f32.mrf.mxu1 }
 0x298   : > { %4101 = vst [vmem:[%s5850_s13 + $0x708] sm:$0xff] %v3589_v46  ;;  %4103 = vst [vmem:[%s5850_s13 + $0x718] sm:$0xff] %v3591_v43  ;;  %v1811_v32 = vadd.f32 %v1810_v38, %v6195_v57  ;;  %v2260_v63 = vadd.f32 %v2259_v14, %v6195_v57  ;;  %v3596_v1 = vmax.f32 %v1809_v39, 0.0 }
 0x299   : > { %v3598_v25 = vmax.f32 %v2258_v40, 0.0  ;;  %v1814_v35 = vpop.f32.mrf.mxu0  ;;  %v2263_v27 = vpop.f32.mrf.mxu1  ;;  %2615 = vmatmul.mubr.f32.gmra.mxu0 %v4672_v12  ;;  %3064 = vmatmul.mubr.f32.gmra.mxu1 %v4672_v12 }
 0x29a   : > { %2620 = vmatprep.mubr.f32.mxu0 %v7306_v22  ;;  %3069 = vmatprep.mubr.f32.mxu1 %v7306_v22  ;;  %v3597_v16 = vmax.f32 %v1811_v32, 0.0  ;;  %v3599_v51 = vmax.f32 %v2260_v63, 0.0  ;;  %4108 = vst [vmem:[%s5850_s13 + $0x740] sm:$0xff] %v3596_v1  ;;  %v1815_v52 = vadd.f32 %v1814_v35, %v6207_v24  ;;  %v2264_v58 = vadd.f32 %v2263_v27, %v6207_v24  ;;  %v4674_v1 = vld [vmem:[#allocation2 + $0x80] sm:$0xff] }
 0x29b   : > { %4110 = vst [vmem:[%s5850_s13 + $0x750] sm:$0xff] %v3598_v25  ;;  %v1816_v41 = vpop.f32.mrf.mxu0  ;;  %v2265_v49 = vpop.f32.mrf.mxu1 }
 0x29c   : > { %4109 = vst [vmem:[%s5850_s13 + $0x748] sm:$0xff] %v3597_v16  ;;  %4111 = vst [vmem:[%s5850_s13 + $0x758] sm:$0xff] %v3599_v51  ;;  %v1817_v37 = vadd.f32 %v1816_v41, %v6207_v24  ;;  %v2266_v53 = vadd.f32 %v2265_v49, %v6207_v24  ;;  %v3604_v28 = vmax.f32 %v1815_v52, 0.0  ;;  %v3606_v34 = vmax.f32 %v2264_v58, 0.0  ;;  %v6243_v16 = vpop.permute.xlu1 %1415 }
 0x29d   : > { %v1820_v50 = vpop.f32.mrf.mxu0  ;;  %v2269_v47 = vpop.f32.mrf.mxu1  ;;  %2621 = vmatmul.mubr.f32.gmra.mxu0 %v4673_v17  ;;  %3070 = vmatmul.mubr.f32.gmra.mxu1 %v4673_v17 }
 0x29e   : > { %2626 = vmatprep.mubr.f32.mxu0 %v7306_v22  ;;  %3075 = vmatprep.mubr.f32.mxu1 %v7306_v22  ;;  %v3605_v30 = vmax.f32 %v1817_v37, 0.0  ;;  %v3607_v29 = vmax.f32 %v2266_v53, 0.0  ;;  %4116 = vst [vmem:[%s5850_s13 + $0x780] sm:$0xff] %v3604_v28  ;;  %4118 = vst [vmem:[%s5850_s13 + $0x790] sm:$0xff] %v3606_v34  ;;  %v1821_v11 = vadd.f32 %v1820_v50, %v6219_v33  ;;  %v4675_v34 = vld [vmem:[#allocation2 + $0x88] sm:$0xff] }
 0x29f   : > { %v2270_v54 = vadd.f32 %v2269_v47, %v6219_v33  ;;  %v1822_v46 = vpop.f32.mrf.mxu0  ;;  %v2271_v43 = vpop.f32.mrf.mxu1 }
 0x2a0   : > { %4117 = vst [vmem:[%s5850_s13 + $0x788] sm:$0xff] %v3605_v30  ;;  %4119 = vst [vmem:[%s5850_s13 + $0x798] sm:$0xff] %v3607_v29  ;;  %v1823_v39 = vadd.f32 %v1822_v46, %v6219_v33  ;;  %v2272_v40 = vadd.f32 %v2271_v43, %v6219_v33  ;;  %v3612_v38 = vmax.f32 %v1821_v11, 0.0  ;;  %v6255_v29 = vpop.permute.xlu0 %1420 }
 0x2a1   : > { %v3614_v14 = vmax.f32 %v2270_v54, 0.0  ;;  %v1826_v32 = vpop.f32.mrf.mxu0  ;;  %v2275_v63 = vpop.f32.mrf.mxu1  ;;  %2627 = vmatmul.mubr.f32.gmra.mxu0 %v4674_v1  ;;  %3076 = vmatmul.mubr.f32.gmra.mxu1 %v4674_v1 }
 0x2a2   : > { %2632 = vmatprep.mubr.f32.mxu0 %v7306_v22  ;;  %3081 = vmatprep.mubr.f32.mxu1 %v7306_v22  ;;  %v3613_v25 = vmax.f32 %v1823_v39, 0.0  ;;  %v3615_v35 = vmax.f32 %v2272_v40, 0.0  ;;  %4124 = vst [vmem:[%s5850_s13 + $0x7c0] sm:$0xff] %v3612_v38  ;;  %v1827_v27 = vadd.f32 %v1826_v32, %v6231_v23  ;;  %v2276_v12 = vadd.f32 %v2275_v63, %v6231_v23  ;;  %v4676_v32 = vld [vmem:[#allocation2 + $0x90] sm:$0xff] }
 0x2a3   : > { %4126 = vst [vmem:[%s5850_s13 + $0x7d0] sm:$0xff] %v3614_v14  ;;  %v1828_v51 = vpop.f32.mrf.mxu0  ;;  %v2277_v52 = vpop.f32.mrf.mxu1 }
 0x2a4   : > { %4125 = vst [vmem:[%s5850_s13 + $0x7c8] sm:$0xff] %v3613_v25  ;;  %4127 = vst [vmem:[%s5850_s13 + $0x7d8] sm:$0xff] %v3615_v35  ;;  %v1829_v58 = vadd.f32 %v1828_v51, %v6231_v23  ;;  %v2278_v41 = vadd.f32 %v2277_v52, %v6231_v23  ;;  %v3620_v49 = vmax.f32 %v1827_v27, 0.0  ;;  %v3622_v37 = vmax.f32 %v2276_v12, 0.0  ;;  %v6267_v27 = vpop.permute.xlu1 %1425 }
 0x2a5   : > { %v1832_v53 = vpop.f32.mrf.mxu0  ;;  %v2281_v28 = vpop.f32.mrf.mxu1  ;;  %2633 = vmatmul.mubr.f32.gmra.mxu0 %v4675_v34  ;;  %3082 = vmatmul.mubr.f32.gmra.mxu1 %v4675_v34 }
 0x2a6   : > { %2638 = vmatprep.mubr.f32.mxu0 %v7306_v22  ;;  %3087 = vmatprep.mubr.f32.mxu1 %v7306_v22  ;;  %v3621_v50 = vmax.f32 %v1829_v58, 0.0  ;;  %v3623_v47 = vmax.f32 %v2278_v41, 0.0  ;;  %4132 = vst [vmem:[%s5850_s13 + $0x800] sm:$0xff] %v3620_v49  ;;  %4134 = vst [vmem:[%s5850_s13 + $0x810] sm:$0xff] %v3622_v37  ;;  %v1833_v17 = vadd.f32 %v1832_v53, %v6243_v16 }
 0x2a7   : > { %v2282_v30 = vadd.f32 %v2281_v28, %v6243_v16  ;;  %v1834_v11 = vpop.f32.mrf.mxu0  ;;  %v2283_v54 = vpop.f32.mrf.mxu1  ;;  %v4677_v28 = vld [vmem:[#allocation2 + $0x98] sm:$0xff] }
 0x2a8   : > { %4133 = vst [vmem:[%s5850_s13 + $0x808] sm:$0xff] %v3621_v50  ;;  %4135 = vst [vmem:[%s5850_s13 + $0x818] sm:$0xff] %v3623_v47  ;;  %v1835_v46 = vadd.f32 %v1834_v11, %v6243_v16  ;;  %v2284_v43 = vadd.f32 %v2283_v54, %v6243_v16  ;;  %v3628_v39 = vmax.f32 %v1833_v17, 0.0 }
 0x2a9   : > { %v3630_v40 = vmax.f32 %v2282_v30, 0.0  ;;  %v1838_v38 = vpop.f32.mrf.mxu0  ;;  %v2287_v14 = vpop.f32.mrf.mxu1  ;;  %2639 = vmatmul.mubr.f32.gmra.mxu0 %v4676_v32  ;;  %3088 = vmatmul.mubr.f32.gmra.mxu1 %v4676_v32  ;;  %v4678_v32 = vld [vmem:[#allocation2 + $0xa0] sm:$0xff] }
 0x2aa   : > { %2644 = vmatprep.mubr.f32.mxu0 %v7306_v22  ;;  %3093 = vmatprep.mubr.f32.mxu1 %v7306_v22  ;;  %v3629_v63 = vmax.f32 %v1835_v46, 0.0  ;;  %v3631_v1 = vmax.f32 %v2284_v43, 0.0  ;;  %4140 = vst [vmem:[%s5850_s13 + $0x840] sm:$0xff] %v3628_v39  ;;  %v1839_v25 = vadd.f32 %v1838_v38, %v6255_v29  ;;  %v2288_v35 = vadd.f32 %v2287_v14, %v6255_v29  ;;  %v6279_v30 = vpop.permute.xlu0 %1430 }
 0x2ab   : > { %4142 = vst [vmem:[%s5850_s13 + $0x850] sm:$0xff] %v3630_v40  ;;  %v1840_v12 = vpop.f32.mrf.mxu0  ;;  %v2289_v51 = vpop.f32.mrf.mxu1 }
 0x2ac   : > { %4141 = vst [vmem:[%s5850_s13 + $0x848] sm:$0xff] %v3629_v63  ;;  %4143 = vst [vmem:[%s5850_s13 + $0x858] sm:$0xff] %v3631_v1  ;;  %v1841_v52 = vadd.f32 %v1840_v12, %v6255_v29  ;;  %v2290_v58 = vadd.f32 %v2289_v51, %v6255_v29  ;;  %v3636_v41 = vmax.f32 %v1839_v25, 0.0  ;;  %v3638_v49 = vmax.f32 %v2288_v35, 0.0  ;;  %v6291_v12 = vpop.permute.xlu1 %1435 }
 0x2ad   : > { %v1844_v37 = vpop.f32.mrf.mxu0  ;;  %v2293_v53 = vpop.f32.mrf.mxu1  ;;  %2645 = vmatmul.mubr.f32.gmra.mxu0 %v4677_v28  ;;  %3094 = vmatmul.mubr.f32.gmra.mxu1 %v4677_v28 }
 0x2ae   : > { %2650 = vmatprep.mubr.f32.mxu0 %v7306_v22  ;;  %3099 = vmatprep.mubr.f32.mxu1 %v7306_v22  ;;  %v3637_v34 = vmax.f32 %v1841_v52, 0.0  ;;  %v3639_v50 = vmax.f32 %v2290_v58, 0.0  ;;  %4148 = vst [vmem:[%s5850_s13 + $0x880] sm:$0xff] %v3636_v41  ;;  %4150 = vst [vmem:[%s5850_s13 + $0x890] sm:$0xff] %v3638_v49  ;;  %v1845_v47 = vadd.f32 %v1844_v37, %v6267_v27 }
 0x2af   : > { %v2294_v17 = vadd.f32 %v2293_v53, %v6267_v27  ;;  %v1846_v11 = vpop.f32.mrf.mxu0  ;;  %v2295_v54 = vpop.f32.mrf.mxu1 }
 0x2b0   : > { %4149 = vst [vmem:[%s5850_s13 + $0x888] sm:$0xff] %v3637_v34  ;;  %4151 = vst [vmem:[%s5850_s13 + $0x898] sm:$0xff] %v3639_v50  ;;  %v1847_v46 = vadd.f32 %v1846_v11, %v6267_v27  ;;  %v2296_v43 = vadd.f32 %v2295_v54, %v6267_v27  ;;  %v3644_v39 = vmax.f32 %v1845_v47, 0.0  ;;  %v4679_v34 = vld [vmem:[#allocation2 + $0xa8] sm:$0xff]  ;;  %v6303_v54 = vpop.permute.xlu0 %1440 }
 0x2b1   : > { %v3646_v40 = vmax.f32 %v2294_v17, 0.0  ;;  %v1850_v38 = vpop.f32.mrf.mxu0  ;;  %v2299_v14 = vpop.f32.mrf.mxu1  ;;  %2651 = vmatmul.mubr.f32.gmra.mxu0 %v4678_v32  ;;  %3100 = vmatmul.mubr.f32.gmra.mxu1 %v4678_v32 }
 0x2b2   : > { %2656 = vmatprep.mubr.f32.mxu0 %v7306_v22  ;;  %3105 = vmatprep.mubr.f32.mxu1 %v7306_v22  ;;  %v3645_v63 = vmax.f32 %v1847_v46, 0.0  ;;  %v3647_v1 = vmax.f32 %v2296_v43, 0.0  ;;  %4156 = vst [vmem:[%s5850_s13 + $0x8c0] sm:$0xff] %v3644_v39  ;;  %v1851_v25 = vadd.f32 %v1850_v38, %v6279_v30  ;;  %v2300_v35 = vadd.f32 %v2299_v14, %v6279_v30 }
 0x2b3   : > { %4158 = vst [vmem:[%s5850_s13 + $0x8d0] sm:$0xff] %v3646_v40  ;;  %v1852_v51 = vpop.f32.mrf.mxu0  ;;  %v2301_v52 = vpop.f32.mrf.mxu1 }
 0x2b4   : > { %4157 = vst [vmem:[%s5850_s13 + $0x8c8] sm:$0xff] %v3645_v63  ;;  %4159 = vst [vmem:[%s5850_s13 + $0x8d8] sm:$0xff] %v3647_v1  ;;  %v1853_v58 = vadd.f32 %v1852_v51, %v6279_v30  ;;  %v2302_v41 = vadd.f32 %v2301_v52, %v6279_v30  ;;  %v3652_v49 = vmax.f32 %v1851_v25, 0.0  ;;  %v3654_v37 = vmax.f32 %v2300_v35, 0.0  ;;  %v4680_v1 = vld [vmem:[#allocation2 + $0xb0] sm:$0xff] }
 0x2b5   : > { %v1856_v53 = vpop.f32.mrf.mxu0  ;;  %v2305_v28 = vpop.f32.mrf.mxu1  ;;  %2657 = vmatmul.mubr.f32.gmra.mxu0 %v4679_v34  ;;  %3106 = vmatmul.mubr.f32.gmra.mxu1 %v4679_v34 }
 0x2b6   : > { %2662 = vmatprep.mubr.f32.mxu0 %v7306_v22  ;;  %3111 = vmatprep.mubr.f32.mxu1 %v7306_v22  ;;  %v3653_v50 = vmax.f32 %v1853_v58, 0.0  ;;  %v3655_v47 = vmax.f32 %v2302_v41, 0.0  ;;  %4164 = vst [vmem:[%s5850_s13 + $0x900] sm:$0xff] %v3652_v49  ;;  %4166 = vst [vmem:[%s5850_s13 + $0x910] sm:$0xff] %v3654_v37  ;;  %v1857_v17 = vadd.f32 %v1856_v53, %v6291_v12  ;;  %v6315_v58 = vpop.permute.xlu1 %1445 }
 0x2b7   : > { %v2306_v11 = vadd.f32 %v2305_v28, %v6291_v12  ;;  %v1858_v46 = vpop.f32.mrf.mxu0  ;;  %v2307_v43 = vpop.f32.mrf.mxu1 }
 0x2b8   : > { %4165 = vst [vmem:[%s5850_s13 + $0x908] sm:$0xff] %v3653_v50  ;;  %4167 = vst [vmem:[%s5850_s13 + $0x918] sm:$0xff] %v3655_v47  ;;  %v1859_v39 = vadd.f32 %v1858_v46, %v6291_v12  ;;  %v2308_v40 = vadd.f32 %v2307_v43, %v6291_v12  ;;  %v3660_v38 = vmax.f32 %v1857_v17, 0.0  ;;  %v4681_v17 = vld [vmem:[#allocation2 + $0xb8] sm:$0xff] }
 0x2b9   : > { %v3662_v14 = vmax.f32 %v2306_v11, 0.0  ;;  %v1862_v32 = vpop.f32.mrf.mxu0  ;;  %v2311_v63 = vpop.f32.mrf.mxu1  ;;  %2663 = vmatmul.mubr.f32.gmra.mxu0 %v4680_v1  ;;  %3112 = vmatmul.mubr.f32.gmra.mxu1 %v4680_v1 }
 0x2ba   : > { %2668 = vmatprep.mubr.f32.mxu0 %v7306_v22  ;;  %3117 = vmatprep.mubr.f32.mxu1 %v7306_v22  ;;  %v3661_v25 = vmax.f32 %v1859_v39, 0.0  ;;  %v3663_v35 = vmax.f32 %v2308_v40, 0.0  ;;  %4172 = vst [vmem:[%s5850_s13 + $0x940] sm:$0xff] %v3660_v38  ;;  %v1863_v51 = vadd.f32 %v1862_v32, %v6303_v54  ;;  %v2312_v52 = vadd.f32 %v2311_v63, %v6303_v54  ;;  %v6327_v40 = vpop.permute.xlu0 %1450 }
 0x2bb   : > { %4174 = vst [vmem:[%s5850_s13 + $0x950] sm:$0xff] %v3662_v14  ;;  %v1864_v41 = vpop.f32.mrf.mxu0  ;;  %v2313_v49 = vpop.f32.mrf.mxu1 }
 0x2bc   : > { %4173 = vst [vmem:[%s5850_s13 + $0x948] sm:$0xff] %v3661_v25  ;;  %4175 = vst [vmem:[%s5850_s13 + $0x958] sm:$0xff] %v3663_v35  ;;  %v1865_v37 = vadd.f32 %v1864_v41, %v6303_v54  ;;  %v2314_v53 = vadd.f32 %v2313_v49, %v6303_v54  ;;  %v3668_v28 = vmax.f32 %v1863_v51, 0.0  ;;  %v3670_v34 = vmax.f32 %v2312_v52, 0.0  ;;  %v4682_v52 = vld [vmem:[#allocation2 + $0xc0] sm:$0xff] }
 0x2bd   : > { %v1868_v50 = vpop.f32.mrf.mxu0  ;;  %v2317_v47 = vpop.f32.mrf.mxu1  ;;  %2669 = vmatmul.mubr.f32.gmra.mxu0 %v4681_v17  ;;  %3118 = vmatmul.mubr.f32.gmra.mxu1 %v4681_v17 }
 0x2be   : > { %2674 = vmatprep.mubr.f32.mxu0 %v7306_v22  ;;  %3123 = vmatprep.mubr.f32.mxu1 %v7306_v22  ;;  %v3669_v11 = vmax.f32 %v1865_v37, 0.0  ;;  %v3671_v46 = vmax.f32 %v2314_v53, 0.0  ;;  %4180 = vst [vmem:[%s5850_s13 + $0x980] sm:$0xff] %v3668_v28  ;;  %4182 = vst [vmem:[%s5850_s13 + $0x990] sm:$0xff] %v3670_v34  ;;  %v1869_v43 = vadd.f32 %v1868_v50, %v6315_v58  ;;  %v6339_v28 = vpop.permute.xlu1 %1455 }
 0x2bf   : > { %v2318_v39 = vadd.f32 %v2317_v47, %v6315_v58  ;;  %v1870_v38 = vpop.f32.mrf.mxu0  ;;  %v2319_v14 = vpop.f32.mrf.mxu1 }
 0x2c0   : > { %4181 = vst [vmem:[%s5850_s13 + $0x988] sm:$0xff] %v3669_v11  ;;  %4183 = vst [vmem:[%s5850_s13 + $0x998] sm:$0xff] %v3671_v46  ;;  %v1871_v32 = vadd.f32 %v1870_v38, %v6315_v58  ;;  %v2320_v63 = vadd.f32 %v2319_v14, %v6315_v58  ;;  %v3676_v1 = vmax.f32 %v1869_v43, 0.0  ;;  %v4683_v38 = vld [vmem:[#allocation2 + $0xc8] sm:$0xff] }
 0x2c1   : > { %v3678_v25 = vmax.f32 %v2318_v39, 0.0  ;;  %v1874_v35 = vpop.f32.mrf.mxu0  ;;  %v2323_v51 = vpop.f32.mrf.mxu1  ;;  %2675 = vmatmul.mubr.f32.gmra.mxu0 %v4682_v52  ;;  %3124 = vmatmul.mubr.f32.gmra.mxu1 %v4682_v52 }
 0x2c2   : > { %2680 = vmatprep.mubr.f32.mxu0 %v7306_v22  ;;  %3129 = vmatprep.mubr.f32.mxu1 %v7306_v22  ;;  %v3677_v41 = vmax.f32 %v1871_v32, 0.0  ;;  %v3679_v49 = vmax.f32 %v2320_v63, 0.0  ;;  %4188 = vst [vmem:[%s5850_s13 + $0x9c0] sm:$0xff] %v3676_v1  ;;  %v1875_v37 = vadd.f32 %v1874_v35, %v6327_v40  ;;  %v2324_v53 = vadd.f32 %v2323_v51, %v6327_v40 }
 0x2c3   : > { %4190 = vst [vmem:[%s5850_s13 + $0x9d0] sm:$0xff] %v3678_v25  ;;  %v1876_v34 = vpop.f32.mrf.mxu0  ;;  %v2325_v50 = vpop.f32.mrf.mxu1 }
 0x2c4   : > { %4189 = vst [vmem:[%s5850_s13 + $0x9c8] sm:$0xff] %v3677_v41  ;;  %4191 = vst [vmem:[%s5850_s13 + $0x9d8] sm:$0xff] %v3679_v49  ;;  %v1877_v47 = vadd.f32 %v1876_v34, %v6327_v40  ;;  %v2326_v17 = vadd.f32 %v2325_v50, %v6327_v40  ;;  %v3684_v11 = vmax.f32 %v1875_v37, 0.0  ;;  %v3686_v46 = vmax.f32 %v2324_v53, 0.0  ;;  %v6351_v25 = vpop.permute.xlu0 %1460  ;;  %v4684_v50 = vld [vmem:[#allocation2 + $0xd0] sm:$0xff] }
 0x2c5   : > { %v1880_v43 = vpop.f32.mrf.mxu0  ;;  %v2329_v39 = vpop.f32.mrf.mxu1  ;;  %2681 = vmatmul.mubr.f32.gmra.mxu0 %v4683_v38  ;;  %3130 = vmatmul.mubr.f32.gmra.mxu1 %v4683_v38 }
 0x2c6   : > { %2686 = vmatprep.mubr.f32.mxu0 %v7306_v22  ;;  %3135 = vmatprep.mubr.f32.mxu1 %v7306_v22  ;;  %v3685_v14 = vmax.f32 %v1877_v47, 0.0  ;;  %v3687_v32 = vmax.f32 %v2326_v17, 0.0  ;;  %4196 = vst [vmem:[%s5850_s13 + $0xa00] sm:$0xff] %v3684_v11  ;;  %4198 = vst [vmem:[%s5850_s13 + $0xa10] sm:$0xff] %v3686_v46  ;;  %v1881_v63 = vadd.f32 %v1880_v43, %v6339_v28  ;;  %v6363_v43 = vpop.permute.xlu1 %1465 }
 0x2c7   : > { %v2330_v1 = vadd.f32 %v2329_v39, %v6339_v28  ;;  %v1882_v35 = vpop.f32.mrf.mxu0  ;;  %v2331_v51 = vpop.f32.mrf.mxu1 }
 0x2c8   : > { %4197 = vst [vmem:[%s5850_s13 + $0xa08] sm:$0xff] %v3685_v14  ;;  %4199 = vst [vmem:[%s5850_s13 + $0xa18] sm:$0xff] %v3687_v32  ;;  %v1883_v52 = vadd.f32 %v1882_v35, %v6339_v28  ;;  %v2332_v41 = vadd.f32 %v2331_v51, %v6339_v28  ;;  %v3692_v49 = vmax.f32 %v1881_v63, 0.0 }
 0x2c9   : > { %v3694_v37 = vmax.f32 %v2330_v1, 0.0  ;;  %v1886_v53 = vpop.f32.mrf.mxu0  ;;  %v2335_v34 = vpop.f32.mrf.mxu1  ;;  %2687 = vmatmul.mubr.f32.gmra.mxu0 %v4684_v50  ;;  %3136 = vmatmul.mubr.f32.gmra.mxu1 %v4684_v50 }
 0x2ca   : > { %2692 = vmatprep.mubr.f32.mxu0 %v7306_v22  ;;  %3141 = vmatprep.mubr.f32.mxu1 %v7306_v22  ;;  %v3693_v47 = vmax.f32 %v1883_v52, 0.0  ;;  %v3695_v17 = vmax.f32 %v2332_v41, 0.0  ;;  %4204 = vst [vmem:[%s5850_s13 + $0xa40] sm:$0xff] %v3692_v49  ;;  %v1887_v11 = vadd.f32 %v1886_v53, %v6351_v25  ;;  %v2336_v46 = vadd.f32 %v2335_v34, %v6351_v25  ;;  %v4685_v52 = vld [vmem:[#allocation2 + $0xd8] sm:$0xff]  ;;  %v6375_v34 = vpop.permute.xlu0 %1470 }
 0x2cb   : > { %4206 = vst [vmem:[%s5850_s13 + $0xa50] sm:$0xff] %v3694_v37  ;;  %v1888_v39 = vpop.f32.mrf.mxu0  ;;  %v2337_v38 = vpop.f32.mrf.mxu1 }
 0x2cc   : > { %4205 = vst [vmem:[%s5850_s13 + $0xa48] sm:$0xff] %v3693_v47  ;;  %4207 = vst [vmem:[%s5850_s13 + $0xa58] sm:$0xff] %v3695_v17  ;;  %v1889_v14 = vadd.f32 %v1888_v39, %v6351_v25  ;;  %v2338_v32 = vadd.f32 %v2337_v38, %v6351_v25  ;;  %v3700_v63 = vmax.f32 %v1887_v11, 0.0  ;;  %v3702_v1 = vmax.f32 %v2336_v46, 0.0 }
 0x2cd   : > { %v1892_v35 = vpop.f32.mrf.mxu0  ;;  %v2341_v51 = vpop.f32.mrf.mxu1  ;;  %2693 = vmatmul.mubr.f32.gmra.mxu0 %v4685_v52  ;;  %3142 = vmatmul.mubr.f32.gmra.mxu1 %v4685_v52 }
 0x2ce   : > { %2698 = vmatprep.mubr.f32.mxu0 %v7306_v22  ;;  %3147 = vmatprep.mubr.f32.mxu1 %v7306_v22  ;;  %v3701_v41 = vmax.f32 %v1889_v14, 0.0  ;;  %v3703_v49 = vmax.f32 %v2338_v32, 0.0  ;;  %4212 = vst [vmem:[%s5850_s13 + $0xa80] sm:$0xff] %v3700_v63  ;;  %4214 = vst [vmem:[%s5850_s13 + $0xa90] sm:$0xff] %v3702_v1  ;;  %v1893_v37 = vadd.f32 %v1892_v35, %v6363_v43  ;;  %v4686_v32 = vld [vmem:[#allocation2 + $0xe0] sm:$0xff]  ;;  %v6387_v52 = vpop.permute.xlu1 %1475 }
 0x2cf   : > { %v2342_v53 = vadd.f32 %v2341_v51, %v6363_v43  ;;  %v1894_v50 = vpop.f32.mrf.mxu0  ;;  %v2343_v47 = vpop.f32.mrf.mxu1 }
 0x2d0   : > { %4213 = vst [vmem:[%s5850_s13 + $0xa88] sm:$0xff] %v3701_v41  ;;  %4215 = vst [vmem:[%s5850_s13 + $0xa98] sm:$0xff] %v3703_v49  ;;  %v1895_v17 = vadd.f32 %v1894_v50, %v6363_v43  ;;  %v2344_v11 = vadd.f32 %v2343_v47, %v6363_v43  ;;  %v3708_v46 = vmax.f32 %v1893_v37, 0.0 }
 0x2d1   : > { %v3710_v39 = vmax.f32 %v2342_v53, 0.0  ;;  %v1898_v38 = vpop.f32.mrf.mxu0  ;;  %v2347_v14 = vpop.f32.mrf.mxu1  ;;  %2699 = vmatmul.mubr.f32.gmra.mxu0 %v4686_v32  ;;  %3148 = vmatmul.mubr.f32.gmra.mxu1 %v4686_v32 }
 0x2d2   : > { %2704 = vmatprep.mubr.f32.mxu0 %v7306_v22  ;;  %3153 = vmatprep.mubr.f32.mxu1 %v7306_v22  ;;  %v3709_v63 = vmax.f32 %v1895_v17, 0.0  ;;  %v3711_v1 = vmax.f32 %v2344_v11, 0.0  ;;  %4220 = vst [vmem:[%s5850_s13 + $0xac0] sm:$0xff] %v3708_v46  ;;  %v1899_v35 = vadd.f32 %v1898_v38, %v6375_v34  ;;  %v2348_v51 = vadd.f32 %v2347_v14, %v6375_v34  ;;  %v4687_v46 = vld [vmem:[#allocation2 + $0xe8] sm:$0xff] }
 0x2d3   : > { %4222 = vst [vmem:[%s5850_s13 + $0xad0] sm:$0xff] %v3710_v39  ;;  %v1900_v41 = vpop.f32.mrf.mxu0  ;;  %v2349_v49 = vpop.f32.mrf.mxu1 }
 0x2d4   : > { %4221 = vst [vmem:[%s5850_s13 + $0xac8] sm:$0xff] %v3709_v63  ;;  %4223 = vst [vmem:[%s5850_s13 + $0xad8] sm:$0xff] %v3711_v1  ;;  %v1901_v37 = vadd.f32 %v1900_v41, %v6375_v34  ;;  %v2350_v53 = vadd.f32 %v2349_v49, %v6375_v34  ;;  %v3716_v50 = vmax.f32 %v1899_v35, 0.0  ;;  %v3718_v47 = vmax.f32 %v2348_v51, 0.0  ;;  %v6399_v63 = vpop.permute.xlu0 %1480 }
 0x2d5   : > { %v1904_v17 = vpop.f32.mrf.mxu0  ;;  %v2353_v11 = vpop.f32.mrf.mxu1  ;;  %2705 = vmatmul.mubr.f32.gmra.mxu0 %v4687_v46  ;;  %3154 = vmatmul.mubr.f32.gmra.mxu1 %v4687_v46  ;;  %7321 = vst [vmem:[#allocation20_spill] sm:$0xff] %v6399_v63 }
 0x2d6   : > { %2710 = vmatprep.mubr.f32.mxu0 %v7306_v22  ;;  %3159 = vmatprep.mubr.f32.mxu1 %v7306_v22  ;;  %v3717_v39 = vmax.f32 %v1901_v37, 0.0  ;;  %v3719_v38 = vmax.f32 %v2350_v53, 0.0  ;;  %4228 = vst [vmem:[%s5850_s13 + $0xb00] sm:$0xff] %v3716_v50  ;;  %4230 = vst [vmem:[%s5850_s13 + $0xb10] sm:$0xff] %v3718_v47  ;;  %v1905_v14 = vadd.f32 %v1904_v17, %v6387_v52  ;;  %v4688_v47 = vld [vmem:[#allocation2 + $0xf0] sm:$0xff] }
 0x2d7   : > { %v2354_v32 = vadd.f32 %v2353_v11, %v6387_v52  ;;  %v1906_v1 = vpop.f32.mrf.mxu0  ;;  %v2355_v35 = vpop.f32.mrf.mxu1 }
 0x2d8   : > { %4229 = vst [vmem:[%s5850_s13 + $0xb08] sm:$0xff] %v3717_v39  ;;  %4231 = vst [vmem:[%s5850_s13 + $0xb18] sm:$0xff] %v3719_v38  ;;  %v1907_v51 = vadd.f32 %v1906_v1, %v6387_v52  ;;  %v2356_v41 = vadd.f32 %v2355_v35, %v6387_v52  ;;  %v3724_v49 = vmax.f32 %v1905_v14, 0.0  ;;  %v6411_v38 = vpop.permute.xlu1 %1485 }
 0x2d9   : > { %v3726_v37 = vmax.f32 %v2354_v32, 0.0  ;;  %v1910_v53 = vpop.f32.mrf.mxu0  ;;  %v2359_v50 = vpop.f32.mrf.mxu1  ;;  %2711 = vmatmul.mubr.f32.gmra.mxu0 %v4688_v47  ;;  %3160 = vmatmul.mubr.f32.gmra.mxu1 %v4688_v47  ;;  %7322 = vst [vmem:[#allocation18_spill] sm:$0xff] %v6411_v38 }
 0x2da   : > { %2716 = vmatprep.mubr.f32.mxu0 %v7306_v22  ;;  %3165 = vmatprep.mubr.f32.mxu1 %v7306_v22  ;;  %v3725_v17 = vmax.f32 %v1907_v51, 0.0  ;;  %v3727_v11 = vmax.f32 %v2356_v41, 0.0  ;;  %4236 = vst [vmem:[%s5850_s13 + $0xb40] sm:$0xff] %v3724_v49  ;;  %v1911_v46 = vadd.f32 %v1910_v53, %v6399_v63  ;;  %v2360_v39 = vadd.f32 %v2359_v50, %v6399_v63  ;;  %v4689_v53 = vld [vmem:[#allocation2 + $0xf8] sm:$0xff] }
 0x2db   : > { %4238 = vst [vmem:[%s5850_s13 + $0xb50] sm:$0xff] %v3726_v37  ;;  %v1912_v14 = vpop.f32.mrf.mxu0  ;;  %v2361_v32 = vpop.f32.mrf.mxu1 }
 0x2dc   : > { %4237 = vst [vmem:[%s5850_s13 + $0xb48] sm:$0xff] %v3725_v17  ;;  %4239 = vst [vmem:[%s5850_s13 + $0xb58] sm:$0xff] %v3727_v11  ;;  %v1913_v1 = vadd.f32 %v1912_v14, %v6399_v63  ;;  %v2362_v35 = vadd.f32 %v2361_v32, %v6399_v63  ;;  %v3732_v51 = vmax.f32 %v1911_v46, 0.0  ;;  %v3734_v41 = vmax.f32 %v2360_v39, 0.0  ;;  %v6423_v46 = vpop.permute.xlu0 %1490 }
 0x2dd   : > { %v1916_v49 = vpop.f32.mrf.mxu0  ;;  %v2365_v37 = vpop.f32.mrf.mxu1  ;;  %2717 = vmatmul.mubr.f32.gmra.mxu0 %v4689_v53  ;;  %3166 = vmatmul.mubr.f32.gmra.mxu1 %v4689_v53  ;;  %7323 = vst [vmem:[#allocation19_spill] sm:$0xff] %v6423_v46 }
 0x2de   : > { %2722 = vmatprep.mubr.f32.mxu0 %v7306_v22  ;;  %3171 = vmatprep.mubr.f32.mxu1 %v7306_v22  ;;  %v3733_v50 = vmax.f32 %v1913_v1, 0.0  ;;  %v3735_v47 = vmax.f32 %v2362_v35, 0.0  ;;  %4244 = vst [vmem:[%s5850_s13 + $0xb80] sm:$0xff] %v3732_v51  ;;  %4246 = vst [vmem:[%s5850_s13 + $0xb90] sm:$0xff] %v3734_v41  ;;  %v1917_v17 = vadd.f32 %v1916_v49, %v6411_v38  ;;  %v4690_v49 = vld [vmem:[#allocation2 + $0x100] sm:$0xff] }
 0x2df   : > { %v2366_v11 = vadd.f32 %v2365_v37, %v6411_v38  ;;  %v1918_v39 = vpop.f32.mrf.mxu0  ;;  %v2367_v14 = vpop.f32.mrf.mxu1 }
 0x2e0   : > { %4245 = vst [vmem:[%s5850_s13 + $0xb88] sm:$0xff] %v3733_v50  ;;  %4247 = vst [vmem:[%s5850_s13 + $0xb98] sm:$0xff] %v3735_v47  ;;  %v1919_v32 = vadd.f32 %v1918_v39, %v6411_v38  ;;  %v2368_v53 = vadd.f32 %v2367_v14, %v6411_v38  ;;  %v3740_v1 = vmax.f32 %v1917_v17, 0.0 }
 0x2e1   : > { %v3742_v35 = vmax.f32 %v2366_v11, 0.0  ;;  %v1922_v51 = vpop.f32.mrf.mxu0  ;;  %v2371_v41 = vpop.f32.mrf.mxu1  ;;  %2723 = vmatmul.mubr.f32.gmra.mxu0 %v4690_v49  ;;  %3172 = vmatmul.mubr.f32.gmra.mxu1 %v4690_v49 }
 0x2e2   : > { %2728 = vmatprep.mubr.f32.mxu0 %v7306_v22  ;;  %3177 = vmatprep.mubr.f32.mxu1 %v7306_v22  ;;  %v3741_v37 = vmax.f32 %v1919_v32, 0.0  ;;  %v3743_v50 = vmax.f32 %v2368_v53, 0.0  ;;  %4252 = vst [vmem:[%s5850_s13 + $0xbc0] sm:$0xff] %v3740_v1  ;;  %v1923_v47 = vadd.f32 %v1922_v51, %v6423_v46  ;;  %v2372_v17 = vadd.f32 %v2371_v41, %v6423_v46  ;;  %v6435_v11 = vpop.permute.xlu1 %1495  ;;  %v4691_v51 = vld [vmem:[#allocation2 + $0x108] sm:$0xff] }
 0x2e3   : > { %4254 = vst [vmem:[%s5850_s13 + $0xbd0] sm:$0xff] %v3742_v35  ;;  %7324 = vst [vmem:[#allocation16_spill] sm:$0xff] %v6435_v11  ;;  %v1924_v39 = vpop.f32.mrf.mxu0  ;;  %v2373_v14 = vpop.f32.mrf.mxu1 }
 0x2e4   : > { %4253 = vst [vmem:[%s5850_s13 + $0xbc8] sm:$0xff] %v3741_v37  ;;  %4255 = vst [vmem:[%s5850_s13 + $0xbd8] sm:$0xff] %v3743_v50  ;;  %v1925_v49 = vadd.f32 %v1924_v39, %v6423_v46  ;;  %v2374_v38 = vadd.f32 %v2373_v14, %v6423_v46  ;;  %v3748_v32 = vmax.f32 %v1923_v47, 0.0  ;;  %v3750_v53 = vmax.f32 %v2372_v17, 0.0  ;;  %v6447_v17 = vpop.permute.xlu0 %1500 }
 0x2e5   : > { %v1928_v1 = vpop.f32.mrf.mxu0  ;;  %v2377_v35 = vpop.f32.mrf.mxu1  ;;  %2729 = vmatmul.mubr.f32.gmra.mxu0 %v4691_v51  ;;  %3178 = vmatmul.mubr.f32.gmra.mxu1 %v4691_v51  ;;  %7325 = vst [vmem:[#allocation17_spill] sm:$0xff] %v6447_v17 }
 0x2e6   : > { %2734 = vmatprep.mubr.f32.mxu0 %v7306_v22  ;;  %3183 = vmatprep.mubr.f32.mxu1 %v7306_v22  ;;  %v3749_v41 = vmax.f32 %v1925_v49, 0.0  ;;  %v3751_v37 = vmax.f32 %v2374_v38, 0.0  ;;  %4260 = vst [vmem:[%s5850_s13 + $0xc00] sm:$0xff] %v3748_v32  ;;  %4262 = vst [vmem:[%s5850_s13 + $0xc10] sm:$0xff] %v3750_v53  ;;  %v1929_v50 = vadd.f32 %v1928_v1, %v6435_v11  ;;  %v4692_v1 = vld [vmem:[#allocation2 + $0x110] sm:$0xff] }
 0x2e7   : > { %v2378_v47 = vadd.f32 %v2377_v35, %v6435_v11  ;;  %v1930_v39 = vpop.f32.mrf.mxu0  ;;  %v2379_v14 = vpop.f32.mrf.mxu1 }
 0x2e8   : > { %4261 = vst [vmem:[%s5850_s13 + $0xc08] sm:$0xff] %v3749_v41  ;;  %4263 = vst [vmem:[%s5850_s13 + $0xc18] sm:$0xff] %v3751_v37  ;;  %v1931_v51 = vadd.f32 %v1930_v39, %v6435_v11  ;;  %v2380_v46 = vadd.f32 %v2379_v14, %v6435_v11  ;;  %v3756_v49 = vmax.f32 %v1929_v50, 0.0 }
 0x2e9   : > { %v3758_v38 = vmax.f32 %v2378_v47, 0.0  ;;  %v1934_v32 = vpop.f32.mrf.mxu0  ;;  %v2383_v53 = vpop.f32.mrf.mxu1  ;;  %2735 = vmatmul.mubr.f32.gmra.mxu0 %v4692_v1  ;;  %3184 = vmatmul.mubr.f32.gmra.mxu1 %v4692_v1 }
 0x2ea   : > { %2740 = vmatprep.mubr.f32.mxu0 %v7306_v22  ;;  %3189 = vmatprep.mubr.f32.mxu1 %v7306_v22  ;;  %v3757_v35 = vmax.f32 %v1931_v51, 0.0  ;;  %v3759_v41 = vmax.f32 %v2380_v46, 0.0  ;;  %4268 = vst [vmem:[%s5850_s13 + $0xc40] sm:$0xff] %v3756_v49  ;;  %v1935_v37 = vadd.f32 %v1934_v32, %v6447_v17  ;;  %v2384_v50 = vadd.f32 %v2383_v53, %v6447_v17  ;;  %v6459_v47 = vpop.permute.xlu1 %1505  ;;  %v4693_v32 = vld [vmem:[#allocation2 + $0x118] sm:$0xff] }
 0x2eb   : > { %4270 = vst [vmem:[%s5850_s13 + $0xc50] sm:$0xff] %v3758_v38  ;;  %7326 = vst [vmem:[#allocation14_spill] sm:$0xff] %v6459_v47  ;;  %v1936_v39 = vpop.f32.mrf.mxu0  ;;  %v2385_v14 = vpop.f32.mrf.mxu1 }
 0x2ec   : > { %4269 = vst [vmem:[%s5850_s13 + $0xc48] sm:$0xff] %v3757_v35  ;;  %4271 = vst [vmem:[%s5850_s13 + $0xc58] sm:$0xff] %v3759_v41  ;;  %v1937_v1 = vadd.f32 %v1936_v39, %v6447_v17  ;;  %v2386_v11 = vadd.f32 %v2385_v14, %v6447_v17  ;;  %v3764_v51 = vmax.f32 %v1935_v37, 0.0  ;;  %v3766_v46 = vmax.f32 %v2384_v50, 0.0  ;;  %v6471_v50 = vpop.permute.xlu0 %1510 }
 0x2ed   : > { %v1940_v49 = vpop.f32.mrf.mxu0  ;;  %v2389_v38 = vpop.f32.mrf.mxu1  ;;  %2741 = vmatmul.mubr.f32.gmra.mxu0 %v4693_v32  ;;  %3190 = vmatmul.mubr.f32.gmra.mxu1 %v4693_v32  ;;  %7327 = vst [vmem:[#allocation15_spill] sm:$0xff] %v6471_v50 }
 0x2ee   : > { %2746 = vmatprep.mubr.f32.mxu0 %v7306_v22  ;;  %3195 = vmatprep.mubr.f32.mxu1 %v7306_v22  ;;  %v3765_v53 = vmax.f32 %v1937_v1, 0.0  ;;  %v3767_v35 = vmax.f32 %v2386_v11, 0.0  ;;  %4276 = vst [vmem:[%s5850_s13 + $0xc80] sm:$0xff] %v3764_v51  ;;  %4278 = vst [vmem:[%s5850_s13 + $0xc90] sm:$0xff] %v3766_v46  ;;  %v1941_v41 = vadd.f32 %v1940_v49, %v6459_v47  ;;  %v4694_v49 = vld [vmem:[#allocation2 + $0x120] sm:$0xff] }
 0x2ef   : > { %v2390_v37 = vadd.f32 %v2389_v38, %v6459_v47  ;;  %v1942_v39 = vpop.f32.mrf.mxu0  ;;  %v2391_v14 = vpop.f32.mrf.mxu1 }
 0x2f0   : > { %4277 = vst [vmem:[%s5850_s13 + $0xc88] sm:$0xff] %v3765_v53  ;;  %4279 = vst [vmem:[%s5850_s13 + $0xc98] sm:$0xff] %v3767_v35  ;;  %v1943_v32 = vadd.f32 %v1942_v39, %v6459_v47  ;;  %v2392_v17 = vadd.f32 %v2391_v14, %v6459_v47  ;;  %v3772_v1 = vmax.f32 %v1941_v41, 0.0 }
 0x2f1   : > { %v3774_v11 = vmax.f32 %v2390_v37, 0.0  ;;  %v1946_v51 = vpop.f32.mrf.mxu0  ;;  %v2395_v46 = vpop.f32.mrf.mxu1  ;;  %2747 = vmatmul.mubr.f32.gmra.mxu0 %v4694_v49  ;;  %3196 = vmatmul.mubr.f32.gmra.mxu1 %v4694_v49 }
 0x2f2   : > { %2752 = vmatprep.mubr.f32.mxu0 %v7306_v22  ;;  %3201 = vmatprep.mubr.f32.mxu1 %v7306_v22  ;;  %v3773_v38 = vmax.f32 %v1943_v32, 0.0  ;;  %v3775_v53 = vmax.f32 %v2392_v17, 0.0  ;;  %4284 = vst [vmem:[%s5850_s13 + $0xcc0] sm:$0xff] %v3772_v1  ;;  %v1947_v35 = vadd.f32 %v1946_v51, %v6471_v50  ;;  %v2396_v41 = vadd.f32 %v2395_v46, %v6471_v50  ;;  %v6483_v37 = vpop.permute.xlu1 %1515  ;;  %v4695_v51 = vld [vmem:[#allocation2 + $0x128] sm:$0xff] }
 0x2f3   : > { %4286 = vst [vmem:[%s5850_s13 + $0xcd0] sm:$0xff] %v3774_v11  ;;  %7328 = vst [vmem:[#allocation12_spill] sm:$0xff] %v6483_v37  ;;  %v1948_v39 = vpop.f32.mrf.mxu0  ;;  %v2397_v14 = vpop.f32.mrf.mxu1 }
 0x2f4   : > { %4285 = vst [vmem:[%s5850_s13 + $0xcc8] sm:$0xff] %v3773_v38  ;;  %4287 = vst [vmem:[%s5850_s13 + $0xcd8] sm:$0xff] %v3775_v53  ;;  %v1949_v49 = vadd.f32 %v1948_v39, %v6471_v50  ;;  %v2398_v47 = vadd.f32 %v2397_v14, %v6471_v50  ;;  %v3780_v32 = vmax.f32 %v1947_v35, 0.0  ;;  %v3782_v17 = vmax.f32 %v2396_v41, 0.0  ;;  %v6495_v41 = vpop.permute.xlu0 %1520 }
 0x2f5   : > { %v1952_v1 = vpop.f32.mrf.mxu0  ;;  %v2401_v11 = vpop.f32.mrf.mxu1  ;;  %2753 = vmatmul.mubr.f32.gmra.mxu0 %v4695_v51  ;;  %3202 = vmatmul.mubr.f32.gmra.mxu1 %v4695_v51  ;;  %7329 = vst [vmem:[#allocation13_spill] sm:$0xff] %v6495_v41 }
 0x2f6   : > { %2758 = vmatprep.mubr.f32.mxu0 %v7306_v22  ;;  %3207 = vmatprep.mubr.f32.mxu1 %v7306_v22  ;;  %v3781_v46 = vmax.f32 %v1949_v49, 0.0  ;;  %v3783_v38 = vmax.f32 %v2398_v47, 0.0  ;;  %4292 = vst [vmem:[%s5850_s13 + $0xd00] sm:$0xff] %v3780_v32  ;;  %4294 = vst [vmem:[%s5850_s13 + $0xd10] sm:$0xff] %v3782_v17  ;;  %v1953_v53 = vadd.f32 %v1952_v1, %v6483_v37  ;;  %v4696_v1 = vld [vmem:[#allocation2 + $0x130] sm:$0xff] }
 0x2f7   : > { %v2402_v35 = vadd.f32 %v2401_v11, %v6483_v37  ;;  %v1954_v39 = vpop.f32.mrf.mxu0  ;;  %v2403_v14 = vpop.f32.mrf.mxu1 }
 0x2f8   : > { %4293 = vst [vmem:[%s5850_s13 + $0xd08] sm:$0xff] %v3781_v46  ;;  %4295 = vst [vmem:[%s5850_s13 + $0xd18] sm:$0xff] %v3783_v38  ;;  %v1955_v51 = vadd.f32 %v1954_v39, %v6483_v37  ;;  %v2404_v50 = vadd.f32 %v2403_v14, %v6483_v37  ;;  %v3788_v49 = vmax.f32 %v1953_v53, 0.0 }
 0x2f9   : > { %v3790_v47 = vmax.f32 %v2402_v35, 0.0  ;;  %v1958_v32 = vpop.f32.mrf.mxu0  ;;  %v2407_v17 = vpop.f32.mrf.mxu1  ;;  %2759 = vmatmul.mubr.f32.gmra.mxu0 %v4696_v1  ;;  %3208 = vmatmul.mubr.f32.gmra.mxu1 %v4696_v1 }
 0x2fa   : > { %2764 = vmatprep.mubr.f32.mxu0 %v7306_v22  ;;  %3213 = vmatprep.mubr.f32.mxu1 %v7306_v22  ;;  %v3789_v11 = vmax.f32 %v1955_v51, 0.0  ;;  %v3791_v46 = vmax.f32 %v2404_v50, 0.0  ;;  %4300 = vst [vmem:[%s5850_s13 + $0xd40] sm:$0xff] %v3788_v49  ;;  %v1959_v38 = vadd.f32 %v1958_v32, %v6495_v41  ;;  %v2408_v53 = vadd.f32 %v2407_v17, %v6495_v41  ;;  %v6507_v35 = vpop.permute.xlu1 %1525  ;;  %v4697_v32 = vld [vmem:[#allocation2 + $0x138] sm:$0xff] }
 0x2fb   : > { %4302 = vst [vmem:[%s5850_s13 + $0xd50] sm:$0xff] %v3790_v47  ;;  %7330 = vst [vmem:[#allocation10_spill] sm:$0xff] %v6507_v35  ;;  %v1960_v39 = vpop.f32.mrf.mxu0  ;;  %v2409_v14 = vpop.f32.mrf.mxu1 }
 0x2fc   : > { %4301 = vst [vmem:[%s5850_s13 + $0xd48] sm:$0xff] %v3789_v11  ;;  %4303 = vst [vmem:[%s5850_s13 + $0xd58] sm:$0xff] %v3791_v46  ;;  %v1961_v1 = vadd.f32 %v1960_v39, %v6495_v41  ;;  %v2410_v37 = vadd.f32 %v2409_v14, %v6495_v41  ;;  %v3796_v51 = vmax.f32 %v1959_v38, 0.0  ;;  %v3798_v50 = vmax.f32 %v2408_v53, 0.0  ;;  %v6519_v53 = vpop.permute.xlu0 %1530 }
 0x2fd   : > { %v1964_v49 = vpop.f32.mrf.mxu0  ;;  %v2413_v47 = vpop.f32.mrf.mxu1  ;;  %2765 = vmatmul.mubr.f32.gmra.mxu0 %v4697_v32  ;;  %3214 = vmatmul.mubr.f32.gmra.mxu1 %v4697_v32  ;;  %7331 = vst [vmem:[#allocation11_spill] sm:$0xff] %v6519_v53 }
 0x2fe   : > { %2770 = vmatprep.mubr.f32.mxu0 %v7306_v22  ;;  %3219 = vmatprep.mubr.f32.mxu1 %v7306_v22  ;;  %v3797_v17 = vmax.f32 %v1961_v1, 0.0  ;;  %v3799_v11 = vmax.f32 %v2410_v37, 0.0  ;;  %4308 = vst [vmem:[%s5850_s13 + $0xd80] sm:$0xff] %v3796_v51  ;;  %4310 = vst [vmem:[%s5850_s13 + $0xd90] sm:$0xff] %v3798_v50  ;;  %v1965_v46 = vadd.f32 %v1964_v49, %v6507_v35  ;;  %v4698_v49 = vld [vmem:[#allocation2 + $0x140] sm:$0xff] }
 0x2ff   : > { %v2414_v38 = vadd.f32 %v2413_v47, %v6507_v35  ;;  %v1966_v39 = vpop.f32.mrf.mxu0  ;;  %v2415_v14 = vpop.f32.mrf.mxu1 }
 0x300   : > { %4309 = vst [vmem:[%s5850_s13 + $0xd88] sm:$0xff] %v3797_v17  ;;  %4311 = vst [vmem:[%s5850_s13 + $0xd98] sm:$0xff] %v3799_v11  ;;  %v1967_v32 = vadd.f32 %v1966_v39, %v6507_v35  ;;  %v2416_v41 = vadd.f32 %v2415_v14, %v6507_v35  ;;  %v3804_v1 = vmax.f32 %v1965_v46, 0.0 }
 0x301   : > { %v3806_v37 = vmax.f32 %v2414_v38, 0.0  ;;  %v1970_v51 = vpop.f32.mrf.mxu0  ;;  %v2419_v50 = vpop.f32.mrf.mxu1  ;;  %2771 = vmatmul.mubr.f32.gmra.mxu0 %v4698_v49  ;;  %3220 = vmatmul.mubr.f32.gmra.mxu1 %v4698_v49 }
 0x302   : > { %2776 = vmatprep.mubr.f32.mxu0 %v7306_v22  ;;  %3225 = vmatprep.mubr.f32.mxu1 %v7306_v22  ;;  %v3805_v47 = vmax.f32 %v1967_v32, 0.0  ;;  %v3807_v17 = vmax.f32 %v2416_v41, 0.0  ;;  %4316 = vst [vmem:[%s5850_s13 + $0xdc0] sm:$0xff] %v3804_v1  ;;  %v1971_v11 = vadd.f32 %v1970_v51, %v6519_v53  ;;  %v2420_v46 = vadd.f32 %v2419_v50, %v6519_v53  ;;  %v6531_v38 = vpop.permute.xlu1 %1535  ;;  %v4699_v51 = vld [vmem:[#allocation2 + $0x148] sm:$0xff] }
 0x303   : > { %4318 = vst [vmem:[%s5850_s13 + $0xdd0] sm:$0xff] %v3806_v37  ;;  %7332 = vst [vmem:[#allocation8_spill] sm:$0xff] %v6531_v38  ;;  %v1972_v39 = vpop.f32.mrf.mxu0  ;;  %v2421_v14 = vpop.f32.mrf.mxu1 }
 0x304   : > { %4317 = vst [vmem:[%s5850_s13 + $0xdc8] sm:$0xff] %v3805_v47  ;;  %4319 = vst [vmem:[%s5850_s13 + $0xdd8] sm:$0xff] %v3807_v17  ;;  %v1973_v49 = vadd.f32 %v1972_v39, %v6519_v53  ;;  %v2422_v35 = vadd.f32 %v2421_v14, %v6519_v53  ;;  %v3812_v32 = vmax.f32 %v1971_v11, 0.0  ;;  %v3814_v41 = vmax.f32 %v2420_v46, 0.0  ;;  %v6543_v46 = vpop.permute.xlu0 %1540 }
 0x305   : > { %v1976_v1 = vpop.f32.mrf.mxu0  ;;  %v2425_v37 = vpop.f32.mrf.mxu1  ;;  %2777 = vmatmul.mubr.f32.gmra.mxu0 %v4699_v51  ;;  %3226 = vmatmul.mubr.f32.gmra.mxu1 %v4699_v51  ;;  %7333 = vst [vmem:[#allocation9_spill] sm:$0xff] %v6543_v46 }
 0x306   : > { %2782 = vmatprep.mubr.f32.mxu0 %v7306_v22  ;;  %3231 = vmatprep.mubr.f32.mxu1 %v7306_v22  ;;  %v3813_v50 = vmax.f32 %v1973_v49, 0.0  ;;  %v3815_v47 = vmax.f32 %v2422_v35, 0.0  ;;  %4324 = vst [vmem:[%s5850_s13 + $0xe00] sm:$0xff] %v3812_v32  ;;  %4326 = vst [vmem:[%s5850_s13 + $0xe10] sm:$0xff] %v3814_v41  ;;  %v1977_v17 = vadd.f32 %v1976_v1, %v6531_v38  ;;  %v4700_v1 = vld [vmem:[#allocation2 + $0x150] sm:$0xff] }
 0x307   : > { %v2426_v11 = vadd.f32 %v2425_v37, %v6531_v38  ;;  %v1978_v39 = vpop.f32.mrf.mxu0  ;;  %v2427_v14 = vpop.f32.mrf.mxu1 }
 0x308   : > { %4325 = vst [vmem:[%s5850_s13 + $0xe08] sm:$0xff] %v3813_v50  ;;  %4327 = vst [vmem:[%s5850_s13 + $0xe18] sm:$0xff] %v3815_v47  ;;  %v1979_v51 = vadd.f32 %v1978_v39, %v6531_v38  ;;  %v2428_v53 = vadd.f32 %v2427_v14, %v6531_v38  ;;  %v3820_v49 = vmax.f32 %v1977_v17, 0.0 }
 0x309   : > { %v3822_v35 = vmax.f32 %v2426_v11, 0.0  ;;  %v1982_v32 = vpop.f32.mrf.mxu0  ;;  %v2431_v41 = vpop.f32.mrf.mxu1  ;;  %2783 = vmatmul.mubr.f32.gmra.mxu0 %v4700_v1  ;;  %3232 = vmatmul.mubr.f32.gmra.mxu1 %v4700_v1 }
 0x30a   : > { %2788 = vmatprep.mubr.f32.mxu0 %v7306_v22  ;;  %3237 = vmatprep.mubr.f32.mxu1 %v7306_v22  ;;  %v3821_v37 = vmax.f32 %v1979_v51, 0.0  ;;  %v3823_v50 = vmax.f32 %v2428_v53, 0.0  ;;  %4332 = vst [vmem:[%s5850_s13 + $0xe40] sm:$0xff] %v3820_v49  ;;  %v1983_v47 = vadd.f32 %v1982_v32, %v6543_v46  ;;  %v2432_v17 = vadd.f32 %v2431_v41, %v6543_v46  ;;  %v6555_v11 = vpop.permute.xlu1 %1545  ;;  %v4701_v32 = vld [vmem:[#allocation2 + $0x158] sm:$0xff] }
 0x30b   : > { %4334 = vst [vmem:[%s5850_s13 + $0xe50] sm:$0xff] %v3822_v35  ;;  %7334 = vst [vmem:[#allocation33_spill] sm:$0xff] %v6555_v11  ;;  %v1984_v39 = vpop.f32.mrf.mxu0  ;;  %v2433_v14 = vpop.f32.mrf.mxu1 }
 0x30c   : > { %4333 = vst [vmem:[%s5850_s13 + $0xe48] sm:$0xff] %v3821_v37  ;;  %4335 = vst [vmem:[%s5850_s13 + $0xe58] sm:$0xff] %v3823_v50  ;;  %v1985_v1 = vadd.f32 %v1984_v39, %v6543_v46  ;;  %v2434_v38 = vadd.f32 %v2433_v14, %v6543_v46  ;;  %v3828_v51 = vmax.f32 %v1983_v47, 0.0  ;;  %v3830_v53 = vmax.f32 %v2432_v17, 0.0  ;;  %v6567_v17 = vpop.permute.xlu0 %1550 }
 0x30d   : > { %v1988_v49 = vpop.f32.mrf.mxu0  ;;  %v2437_v35 = vpop.f32.mrf.mxu1  ;;  %2789 = vmatmul.mubr.f32.gmra.mxu0 %v4701_v32  ;;  %3238 = vmatmul.mubr.f32.gmra.mxu1 %v4701_v32  ;;  %7335 = vst [vmem:[#allocation34_spill] sm:$0xff] %v6567_v17 }
 0x30e   : > { %2794 = vmatprep.mubr.f32.mxu0 %v7306_v22  ;;  %3243 = vmatprep.mubr.f32.mxu1 %v7306_v22  ;;  %v3829_v41 = vmax.f32 %v1985_v1, 0.0  ;;  %v3831_v37 = vmax.f32 %v2434_v38, 0.0  ;;  %4340 = vst [vmem:[%s5850_s13 + $0xe80] sm:$0xff] %v3828_v51  ;;  %4342 = vst [vmem:[%s5850_s13 + $0xe90] sm:$0xff] %v3830_v53  ;;  %v1989_v50 = vadd.f32 %v1988_v49, %v6555_v11  ;;  %v4702_v49 = vld [vmem:[#allocation2 + $0x160] sm:$0xff] }
 0x30f   : > { %v2438_v47 = vadd.f32 %v2437_v35, %v6555_v11  ;;  %v1990_v39 = vpop.f32.mrf.mxu0  ;;  %v2439_v14 = vpop.f32.mrf.mxu1 }
 0x310   : > { %4341 = vst [vmem:[%s5850_s13 + $0xe88] sm:$0xff] %v3829_v41  ;;  %4343 = vst [vmem:[%s5850_s13 + $0xe98] sm:$0xff] %v3831_v37  ;;  %v1991_v32 = vadd.f32 %v1990_v39, %v6555_v11  ;;  %v2440_v46 = vadd.f32 %v2439_v14, %v6555_v11  ;;  %v3836_v1 = vmax.f32 %v1989_v50, 0.0 }
 0x311   : > { %v3838_v38 = vmax.f32 %v2438_v47, 0.0  ;;  %v1994_v51 = vpop.f32.mrf.mxu0  ;;  %v2443_v53 = vpop.f32.mrf.mxu1  ;;  %2795 = vmatmul.mubr.f32.gmra.mxu0 %v4702_v49  ;;  %3244 = vmatmul.mubr.f32.gmra.mxu1 %v4702_v49 }
 0x312   : > { %2800 = vmatprep.mubr.f32.mxu0 %v7306_v22  ;;  %3249 = vmatprep.mubr.f32.mxu1 %v7306_v22  ;;  %v3837_v35 = vmax.f32 %v1991_v32, 0.0  ;;  %v3839_v41 = vmax.f32 %v2440_v46, 0.0  ;;  %4348 = vst [vmem:[%s5850_s13 + $0xec0] sm:$0xff] %v3836_v1  ;;  %v1995_v37 = vadd.f32 %v1994_v51, %v6567_v17  ;;  %v2444_v50 = vadd.f32 %v2443_v53, %v6567_v17  ;;  %v6579_v47 = vpop.permute.xlu1 %1555  ;;  %v4703_v51 = vld [vmem:[#allocation2 + $0x168] sm:$0xff] }
 0x313   : > { %4350 = vst [vmem:[%s5850_s13 + $0xed0] sm:$0xff] %v3838_v38  ;;  %7336 = vst [vmem:[#allocation31_spill] sm:$0xff] %v6579_v47  ;;  %v1996_v39 = vpop.f32.mrf.mxu0  ;;  %v2445_v14 = vpop.f32.mrf.mxu1 }
 0x314   : > { %4349 = vst [vmem:[%s5850_s13 + $0xec8] sm:$0xff] %v3837_v35  ;;  %4351 = vst [vmem:[%s5850_s13 + $0xed8] sm:$0xff] %v3839_v41  ;;  %v1997_v49 = vadd.f32 %v1996_v39, %v6567_v17  ;;  %v2446_v11 = vadd.f32 %v2445_v14, %v6567_v17  ;;  %v3844_v32 = vmax.f32 %v1995_v37, 0.0  ;;  %v3846_v46 = vmax.f32 %v2444_v50, 0.0  ;;  %v6591_v50 = vpop.permute.xlu0 %1560 }
 0x315   : > { %v2000_v1 = vpop.f32.mrf.mxu0  ;;  %v2449_v38 = vpop.f32.mrf.mxu1  ;;  %2801 = vmatmul.mubr.f32.gmra.mxu0 %v4703_v51  ;;  %3250 = vmatmul.mubr.f32.gmra.mxu1 %v4703_v51  ;;  %7337 = vst [vmem:[#allocation32_spill] sm:$0xff] %v6591_v50 }
 0x316   : > { %2806 = vmatprep.mubr.f32.mxu0 %v7306_v22  ;;  %3255 = vmatprep.mubr.f32.mxu1 %v7306_v22  ;;  %v3845_v53 = vmax.f32 %v1997_v49, 0.0  ;;  %v3847_v35 = vmax.f32 %v2446_v11, 0.0  ;;  %4356 = vst [vmem:[%s5850_s13 + $0xf00] sm:$0xff] %v3844_v32  ;;  %4358 = vst [vmem:[%s5850_s13 + $0xf10] sm:$0xff] %v3846_v46  ;;  %v2001_v41 = vadd.f32 %v2000_v1, %v6579_v47  ;;  %v4704_v1 = vld [vmem:[#allocation2 + $0x170] sm:$0xff] }
 0x317   : > { %v2450_v37 = vadd.f32 %v2449_v38, %v6579_v47  ;;  %v2002_v39 = vpop.f32.mrf.mxu0  ;;  %v2451_v14 = vpop.f32.mrf.mxu1 }
 0x318   : > { %4357 = vst [vmem:[%s5850_s13 + $0xf08] sm:$0xff] %v3845_v53  ;;  %4359 = vst [vmem:[%s5850_s13 + $0xf18] sm:$0xff] %v3847_v35  ;;  %v2003_v51 = vadd.f32 %v2002_v39, %v6579_v47  ;;  %v2452_v17 = vadd.f32 %v2451_v14, %v6579_v47  ;;  %v3852_v49 = vmax.f32 %v2001_v41, 0.0 }
 0x319   : > { %v3854_v11 = vmax.f32 %v2450_v37, 0.0  ;;  %v2006_v32 = vpop.f32.mrf.mxu0  ;;  %v2455_v46 = vpop.f32.mrf.mxu1  ;;  %2807 = vmatmul.mubr.f32.gmra.mxu0 %v4704_v1  ;;  %3256 = vmatmul.mubr.f32.gmra.mxu1 %v4704_v1 }
 0x31a   : > { %2812 = vmatprep.mubr.f32.mxu0 %v7306_v22  ;;  %3261 = vmatprep.mubr.f32.mxu1 %v7306_v22  ;;  %v3853_v38 = vmax.f32 %v2003_v51, 0.0  ;;  %v3855_v53 = vmax.f32 %v2452_v17, 0.0  ;;  %4364 = vst [vmem:[%s5850_s13 + $0xf40] sm:$0xff] %v3852_v49  ;;  %v2007_v35 = vadd.f32 %v2006_v32, %v6591_v50  ;;  %v2456_v41 = vadd.f32 %v2455_v46, %v6591_v50  ;;  %v6603_v37 = vpop.permute.xlu1 %1565  ;;  %v4705_v32 = vld [vmem:[#allocation2 + $0x178] sm:$0xff] }
 0x31b   : > { %4366 = vst [vmem:[%s5850_s13 + $0xf50] sm:$0xff] %v3854_v11  ;;  %v2008_v39 = vpop.f32.mrf.mxu0  ;;  %v2457_v14 = vpop.f32.mrf.mxu1 }
 0x31c   : > { %4365 = vst [vmem:[%s5850_s13 + $0xf48] sm:$0xff] %v3853_v38  ;;  %4367 = vst [vmem:[%s5850_s13 + $0xf58] sm:$0xff] %v3855_v53  ;;  %v2009_v1 = vadd.f32 %v2008_v39, %v6591_v50  ;;  %v2458_v47 = vadd.f32 %v2457_v14, %v6591_v50  ;;  %v3860_v51 = vmax.f32 %v2007_v35, 0.0  ;;  %v3862_v17 = vmax.f32 %v2456_v41, 0.0 }
 0x31d   : > { %v2012_v49 = vpop.f32.mrf.mxu0  ;;  %v2461_v11 = vpop.f32.mrf.mxu1  ;;  %2813 = vmatmul.mubr.f32.gmra.mxu0 %v4705_v32  ;;  %3262 = vmatmul.mubr.f32.gmra.mxu1 %v4705_v32 }
 0x31e   : > { %2818 = vmatprep.mubr.f32.mxu0 %v7306_v22  ;;  %3267 = vmatprep.mubr.f32.mxu1 %v7306_v22  ;;  %v3861_v46 = vmax.f32 %v2009_v1, 0.0  ;;  %v3863_v38 = vmax.f32 %v2458_v47, 0.0  ;;  %4372 = vst [vmem:[%s5850_s13 + $0xf80] sm:$0xff] %v3860_v51  ;;  %4374 = vst [vmem:[%s5850_s13 + $0xf90] sm:$0xff] %v3862_v17  ;;  %v2013_v53 = vadd.f32 %v2012_v49, %v6603_v37  ;;  %v4706_v47 = vld [vmem:[#allocation2 + $0x180] sm:$0xff] }
 0x31f   : > { %v2462_v35 = vadd.f32 %v2461_v11, %v6603_v37  ;;  %v2014_v41 = vpop.f32.mrf.mxu0  ;;  %v2463_v39 = vpop.f32.mrf.mxu1 }
 0x320   : > { %4373 = vst [vmem:[%s5850_s13 + $0xf88] sm:$0xff] %v3861_v46  ;;  %4375 = vst [vmem:[%s5850_s13 + $0xf98] sm:$0xff] %v3863_v38  ;;  %v2015_v14 = vadd.f32 %v2014_v41, %v6603_v37  ;;  %v2464_v32 = vadd.f32 %v2463_v39, %v6603_v37  ;;  %v3868_v50 = vmax.f32 %v2013_v53, 0.0 }
 0x321   : > { %v3870_v63 = vmax.f32 %v2462_v35, 0.0  ;;  %v2532_v1 = vpop.f32.mrf.mxu0  ;;  %2819 = vmatmul.mubr.f32.gmra.mxu0 %v4706_v47  ;;  %v2981_v51 = vpop.f32.mrf.mxu1  ;;  %3268 = vmatmul.mubr.f32.gmra.mxu1 %v4706_v47 }
 0x322   : > { %v2533_v17 = vadd.f32 %v2532_v1, %v5822_v7  ;;  %v2982_v49 = vadd.f32 %v2981_v51, %v5822_v7  ;;  %2824 = vmatprep.mubr.f32.mxu0 %v7306_v22  ;;  %3273 = vmatprep.mubr.f32.mxu1 %v7306_v22  ;;  %v3869_v11 = vmax.f32 %v2015_v14, 0.0  ;;  %v3871_v46 = vmax.f32 %v2464_v32, 0.0  ;;  %4380 = vst [vmem:[%s5850_s13 + $0xfc0] sm:$0xff] %v3868_v50  ;;  %v4707_v51 = vld [vmem:[#allocation2 + $0x188] sm:$0xff] }
 0x323   : > { %4382 = vst [vmem:[%s5850_s13 + $0xfd0] sm:$0xff] %v3870_v63  ;;  %v2534_v38 = vpop.f32.mrf.mxu0  ;;  %v2983_v53 = vpop.f32.mrf.mxu1 }
 0x324   : > { %v3368_v35 = vmax.f32 %v2533_v17, 0.0  ;;  %v3370_v41 = vmax.f32 %v2982_v49, 0.0  ;;  %v2535_v39 = vadd.f32 %v2534_v38, %v5822_v7  ;;  %v2984_v1 = vadd.f32 %v2983_v53, %v5822_v7  ;;  %4381 = vst [vmem:[%s5850_s13 + $0xfc8] sm:$0xff] %v3869_v11  ;;  %4383 = vst [vmem:[%s5850_s13 + $0xfd8] sm:$0xff] %v3871_v46 }
 0x325   : > { %v2538_v47 = vpop.f32.mrf.mxu0  ;;  %2825 = vmatmul.mubr.f32.gmra.mxu0 %v4707_v51  ;;  %v2987_v14 = vpop.f32.mrf.mxu1  ;;  %3274 = vmatmul.mubr.f32.gmra.mxu1 %v4707_v51 }
 0x326   : > { %3880 = vst [vmem:[%s5850_s13 + $0x20] sm:$0xff] %v3368_v35  ;;  %3882 = vst [vmem:[%s5850_s13 + $0x30] sm:$0xff] %v3370_v41  ;;  %v3369_v63 = vmax.f32 %v2535_v39, 0.0  ;;  %v3371_v50 = vmax.f32 %v2984_v1, 0.0  ;;  %v2539_v32 = vadd.f32 %v2538_v47, %v5839_v20  ;;  %v2988_v17 = vadd.f32 %v2987_v14, %v5839_v20  ;;  %2830 = vmatprep.mubr.f32.mxu0 %v7306_v22  ;;  %v4708_v41 = vld [vmem:[#allocation2 + $0x190] sm:$0xff] }
 0x327   : > { %3279 = vmatprep.mubr.f32.mxu1 %v7306_v22  ;;  %v2540_v7 = vpop.f32.mrf.mxu0  ;;  %v2989_v49 = vpop.f32.mrf.mxu1 }
 0x328   : > { %3881 = vst [vmem:[%s5850_s13 + $0x28] sm:$0xff] %v3369_v63  ;;  %3883 = vst [vmem:[%s5850_s13 + $0x38] sm:$0xff] %v3371_v50  ;;  %v3376_v11 = vmax.f32 %v2539_v32, 0.0  ;;  %v3378_v46 = vmax.f32 %v2988_v17, 0.0  ;;  %v2541_v38 = vadd.f32 %v2540_v7, %v5839_v20  ;;  %v2990_v53 = vadd.f32 %v2989_v49, %v5839_v20 }
 0x329   : > { %v2544_v35 = vpop.f32.mrf.mxu0  ;;  %2831 = vmatmul.mubr.f32.gmra.mxu0 %v4708_v41  ;;  %v2993_v39 = vpop.f32.mrf.mxu1  ;;  %3280 = vmatmul.mubr.f32.gmra.mxu1 %v4708_v41 }
 0x32a   : > { %3888 = vst [vmem:[%s5850_s13 + $0x60] sm:$0xff] %v3376_v11  ;;  %3890 = vst [vmem:[%s5850_s13 + $0x70] sm:$0xff] %v3378_v46  ;;  %v3377_v1 = vmax.f32 %v2541_v38, 0.0  ;;  %v3379_v47 = vmax.f32 %v2990_v53, 0.0  ;;  %v2545_v51 = vadd.f32 %v2544_v35, %v5843_v60  ;;  %v2994_v14 = vadd.f32 %v2993_v39, %v5843_v60  ;;  %2836 = vmatprep.mubr.f32.mxu0 %v7306_v22  ;;  %v4709_v11 = vld [vmem:[#allocation2 + $0x198] sm:$0xff] }
 0x32b   : > { %3285 = vmatprep.mubr.f32.mxu1 %v7306_v22  ;;  %v2546_v20 = vpop.f32.mrf.mxu0  ;;  %v2995_v63 = vpop.f32.mrf.mxu1 }
 0x32c   : > { %3889 = vst [vmem:[%s5850_s13 + $0x68] sm:$0xff] %v3377_v1  ;;  %3891 = vst [vmem:[%s5850_s13 + $0x78] sm:$0xff] %v3379_v47  ;;  %v3384_v50 = vmax.f32 %v2545_v51, 0.0  ;;  %v3386_v32 = vmax.f32 %v2994_v14, 0.0  ;;  %v2547_v17 = vadd.f32 %v2546_v20, %v5843_v60  ;;  %v2996_v7 = vadd.f32 %v2995_v63, %v5843_v60  ;;  %v4710_v63 = vld [vmem:[#allocation2 + $0x1a0] sm:$0xff] }
 0x32d   : > { %v2550_v49 = vpop.f32.mrf.mxu0  ;;  %2837 = vmatmul.mubr.f32.gmra.mxu0 %v4709_v11  ;;  %v2999_v46 = vpop.f32.mrf.mxu1  ;;  %3286 = vmatmul.mubr.f32.gmra.mxu1 %v4709_v11 }
 0x32e   : > { %3896 = vst [vmem:[%s5850_s13 + $0xa0] sm:$0xff] %v3384_v50  ;;  %3898 = vst [vmem:[%s5850_s13 + $0xb0] sm:$0xff] %v3386_v32  ;;  %v3385_v38 = vmax.f32 %v2547_v17, 0.0  ;;  %v3387_v53 = vmax.f32 %v2996_v7, 0.0  ;;  %v2551_v35 = vadd.f32 %v2550_v49, %v5869_v6  ;;  %v3000_v41 = vadd.f32 %v2999_v46, %v5869_v6  ;;  %2842 = vmatprep.mubr.f32.mxu0 %v7306_v22 }
 0x32f   : > { %3291 = vmatprep.mubr.f32.mxu1 %v7306_v22  ;;  %v2552_v60 = vpop.f32.mrf.mxu0  ;;  %v3001_v39 = vpop.f32.mrf.mxu1 }
 0x330   : > { %3897 = vst [vmem:[%s5850_s13 + $0xa8] sm:$0xff] %v3385_v38  ;;  %3899 = vst [vmem:[%s5850_s13 + $0xb8] sm:$0xff] %v3387_v53  ;;  %v3392_v1 = vmax.f32 %v2551_v35, 0.0  ;;  %v3394_v47 = vmax.f32 %v3000_v41, 0.0  ;;  %v2553_v51 = vadd.f32 %v2552_v60, %v5869_v6  ;;  %v3002_v14 = vadd.f32 %v3001_v39, %v5869_v6  ;;  %v4711_v60 = vld [vmem:[#allocation2 + $0x1a8] sm:$0xff] }
 0x331   : > { %v2556_v20 = vpop.f32.mrf.mxu0  ;;  %2843 = vmatmul.mubr.f32.gmra.mxu0 %v4710_v63  ;;  %v3005_v50 = vpop.f32.mrf.mxu1  ;;  %3292 = vmatmul.mubr.f32.gmra.mxu1 %v4710_v63 }
 0x332   : > { %3904 = vst [vmem:[%s5850_s13 + $0xe0] sm:$0xff] %v3392_v1  ;;  %3906 = vst [vmem:[%s5850_s13 + $0xf0] sm:$0xff] %v3394_v47  ;;  %v3393_v32 = vmax.f32 %v2553_v51, 0.0  ;;  %v3395_v17 = vmax.f32 %v3002_v14, 0.0  ;;  %v2557_v7 = vadd.f32 %v2556_v20, %v5884_v42  ;;  %v3006_v49 = vadd.f32 %v3005_v50, %v5884_v42  ;;  %2848 = vmatprep.mubr.f32.mxu0 %v7306_v22 }
 0x333   : > { %3297 = vmatprep.mubr.f32.mxu1 %v7306_v22  ;;  %v2558_v6 = vpop.f32.mrf.mxu0  ;;  %v3007_v11 = vpop.f32.mrf.mxu1 }
 0x334   : > { %3905 = vst [vmem:[%s5850_s13 + $0xe8] sm:$0xff] %v3393_v32  ;;  %3907 = vst [vmem:[%s5850_s13 + $0xf8] sm:$0xff] %v3395_v17  ;;  %v3400_v46 = vmax.f32 %v2557_v7, 0.0  ;;  %v3402_v38 = vmax.f32 %v3006_v49, 0.0  ;;  %v2559_v53 = vadd.f32 %v2558_v6, %v5884_v42  ;;  %v3008_v35 = vadd.f32 %v3007_v11, %v5884_v42  ;;  %v4712_v49 = vld [vmem:[#allocation2 + $0x1b0] sm:$0xff] }
 0x335   : > { %v2562_v41 = vpop.f32.mrf.mxu0  ;;  %2849 = vmatmul.mubr.f32.gmra.mxu0 %v4711_v60  ;;  %v3011_v39 = vpop.f32.mrf.mxu1  ;;  %3298 = vmatmul.mubr.f32.gmra.mxu1 %v4711_v60 }
 0x336   : > { %3912 = vst [vmem:[%s5850_s13 + $0x120] sm:$0xff] %v3400_v46  ;;  %3914 = vst [vmem:[%s5850_s13 + $0x130] sm:$0xff] %v3402_v38  ;;  %v3401_v1 = vmax.f32 %v2559_v53, 0.0  ;;  %v3403_v47 = vmax.f32 %v3008_v35, 0.0  ;;  %v2563_v51 = vadd.f32 %v2562_v41, %v5899_v48  ;;  %v3012_v14 = vadd.f32 %v3011_v39, %v5899_v48  ;;  %2854 = vmatprep.mubr.f32.mxu0 %v7306_v22 }
 0x337   : > { %3303 = vmatprep.mubr.f32.mxu1 %v7306_v22  ;;  %v2564_v42 = vpop.f32.mrf.mxu0  ;;  %v3013_v20 = vpop.f32.mrf.mxu1 }
 0x338   : > { %3913 = vst [vmem:[%s5850_s13 + $0x128] sm:$0xff] %v3401_v1  ;;  %3915 = vst [vmem:[%s5850_s13 + $0x138] sm:$0xff] %v3403_v47  ;;  %v3408_v63 = vmax.f32 %v2563_v51, 0.0  ;;  %v3410_v50 = vmax.f32 %v3012_v14, 0.0  ;;  %v2565_v32 = vadd.f32 %v2564_v42, %v5899_v48  ;;  %v3014_v17 = vadd.f32 %v3013_v20, %v5899_v48  ;;  %v4713_v51 = vld [vmem:[#allocation2 + $0x1b8] sm:$0xff] }
 0x339   : > { %v2568_v7 = vpop.f32.mrf.mxu0  ;;  %2855 = vmatmul.mubr.f32.gmra.mxu0 %v4712_v49  ;;  %v3017_v6 = vpop.f32.mrf.mxu1  ;;  %3304 = vmatmul.mubr.f32.gmra.mxu1 %v4712_v49 }
 0x33a   : > { %3920 = vst [vmem:[%s5850_s13 + $0x160] sm:$0xff] %v3408_v63  ;;  %3922 = vst [vmem:[%s5850_s13 + $0x170] sm:$0xff] %v3410_v50  ;;  %v3409_v11 = vmax.f32 %v2565_v32, 0.0  ;;  %v3411_v46 = vmax.f32 %v3014_v17, 0.0  ;;  %v2569_v38 = vadd.f32 %v2568_v7, %v5911_v44  ;;  %v3018_v53 = vadd.f32 %v3017_v6, %v5911_v44  ;;  %2860 = vmatprep.mubr.f32.mxu0 %v7306_v22 }
 0x33b   : > { %3309 = vmatprep.mubr.f32.mxu1 %v7306_v22  ;;  %v2570_v48 = vpop.f32.mrf.mxu0  ;;  %v3019_v35 = vpop.f32.mrf.mxu1 }
 0x33c   : > { %3921 = vst [vmem:[%s5850_s13 + $0x168] sm:$0xff] %v3409_v11  ;;  %3923 = vst [vmem:[%s5850_s13 + $0x178] sm:$0xff] %v3411_v46  ;;  %v3416_v41 = vmax.f32 %v2569_v38, 0.0  ;;  %v3418_v60 = vmax.f32 %v3018_v53, 0.0  ;;  %v2571_v39 = vadd.f32 %v2570_v48, %v5911_v44  ;;  %v3020_v1 = vadd.f32 %v3019_v35, %v5911_v44  ;;  %v4714_v46 = vld [vmem:[#allocation2 + $0x1c0] sm:$0xff] }
 0x33d   : > { %v2574_v47 = vpop.f32.mrf.mxu0  ;;  %2861 = vmatmul.mubr.f32.gmra.mxu0 %v4713_v51  ;;  %v3023_v14 = vpop.f32.mrf.mxu1  ;;  %3310 = vmatmul.mubr.f32.gmra.mxu1 %v4713_v51 }
 0x33e   : > { %3928 = vst [vmem:[%s5850_s13 + $0x1a0] sm:$0xff] %v3416_v41  ;;  %3930 = vst [vmem:[%s5850_s13 + $0x1b0] sm:$0xff] %v3418_v60  ;;  %v3417_v42 = vmax.f32 %v2571_v39, 0.0  ;;  %v3419_v20 = vmax.f32 %v3020_v1, 0.0  ;;  %v2575_v63 = vadd.f32 %v2574_v47, %v5923_v3  ;;  %v3024_v50 = vadd.f32 %v3023_v14, %v5923_v3  ;;  %2866 = vmatprep.mubr.f32.mxu0 %v7306_v22 }
 0x33f   : > { %3315 = vmatprep.mubr.f32.mxu1 %v7306_v22  ;;  %v2576_v44 = vpop.f32.mrf.mxu0  ;;  %v3025_v32 = vpop.f32.mrf.mxu1 }
 0x340   : > { %3929 = vst [vmem:[%s5850_s13 + $0x1a8] sm:$0xff] %v3417_v42  ;;  %3931 = vst [vmem:[%s5850_s13 + $0x1b8] sm:$0xff] %v3419_v20  ;;  %v3424_v17 = vmax.f32 %v2575_v63, 0.0  ;;  %v3426_v7 = vmax.f32 %v3024_v50, 0.0  ;;  %v2577_v49 = vadd.f32 %v2576_v44, %v5923_v3  ;;  %v3026_v6 = vadd.f32 %v3025_v32, %v5923_v3  ;;  %v4715_v42 = vld [vmem:[#allocation2 + $0x1c8] sm:$0xff] }
 0x341   : > { %v2580_v11 = vpop.f32.mrf.mxu0  ;;  %2867 = vmatmul.mubr.f32.gmra.mxu0 %v4714_v46  ;;  %v3029_v38 = vpop.f32.mrf.mxu1  ;;  %3316 = vmatmul.mubr.f32.gmra.mxu1 %v4714_v46 }
 0x342   : > { %3936 = vst [vmem:[%s5850_s13 + $0x1e0] sm:$0xff] %v3424_v17  ;;  %3938 = vst [vmem:[%s5850_s13 + $0x1f0] sm:$0xff] %v3426_v7  ;;  %v3425_v53 = vmax.f32 %v2577_v49, 0.0  ;;  %v3427_v48 = vmax.f32 %v3026_v6, 0.0  ;;  %v2581_v35 = vadd.f32 %v2580_v11, %v5935_v31  ;;  %v3030_v41 = vadd.f32 %v3029_v38, %v5935_v31  ;;  %2872 = vmatprep.mubr.f32.mxu0 %v7306_v22  ;;  %v4716_v38 = vld [vmem:[#allocation2 + $0x1d0] sm:$0xff] }
 0x343   : > { %3321 = vmatprep.mubr.f32.mxu1 %v7306_v22  ;;  %v2582_v3 = vpop.f32.mrf.mxu0  ;;  %v3031_v60 = vpop.f32.mrf.mxu1 }
 0x344   : > { %3937 = vst [vmem:[%s5850_s13 + $0x1e8] sm:$0xff] %v3425_v53  ;;  %3939 = vst [vmem:[%s5850_s13 + $0x1f8] sm:$0xff] %v3427_v48  ;;  %v3432_v39 = vmax.f32 %v2581_v35, 0.0  ;;  %v3434_v1 = vmax.f32 %v3030_v41, 0.0  ;;  %v2583_v47 = vadd.f32 %v2582_v3, %v5935_v31  ;;  %v3032_v51 = vadd.f32 %v3031_v60, %v5935_v31 }
 0x345   : > { %v2586_v14 = vpop.f32.mrf.mxu0  ;;  %2873 = vmatmul.mubr.f32.gmra.mxu0 %v4715_v42  ;;  %v3035_v20 = vpop.f32.mrf.mxu1  ;;  %3322 = vmatmul.mubr.f32.gmra.mxu1 %v4715_v42  ;;  %v4717_v42 = vld [vmem:[#allocation2 + $0x1d8] sm:$0xff] }
 0x346   : > { %3944 = vst [vmem:[%s5850_s13 + $0x220] sm:$0xff] %v3432_v39  ;;  %3946 = vst [vmem:[%s5850_s13 + $0x230] sm:$0xff] %v3434_v1  ;;  %v3433_v63 = vmax.f32 %v2583_v47, 0.0  ;;  %v3435_v50 = vmax.f32 %v3032_v51, 0.0  ;;  %v2587_v44 = vadd.f32 %v2586_v14, %v5951_v59  ;;  %v3036_v32 = vadd.f32 %v3035_v20, %v5951_v59  ;;  %2878 = vmatprep.mubr.f32.mxu0 %v7306_v22 }
 0x347   : > { %3327 = vmatprep.mubr.f32.mxu1 %v7306_v22  ;;  %v2588_v31 = vpop.f32.mrf.mxu0  ;;  %v3037_v17 = vpop.f32.mrf.mxu1 }
 0x348   : > { %3945 = vst [vmem:[%s5850_s13 + $0x228] sm:$0xff] %v3433_v63  ;;  %3947 = vst [vmem:[%s5850_s13 + $0x238] sm:$0xff] %v3435_v50  ;;  %v3440_v7 = vmax.f32 %v2587_v44, 0.0  ;;  %v3442_v49 = vmax.f32 %v3036_v32, 0.0  ;;  %v2589_v6 = vadd.f32 %v2588_v31, %v5951_v59  ;;  %v3038_v11 = vadd.f32 %v3037_v17, %v5951_v59 }
 0x349   : > { %v2592_v46 = vpop.f32.mrf.mxu0  ;;  %2879 = vmatmul.mubr.f32.gmra.mxu0 %v4716_v38  ;;  %v3041_v53 = vpop.f32.mrf.mxu1  ;;  %3328 = vmatmul.mubr.f32.gmra.mxu1 %v4716_v38 }
 0x34a   : > { %3952 = vst [vmem:[%s5850_s13 + $0x260] sm:$0xff] %v3440_v7  ;;  %3954 = vst [vmem:[%s5850_s13 + $0x270] sm:$0xff] %v3442_v49  ;;  %v3441_v48 = vmax.f32 %v2589_v6, 0.0  ;;  %v3443_v35 = vmax.f32 %v3038_v11, 0.0  ;;  %v2593_v41 = vadd.f32 %v2592_v46, %v5965_v61  ;;  %v3042_v3 = vadd.f32 %v3041_v53, %v5965_v61  ;;  %2884 = vmatprep.mubr.f32.mxu0 %v7306_v22  ;;  %v4718_v46 = vld [vmem:[#allocation2 + $0x1e0] sm:$0xff] }
 0x34b   : > { %3333 = vmatprep.mubr.f32.mxu1 %v7306_v22  ;;  %v2594_v59 = vpop.f32.mrf.mxu0  ;;  %v3043_v60 = vpop.f32.mrf.mxu1 }
 0x34c   : > { %3953 = vst [vmem:[%s5850_s13 + $0x268] sm:$0xff] %v3441_v48  ;;  %3955 = vst [vmem:[%s5850_s13 + $0x278] sm:$0xff] %v3443_v35  ;;  %v3448_v39 = vmax.f32 %v2593_v41, 0.0  ;;  %v3450_v1 = vmax.f32 %v3042_v3, 0.0  ;;  %v2595_v47 = vadd.f32 %v2594_v59, %v5965_v61  ;;  %v3044_v51 = vadd.f32 %v3043_v60, %v5965_v61 }
 0x34d   : > { %v2598_v14 = vpop.f32.mrf.mxu0  ;;  %2885 = vmatmul.mubr.f32.gmra.mxu0 %v4717_v42  ;;  %v3047_v20 = vpop.f32.mrf.mxu1  ;;  %3334 = vmatmul.mubr.f32.gmra.mxu1 %v4717_v42 }
 0x34e   : > { %3960 = vst [vmem:[%s5850_s13 + $0x2a0] sm:$0xff] %v3448_v39  ;;  %3962 = vst [vmem:[%s5850_s13 + $0x2b0] sm:$0xff] %v3450_v1  ;;  %v3449_v63 = vmax.f32 %v2595_v47, 0.0  ;;  %v3451_v50 = vmax.f32 %v3044_v51, 0.0  ;;  %v2599_v44 = vadd.f32 %v2598_v14, %v5977_v13  ;;  %v3048_v32 = vadd.f32 %v3047_v20, %v5977_v13  ;;  %2890 = vmatprep.mubr.f32.mxu0 %v7306_v22  ;;  %v4719_v51 = vld [vmem:[#allocation2 + $0x1e8] sm:$0xff] }
 0x34f   : > { %3339 = vmatprep.mubr.f32.mxu1 %v7306_v22  ;;  %v2600_v61 = vpop.f32.mrf.mxu0  ;;  %v3049_v31 = vpop.f32.mrf.mxu1 }
 0x350   : > { %3961 = vst [vmem:[%s5850_s13 + $0x2a8] sm:$0xff] %v3449_v63  ;;  %3963 = vst [vmem:[%s5850_s13 + $0x2b8] sm:$0xff] %v3451_v50  ;;  %v3456_v17 = vmax.f32 %v2599_v44, 0.0  ;;  %v3458_v7 = vmax.f32 %v3048_v32, 0.0  ;;  %v2601_v49 = vadd.f32 %v2600_v61, %v5977_v13  ;;  %v3050_v6 = vadd.f32 %v3049_v31, %v5977_v13 }
 0x351   : > { %v2604_v11 = vpop.f32.mrf.mxu0  ;;  %2891 = vmatmul.mubr.f32.gmra.mxu0 %v4718_v46  ;;  %v3053_v38 = vpop.f32.mrf.mxu1  ;;  %3340 = vmatmul.mubr.f32.gmra.mxu1 %v4718_v46 }
 0x352   : > { %3968 = vst [vmem:[%s5850_s13 + $0x2e0] sm:$0xff] %v3456_v17  ;;  %3970 = vst [vmem:[%s5850_s13 + $0x2f0] sm:$0xff] %v3458_v7  ;;  %v3457_v53 = vmax.f32 %v2601_v49, 0.0  ;;  %v3459_v48 = vmax.f32 %v3050_v6, 0.0  ;;  %v2605_v35 = vadd.f32 %v2604_v11, %v5991_v5  ;;  %v3054_v41 = vadd.f32 %v3053_v38, %v5991_v5  ;;  %2896 = vmatprep.mubr.f32.mxu0 %v7306_v22  ;;  %v4720_v49 = vld [vmem:[#allocation2 + $0x1f0] sm:$0xff] }
 0x353   : > { %3345 = vmatprep.mubr.f32.mxu1 %v7306_v22  ;;  %v2606_v13 = vpop.f32.mrf.mxu0  ;;  %v3055_v3 = vpop.f32.mrf.mxu1 }
 0x354   : > { %3969 = vst [vmem:[%s5850_s13 + $0x2e8] sm:$0xff] %v3457_v53  ;;  %3971 = vst [vmem:[%s5850_s13 + $0x2f8] sm:$0xff] %v3459_v48  ;;  %v3464_v59 = vmax.f32 %v2605_v35, 0.0  ;;  %v3466_v60 = vmax.f32 %v3054_v41, 0.0  ;;  %v2607_v39 = vadd.f32 %v2606_v13, %v5991_v5  ;;  %v3056_v1 = vadd.f32 %v3055_v3, %v5991_v5 }
 0x355   : > { %v2610_v47 = vpop.f32.mrf.mxu0  ;;  %2897 = vmatmul.mubr.f32.gmra.mxu0 %v4719_v51  ;;  %v3059_v14 = vpop.f32.mrf.mxu1  ;;  %3346 = vmatmul.mubr.f32.gmra.mxu1 %v4719_v51 }
 0x356   : > { %3976 = vst [vmem:[%s5850_s13 + $0x320] sm:$0xff] %v3464_v59  ;;  %3978 = vst [vmem:[%s5850_s13 + $0x330] sm:$0xff] %v3466_v60  ;;  %v3465_v42 = vmax.f32 %v2607_v39, 0.0  ;;  %v3467_v20 = vmax.f32 %v3056_v1, 0.0  ;;  %v2611_v63 = vadd.f32 %v2610_v47, %v6003_v4  ;;  %v3060_v50 = vadd.f32 %v3059_v14, %v6003_v4  ;;  %2902 = vmatprep.mubr.f32.mxu0 %v7306_v22  ;;  %v4721_v60 = vld [vmem:[#allocation2 + $0x1f8] sm:$0xff] }
 0x357   : > { %3351 = vmatprep.mubr.f32.mxu1 %v7306_v22  ;;  %v2612_v5 = vpop.f32.mrf.mxu0  ;;  %v3061_v44 = vpop.f32.mrf.mxu1 }
 0x358   : > { %3977 = vst [vmem:[%s5850_s13 + $0x328] sm:$0xff] %v3465_v42  ;;  %3979 = vst [vmem:[%s5850_s13 + $0x338] sm:$0xff] %v3467_v20  ;;  %v3472_v32 = vmax.f32 %v2611_v63, 0.0  ;;  %v3474_v61 = vmax.f32 %v3060_v50, 0.0  ;;  %v2613_v31 = vadd.f32 %v2612_v5, %v6003_v4  ;;  %v3062_v17 = vadd.f32 %v3061_v44, %v6003_v4 }
 0x359   : > { %v2616_v7 = vpop.f32.mrf.mxu0  ;;  %2903 = vmatmul.mubr.f32.gmra.mxu0 %v4720_v49  ;;  %v3065_v6 = vpop.f32.mrf.mxu1  ;;  %3352 = vmatmul.mubr.f32.gmra.mxu1 %v4720_v49 }
 0x35a   : > { %3984 = vst [vmem:[%s5850_s13 + $0x360] sm:$0xff] %v3472_v32  ;;  %3986 = vst [vmem:[%s5850_s13 + $0x370] sm:$0xff] %v3474_v61  ;;  %v3473_v11 = vmax.f32 %v2613_v31, 0.0  ;;  %v3475_v46 = vmax.f32 %v3062_v17, 0.0  ;;  %v2617_v38 = vadd.f32 %v2616_v7, %v6017_v9  ;;  %v3066_v53 = vadd.f32 %v3065_v6, %v6017_v9  ;;  %2908 = vmatprep.mubr.f32.mxu0 %v7306_v22 }
 0x35b   : > { %3357 = vmatprep.mubr.f32.mxu1 %v7306_v22  ;;  %v2618_v4 = vpop.f32.mrf.mxu0  ;;  %v3067_v48 = vpop.f32.mrf.mxu1 }
 0x35c   : > { %3985 = vst [vmem:[%s5850_s13 + $0x368] sm:$0xff] %v3473_v11  ;;  %3987 = vst [vmem:[%s5850_s13 + $0x378] sm:$0xff] %v3475_v46  ;;  %v3480_v35 = vmax.f32 %v2617_v38, 0.0  ;;  %v3482_v41 = vmax.f32 %v3066_v53, 0.0  ;;  %v2619_v13 = vadd.f32 %v2618_v4, %v6017_v9  ;;  %v3068_v3 = vadd.f32 %v3067_v48, %v6017_v9 }
 0x35d   : > { %v2622_v59 = vpop.f32.mrf.mxu0  ;;  %2909 = vmatmul.mubr.f32.gmra.mxu0 %v4721_v60  ;;  %v3071_v39 = vpop.f32.mrf.mxu1  ;;  %3358 = vmatmul.mubr.f32.gmra.mxu1 %v4721_v60 }
 0x35e   : > { %3992 = vst [vmem:[%s5850_s13 + $0x3a0] sm:$0xff] %v3480_v35  ;;  %3994 = vst [vmem:[%s5850_s13 + $0x3b0] sm:$0xff] %v3482_v41  ;;  %v3481_v22 = vmax.f32 %v2619_v13, 0.0  ;;  %v3483_v1 = vmax.f32 %v3068_v3, 0.0  ;;  %v2623_v47 = vadd.f32 %v2622_v59, %v6029_v21  ;;  %v3072_v51 = vadd.f32 %v3071_v39, %v6029_v21 }
 0x35f   : > { %v2624_v14 = vpop.f32.mrf.mxu0  ;;  %v3073_v42 = vpop.f32.mrf.mxu1 }
 0x360   : > { %3993 = vst [vmem:[%s5850_s13 + $0x3a8] sm:$0xff] %v3481_v22  ;;  %3995 = vst [vmem:[%s5850_s13 + $0x3b8] sm:$0xff] %v3483_v1  ;;  %v3488_v9 = vmax.f32 %v2623_v47, 0.0  ;;  %v3490_v20 = vmax.f32 %v3072_v51, 0.0  ;;  %v2625_v63 = vadd.f32 %v2624_v14, %v6029_v21  ;;  %v3074_v50 = vadd.f32 %v3073_v42, %v6029_v21 }
 0x361   : > { %v2628_v5 = vpop.f32.mrf.mxu0  ;;  %v3077_v44 = vpop.f32.mrf.mxu1 }
 0x362   : > { %4000 = vst [vmem:[%s5850_s13 + $0x3e0] sm:$0xff] %v3488_v9  ;;  %4002 = vst [vmem:[%s5850_s13 + $0x3f0] sm:$0xff] %v3490_v20  ;;  %v3489_v32 = vmax.f32 %v2625_v63, 0.0  ;;  %v3491_v61 = vmax.f32 %v3074_v50, 0.0  ;;  %v2629_v31 = vadd.f32 %v2628_v5, %v6043_v19  ;;  %v3078_v17 = vadd.f32 %v3077_v44, %v6043_v19 }
 0x363   : > { %v2630_v7 = vpop.f32.mrf.mxu0  ;;  %v3079_v49 = vpop.f32.mrf.mxu1 }
 0x364   : > { %4001 = vst [vmem:[%s5850_s13 + $0x3e8] sm:$0xff] %v3489_v32  ;;  %4003 = vst [vmem:[%s5850_s13 + $0x3f8] sm:$0xff] %v3491_v61  ;;  %v3496_v6 = vmax.f32 %v2629_v31, 0.0  ;;  %v3498_v21 = vmax.f32 %v3078_v17, 0.0  ;;  %v2631_v11 = vadd.f32 %v2630_v7, %v6043_v19  ;;  %v3080_v46 = vadd.f32 %v3079_v49, %v6043_v19 }
 0x365   : > { %v2634_v38 = vpop.f32.mrf.mxu0  ;;  %v3083_v53 = vpop.f32.mrf.mxu1 }
 0x366   : > { %4008 = vst [vmem:[%s5850_s13 + $0x420] sm:$0xff] %v3496_v6  ;;  %4010 = vst [vmem:[%s5850_s13 + $0x430] sm:$0xff] %v3498_v21  ;;  %v3497_v4 = vmax.f32 %v2631_v11, 0.0  ;;  %v3499_v48 = vmax.f32 %v3080_v46, 0.0  ;;  %v2635_v35 = vadd.f32 %v2634_v38, %v6053_v45  ;;  %v3084_v41 = vadd.f32 %v3083_v53, %v6053_v45 }
 0x367   : > { %v2636_v13 = vpop.f32.mrf.mxu0  ;;  %v3085_v3 = vpop.f32.mrf.mxu1 }
 0x368   : > { %4009 = vst [vmem:[%s5850_s13 + $0x428] sm:$0xff] %v3497_v4  ;;  %4011 = vst [vmem:[%s5850_s13 + $0x438] sm:$0xff] %v3499_v48  ;;  %v3504_v59 = vmax.f32 %v2635_v35, 0.0  ;;  %v3506_v19 = vmax.f32 %v3084_v41, 0.0  ;;  %v2637_v60 = vadd.f32 %v2636_v13, %v6053_v45  ;;  %v3086_v39 = vadd.f32 %v3085_v3, %v6053_v45 }
 0x369   : > { %v2640_v22 = vpop.f32.mrf.mxu0  ;;  %v3089_v1 = vpop.f32.mrf.mxu1 }
 0x36a   : > { %4016 = vst [vmem:[%s5850_s13 + $0x460] sm:$0xff] %v3504_v59  ;;  %4018 = vst [vmem:[%s5850_s13 + $0x470] sm:$0xff] %v3506_v19  ;;  %v3505_v47 = vmax.f32 %v2637_v60, 0.0  ;;  %v3507_v51 = vmax.f32 %v3086_v39, 0.0  ;;  %v2641_v14 = vadd.f32 %v2640_v22, %v6063_v62  ;;  %v3090_v42 = vadd.f32 %v3089_v1, %v6063_v62 }
 0x36b   : > { %v2642_v9 = vpop.f32.mrf.mxu0  ;;  %v3091_v20 = vpop.f32.mrf.mxu1 }
 0x36c   : > { %4017 = vst [vmem:[%s5850_s13 + $0x468] sm:$0xff] %v3505_v47  ;;  %4019 = vst [vmem:[%s5850_s13 + $0x478] sm:$0xff] %v3507_v51  ;;  %v3512_v63 = vmax.f32 %v2641_v14, 0.0  ;;  %v3514_v45 = vmax.f32 %v3090_v42, 0.0  ;;  %v2643_v50 = vadd.f32 %v2642_v9, %v6063_v62  ;;  %v3092_v5 = vadd.f32 %v3091_v20, %v6063_v62 }
 0x36d   : > { %v2646_v44 = vpop.f32.mrf.mxu0  ;;  %v3095_v32 = vpop.f32.mrf.mxu1 }
 0x36e   : > { %4024 = vst [vmem:[%s5850_s13 + $0x4a0] sm:$0xff] %v3512_v63  ;;  %4026 = vst [vmem:[%s5850_s13 + $0x4b0] sm:$0xff] %v3514_v45  ;;  %v3513_v61 = vmax.f32 %v2643_v50, 0.0  ;;  %v3515_v31 = vmax.f32 %v3092_v5, 0.0  ;;  %v2647_v17 = vadd.f32 %v2646_v44, %v6075_v26  ;;  %v3096_v7 = vadd.f32 %v3095_v32, %v6075_v26 }
 0x36f   : > { %v2648_v49 = vpop.f32.mrf.mxu0  ;;  %v3097_v6 = vpop.f32.mrf.mxu1 }
 0x370   : > { %4025 = vst [vmem:[%s5850_s13 + $0x4a8] sm:$0xff] %v3513_v61  ;;  %4027 = vst [vmem:[%s5850_s13 + $0x4b8] sm:$0xff] %v3515_v31  ;;  %v3520_v21 = vmax.f32 %v2647_v17, 0.0  ;;  %v3522_v62 = vmax.f32 %v3096_v7, 0.0  ;;  %v2649_v11 = vadd.f32 %v2648_v49, %v6075_v26  ;;  %v3098_v46 = vadd.f32 %v3097_v6, %v6075_v26 }
 0x371   : > { %v2652_v38 = vpop.f32.mrf.mxu0  ;;  %v3101_v53 = vpop.f32.mrf.mxu1 }
 0x372   : > { %4032 = vst [vmem:[%s5850_s13 + $0x4e0] sm:$0xff] %v3520_v21  ;;  %4034 = vst [vmem:[%s5850_s13 + $0x4f0] sm:$0xff] %v3522_v62  ;;  %v3521_v4 = vmax.f32 %v2649_v11, 0.0  ;;  %v3523_v48 = vmax.f32 %v3098_v46, 0.0  ;;  %v2653_v35 = vadd.f32 %v2652_v38, %v6087_v56  ;;  %v3102_v41 = vadd.f32 %v3101_v53, %v6087_v56 }
 0x373   : > { %v2654_v13 = vpop.f32.mrf.mxu0  ;;  %v3103_v3 = vpop.f32.mrf.mxu1 }
 0x374   : > { %4033 = vst [vmem:[%s5850_s13 + $0x4e8] sm:$0xff] %v3521_v4  ;;  %4035 = vst [vmem:[%s5850_s13 + $0x4f8] sm:$0xff] %v3523_v48  ;;  %v3528_v59 = vmax.f32 %v2653_v35, 0.0  ;;  %v3530_v26 = vmax.f32 %v3102_v41, 0.0  ;;  %v2655_v19 = vadd.f32 %v2654_v13, %v6087_v56  ;;  %v3104_v60 = vadd.f32 %v3103_v3, %v6087_v56 }
 0x375   : > { %v2658_v39 = vpop.f32.mrf.mxu0  ;;  %v3107_v22 = vpop.f32.mrf.mxu1 }
 0x376   : > { %4040 = vst [vmem:[%s5850_s13 + $0x520] sm:$0xff] %v3528_v59  ;;  %4042 = vst [vmem:[%s5850_s13 + $0x530] sm:$0xff] %v3530_v26  ;;  %v3529_v1 = vmax.f32 %v2655_v19, 0.0  ;;  %v3531_v47 = vmax.f32 %v3104_v60, 0.0  ;;  %v2659_v51 = vadd.f32 %v2658_v39, %v6099_v36  ;;  %v3108_v14 = vadd.f32 %v3107_v22, %v6099_v36 }
 0x377   : > { %v2660_v42 = vpop.f32.mrf.mxu0  ;;  %v3109_v9 = vpop.f32.mrf.mxu1 }
 0x378   : > { %4041 = vst [vmem:[%s5850_s13 + $0x528] sm:$0xff] %v3529_v1  ;;  %4043 = vst [vmem:[%s5850_s13 + $0x538] sm:$0xff] %v3531_v47  ;;  %v3536_v20 = vmax.f32 %v2659_v51, 0.0  ;;  %v3538_v56 = vmax.f32 %v3108_v14, 0.0  ;;  %v2661_v63 = vadd.f32 %v2660_v42, %v6099_v36  ;;  %v3110_v45 = vadd.f32 %v3109_v9, %v6099_v36 }
 0x379   : > { %v2664_v50 = vpop.f32.mrf.mxu0  ;;  %v3113_v5 = vpop.f32.mrf.mxu1 }
 0x37a   : > { %4048 = vst [vmem:[%s5850_s13 + $0x560] sm:$0xff] %v3536_v20  ;;  %4050 = vst [vmem:[%s5850_s13 + $0x570] sm:$0xff] %v3538_v56  ;;  %v3537_v44 = vmax.f32 %v2661_v63, 0.0  ;;  %v3539_v32 = vmax.f32 %v3110_v45, 0.0  ;;  %v2665_v61 = vadd.f32 %v2664_v50, %v6111_v18  ;;  %v3114_v31 = vadd.f32 %v3113_v5, %v6111_v18 }
 0x37b   : > { %v2666_v17 = vpop.f32.mrf.mxu0  ;;  %v3115_v7 = vpop.f32.mrf.mxu1 }
 0x37c   : > { %4049 = vst [vmem:[%s5850_s13 + $0x568] sm:$0xff] %v3537_v44  ;;  %4051 = vst [vmem:[%s5850_s13 + $0x578] sm:$0xff] %v3539_v32  ;;  %v3544_v49 = vmax.f32 %v2665_v61, 0.0  ;;  %v3546_v36 = vmax.f32 %v3114_v31, 0.0  ;;  %v2667_v6 = vadd.f32 %v2666_v17, %v6111_v18  ;;  %v3116_v21 = vadd.f32 %v3115_v7, %v6111_v18 }
 0x37d   : > { %v2670_v62 = vpop.f32.mrf.mxu0  ;;  %v3119_v11 = vpop.f32.mrf.mxu1 }
 0x37e   : > { %4056 = vst [vmem:[%s5850_s13 + $0x5a0] sm:$0xff] %v3544_v49  ;;  %4058 = vst [vmem:[%s5850_s13 + $0x5b0] sm:$0xff] %v3546_v36  ;;  %v3545_v46 = vmax.f32 %v2667_v6, 0.0  ;;  %v3547_v38 = vmax.f32 %v3116_v21, 0.0  ;;  %v2671_v53 = vadd.f32 %v2670_v62, %v6123_v55  ;;  %v3120_v4 = vadd.f32 %v3119_v11, %v6123_v55 }
 0x37f   : > { %v2672_v48 = vpop.f32.mrf.mxu0  ;;  %v3121_v35 = vpop.f32.mrf.mxu1 }
 0x380   : > { %4057 = vst [vmem:[%s5850_s13 + $0x5a8] sm:$0xff] %v3545_v46  ;;  %4059 = vst [vmem:[%s5850_s13 + $0x5b8] sm:$0xff] %v3547_v38  ;;  %v3552_v41 = vmax.f32 %v2671_v53, 0.0  ;;  %v3554_v18 = vmax.f32 %v3120_v4, 0.0  ;;  %v2673_v13 = vadd.f32 %v2672_v48, %v6123_v55  ;;  %v3122_v3 = vadd.f32 %v3121_v35, %v6123_v55 }
 0x381   : > { %v2676_v59 = vpop.f32.mrf.mxu0  ;;  %v3125_v26 = vpop.f32.mrf.mxu1 }
 0x382   : > { %4064 = vst [vmem:[%s5850_s13 + $0x5e0] sm:$0xff] %v3552_v41  ;;  %4066 = vst [vmem:[%s5850_s13 + $0x5f0] sm:$0xff] %v3554_v18  ;;  %v3553_v19 = vmax.f32 %v2673_v13, 0.0  ;;  %v3555_v60 = vmax.f32 %v3122_v3, 0.0  ;;  %v2677_v39 = vadd.f32 %v2676_v59, %v6135_v2  ;;  %v3126_v22 = vadd.f32 %v3125_v26, %v6135_v2 }
 0x383   : > { %v2678_v1 = vpop.f32.mrf.mxu0  ;;  %v3127_v47 = vpop.f32.mrf.mxu1 }
 0x384   : > { %4065 = vst [vmem:[%s5850_s13 + $0x5e8] sm:$0xff] %v3553_v19  ;;  %4067 = vst [vmem:[%s5850_s13 + $0x5f8] sm:$0xff] %v3555_v60  ;;  %v3560_v51 = vmax.f32 %v2677_v39, 0.0  ;;  %v3562_v55 = vmax.f32 %v3126_v22, 0.0  ;;  %v2679_v14 = vadd.f32 %v2678_v1, %v6135_v2  ;;  %v3128_v42 = vadd.f32 %v3127_v47, %v6135_v2 }
 0x385   : > { %v2682_v9 = vpop.f32.mrf.mxu0  ;;  %v3131_v20 = vpop.f32.mrf.mxu1 }
 0x386   : > { %4072 = vst [vmem:[%s5850_s13 + $0x620] sm:$0xff] %v3560_v51  ;;  %4074 = vst [vmem:[%s5850_s13 + $0x630] sm:$0xff] %v3562_v55  ;;  %v3561_v56 = vmax.f32 %v2679_v14, 0.0  ;;  %v3563_v63 = vmax.f32 %v3128_v42, 0.0  ;;  %v2683_v45 = vadd.f32 %v2682_v9, %v6147_v10  ;;  %v3132_v50 = vadd.f32 %v3131_v20, %v6147_v10 }
 0x387   : > { %v2684_v5 = vpop.f32.mrf.mxu0  ;;  %v3133_v44 = vpop.f32.mrf.mxu1 }
 0x388   : > { %4073 = vst [vmem:[%s5850_s13 + $0x628] sm:$0xff] %v3561_v56  ;;  %4075 = vst [vmem:[%s5850_s13 + $0x638] sm:$0xff] %v3563_v63  ;;  %v3568_v32 = vmax.f32 %v2683_v45, 0.0  ;;  %v3570_v2 = vmax.f32 %v3132_v50, 0.0  ;;  %v2685_v61 = vadd.f32 %v2684_v5, %v6147_v10  ;;  %v3134_v31 = vadd.f32 %v3133_v44, %v6147_v10 }
 0x389   : > { %v2688_v17 = vpop.f32.mrf.mxu0  ;;  %v3137_v7 = vpop.f32.mrf.mxu1 }
 0x38a   : > { %4080 = vst [vmem:[%s5850_s13 + $0x660] sm:$0xff] %v3568_v32  ;;  %4082 = vst [vmem:[%s5850_s13 + $0x670] sm:$0xff] %v3570_v2  ;;  %v3569_v49 = vmax.f32 %v2685_v61, 0.0  ;;  %v3571_v36 = vmax.f32 %v3134_v31, 0.0  ;;  %v2689_v6 = vadd.f32 %v2688_v17, %v6159_v15  ;;  %v3138_v21 = vadd.f32 %v3137_v7, %v6159_v15 }
 0x38b   : > { %v2690_v62 = vpop.f32.mrf.mxu0  ;;  %v3139_v11 = vpop.f32.mrf.mxu1 }
 0x38c   : > { %4081 = vst [vmem:[%s5850_s13 + $0x668] sm:$0xff] %v3569_v49  ;;  %4083 = vst [vmem:[%s5850_s13 + $0x678] sm:$0xff] %v3571_v36  ;;  %v3576_v46 = vmax.f32 %v2689_v6, 0.0  ;;  %v3578_v10 = vmax.f32 %v3138_v21, 0.0  ;;  %v2691_v38 = vadd.f32 %v2690_v62, %v6159_v15  ;;  %v3140_v53 = vadd.f32 %v3139_v11, %v6159_v15 }
 0x38d   : > { %v2694_v4 = vpop.f32.mrf.mxu0  ;;  %v3143_v48 = vpop.f32.mrf.mxu1 }
 0x38e   : > { %4088 = vst [vmem:[%s5850_s13 + $0x6a0] sm:$0xff] %v3576_v46  ;;  %4090 = vst [vmem:[%s5850_s13 + $0x6b0] sm:$0xff] %v3578_v10  ;;  %v3577_v35 = vmax.f32 %v2691_v38, 0.0  ;;  %v3579_v41 = vmax.f32 %v3140_v53, 0.0  ;;  %v2695_v18 = vadd.f32 %v2694_v4, %v6171_v0  ;;  %v3144_v13 = vadd.f32 %v3143_v48, %v6171_v0 }
 0x38f   : > { %v2696_v3 = vpop.f32.mrf.mxu0  ;;  %v3145_v59 = vpop.f32.mrf.mxu1 }
 0x390   : > { %4089 = vst [vmem:[%s5850_s13 + $0x6a8] sm:$0xff] %v3577_v35  ;;  %4091 = vst [vmem:[%s5850_s13 + $0x6b8] sm:$0xff] %v3579_v41  ;;  %v3584_v26 = vmax.f32 %v2695_v18, 0.0  ;;  %v3586_v15 = vmax.f32 %v3144_v13, 0.0  ;;  %v2697_v19 = vadd.f32 %v2696_v3, %v6171_v0  ;;  %v3146_v60 = vadd.f32 %v3145_v59, %v6171_v0 }
 0x391   : > { %v2700_v39 = vpop.f32.mrf.mxu0  ;;  %v3149_v22 = vpop.f32.mrf.mxu1 }
 0x392   : > { %4096 = vst [vmem:[%s5850_s13 + $0x6e0] sm:$0xff] %v3584_v26  ;;  %4098 = vst [vmem:[%s5850_s13 + $0x6f0] sm:$0xff] %v3586_v15  ;;  %v3585_v1 = vmax.f32 %v2697_v19, 0.0  ;;  %v3587_v47 = vmax.f32 %v3146_v60, 0.0  ;;  %v2701_v51 = vadd.f32 %v2700_v39, %v6183_v8  ;;  %v3150_v55 = vadd.f32 %v3149_v22, %v6183_v8 }
 0x393   : > { %v2702_v14 = vpop.f32.mrf.mxu0  ;;  %v3151_v42 = vpop.f32.mrf.mxu1 }
 0x394   : > { %4097 = vst [vmem:[%s5850_s13 + $0x6e8] sm:$0xff] %v3585_v1  ;;  %4099 = vst [vmem:[%s5850_s13 + $0x6f8] sm:$0xff] %v3587_v47  ;;  %v3592_v9 = vmax.f32 %v2701_v51, 0.0  ;;  %v3594_v0 = vmax.f32 %v3150_v55, 0.0  ;;  %v2703_v20 = vadd.f32 %v2702_v14, %v6183_v8  ;;  %v3152_v56 = vadd.f32 %v3151_v42, %v6183_v8 }
 0x395   : > { %v2706_v63 = vpop.f32.mrf.mxu0  ;;  %v3155_v45 = vpop.f32.mrf.mxu1 }
 0x396   : > { %4104 = vst [vmem:[%s5850_s13 + $0x720] sm:$0xff] %v3592_v9  ;;  %4106 = vst [vmem:[%s5850_s13 + $0x730] sm:$0xff] %v3594_v0  ;;  %v3593_v50 = vmax.f32 %v2703_v20, 0.0  ;;  %v3595_v5 = vmax.f32 %v3152_v56, 0.0  ;;  %v2707_v44 = vadd.f32 %v2706_v63, %v6195_v57  ;;  %v3156_v32 = vadd.f32 %v3155_v45, %v6195_v57 }
 0x397   : > { %v2708_v2 = vpop.f32.mrf.mxu0  ;;  %v3157_v61 = vpop.f32.mrf.mxu1 }
 0x398   : > { %4105 = vst [vmem:[%s5850_s13 + $0x728] sm:$0xff] %v3593_v50  ;;  %4107 = vst [vmem:[%s5850_s13 + $0x738] sm:$0xff] %v3595_v5  ;;  %v3600_v31 = vmax.f32 %v2707_v44, 0.0  ;;  %v3602_v8 = vmax.f32 %v3156_v32, 0.0  ;;  %v2709_v17 = vadd.f32 %v2708_v2, %v6195_v57  ;;  %v3158_v7 = vadd.f32 %v3157_v61, %v6195_v57 }
 0x399   : > { %v2712_v49 = vpop.f32.mrf.mxu0  ;;  %v3161_v36 = vpop.f32.mrf.mxu1 }
 0x39a   : > { %4112 = vst [vmem:[%s5850_s13 + $0x760] sm:$0xff] %v3600_v31  ;;  %4114 = vst [vmem:[%s5850_s13 + $0x770] sm:$0xff] %v3602_v8  ;;  %v3601_v6 = vmax.f32 %v2709_v17, 0.0  ;;  %v3603_v21 = vmax.f32 %v3158_v7, 0.0  ;;  %v2713_v62 = vadd.f32 %v2712_v49, %v6207_v24  ;;  %v3162_v11 = vadd.f32 %v3161_v36, %v6207_v24 }
 0x39b   : > { %v2714_v46 = vpop.f32.mrf.mxu0  ;;  %v3163_v10 = vpop.f32.mrf.mxu1 }
 0x39c   : > { %4113 = vst [vmem:[%s5850_s13 + $0x768] sm:$0xff] %v3601_v6  ;;  %4115 = vst [vmem:[%s5850_s13 + $0x778] sm:$0xff] %v3603_v21  ;;  %v3608_v38 = vmax.f32 %v2713_v62, 0.0  ;;  %v3610_v57 = vmax.f32 %v3162_v11, 0.0  ;;  %v2715_v53 = vadd.f32 %v2714_v46, %v6207_v24  ;;  %v3164_v4 = vadd.f32 %v3163_v10, %v6207_v24 }
 0x39d   : > { %v2718_v48 = vpop.f32.mrf.mxu0  ;;  %v3167_v35 = vpop.f32.mrf.mxu1 }
 0x39e   : > { %4120 = vst [vmem:[%s5850_s13 + $0x7a0] sm:$0xff] %v3608_v38  ;;  %4122 = vst [vmem:[%s5850_s13 + $0x7b0] sm:$0xff] %v3610_v57  ;;  %v3609_v41 = vmax.f32 %v2715_v53, 0.0  ;;  %v3611_v18 = vmax.f32 %v3164_v4, 0.0  ;;  %v2719_v13 = vadd.f32 %v2718_v48, %v6219_v33  ;;  %v3168_v3 = vadd.f32 %v3167_v35, %v6219_v33 }
 0x39f   : > { %v2720_v59 = vpop.f32.mrf.mxu0  ;;  %v3169_v26 = vpop.f32.mrf.mxu1 }
 0x3a0   : > { %4121 = vst [vmem:[%s5850_s13 + $0x7a8] sm:$0xff] %v3609_v41  ;;  %4123 = vst [vmem:[%s5850_s13 + $0x7b8] sm:$0xff] %v3611_v18  ;;  %v3616_v15 = vmax.f32 %v2719_v13, 0.0  ;;  %v3618_v24 = vmax.f32 %v3168_v3, 0.0  ;;  %v2721_v19 = vadd.f32 %v2720_v59, %v6219_v33  ;;  %v3170_v60 = vadd.f32 %v3169_v26, %v6219_v33 }
 0x3a1   : > { %v2724_v39 = vpop.f32.mrf.mxu0  ;;  %v3173_v22 = vpop.f32.mrf.mxu1 }
 0x3a2   : > { %4128 = vst [vmem:[%s5850_s13 + $0x7e0] sm:$0xff] %v3616_v15  ;;  %4130 = vst [vmem:[%s5850_s13 + $0x7f0] sm:$0xff] %v3618_v24  ;;  %v3617_v1 = vmax.f32 %v2721_v19, 0.0  ;;  %v3619_v47 = vmax.f32 %v3170_v60, 0.0  ;;  %v2725_v51 = vadd.f32 %v2724_v39, %v6231_v23  ;;  %v3174_v55 = vadd.f32 %v3173_v22, %v6231_v23 }
 0x3a3   : > { %v2726_v14 = vpop.f32.mrf.mxu0  ;;  %v3175_v42 = vpop.f32.mrf.mxu1 }
 0x3a4   : > { %4129 = vst [vmem:[%s5850_s13 + $0x7e8] sm:$0xff] %v3617_v1  ;;  %4131 = vst [vmem:[%s5850_s13 + $0x7f8] sm:$0xff] %v3619_v47  ;;  %v3624_v9 = vmax.f32 %v2725_v51, 0.0  ;;  %v3626_v33 = vmax.f32 %v3174_v55, 0.0  ;;  %v2727_v0 = vadd.f32 %v2726_v14, %v6231_v23  ;;  %v3176_v20 = vadd.f32 %v3175_v42, %v6231_v23 }
 0x3a5   : > { %v2730_v56 = vpop.f32.mrf.mxu0  ;;  %v3179_v63 = vpop.f32.mrf.mxu1 }
 0x3a6   : > { %4136 = vst [vmem:[%s5850_s13 + $0x820] sm:$0xff] %v3624_v9  ;;  %4138 = vst [vmem:[%s5850_s13 + $0x830] sm:$0xff] %v3626_v33  ;;  %v3625_v45 = vmax.f32 %v2727_v0, 0.0  ;;  %v3627_v50 = vmax.f32 %v3176_v20, 0.0  ;;  %v2731_v5 = vadd.f32 %v2730_v56, %v6243_v16  ;;  %v3180_v44 = vadd.f32 %v3179_v63, %v6243_v16 }
 0x3a7   : > { %v2732_v32 = vpop.f32.mrf.mxu0  ;;  %v3181_v2 = vpop.f32.mrf.mxu1 }
 0x3a8   : > { %4137 = vst [vmem:[%s5850_s13 + $0x828] sm:$0xff] %v3625_v45  ;;  %4139 = vst [vmem:[%s5850_s13 + $0x838] sm:$0xff] %v3627_v50  ;;  %v3632_v61 = vmax.f32 %v2731_v5, 0.0  ;;  %v3634_v23 = vmax.f32 %v3180_v44, 0.0  ;;  %v2733_v31 = vadd.f32 %v2732_v32, %v6243_v16  ;;  %v3182_v8 = vadd.f32 %v3181_v2, %v6243_v16 }
 0x3a9   : > { %v2736_v17 = vpop.f32.mrf.mxu0  ;;  %v3185_v7 = vpop.f32.mrf.mxu1 }
 0x3aa   : > { %4144 = vst [vmem:[%s5850_s13 + $0x860] sm:$0xff] %v3632_v61  ;;  %4146 = vst [vmem:[%s5850_s13 + $0x870] sm:$0xff] %v3634_v23  ;;  %v3633_v49 = vmax.f32 %v2733_v31, 0.0  ;;  %v3635_v36 = vmax.f32 %v3182_v8, 0.0  ;;  %v2737_v6 = vadd.f32 %v2736_v17, %v6255_v29  ;;  %v3186_v21 = vadd.f32 %v3185_v7, %v6255_v29 }
 0x3ab   : > { %v2738_v62 = vpop.f32.mrf.mxu0  ;;  %v3187_v11 = vpop.f32.mrf.mxu1 }
 0x3ac   : > { %4145 = vst [vmem:[%s5850_s13 + $0x868] sm:$0xff] %v3633_v49  ;;  %4147 = vst [vmem:[%s5850_s13 + $0x878] sm:$0xff] %v3635_v36  ;;  %v3640_v46 = vmax.f32 %v2737_v6, 0.0  ;;  %v3642_v16 = vmax.f32 %v3186_v21, 0.0  ;;  %v2739_v10 = vadd.f32 %v2738_v62, %v6255_v29  ;;  %v3188_v38 = vadd.f32 %v3187_v11, %v6255_v29 }
 0x3ad   : > { %v2742_v57 = vpop.f32.mrf.mxu0  ;;  %v3191_v53 = vpop.f32.mrf.mxu1 }
 0x3ae   : > { %4152 = vst [vmem:[%s5850_s13 + $0x8a0] sm:$0xff] %v3640_v46  ;;  %4154 = vst [vmem:[%s5850_s13 + $0x8b0] sm:$0xff] %v3642_v16  ;;  %v3641_v4 = vmax.f32 %v2739_v10, 0.0  ;;  %v3643_v48 = vmax.f32 %v3188_v38, 0.0  ;;  %v2743_v35 = vadd.f32 %v2742_v57, %v6267_v27  ;;  %v3192_v41 = vadd.f32 %v3191_v53, %v6267_v27 }
 0x3af   : > { %v2744_v18 = vpop.f32.mrf.mxu0  ;;  %v3193_v13 = vpop.f32.mrf.mxu1 }
 0x3b0   : > { %4153 = vst [vmem:[%s5850_s13 + $0x8a8] sm:$0xff] %v3641_v4  ;;  %4155 = vst [vmem:[%s5850_s13 + $0x8b8] sm:$0xff] %v3643_v48  ;;  %v3648_v3 = vmax.f32 %v2743_v35, 0.0  ;;  %v3650_v29 = vmax.f32 %v3192_v41, 0.0  ;;  %v2745_v59 = vadd.f32 %v2744_v18, %v6267_v27  ;;  %v3194_v26 = vadd.f32 %v3193_v13, %v6267_v27 }
 0x3b1   : > { %v2748_v15 = vpop.f32.mrf.mxu0  ;;  %v3197_v24 = vpop.f32.mrf.mxu1 }
 0x3b2   : > { %4160 = vst [vmem:[%s5850_s13 + $0x8e0] sm:$0xff] %v3648_v3  ;;  %4162 = vst [vmem:[%s5850_s13 + $0x8f0] sm:$0xff] %v3650_v29  ;;  %v3649_v19 = vmax.f32 %v2745_v59, 0.0  ;;  %v3651_v60 = vmax.f32 %v3194_v26, 0.0  ;;  %v2749_v39 = vadd.f32 %v2748_v15, %v6279_v30  ;;  %v3198_v22 = vadd.f32 %v3197_v24, %v6279_v30 }
 0x3b3   : > { %v2750_v1 = vpop.f32.mrf.mxu0  ;;  %v3199_v47 = vpop.f32.mrf.mxu1 }
 0x3b4   : > { %4161 = vst [vmem:[%s5850_s13 + $0x8e8] sm:$0xff] %v3649_v19  ;;  %4163 = vst [vmem:[%s5850_s13 + $0x8f8] sm:$0xff] %v3651_v60  ;;  %v3656_v51 = vmax.f32 %v2749_v39, 0.0  ;;  %v3658_v27 = vmax.f32 %v3198_v22, 0.0  ;;  %v2751_v55 = vadd.f32 %v2750_v1, %v6279_v30  ;;  %v3200_v14 = vadd.f32 %v3199_v47, %v6279_v30 }
 0x3b5   : > { %v2754_v42 = vpop.f32.mrf.mxu0  ;;  %v3203_v9 = vpop.f32.mrf.mxu1 }
 0x3b6   : > { %4168 = vst [vmem:[%s5850_s13 + $0x920] sm:$0xff] %v3656_v51  ;;  %4170 = vst [vmem:[%s5850_s13 + $0x930] sm:$0xff] %v3658_v27  ;;  %v3657_v33 = vmax.f32 %v2751_v55, 0.0  ;;  %v3659_v0 = vmax.f32 %v3200_v14, 0.0  ;;  %v2755_v20 = vadd.f32 %v2754_v42, %v6291_v12  ;;  %v3204_v56 = vadd.f32 %v3203_v9, %v6291_v12 }
 0x3b7   : > { %v2756_v63 = vpop.f32.mrf.mxu0  ;;  %v3205_v45 = vpop.f32.mrf.mxu1 }
 0x3b8   : > { %4169 = vst [vmem:[%s5850_s13 + $0x928] sm:$0xff] %v3657_v33  ;;  %4171 = vst [vmem:[%s5850_s13 + $0x938] sm:$0xff] %v3659_v0  ;;  %v3664_v50 = vmax.f32 %v2755_v20, 0.0  ;;  %v3666_v30 = vmax.f32 %v3204_v56, 0.0  ;;  %v2757_v5 = vadd.f32 %v2756_v63, %v6291_v12  ;;  %v3206_v44 = vadd.f32 %v3205_v45, %v6291_v12 }
 0x3b9   : > { %v2760_v32 = vpop.f32.mrf.mxu0  ;;  %v3209_v2 = vpop.f32.mrf.mxu1 }
 0x3ba   : > { %4176 = vst [vmem:[%s5850_s13 + $0x960] sm:$0xff] %v3664_v50  ;;  %4178 = vst [vmem:[%s5850_s13 + $0x970] sm:$0xff] %v3666_v30  ;;  %v3665_v61 = vmax.f32 %v2757_v5, 0.0  ;;  %v3667_v23 = vmax.f32 %v3206_v44, 0.0  ;;  %v2761_v31 = vadd.f32 %v2760_v32, %v6303_v54  ;;  %v3210_v8 = vadd.f32 %v3209_v2, %v6303_v54 }
 0x3bb   : > { %v2762_v17 = vpop.f32.mrf.mxu0  ;;  %v3211_v7 = vpop.f32.mrf.mxu1 }
 0x3bc   : > { %4177 = vst [vmem:[%s5850_s13 + $0x968] sm:$0xff] %v3665_v61  ;;  %4179 = vst [vmem:[%s5850_s13 + $0x978] sm:$0xff] %v3667_v23  ;;  %v3672_v49 = vmax.f32 %v2761_v31, 0.0  ;;  %v3674_v12 = vmax.f32 %v3210_v8, 0.0  ;;  %v2763_v36 = vadd.f32 %v2762_v17, %v6303_v54  ;;  %v3212_v6 = vadd.f32 %v3211_v7, %v6303_v54 }
 0x3bd   : > { %v2766_v21 = vpop.f32.mrf.mxu0  ;;  %v3215_v62 = vpop.f32.mrf.mxu1 }
 0x3be   : > { %4184 = vst [vmem:[%s5850_s13 + $0x9a0] sm:$0xff] %v3672_v49  ;;  %4186 = vst [vmem:[%s5850_s13 + $0x9b0] sm:$0xff] %v3674_v12  ;;  %v3673_v11 = vmax.f32 %v2763_v36, 0.0  ;;  %v3675_v46 = vmax.f32 %v3212_v6, 0.0  ;;  %v2767_v16 = vadd.f32 %v2766_v21, %v6315_v58  ;;  %v3216_v10 = vadd.f32 %v3215_v62, %v6315_v58 }
 0x3bf   : > { %v2768_v38 = vpop.f32.mrf.mxu0  ;;  %v3217_v57 = vpop.f32.mrf.mxu1 }
 0x3c0   : > { %4185 = vst [vmem:[%s5850_s13 + $0x9a8] sm:$0xff] %v3673_v11  ;;  %4187 = vst [vmem:[%s5850_s13 + $0x9b8] sm:$0xff] %v3675_v46  ;;  %v3680_v53 = vmax.f32 %v2767_v16, 0.0  ;;  %v3682_v54 = vmax.f32 %v3216_v10, 0.0  ;;  %v2769_v4 = vadd.f32 %v2768_v38, %v6315_v58  ;;  %v3218_v48 = vadd.f32 %v3217_v57, %v6315_v58 }
 0x3c1   : > { %v2772_v35 = vpop.f32.mrf.mxu0  ;;  %v3221_v41 = vpop.f32.mrf.mxu1 }
 0x3c2   : > { %4192 = vst [vmem:[%s5850_s13 + $0x9e0] sm:$0xff] %v3680_v53  ;;  %4194 = vst [vmem:[%s5850_s13 + $0x9f0] sm:$0xff] %v3682_v54  ;;  %v3681_v18 = vmax.f32 %v2769_v4, 0.0  ;;  %v3683_v13 = vmax.f32 %v3218_v48, 0.0  ;;  %v2773_v3 = vadd.f32 %v2772_v35, %v6327_v40  ;;  %v3222_v29 = vadd.f32 %v3221_v41, %v6327_v40 }
 0x3c3   : > { %v2774_v59 = vpop.f32.mrf.mxu0  ;;  %v3223_v26 = vpop.f32.mrf.mxu1 }
 0x3c4   : > { %4193 = vst [vmem:[%s5850_s13 + $0x9e8] sm:$0xff] %v3681_v18  ;;  %4195 = vst [vmem:[%s5850_s13 + $0x9f8] sm:$0xff] %v3683_v13  ;;  %v3688_v15 = vmax.f32 %v2773_v3, 0.0  ;;  %v3690_v58 = vmax.f32 %v3222_v29, 0.0  ;;  %v2775_v24 = vadd.f32 %v2774_v59, %v6327_v40  ;;  %v3224_v19 = vadd.f32 %v3223_v26, %v6327_v40 }
 0x3c5   : > { %v2778_v60 = vpop.f32.mrf.mxu0  ;;  %v3227_v39 = vpop.f32.mrf.mxu1 }
 0x3c6   : > { %4200 = vst [vmem:[%s5850_s13 + $0xa20] sm:$0xff] %v3688_v15  ;;  %4202 = vst [vmem:[%s5850_s13 + $0xa30] sm:$0xff] %v3690_v58  ;;  %v3689_v22 = vmax.f32 %v2775_v24, 0.0  ;;  %v3691_v1 = vmax.f32 %v3224_v19, 0.0  ;;  %v2779_v47 = vadd.f32 %v2778_v60, %v6339_v28  ;;  %v3228_v51 = vadd.f32 %v3227_v39, %v6339_v28 }
 0x3c7   : > { %v2780_v27 = vpop.f32.mrf.mxu0  ;;  %v3229_v55 = vpop.f32.mrf.mxu1 }
 0x3c8   : > { %4201 = vst [vmem:[%s5850_s13 + $0xa28] sm:$0xff] %v3689_v22  ;;  %4203 = vst [vmem:[%s5850_s13 + $0xa38] sm:$0xff] %v3691_v1  ;;  %v3696_v14 = vmax.f32 %v2779_v47, 0.0  ;;  %v3698_v40 = vmax.f32 %v3228_v51, 0.0  ;;  %v2781_v42 = vadd.f32 %v2780_v27, %v6339_v28  ;;  %v3230_v9 = vadd.f32 %v3229_v55, %v6339_v28  ;;  %v7338_v22 = vld [vmem:[#allocation20_spill] sm:$0xff] }
 0x3c9   : > { %v2784_v33 = vpop.f32.mrf.mxu0  ;;  %v3233_v0 = vpop.f32.mrf.mxu1 }
 0x3ca   : > { %4208 = vst [vmem:[%s5850_s13 + $0xa60] sm:$0xff] %v3696_v14  ;;  %4210 = vst [vmem:[%s5850_s13 + $0xa70] sm:$0xff] %v3698_v40  ;;  %v3697_v20 = vmax.f32 %v2781_v42, 0.0  ;;  %v3699_v56 = vmax.f32 %v3230_v9, 0.0  ;;  %v2785_v63 = vadd.f32 %v2784_v33, %v6351_v25  ;;  %v3234_v45 = vadd.f32 %v3233_v0, %v6351_v25 }
 0x3cb   : > { %v2786_v50 = vpop.f32.mrf.mxu0  ;;  %v3235_v30 = vpop.f32.mrf.mxu1 }
 0x3cc   : > { %4209 = vst [vmem:[%s5850_s13 + $0xa68] sm:$0xff] %v3697_v20  ;;  %4211 = vst [vmem:[%s5850_s13 + $0xa78] sm:$0xff] %v3699_v56  ;;  %v3704_v5 = vmax.f32 %v2785_v63, 0.0  ;;  %v3706_v28 = vmax.f32 %v3234_v45, 0.0  ;;  %v2787_v44 = vadd.f32 %v2786_v50, %v6351_v25  ;;  %v3236_v32 = vadd.f32 %v3235_v30, %v6351_v25  ;;  %v7339_v20 = vld [vmem:[#allocation18_spill] sm:$0xff] }
 0x3cd   : > { %v2790_v2 = vpop.f32.mrf.mxu0  ;;  %v3239_v61 = vpop.f32.mrf.mxu1 }
 0x3ce   : > { %4216 = vst [vmem:[%s5850_s13 + $0xaa0] sm:$0xff] %v3704_v5  ;;  %4218 = vst [vmem:[%s5850_s13 + $0xab0] sm:$0xff] %v3706_v28  ;;  %v3705_v23 = vmax.f32 %v2787_v44, 0.0  ;;  %v3707_v31 = vmax.f32 %v3236_v32, 0.0  ;;  %v2791_v8 = vadd.f32 %v2790_v2, %v6363_v43  ;;  %v3240_v17 = vadd.f32 %v3239_v61, %v6363_v43 }
 0x3cf   : > { %v2792_v7 = vpop.f32.mrf.mxu0  ;;  %v3241_v49 = vpop.f32.mrf.mxu1 }
 0x3d0   : > { %4217 = vst [vmem:[%s5850_s13 + $0xaa8] sm:$0xff] %v3705_v23  ;;  %4219 = vst [vmem:[%s5850_s13 + $0xab8] sm:$0xff] %v3707_v31  ;;  %v3712_v12 = vmax.f32 %v2791_v8, 0.0  ;;  %v3714_v25 = vmax.f32 %v3240_v17, 0.0  ;;  %v2793_v36 = vadd.f32 %v2792_v7, %v6363_v43  ;;  %v3242_v6 = vadd.f32 %v3241_v49, %v6363_v43  ;;  %v7340_v31 = vld [vmem:[#allocation19_spill] sm:$0xff] }
 0x3d1   : > { %v2796_v21 = vpop.f32.mrf.mxu0  ;;  %v3245_v62 = vpop.f32.mrf.mxu1 }
 0x3d2   : > { %4224 = vst [vmem:[%s5850_s13 + $0xae0] sm:$0xff] %v3712_v12  ;;  %4226 = vst [vmem:[%s5850_s13 + $0xaf0] sm:$0xff] %v3714_v25  ;;  %v3713_v11 = vmax.f32 %v2793_v36, 0.0  ;;  %v3715_v46 = vmax.f32 %v3242_v6, 0.0  ;;  %v2797_v16 = vadd.f32 %v2796_v21, %v6375_v34  ;;  %v3246_v10 = vadd.f32 %v3245_v62, %v6375_v34 }
 0x3d3   : > { %v2798_v38 = vpop.f32.mrf.mxu0  ;;  %v3247_v57 = vpop.f32.mrf.mxu1 }
 0x3d4   : > { %4225 = vst [vmem:[%s5850_s13 + $0xae8] sm:$0xff] %v3713_v11  ;;  %4227 = vst [vmem:[%s5850_s13 + $0xaf8] sm:$0xff] %v3715_v46  ;;  %v3720_v53 = vmax.f32 %v2797_v16, 0.0  ;;  %v3722_v43 = vmax.f32 %v3246_v10, 0.0  ;;  %v2799_v54 = vadd.f32 %v2798_v38, %v6375_v34  ;;  %v3248_v4 = vadd.f32 %v3247_v57, %v6375_v34  ;;  %v7341_v16 = vld [vmem:[#allocation16_spill] sm:$0xff] }
 0x3d5   : > { %v2802_v48 = vpop.f32.mrf.mxu0  ;;  %v3251_v35 = vpop.f32.mrf.mxu1 }
 0x3d6   : > { %4232 = vst [vmem:[%s5850_s13 + $0xb20] sm:$0xff] %v3720_v53  ;;  %4234 = vst [vmem:[%s5850_s13 + $0xb30] sm:$0xff] %v3722_v43  ;;  %v3721_v41 = vmax.f32 %v2799_v54, 0.0  ;;  %v3723_v18 = vmax.f32 %v3248_v4, 0.0  ;;  %v2803_v13 = vadd.f32 %v2802_v48, %v6387_v52  ;;  %v3252_v3 = vadd.f32 %v3251_v35, %v6387_v52 }
 0x3d7   : > { %v2804_v29 = vpop.f32.mrf.mxu0  ;;  %v3253_v59 = vpop.f32.mrf.mxu1 }
 0x3d8   : > { %4233 = vst [vmem:[%s5850_s13 + $0xb28] sm:$0xff] %v3721_v41  ;;  %4235 = vst [vmem:[%s5850_s13 + $0xb38] sm:$0xff] %v3723_v18  ;;  %v3728_v26 = vmax.f32 %v2803_v13, 0.0  ;;  %v3730_v34 = vmax.f32 %v3252_v3, 0.0  ;;  %v2805_v15 = vadd.f32 %v2804_v29, %v6387_v52  ;;  %v3254_v58 = vadd.f32 %v3253_v59, %v6387_v52  ;;  %v7342_v3 = vld [vmem:[#allocation17_spill] sm:$0xff] }
 0x3d9   : > { %v2808_v24 = vpop.f32.mrf.mxu0  ;;  %v3257_v19 = vpop.f32.mrf.mxu1 }
 0x3da   : > { %4240 = vst [vmem:[%s5850_s13 + $0xb60] sm:$0xff] %v3728_v26  ;;  %4242 = vst [vmem:[%s5850_s13 + $0xb70] sm:$0xff] %v3730_v34  ;;  %v3729_v60 = vmax.f32 %v2805_v15, 0.0  ;;  %v3731_v39 = vmax.f32 %v3254_v58, 0.0  ;;  %v2809_v1 = vadd.f32 %v2808_v24, %v7338_v22  ;;  %v3258_v47 = vadd.f32 %v3257_v19, %v7338_v22 }
 0x3db   : > { %v2810_v51 = vpop.f32.mrf.mxu0  ;;  %v3259_v27 = vpop.f32.mrf.mxu1 }
 0x3dc   : > { %4241 = vst [vmem:[%s5850_s13 + $0xb68] sm:$0xff] %v3729_v60  ;;  %4243 = vst [vmem:[%s5850_s13 + $0xb78] sm:$0xff] %v3731_v39  ;;  %v3736_v55 = vmax.f32 %v2809_v1, 0.0  ;;  %v3738_v52 = vmax.f32 %v3258_v47, 0.0  ;;  %v2811_v14 = vadd.f32 %v2810_v51, %v7338_v22  ;;  %v3260_v40 = vadd.f32 %v3259_v27, %v7338_v22  ;;  %v7343_v47 = vld [vmem:[#allocation14_spill] sm:$0xff] }
 0x3dd   : > { %v2814_v42 = vpop.f32.mrf.mxu0  ;;  %v3263_v9 = vpop.f32.mrf.mxu1 }
 0x3de   : > { %4248 = vst [vmem:[%s5850_s13 + $0xba0] sm:$0xff] %v3736_v55  ;;  %4250 = vst [vmem:[%s5850_s13 + $0xbb0] sm:$0xff] %v3738_v52  ;;  %v3737_v33 = vmax.f32 %v2811_v14, 0.0  ;;  %v3739_v0 = vmax.f32 %v3260_v40, 0.0  ;;  %v2815_v56 = vadd.f32 %v2814_v42, %v7339_v20  ;;  %v3264_v63 = vadd.f32 %v3263_v9, %v7339_v20 }
 0x3df   : > { %v2816_v45 = vpop.f32.mrf.mxu0  ;;  %v3265_v50 = vpop.f32.mrf.mxu1 }
 0x3e0   : > { %4249 = vst [vmem:[%s5850_s13 + $0xba8] sm:$0xff] %v3737_v33  ;;  %4251 = vst [vmem:[%s5850_s13 + $0xbb8] sm:$0xff] %v3739_v0  ;;  %v3744_v30 = vmax.f32 %v2815_v56, 0.0  ;;  %v3746_v5 = vmax.f32 %v3264_v63, 0.0  ;;  %v2817_v28 = vadd.f32 %v2816_v45, %v7339_v20  ;;  %v3266_v44 = vadd.f32 %v3265_v50, %v7339_v20  ;;  %v7344_v63 = vld [vmem:[#allocation15_spill] sm:$0xff] }
 0x3e1   : > { %v2820_v32 = vpop.f32.mrf.mxu0  ;;  %v3269_v2 = vpop.f32.mrf.mxu1 }
 0x3e2   : > { %4256 = vst [vmem:[%s5850_s13 + $0xbe0] sm:$0xff] %v3744_v30  ;;  %4258 = vst [vmem:[%s5850_s13 + $0xbf0] sm:$0xff] %v3746_v5  ;;  %v3745_v61 = vmax.f32 %v2817_v28, 0.0  ;;  %v3747_v23 = vmax.f32 %v3266_v44, 0.0  ;;  %v2821_v8 = vadd.f32 %v2820_v32, %v7340_v31  ;;  %v3270_v17 = vadd.f32 %v3269_v2, %v7340_v31 }
 0x3e3   : > { %v2822_v7 = vpop.f32.mrf.mxu0  ;;  %v3271_v49 = vpop.f32.mrf.mxu1 }
 0x3e4   : > { %4257 = vst [vmem:[%s5850_s13 + $0xbe8] sm:$0xff] %v3745_v61  ;;  %4259 = vst [vmem:[%s5850_s13 + $0xbf8] sm:$0xff] %v3747_v23  ;;  %v3752_v12 = vmax.f32 %v2821_v8, 0.0  ;;  %v3754_v25 = vmax.f32 %v3270_v17, 0.0  ;;  %v2823_v36 = vadd.f32 %v2822_v7, %v7340_v31  ;;  %v3272_v6 = vadd.f32 %v3271_v49, %v7340_v31  ;;  %v7345_v17 = vld [vmem:[#allocation12_spill] sm:$0xff] }
 0x3e5   : > { %v2826_v21 = vpop.f32.mrf.mxu0  ;;  %v3275_v62 = vpop.f32.mrf.mxu1 }
 0x3e6   : > { %4264 = vst [vmem:[%s5850_s13 + $0xc20] sm:$0xff] %v3752_v12  ;;  %4266 = vst [vmem:[%s5850_s13 + $0xc30] sm:$0xff] %v3754_v25  ;;  %v3753_v11 = vmax.f32 %v2823_v36, 0.0  ;;  %v3755_v46 = vmax.f32 %v3272_v6, 0.0  ;;  %v2827_v10 = vadd.f32 %v2826_v21, %v7341_v16  ;;  %v3276_v38 = vadd.f32 %v3275_v62, %v7341_v16 }
 0x3e7   : > { %v2828_v57 = vpop.f32.mrf.mxu0  ;;  %v3277_v53 = vpop.f32.mrf.mxu1 }
 0x3e8   : > { %4265 = vst [vmem:[%s5850_s13 + $0xc28] sm:$0xff] %v3753_v11  ;;  %4267 = vst [vmem:[%s5850_s13 + $0xc38] sm:$0xff] %v3755_v46  ;;  %v3760_v43 = vmax.f32 %v2827_v10, 0.0  ;;  %v3762_v54 = vmax.f32 %v3276_v38, 0.0  ;;  %v2829_v4 = vadd.f32 %v2828_v57, %v7341_v16  ;;  %v3278_v48 = vadd.f32 %v3277_v53, %v7341_v16  ;;  %v7346_v38 = vld [vmem:[#allocation13_spill] sm:$0xff] }
 0x3e9   : > { %v2832_v35 = vpop.f32.mrf.mxu0  ;;  %v3281_v41 = vpop.f32.mrf.mxu1 }
 0x3ea   : > { %4272 = vst [vmem:[%s5850_s13 + $0xc60] sm:$0xff] %v3760_v43  ;;  %4274 = vst [vmem:[%s5850_s13 + $0xc70] sm:$0xff] %v3762_v54  ;;  %v3761_v18 = vmax.f32 %v2829_v4, 0.0  ;;  %v3763_v13 = vmax.f32 %v3278_v48, 0.0  ;;  %v2833_v29 = vadd.f32 %v2832_v35, %v7342_v3  ;;  %v3282_v59 = vadd.f32 %v3281_v41, %v7342_v3 }
 0x3eb   : > { %v2834_v26 = vpop.f32.mrf.mxu0  ;;  %v3283_v34 = vpop.f32.mrf.mxu1 }
 0x3ec   : > { %4273 = vst [vmem:[%s5850_s13 + $0xc68] sm:$0xff] %v3761_v18  ;;  %4275 = vst [vmem:[%s5850_s13 + $0xc78] sm:$0xff] %v3763_v13  ;;  %v3768_v15 = vmax.f32 %v2833_v29, 0.0  ;;  %v3770_v58 = vmax.f32 %v3282_v59, 0.0  ;;  %v2835_v24 = vadd.f32 %v2834_v26, %v7342_v3  ;;  %v3284_v19 = vadd.f32 %v3283_v34, %v7342_v3  ;;  %v7347_v59 = vld [vmem:[#allocation10_spill] sm:$0xff] }
 0x3ed   : > { %v2838_v60 = vpop.f32.mrf.mxu0  ;;  %v3287_v39 = vpop.f32.mrf.mxu1 }
 0x3ee   : > { %4280 = vst [vmem:[%s5850_s13 + $0xca0] sm:$0xff] %v3768_v15  ;;  %4282 = vst [vmem:[%s5850_s13 + $0xcb0] sm:$0xff] %v3770_v58  ;;  %v3769_v22 = vmax.f32 %v2835_v24, 0.0  ;;  %v3771_v1 = vmax.f32 %v3284_v19, 0.0  ;;  %v2839_v51 = vadd.f32 %v2838_v60, %v7343_v47  ;;  %v3288_v27 = vadd.f32 %v3287_v39, %v7343_v47 }
 0x3ef   : > { %v2840_v55 = vpop.f32.mrf.mxu0  ;;  %v3289_v52 = vpop.f32.mrf.mxu1 }
 0x3f0   : > { %4281 = vst [vmem:[%s5850_s13 + $0xca8] sm:$0xff] %v3769_v22  ;;  %4283 = vst [vmem:[%s5850_s13 + $0xcb8] sm:$0xff] %v3771_v1  ;;  %v3776_v14 = vmax.f32 %v2839_v51, 0.0  ;;  %v3778_v40 = vmax.f32 %v3288_v27, 0.0  ;;  %v2841_v42 = vadd.f32 %v2840_v55, %v7343_v47  ;;  %v3290_v9 = vadd.f32 %v3289_v52, %v7343_v47  ;;  %v7348_v27 = vld [vmem:[#allocation11_spill] sm:$0xff] }
 0x3f1   : > { %v2844_v33 = vpop.f32.mrf.mxu0  ;;  %v3293_v0 = vpop.f32.mrf.mxu1 }
 0x3f2   : > { %4288 = vst [vmem:[%s5850_s13 + $0xce0] sm:$0xff] %v3776_v14  ;;  %4290 = vst [vmem:[%s5850_s13 + $0xcf0] sm:$0xff] %v3778_v40  ;;  %v3777_v20 = vmax.f32 %v2841_v42, 0.0  ;;  %v3779_v56 = vmax.f32 %v3290_v9, 0.0  ;;  %v2845_v45 = vadd.f32 %v2844_v33, %v7344_v63  ;;  %v3294_v50 = vadd.f32 %v3293_v0, %v7344_v63 }
 0x3f3   : > { %v2846_v30 = vpop.f32.mrf.mxu0  ;;  %v3295_v5 = vpop.f32.mrf.mxu1 }
 0x3f4   : > { %4289 = vst [vmem:[%s5850_s13 + $0xce8] sm:$0xff] %v3777_v20  ;;  %4291 = vst [vmem:[%s5850_s13 + $0xcf8] sm:$0xff] %v3779_v56  ;;  %v3784_v28 = vmax.f32 %v2845_v45, 0.0  ;;  %v3786_v44 = vmax.f32 %v3294_v50, 0.0  ;;  %v2847_v32 = vadd.f32 %v2846_v30, %v7344_v63  ;;  %v3296_v2 = vadd.f32 %v3295_v5, %v7344_v63  ;;  %v7349_v50 = vld [vmem:[#allocation8_spill] sm:$0xff] }
 0x3f5   : > { %v2850_v61 = vpop.f32.mrf.mxu0  ;;  %v3299_v23 = vpop.f32.mrf.mxu1 }
 0x3f6   : > { %4296 = vst [vmem:[%s5850_s13 + $0xd20] sm:$0xff] %v3784_v28  ;;  %4298 = vst [vmem:[%s5850_s13 + $0xd30] sm:$0xff] %v3786_v44  ;;  %v3785_v31 = vmax.f32 %v2847_v32, 0.0  ;;  %v3787_v8 = vmax.f32 %v3296_v2, 0.0  ;;  %v2851_v7 = vadd.f32 %v2850_v61, %v7345_v17  ;;  %v3300_v49 = vadd.f32 %v3299_v23, %v7345_v17 }
 0x3f7   : > { %v2852_v12 = vpop.f32.mrf.mxu0  ;;  %v3301_v25 = vpop.f32.mrf.mxu1 }
 0x3f8   : > { %4297 = vst [vmem:[%s5850_s13 + $0xd28] sm:$0xff] %v3785_v31  ;;  %4299 = vst [vmem:[%s5850_s13 + $0xd38] sm:$0xff] %v3787_v8  ;;  %v3792_v36 = vmax.f32 %v2851_v7, 0.0  ;;  %v3794_v6 = vmax.f32 %v3300_v49, 0.0  ;;  %v2853_v21 = vadd.f32 %v2852_v12, %v7345_v17  ;;  %v3302_v62 = vadd.f32 %v3301_v25, %v7345_v17  ;;  %v7350_v49 = vld [vmem:[#allocation9_spill] sm:$0xff] }
 0x3f9   : > { %v2856_v11 = vpop.f32.mrf.mxu0  ;;  %v3305_v46 = vpop.f32.mrf.mxu1 }
 0x3fa   : > { %4304 = vst [vmem:[%s5850_s13 + $0xd60] sm:$0xff] %v3792_v36  ;;  %4306 = vst [vmem:[%s5850_s13 + $0xd70] sm:$0xff] %v3794_v6  ;;  %v3793_v16 = vmax.f32 %v2853_v21, 0.0  ;;  %v3795_v10 = vmax.f32 %v3302_v62, 0.0  ;;  %v2857_v57 = vadd.f32 %v2856_v11, %v7346_v38  ;;  %v3306_v53 = vadd.f32 %v3305_v46, %v7346_v38 }
 0x3fb   : > { %v2858_v43 = vpop.f32.mrf.mxu0  ;;  %v3307_v54 = vpop.f32.mrf.mxu1 }
 0x3fc   : > { %4305 = vst [vmem:[%s5850_s13 + $0xd68] sm:$0xff] %v3793_v16  ;;  %4307 = vst [vmem:[%s5850_s13 + $0xd78] sm:$0xff] %v3795_v10  ;;  %v3800_v4 = vmax.f32 %v2857_v57, 0.0  ;;  %v3802_v48 = vmax.f32 %v3306_v53, 0.0  ;;  %v2859_v35 = vadd.f32 %v2858_v43, %v7346_v38  ;;  %v3308_v41 = vadd.f32 %v3307_v54, %v7346_v38  ;;  %v7351_v53 = vld [vmem:[#allocation33_spill] sm:$0xff] }
 0x3fd   : > { %v2862_v18 = vpop.f32.mrf.mxu0  ;;  %v3311_v13 = vpop.f32.mrf.mxu1 }
 0x3fe   : > { %4312 = vst [vmem:[%s5850_s13 + $0xda0] sm:$0xff] %v3800_v4  ;;  %4314 = vst [vmem:[%s5850_s13 + $0xdb0] sm:$0xff] %v3802_v48  ;;  %v3801_v3 = vmax.f32 %v2859_v35, 0.0  ;;  %v3803_v29 = vmax.f32 %v3308_v41, 0.0  ;;  %v2863_v26 = vadd.f32 %v2862_v18, %v7347_v59  ;;  %v3312_v34 = vadd.f32 %v3311_v13, %v7347_v59 }
 0x3ff   : > { %v2864_v15 = vpop.f32.mrf.mxu0  ;;  %v3313_v58 = vpop.f32.mrf.mxu1 }
 0x400   : > { %4313 = vst [vmem:[%s5850_s13 + $0xda8] sm:$0xff] %v3801_v3  ;;  %4315 = vst [vmem:[%s5850_s13 + $0xdb8] sm:$0xff] %v3803_v29  ;;  %v3808_v24 = vmax.f32 %v2863_v26, 0.0  ;;  %v3810_v19 = vmax.f32 %v3312_v34, 0.0  ;;  %v2865_v60 = vadd.f32 %v2864_v15, %v7347_v59  ;;  %v3314_v39 = vadd.f32 %v3313_v58, %v7347_v59  ;;  %v7352_v34 = vld [vmem:[#allocation34_spill] sm:$0xff] }
 0x401   : > { %v2868_v22 = vpop.f32.mrf.mxu0  ;;  %v3317_v1 = vpop.f32.mrf.mxu1 }
 0x402   : > { %4320 = vst [vmem:[%s5850_s13 + $0xde0] sm:$0xff] %v3808_v24  ;;  %4322 = vst [vmem:[%s5850_s13 + $0xdf0] sm:$0xff] %v3810_v19  ;;  %v3809_v47 = vmax.f32 %v2865_v60, 0.0  ;;  %v3811_v51 = vmax.f32 %v3314_v39, 0.0  ;;  %v2869_v55 = vadd.f32 %v2868_v22, %v7348_v27  ;;  %v3318_v52 = vadd.f32 %v3317_v1, %v7348_v27 }
 0x403   : > { %v2870_v14 = vpop.f32.mrf.mxu0  ;;  %v3319_v40 = vpop.f32.mrf.mxu1 }
 0x404   : > { %4321 = vst [vmem:[%s5850_s13 + $0xde8] sm:$0xff] %v3809_v47  ;;  %4323 = vst [vmem:[%s5850_s13 + $0xdf8] sm:$0xff] %v3811_v51  ;;  %v3816_v42 = vmax.f32 %v2869_v55, 0.0  ;;  %v3818_v9 = vmax.f32 %v3318_v52, 0.0  ;;  %v2871_v33 = vadd.f32 %v2870_v14, %v7348_v27  ;;  %v3320_v0 = vadd.f32 %v3319_v40, %v7348_v27  ;;  %v7353_v52 = vld [vmem:[#allocation31_spill] sm:$0xff] }
 0x405   : > { %v2874_v20 = vpop.f32.mrf.mxu0  ;;  %v3323_v56 = vpop.f32.mrf.mxu1 }
 0x406   : > { %4328 = vst [vmem:[%s5850_s13 + $0xe20] sm:$0xff] %v3816_v42  ;;  %4330 = vst [vmem:[%s5850_s13 + $0xe30] sm:$0xff] %v3818_v9  ;;  %v3817_v63 = vmax.f32 %v2871_v33, 0.0  ;;  %v3819_v45 = vmax.f32 %v3320_v0, 0.0  ;;  %v2875_v30 = vadd.f32 %v2874_v20, %v7349_v50  ;;  %v3324_v5 = vadd.f32 %v3323_v56, %v7349_v50 }
 0x407   : > { %v2876_v28 = vpop.f32.mrf.mxu0  ;;  %v3325_v44 = vpop.f32.mrf.mxu1 }
 0x408   : > { %4329 = vst [vmem:[%s5850_s13 + $0xe28] sm:$0xff] %v3817_v63  ;;  %4331 = vst [vmem:[%s5850_s13 + $0xe38] sm:$0xff] %v3819_v45  ;;  %v3824_v32 = vmax.f32 %v2875_v30, 0.0  ;;  %v3826_v2 = vmax.f32 %v3324_v5, 0.0  ;;  %v2877_v61 = vadd.f32 %v2876_v28, %v7349_v50  ;;  %v3326_v23 = vadd.f32 %v3325_v44, %v7349_v50  ;;  %v7354_v5 = vld [vmem:[#allocation32_spill] sm:$0xff] }
 0x409   : > { %v2880_v31 = vpop.f32.mrf.mxu0  ;;  %v3329_v8 = vpop.f32.mrf.mxu1 }
 0x40a   : > { %4336 = vst [vmem:[%s5850_s13 + $0xe60] sm:$0xff] %v3824_v32  ;;  %4338 = vst [vmem:[%s5850_s13 + $0xe70] sm:$0xff] %v3826_v2  ;;  %v3825_v17 = vmax.f32 %v2877_v61, 0.0  ;;  %v3827_v7 = vmax.f32 %v3326_v23, 0.0  ;;  %v2881_v12 = vadd.f32 %v2880_v31, %v7350_v49  ;;  %v3330_v25 = vadd.f32 %v3329_v8, %v7350_v49 }
 0x40b   : > { %v2882_v36 = vpop.f32.mrf.mxu0  ;;  %v3331_v6 = vpop.f32.mrf.mxu1 }
 0x40c   : > { %4337 = vst [vmem:[%s5850_s13 + $0xe68] sm:$0xff] %v3825_v17  ;;  %4339 = vst [vmem:[%s5850_s13 + $0xe78] sm:$0xff] %v3827_v7  ;;  %v3832_v21 = vmax.f32 %v2881_v12, 0.0  ;;  %v3834_v62 = vmax.f32 %v3330_v25, 0.0  ;;  %v2883_v11 = vadd.f32 %v2882_v36, %v7350_v49  ;;  %v3332_v46 = vadd.f32 %v3331_v6, %v7350_v49 }
 0x40d   : > { %v2886_v16 = vpop.f32.mrf.mxu0  ;;  %v3335_v10 = vpop.f32.mrf.mxu1 }
 0x40e   : > { %4344 = vst [vmem:[%s5850_s13 + $0xea0] sm:$0xff] %v3832_v21  ;;  %4346 = vst [vmem:[%s5850_s13 + $0xeb0] sm:$0xff] %v3834_v62  ;;  %v3833_v38 = vmax.f32 %v2883_v11, 0.0  ;;  %v3835_v57 = vmax.f32 %v3332_v46, 0.0  ;;  %v2887_v43 = vadd.f32 %v2886_v16, %v7351_v53  ;;  %v3336_v54 = vadd.f32 %v3335_v10, %v7351_v53 }
 0x40f   : > { %v2888_v4 = vpop.f32.mrf.mxu0  ;;  %v3337_v48 = vpop.f32.mrf.mxu1 }
 0x410   : > { %4345 = vst [vmem:[%s5850_s13 + $0xea8] sm:$0xff] %v3833_v38  ;;  %4347 = vst [vmem:[%s5850_s13 + $0xeb8] sm:$0xff] %v3835_v57  ;;  %v3840_v35 = vmax.f32 %v2887_v43, 0.0  ;;  %v3842_v41 = vmax.f32 %v3336_v54, 0.0  ;;  %v2889_v18 = vadd.f32 %v2888_v4, %v7351_v53  ;;  %v3338_v13 = vadd.f32 %v3337_v48, %v7351_v53 }
 0x411   : > { %v2892_v3 = vpop.f32.mrf.mxu0  ;;  %v3341_v29 = vpop.f32.mrf.mxu1 }
 0x412   : > { %4352 = vst [vmem:[%s5850_s13 + $0xee0] sm:$0xff] %v3840_v35  ;;  %4354 = vst [vmem:[%s5850_s13 + $0xef0] sm:$0xff] %v3842_v41  ;;  %v3841_v59 = vmax.f32 %v2889_v18, 0.0  ;;  %v3843_v26 = vmax.f32 %v3338_v13, 0.0  ;;  %v2893_v15 = vadd.f32 %v2892_v3, %v7352_v34  ;;  %v3342_v58 = vadd.f32 %v3341_v29, %v7352_v34 }
 0x413   : > { %v2894_v24 = vpop.f32.mrf.mxu0  ;;  %v3343_v19 = vpop.f32.mrf.mxu1 }
 0x414   : > { %4353 = vst [vmem:[%s5850_s13 + $0xee8] sm:$0xff] %v3841_v59  ;;  %4355 = vst [vmem:[%s5850_s13 + $0xef8] sm:$0xff] %v3843_v26  ;;  %v3848_v60 = vmax.f32 %v2893_v15, 0.0  ;;  %v3850_v39 = vmax.f32 %v3342_v58, 0.0  ;;  %v2895_v22 = vadd.f32 %v2894_v24, %v7352_v34  ;;  %v3344_v1 = vadd.f32 %v3343_v19, %v7352_v34 }
 0x415   : > { %v2898_v47 = vpop.f32.mrf.mxu0  ;;  %v3347_v51 = vpop.f32.mrf.mxu1 }
 0x416   : > { %4360 = vst [vmem:[%s5850_s13 + $0xf20] sm:$0xff] %v3848_v60  ;;  %4362 = vst [vmem:[%s5850_s13 + $0xf30] sm:$0xff] %v3850_v39  ;;  %v3849_v27 = vmax.f32 %v2895_v22, 0.0  ;;  %v3851_v55 = vmax.f32 %v3344_v1, 0.0  ;;  %v2899_v14 = vadd.f32 %v2898_v47, %v7353_v52  ;;  %v3348_v40 = vadd.f32 %v3347_v51, %v7353_v52 }
 0x417   : > { %v2900_v42 = vpop.f32.mrf.mxu0  ;;  %v3349_v9 = vpop.f32.mrf.mxu1 }
 0x418   : > { %4361 = vst [vmem:[%s5850_s13 + $0xf28] sm:$0xff] %v3849_v27  ;;  %4363 = vst [vmem:[%s5850_s13 + $0xf38] sm:$0xff] %v3851_v55  ;;  %v3856_v33 = vmax.f32 %v2899_v14, 0.0  ;;  %v3858_v0 = vmax.f32 %v3348_v40, 0.0  ;;  %v2901_v20 = vadd.f32 %v2900_v42, %v7353_v52  ;;  %v3350_v56 = vadd.f32 %v3349_v9, %v7353_v52 }
 0x419   : > { %v2904_v63 = vpop.f32.mrf.mxu0  ;;  %v3353_v45 = vpop.f32.mrf.mxu1 }
 0x41a   : > { %4368 = vst [vmem:[%s5850_s13 + $0xf60] sm:$0xff] %v3856_v33  ;;  %4370 = vst [vmem:[%s5850_s13 + $0xf70] sm:$0xff] %v3858_v0  ;;  %v3857_v50 = vmax.f32 %v2901_v20, 0.0  ;;  %v3859_v30 = vmax.f32 %v3350_v56, 0.0  ;;  %v2905_v28 = vadd.f32 %v2904_v63, %v7354_v5  ;;  %v3354_v44 = vadd.f32 %v3353_v45, %v7354_v5 }
 0x41b   : > { %v2906_v32 = vpop.f32.mrf.mxu0  ;;  %v3355_v2 = vpop.f32.mrf.mxu1 }
 0x41c   : > { %4369 = vst [vmem:[%s5850_s13 + $0xf68] sm:$0xff] %v3857_v50  ;;  %4371 = vst [vmem:[%s5850_s13 + $0xf78] sm:$0xff] %v3859_v30  ;;  %v3864_v61 = vmax.f32 %v2905_v28, 0.0  ;;  %v3866_v23 = vmax.f32 %v3354_v44, 0.0  ;;  %v2907_v31 = vadd.f32 %v2906_v32, %v7354_v5  ;;  %v3356_v8 = vadd.f32 %v3355_v2, %v7354_v5 }
 0x41d   : > { %v2910_v17 = vpop.f32.mrf.mxu0  ;;  %v3359_v7 = vpop.f32.mrf.mxu1 }
 0x41e   : > { %4376 = vst [vmem:[%s5850_s13 + $0xfa0] sm:$0xff] %v3864_v61  ;;  %4378 = vst [vmem:[%s5850_s13 + $0xfb0] sm:$0xff] %v3866_v23  ;;  %v3865_v49 = vmax.f32 %v2907_v31, 0.0  ;;  %v3867_v12 = vmax.f32 %v3356_v8, 0.0  ;;  %v2911_v25 = vadd.f32 %v2910_v17, %v6603_v37  ;;  %v3360_v36 = vadd.f32 %v3359_v7, %v6603_v37 }
 0x41f   : > { %v2912_v6 = vpop.f32.mrf.mxu0  ;;  %v3361_v21 = vpop.f32.mrf.mxu1 }
 0x420   : > { %4377 = vst [vmem:[%s5850_s13 + $0xfa8] sm:$0xff] %v3865_v49  ;;  %4379 = vst [vmem:[%s5850_s13 + $0xfb8] sm:$0xff] %v3867_v12  ;;  %v3872_v62 = vmax.f32 %v2911_v25, 0.0  ;;  %v3874_v11 = vmax.f32 %v3360_v36, 0.0  ;;  %v2913_v46 = vadd.f32 %v2912_v6, %v6603_v37  ;;  %v3362_v16 = vadd.f32 %v3361_v21, %v6603_v37 }
 0x422   : > { %4384 = vst [vmem:[%s5850_s13 + $0xfe0] sm:$0xff] %v3872_v62  ;;  %4386 = vst [vmem:[%s5850_s13 + $0xff0] sm:$0xff] %v3874_v11  ;;  %v3873_v10 = vmax.f32 %v2913_v46, 0.0  ;;  %v3875_v38 = vmax.f32 %v3362_v16, 0.0 }
 0x424   : > { %4385 = vst [vmem:[%s5850_s13 + $0xfe8] sm:$0xff] %v3873_v10  ;;  %4387 = vst [vmem:[%s5850_s13 + $0xff8] sm:$0xff] %v3875_v38 }
 0x425   : > { %4761 = shalt.err (!%p4758_p3)
}
 0x426   : > { %s4762_s5 = scalar_lea.hbm %s7166_s9, 65536  ;;  %s4766_s22 = scalar_lea.hbm %s7225_s4, 131072 }
 0x427   : > { %p4763_p5 = scmp.ne.s32.totalorder %s7166_s9, %s4762_s5  ;;  %p4767_p9 = scmp.lt.s32.totalorder %s7166_s9, %s7225_s4 }
 0x428   : > { %p4768_p12 = scmp.lt.s32.totalorder %s4766_s22, %s4762_s5 }
 0x429   : > { %p4764_p6 = pnand %p4763_p5, %p4903_p4 }
 0x42a   : > { %p4769_p10 = por %p4768_p12, %p4767_p9 }
 0x42b   : > { %p4765_p7 = pneg %p4764_p6 }
 0x42d   : > { %p4770_p11 = pnand %p4769_p10, %p4765_p7 }
 0x42f   : > { %4773 = shalt.err (!%p4770_p11)
}
 0x430   : > { %s4836_s29 = smov 1024   ;;  %s4837_s30 = smov 64  }
 0x431   : > { %4588 = dma.vmem_to_hbm [thread:$0]  (%p4903_p4), %s7168_s6, 65536, %s7166_s9, %s7176_s18, %s4836_s29, %s4836_s29, %s4837_s30  }
 0x432 PF: > { %p4600_p13 = scmp.ge.s32.totalorder %s4828_s20, 2  ;;  %s4419_s7 = sand.u32 1, %s4808_s15  }
 0x433   : > { %s4420_s8 = scalar_lea.sflag [#allocation4], %s4419_s7 }
 0x434   : > { %p4595_p0 = pnand %p4600_p13, %p4910_p8 }
 0x436   : > { %p4596_p1 = pneg %p4595_p0 }
 0x438   : > { %4803 = dma.done.wait (%p4596_p1), %s4420_s8, 65536  }
 0x439   : > { %4805 = vsyncadd (%p4596_p1), %s4420_s8, 4294901760  ;;  %s18_s20 = sadd.s32 1, %s4828_s20   ;;  %s7355_s15 = smov %s4812_s16 }
 0x43a   : > { %p15_p2 = scmp.ge.s32.totalorder %s18_s20, 4   ;;  %s7356_s16 = smov %s4816_s17 }
 0x43b   : > { %s7357_s17 = smov %s4916_s28  ;;  %s7358_s18 = smov %s4824_s19 }
 0x43c   : > { %s7359_s19 = smov %s7361_s23  ;;  %17 = sbr.rel (!%p15_p2) target bundleno = 5 (0x5), region = 76 }
 0x441   :  { %4425 = vsyncpa [#allocation3], 1 }
 0x442   :  { %4427 = vsyncpa [#allocation3 + $0x1], 1 }
 0x443   :  { %4428 = vsyncpa [#allocation4], 1 }
 0x444   :  { %4430 = vsyncpa [#allocation4 + $0x1], 1 }

// kernel: tpu_custom_call.1
= control target key start
LH: loop header
LB: loop body
LE: loop exit
PB: predicated region body
PF: predicated region fallthrough
CT: control target
= control target key end

     0   :  { %9 = vsyncpa [#allocation3], 0  ;;  %s7221_s0 = inlined_call_operand.vmem [shape: f32[2,10,1024], index: 0, kind: input, shape index: {}]   ;;  %s7222_s1 = inlined_call_operand.vmem [shape: f32[128,10], index: 1, kind: input, shape index: {}]   ;;  %s7223_s2 = inlined_call_operand.hbm [shape: f32[512,128], index: 2, kind: input, shape index: {}]   ;;  %s7224_s3 = inlined_call_operand.vmem [shape: f32[512,1], index: 3, kind: input, shape index: {}]   ;;  %s7225_s4 = inlined_call_operand.hbm [shape: f32[2,512,1024], index: 4, kind: output, shape index: {}]  }
   0x1   :  { %10 = vsyncpa [#allocation4], 0 }
   0x2   :  { %12 = vsyncpa [#allocation4 + $0x1], 0  ;;  %s4863_s15 = smov 0   ;;  %s4865_s16 = smov 0  }
   0x3   :  { %s4867_s17 = smov 0   ;;  %s4869_s18 = smov 0  }
   0x4   :  { %s4871_s19 = smov 0   ;;  %s4873_s20 = smov 0  }
   0x5 LB: > { %s4495_s21 = sadd.s32 4294967295, %s4828_s20   ;;  %s4496_s22 = sadd.s32 4294967294, %s4828_s20   ;;  %s4828_s20 = sphi %s4873_s20, %s18_s20   ;;  %s4824_s19 = sphi %s4871_s19, %s7359_s19   ;;  %s4820_s18 = sphi %s4869_s18, %s7358_s18   ;;  %s4816_s17 = sphi %s4867_s17, %s7357_s17   ;;  %s4812_s16 = sphi %s4865_s16, %s7356_s16   ;;  %s4808_s15 = sphi %s4863_s15, %s7355_s15  }
   0x6   : > { %s30_s23 = sadd.s32 1, %s4824_s19  ;;  %s130_s24 = sadd.s32 1, %s4816_s17 }
   0x7   : > { %p32_p0 = scmp.ge.s32.totalorder %s30_s23, 2  ;;  %p140_p1 = scmp.ne.s32.totalorder %s4816_s17, %s4812_s16 }
   0x8   : > { %p141_p2 = scmp.eq.s32.totalorder %s4495_s21, 1  ;;  %p146_p3 = scmp.ne.s32.totalorder %s4812_s16, %s4808_s15 }
   0x9   : > { %s7361_s23 = smov (%p32_p0, %s30_s23), 0  ;;  %p147_p5 = scmp.eq.s32.totalorder %s4496_s22, 1 }
   0xa   : > { %p4903_p4 = por %p141_p2, %p140_p1  ;;  %s125_s26 = ssub.s32 %s4824_s19, %s7361_s23 }
   0xb   : > { %p4497_p6 = scmp.ge.s32.totalorder %s4828_s20, 1  ;;  %p128_p7 = scmp.eq.s32.totalorder %s125_s26, 0 }
   0xc   : > { %p4910_p8 = por %p147_p5, %p146_p3  ;;  %p154_p9 = scmp.lt.s32.totalorder %s4828_s20, 3 }
   0xd   : > { %s4916_s28 = scalar_select %p128_p7, %s4816_s17, %s130_s24  }
   0xe   : > { %p4918_p10 = pnand %p4497_p6, %p154_p9  ;;  %p4922_p11 = scmp.eq.s32.totalorder %s4495_s21, 0 }
   0xf   : > { %s4830_s5 = smov [#allocation2]  }
  0x10   : > { %p4590_p12 = pneg %p4918_p10  ;;  %s169_s6 = sshll.u32 %s4830_s5, 4  ;;  %s170_s6 = int_to_ptr.vmem [resolvable:$true] %s169_s6 }
  0x11   : > { %s4733_s7 = scalar_lea.vmem %s170_s6, 8192  ;;  %p4741_p5 = scmp.lt.s32.totalorder %s170_s6, %s170_s6 }
  0x12   : > { %p4591_p13 = pnand %p4922_p11, %p4590_p12  ;;  %p4734_p1 = scmp.ne.s32.totalorder %s170_s6, %s4733_s7 }
  0x13   : > { %p4742_p6 = scmp.lt.s32.totalorder %s4733_s7, %s4733_s7 }
  0x14   : > { %p4724_p0 = pneg %p4591_p13 }
  0x15   : > { %p4743_p7 = por %p4742_p6, %p4741_p5 }
  0x16   : > { %p4736_p2 = pnand %p4734_p1, %p4724_p0 }
  0x18   : > { %p4737_p3 = pneg %p4736_p2 }
  0x1a   : > { %p4744_p9 = pnand %p4743_p7, %p4737_p3 }
  0x1c   : > { %4747 = shalt.err (!%p4744_p9)
}
  0x1d   : > { %s4831_s8 = smov 128   ;;  %s4832_s9 = smov 8  }
  0x1e   : > { %4593 = dma.hbm_to_vmem [thread:$0]  (!%p4591_p13), %s7223_s2, 8192, %s170_s6, [#allocation3], %s4831_s8, %s4831_s8, %s4832_s9  }
  0x1f   : > { %201 = sbr.rel (%p4918_p10) target bundleno = 1074 (0x432), region = 36 }
  0x24   : > { %4799 = dma.done.wait (%p4922_p11), [#allocation3], 8192  }
  0x25   : > { %4801 = vsyncadd (%p4922_p11), [#allocation3], 4294959104  ;;  %p232_p12 = scmp.lt.s32.totalorder %s4820_s18, 1  ;;  %v7226_v0 = vmov 0.0   ;;  %vm323_vm0 = vcmask 1041408   ;;  %v4963_v9 = vld [vmem:[%s7222_s1] sm:$0xff] }
  0x26   : > { %412 = vmatprep.mubr.f32.mxu0 %v7226_v0  ;;  %573 = vmatprep.mubr.f32.mxu1 %v7226_v0  ;;  %vm274_vm1 = vcmask 80896   ;;  %v4974_v10 = vld [vmem:[%s7222_s1 + $0x8] sm:$0xff]  ;;  %v4989_v15 = vld [vmem:[%s7222_s1 + $0x10] sm:$0xff]  ;;  %v5008_v20 = vld [vmem:[%s7222_s1 + $0x18] sm:$0xff]  ;;  %s228_s5 = sand.u32 1, %s4812_s16   ;;  %s4583_s30 = sshll.u32 %s4820_s18, 16 }
  0x27   : > { %s233_s12 = scalar_select %p232_p12, %s4820_s18, 1  ;;  %v5019_v21 = vld [vmem:[%s7222_s1 + $0x20] sm:$0xff]  ;;  %v5030_v22 = vld [vmem:[%s7222_s1 + $0x28] sm:$0xff]  ;;  %v5041_v23 = vld [vmem:[%s7222_s1 + $0x30] sm:$0xff] }
  0x28   : > { %v5052_v24 = vld [vmem:[%s7222_s1 + $0x38] sm:$0xff]  ;;  %v5063_v25 = vld [vmem:[%s7222_s1 + $0x40] sm:$0xff]  ;;  %v5074_v26 = vld [vmem:[%s7222_s1 + $0x48] sm:$0xff]  ;;  %s4502_s8 = sshll.u32 %s228_s5, 12  ;;  %s7166_s9 = scalar_lea.hbm %s7225_s4, %s4583_s30 }
  0x29   : > { %s4582_s13 = sshll.u32 %s233_s12, 7  ;;  %v5085_v27 = vld [vmem:[%s7222_s1 + $0x50] sm:$0xff]  ;;  %v5096_v28 = vld [vmem:[%s7222_s1 + $0x58] sm:$0xff]  ;;  %v5107_v29 = vld [vmem:[%s7222_s1 + $0x60] sm:$0xff]  ;;  %s7176_s18 = scalar_lea.sflag [#allocation4], %s228_s5 }
  0x2a   : > { %s4946_s22 = scalar_lea.vmem %s7221_s0, %s4582_s13  ;;  %v5118_v30 = vld [vmem:[%s7222_s1 + $0x68] sm:$0xff]  ;;  %v5129_v31 = vld [vmem:[%s7222_s1 + $0x70] sm:$0xff]  ;;  %v5140_v32 = vld [vmem:[%s7222_s1 + $0x78] sm:$0xff]  ;;  %s5850_s13 = scalar_lea.vmem [#allocation5], %s4502_s8 }
  0x2b   : > { %v267_v1 = vld [vmem:[%s4946_s22 + $0x48] sm:$0x3]  ;;  %v269_v2 = vld [vmem:[%s4946_s22 + $0x58] sm:$0x3]  ;;  %v266_v3 = vld [vmem:[%s4946_s22 + $0x40] sm:$0x3] }
  0x2c   : > { %4505 = vmatprep.subr.msk.mxu0 %vm323_vm0, %v267_v1  ;;  %4523 = vmatprep.subr.msk.mxu1 %vm323_vm0, %v269_v2  ;;  %v268_v4 = vld [vmem:[%s4946_s22 + $0x50] sm:$0x3]  ;;  %v259_v5 = vld [vmem:[%s4946_s22 + $0x8] sm:$0xff]  ;;  %v261_v6 = vld [vmem:[%s4946_s22 + $0x18] sm:$0xff]  ;;  %s4404_s6 = sshll.u32 %s5850_s13, 4  ;;  %s4835_s11 = smov [#allocation5]   ;;  %s7168_s6 = int_to_ptr.vmem [resolvable:$true] %s4404_s6 }
  0x2d   : > { %4506 = vmatpush1.msk.msra.mxu0 %vm323_vm0, %v266_v3  ;;  %4524 = vmatpush1.msk.msra.mxu1 %vm323_vm0, %v268_v4  ;;  %v258_v7 = vld [vmem:[%s4946_s22] sm:$0xff]  ;;  %v260_v8 = vld [vmem:[%s4946_s22 + $0x10] sm:$0xff]  ;;  %v271_v11 = vld [vmem:[%s4946_s22 + $0x68] sm:$0x3]  ;;  %s4748_s10 = scalar_lea.vmem %s7168_s6, 65536  ;;  %s4752_s12 = sshll.u32 %s4835_s11, 4  ;;  %s4753_s12 = int_to_ptr.vmem [resolvable:$false] %s4752_s12 }
  0x2e   : > { %378 = vmatprep.subr.mxu0 %v259_v5  ;;  %539 = vmatprep.subr.mxu1 %v261_v6  ;;  %v273_v12 = vld [vmem:[%s4946_s22 + $0x78] sm:$0x3]  ;;  %v270_v13 = vld [vmem:[%s4946_s22 + $0x60] sm:$0x3]  ;;  %v272_v14 = vld [vmem:[%s4946_s22 + $0x70] sm:$0x3]  ;;  %p4749_p10 = scmp.ne.s32.totalorder %s7168_s6, %s4748_s10  ;;  %p4755_p0 = scmp.lt.s32.totalorder %s7168_s6, %s4753_s12 }
  0x2f   : > { %379 = vmatpush1.msra.mxu0 %v258_v7  ;;  %540 = vmatpush1.msra.mxu1 %v260_v8  ;;  %v263_v16 = vld [vmem:[%s4946_s22 + $0x28] sm:$0xff]  ;;  %v265_v17 = vld [vmem:[%s4946_s22 + $0x38] sm:$0xff]  ;;  %v262_v18 = vld [vmem:[%s4946_s22 + $0x20] sm:$0xff]  ;;  %s4754_s14 = scalar_lea.vmem %s4753_s12, 131072 }
  0x30   : > { %4507 = vmatmul.mubr.msk.f32.vlgmr.msra.gmra.mxu0 %vm274_vm1, %v4963_v9  ;;  %4525 = vmatmul.mubr.msk.f32.vlgmr.msra.gmra.mxu1 %vm274_vm1, %v4963_v9  ;;  %v264_v19 = vld [vmem:[%s4946_s22 + $0x30] sm:$0xff]  ;;  %p4750_p11 = pnand %p4749_p10, %p4903_p4  ;;  %p4756_p1 = scmp.lt.s32.totalorder %s4754_s14, %s4748_s10 }
  0x31   : > { %418 = vmatprep.mubr.f32.mxu0 %v7226_v0  ;;  %579 = vmatprep.mubr.f32.mxu1 %v7226_v0 }
  0x32   : > { %4541 = vmatprep.subr.msk.mxu0 %vm323_vm0, %v271_v11  ;;  %4559 = vmatprep.subr.msk.mxu1 %vm323_vm0, %v273_v12  ;;  %p4751_p13 = pneg %p4750_p11  ;;  %p4757_p2 = por %p4756_p1, %p4755_p0 }
  0x33   : > { %4542 = vmatpush1.msk.msra.mxu0 %vm323_vm0, %v270_v13  ;;  %4560 = vmatpush1.msk.msra.mxu1 %vm323_vm0, %v272_v14 }
  0x34   : > { %4508 = vmatmul.mubr.msk.f32.gmra.mxu0 %vm274_vm1, %v4974_v10  ;;  %4526 = vmatmul.mubr.msk.f32.gmra.mxu1 %vm274_vm1, %v4974_v10  ;;  %p4758_p3 = pnand %p4757_p2, %p4751_p13 }
  0x35   : > { %424 = vmatprep.mubr.f32.mxu0 %v7226_v0  ;;  %585 = vmatprep.mubr.f32.mxu1 %v7226_v0 }
  0x36   : > { %700 = vmatprep.subr.mxu0 %v263_v16  ;;  %861 = vmatprep.subr.mxu1 %v265_v17 }
  0x37   : > { %701 = vmatpush1.msra.mxu0 %v262_v18  ;;  %862 = vmatpush1.msra.mxu1 %v264_v19 }
  0x38   : > { %4509 = vmatmul.mubr.msk.f32.gmra.mxu0 %vm274_vm1, %v4989_v15  ;;  %4527 = vmatmul.mubr.msk.f32.gmra.mxu1 %vm274_vm1, %v4989_v15 }
  0x39   : > { %430 = vmatprep.mubr.f32.mxu0 %v7226_v0  ;;  %591 = vmatprep.mubr.f32.mxu1 %v7226_v0 }
  0x3c   : > { %4510 = vmatmul.mubr.msk.f32.gmra.mxu0 %vm274_vm1, %v5008_v20  ;;  %4528 = vmatmul.mubr.msk.f32.gmra.mxu1 %vm274_vm1, %v5008_v20 }
  0x3d   : > { %436 = vmatprep.mubr.f32.mxu0 %v7226_v0  ;;  %597 = vmatprep.mubr.f32.mxu1 %v7226_v0 }
  0x40   : > { %4511 = vmatmul.mubr.msk.f32.gmra.mxu0 %vm274_vm1, %v5019_v21  ;;  %4529 = vmatmul.mubr.msk.f32.gmra.mxu1 %vm274_vm1, %v5019_v21 }
  0x41   : > { %442 = vmatprep.mubr.f32.mxu0 %v7226_v0  ;;  %603 = vmatprep.mubr.f32.mxu1 %v7226_v0 }
  0x44   : > { %4512 = vmatmul.mubr.msk.f32.gmra.mxu0 %vm274_vm1, %v5030_v22  ;;  %4530 = vmatmul.mubr.msk.f32.gmra.mxu1 %vm274_vm1, %v5030_v22 }
  0x45   : > { %448 = vmatprep.mubr.f32.mxu0 %v7226_v0  ;;  %609 = vmatprep.mubr.f32.mxu1 %v7226_v0 }
  0x48   : > { %4513 = vmatmul.mubr.msk.f32.gmra.mxu0 %vm274_vm1, %v5041_v23  ;;  %4531 = vmatmul.mubr.msk.f32.gmra.mxu1 %vm274_vm1, %v5041_v23 }
  0x49   : > { %454 = vmatprep.mubr.f32.mxu0 %v7226_v0  ;;  %615 = vmatprep.mubr.f32.mxu1 %v7226_v0 }
  0x4c   : > { %4514 = vmatmul.mubr.msk.f32.gmra.mxu0 %vm274_vm1, %v5052_v24  ;;  %4532 = vmatmul.mubr.msk.f32.gmra.mxu1 %vm274_vm1, %v5052_v24 }
  0x4d   : > { %460 = vmatprep.mubr.f32.mxu0 %v7226_v0  ;;  %621 = vmatprep.mubr.f32.mxu1 %v7226_v0 }
  0x50   : > { %4515 = vmatmul.mubr.msk.f32.gmra.mxu0 %vm274_vm1, %v5063_v25  ;;  %4533 = vmatmul.mubr.msk.f32.gmra.mxu1 %vm274_vm1, %v5063_v25 }
  0x51   : > { %466 = vmatprep.mubr.f32.mxu0 %v7226_v0  ;;  %627 = vmatprep.mubr.f32.mxu1 %v7226_v0 }
  0x54   : > { %4516 = vmatmul.mubr.msk.f32.gmra.mxu0 %vm274_vm1, %v5074_v26  ;;  %4534 = vmatmul.mubr.msk.f32.gmra.mxu1 %vm274_vm1, %v5074_v26 }
  0x55   : > { %472 = vmatprep.mubr.f32.mxu0 %v7226_v0  ;;  %633 = vmatprep.mubr.f32.mxu1 %v7226_v0 }
  0x58   : > { %4517 = vmatmul.mubr.msk.f32.gmra.mxu0 %vm274_vm1, %v5085_v27  ;;  %4535 = vmatmul.mubr.msk.f32.gmra.mxu1 %vm274_vm1, %v5085_v27 }
  0x59   : > { %478 = vmatprep.mubr.f32.mxu0 %v7226_v0  ;;  %639 = vmatprep.mubr.f32.mxu1 %v7226_v0 }
  0x5c   : > { %4518 = vmatmul.mubr.msk.f32.gmra.mxu0 %vm274_vm1, %v5096_v28  ;;  %4536 = vmatmul.mubr.msk.f32.gmra.mxu1 %vm274_vm1, %v5096_v28 }
  0x5d   : > { %484 = vmatprep.mubr.f32.mxu0 %v7226_v0  ;;  %645 = vmatprep.mubr.f32.mxu1 %v7226_v0 }
  0x60   : > { %4519 = vmatmul.mubr.msk.f32.gmra.mxu0 %vm274_vm1, %v5107_v29  ;;  %4537 = vmatmul.mubr.msk.f32.gmra.mxu1 %vm274_vm1, %v5107_v29 }
  0x61   : > { %490 = vmatprep.mubr.f32.mxu0 %v7226_v0  ;;  %651 = vmatprep.mubr.f32.mxu1 %v7226_v0 }
  0x64   : > { %4520 = vmatmul.mubr.msk.f32.gmra.mxu0 %vm274_vm1, %v5118_v30  ;;  %4538 = vmatmul.mubr.msk.f32.gmra.mxu1 %vm274_vm1, %v5118_v30 }
  0x65   : > { %496 = vmatprep.mubr.f32.mxu0 %v7226_v0  ;;  %657 = vmatprep.mubr.f32.mxu1 %v7226_v0 }
  0x68   : > { %4521 = vmatmul.mubr.msk.f32.gmra.mxu0 %vm274_vm1, %v5129_v31  ;;  %4539 = vmatmul.mubr.msk.f32.gmra.mxu1 %vm274_vm1, %v5129_v31 }
  0x69   : > { %502 = vmatprep.mubr.f32.mxu0 %v7226_v0  ;;  %663 = vmatprep.mubr.f32.mxu1 %v7226_v0 }
  0x6c   : > { %4522 = vmatmul.mubr.msk.f32.gmra.mxu0 %vm274_vm1, %v5140_v32  ;;  %4540 = vmatmul.mubr.msk.f32.gmra.mxu1 %vm274_vm1, %v5140_v32 }
  0x6d   : > { %734 = vmatprep.mubr.f32.mxu0 %v7226_v0  ;;  %895 = vmatprep.mubr.f32.mxu1 %v7226_v0 }
  0x70   : > { %4543 = vmatmul.mubr.msk.f32.vlgmr.msra.gmra.mxu0 %vm274_vm1, %v4963_v9  ;;  %4561 = vmatmul.mubr.msk.f32.vlgmr.msra.gmra.mxu1 %vm274_vm1, %v4963_v9 }
  0x71   : > { %740 = vmatprep.mubr.f32.mxu0 %v7226_v0  ;;  %901 = vmatprep.mubr.f32.mxu1 %v7226_v0 }
  0x74   : > { %4544 = vmatmul.mubr.msk.f32.gmra.mxu0 %vm274_vm1, %v4974_v10  ;;  %4562 = vmatmul.mubr.msk.f32.gmra.mxu1 %vm274_vm1, %v4974_v10 }
  0x75   : > { %746 = vmatprep.mubr.f32.mxu0 %v7226_v0  ;;  %907 = vmatprep.mubr.f32.mxu1 %v7226_v0 }
  0x78   : > { %4545 = vmatmul.mubr.msk.f32.gmra.mxu0 %vm274_vm1, %v4989_v15  ;;  %4563 = vmatmul.mubr.msk.f32.gmra.mxu1 %vm274_vm1, %v4989_v15 }
  0x79   : > { %752 = vmatprep.mubr.f32.mxu0 %v7226_v0  ;;  %913 = vmatprep.mubr.f32.mxu1 %v7226_v0 }
  0x7c   : > { %4546 = vmatmul.mubr.msk.f32.gmra.mxu0 %vm274_vm1, %v5008_v20  ;;  %4564 = vmatmul.mubr.msk.f32.gmra.mxu1 %vm274_vm1, %v5008_v20 }
  0x7d   : > { %758 = vmatprep.mubr.f32.mxu0 %v7226_v0  ;;  %919 = vmatprep.mubr.f32.mxu1 %v7226_v0 }
  0x80   : > { %4547 = vmatmul.mubr.msk.f32.gmra.mxu0 %vm274_vm1, %v5019_v21  ;;  %4565 = vmatmul.mubr.msk.f32.gmra.mxu1 %vm274_vm1, %v5019_v21 }
  0x81   : > { %764 = vmatprep.mubr.f32.mxu0 %v7226_v0  ;;  %925 = vmatprep.mubr.f32.mxu1 %v7226_v0 }
  0x84   : > { %4548 = vmatmul.mubr.msk.f32.gmra.mxu0 %vm274_vm1, %v5030_v22  ;;  %4566 = vmatmul.mubr.msk.f32.gmra.mxu1 %vm274_vm1, %v5030_v22 }
  0x85   : > { %770 = vmatprep.mubr.f32.mxu0 %v7226_v0  ;;  %931 = vmatprep.mubr.f32.mxu1 %v7226_v0 }
  0x88   : > { %4549 = vmatmul.mubr.msk.f32.gmra.mxu0 %vm274_vm1, %v5041_v23  ;;  %4567 = vmatmul.mubr.msk.f32.gmra.mxu1 %vm274_vm1, %v5041_v23 }
  0x89   : > { %776 = vmatprep.mubr.f32.mxu0 %v7226_v0  ;;  %937 = vmatprep.mubr.f32.mxu1 %v7226_v0 }
  0x8c   : > { %4550 = vmatmul.mubr.msk.f32.gmra.mxu0 %vm274_vm1, %v5052_v24  ;;  %4568 = vmatmul.mubr.msk.f32.gmra.mxu1 %vm274_vm1, %v5052_v24  ;;  %v4834_v24 = vmov 0  }
  0x8d   : > { %782 = vmatprep.mubr.f32.mxu0 %v7226_v0  ;;  %943 = vmatprep.mubr.f32.mxu1 %v7226_v0 }
  0x8e   : > { %4656 = vset.pattern.permute.xlu0 %v4834_v24  ;;  %4657 = vset.pattern.permute.xlu1 %v4834_v24 }
  0x90   : > { %4551 = vmatmul.mubr.msk.f32.gmra.mxu0 %vm274_vm1, %v5063_v25  ;;  %4569 = vmatmul.mubr.msk.f32.gmra.mxu1 %vm274_vm1, %v5063_v25  ;;  %v1184_v25 = vld [vmem:[%s7224_s3] sm:$0xff] }
  0x91   : > { %788 = vmatprep.mubr.f32.mxu0 %v7226_v0  ;;  %949 = vmatprep.mubr.f32.mxu1 %v7226_v0 }
  0x92   : > { %1250 = vperm.xlu0 %4656, %v1184_v25  }
  0x94   : > { %4552 = vmatmul.mubr.msk.f32.gmra.mxu0 %vm274_vm1, %v5074_v26  ;;  %4570 = vmatmul.mubr.msk.f32.gmra.mxu1 %vm274_vm1, %v5074_v26 }
  0x95   : > { %794 = vmatprep.mubr.f32.mxu0 %v7226_v0  ;;  %955 = vmatprep.mubr.f32.mxu1 %v7226_v0 }
  0x98   : > { %4553 = vmatmul.mubr.msk.f32.gmra.mxu0 %vm274_vm1, %v5085_v27  ;;  %4571 = vmatmul.mubr.msk.f32.gmra.mxu1 %vm274_vm1, %v5085_v27 }
  0x99   : > { %800 = vmatprep.mubr.f32.mxu0 %v7226_v0  ;;  %961 = vmatprep.mubr.f32.mxu1 %v7226_v0 }
  0x9c   : > { %4554 = vmatmul.mubr.msk.f32.gmra.mxu0 %vm274_vm1, %v5096_v28  ;;  %4572 = vmatmul.mubr.msk.f32.gmra.mxu1 %vm274_vm1, %v5096_v28 }
  0x9d   : > { %806 = vmatprep.mubr.f32.mxu0 %v7226_v0  ;;  %967 = vmatprep.mubr.f32.mxu1 %v7226_v0 }
  0xa0   : > { %4555 = vmatmul.mubr.msk.f32.gmra.mxu0 %vm274_vm1, %v5107_v29  ;;  %4573 = vmatmul.mubr.msk.f32.gmra.mxu1 %vm274_vm1, %v5107_v29 }
  0xa1   : > { %812 = vmatprep.mubr.f32.mxu0 %v7226_v0  ;;  %973 = vmatprep.mubr.f32.mxu1 %v7226_v0 }
  0xa4   : > { %4556 = vmatmul.mubr.msk.f32.gmra.mxu0 %vm274_vm1, %v5118_v30  ;;  %4574 = vmatmul.mubr.msk.f32.gmra.mxu1 %vm274_vm1, %v5118_v30  ;;  %v1185_v30 = vld [vmem:[%s7224_s3 + $0x8] sm:$0xff] }
  0xa5   : > { %818 = vmatprep.mubr.f32.mxu0 %v7226_v0  ;;  %979 = vmatprep.mubr.f32.mxu1 %v7226_v0 }
  0xa6   : > { %1255 = vperm.xlu0 %4656, %v1185_v30  }
  0xa8   : > { %4557 = vmatmul.mubr.msk.f32.gmra.mxu0 %vm274_vm1, %v5129_v31  ;;  %4575 = vmatmul.mubr.msk.f32.gmra.mxu1 %vm274_vm1, %v5129_v31 }
  0xa9   : > { %824 = vmatprep.mubr.f32.mxu0 %v7226_v0  ;;  %985 = vmatprep.mubr.f32.mxu1 %v7226_v0 }
  0xac   : > { %4558 = vmatmul.mubr.msk.f32.gmra.mxu0 %vm274_vm1, %v5140_v32  ;;  %4576 = vmatmul.mubr.msk.f32.gmra.mxu1 %vm274_vm1, %v5140_v32 }
  0xad   : > { %1632 = vmatprep.mubr.f32.mxu0 %v7226_v0  ;;  %2081 = vmatprep.mubr.f32.mxu1 %v7226_v0 }
  0xf0   : > { %v5244_v33 = vpop.f32.mrf.mxu0  ;;  %v5246_v34 = vpop.f32.mrf.mxu1 }
  0xf1   : > { %7266 = vst [vmem:[#allocation8_spill] sm:$0xff] %v5244_v33  ;;  %7267 = vst [vmem:[#allocation9_spill] sm:$0xff] %v5246_v34  ;;  %v1186_v33 = vld [vmem:[%s7224_s3 + $0x10] sm:$0xff] }
  0xf2   : > { %v5248_v35 = vpop.f32.mrf.mxu0  ;;  %v5250_v36 = vpop.f32.mrf.mxu1  ;;  %1260 = vperm.xlu1 %4657, %v1186_v33  }
  0xf3   : > { %7268 = vst [vmem:[#allocation10_spill] sm:$0xff] %v5248_v35  ;;  %7269 = vst [vmem:[#allocation11_spill] sm:$0xff] %v5250_v36 }
  0xf4   : > { %v5252_v37 = vpop.f32.mrf.mxu0  ;;  %v5254_v38 = vpop.f32.mrf.mxu1 }
  0xf5   : > { %7270 = vst [vmem:[#allocation12_spill] sm:$0xff] %v5252_v37  ;;  %7271 = vst [vmem:[#allocation13_spill] sm:$0xff] %v5254_v38 }
  0xf6   : > { %v5256_v39 = vpop.f32.mrf.mxu0  ;;  %v5258_v40 = vpop.f32.mrf.mxu1 }
  0xf7   : > { %7272 = vst [vmem:[#allocation14_spill] sm:$0xff] %v5256_v39  ;;  %7273 = vst [vmem:[#allocation15_spill] sm:$0xff] %v5258_v40 }
  0xf8   : > { %v5260_v41 = vpop.f32.mrf.mxu0  ;;  %v5262_v42 = vpop.f32.mrf.mxu1 }
  0xf9   : > { %7274 = vst [vmem:[#allocation16_spill] sm:$0xff] %v5260_v41  ;;  %7275 = vst [vmem:[#allocation17_spill] sm:$0xff] %v5262_v42 }
  0xfa   : > { %v5264_v43 = vpop.f32.mrf.mxu0  ;;  %v5266_v44 = vpop.f32.mrf.mxu1 }
  0xfb   : > { %7276 = vst [vmem:[#allocation18_spill] sm:$0xff] %v5264_v43  ;;  %7277 = vst [vmem:[#allocation19_spill] sm:$0xff] %v5266_v44 }
  0xfc   : > { %v5268_v45 = vpop.f32.mrf.mxu0  ;;  %v5270_v46 = vpop.f32.mrf.mxu1 }
  0xfd   : > { %7278 = vst [vmem:[#allocation20_spill] sm:$0xff] %v5270_v46 }
  0xfe   : > { %v5272_v47 = vpop.f32.mrf.mxu0  ;;  %v5274_v48 = vpop.f32.mrf.mxu1 }
 0x100   : > { %v5276_v49 = vpop.f32.mrf.mxu0  ;;  %v5278_v50 = vpop.f32.mrf.mxu1 }
 0x102   : > { %v5280_v51 = vpop.f32.mrf.mxu0  ;;  %v5282_v52 = vpop.f32.mrf.mxu1 }
 0x104   : > { %v5284_v53 = vpop.f32.mrf.mxu0  ;;  %v5286_v54 = vpop.f32.mrf.mxu1 }
 0x106   : > { %v5288_v55 = vpop.f32.mrf.mxu0  ;;  %v5290_v56 = vpop.f32.mrf.mxu1 }
 0x108   : > { %v5292_v57 = vpop.f32.mrf.mxu0  ;;  %v5294_v58 = vpop.f32.mrf.mxu1 }
 0x10a   : > { %v5296_v59 = vpop.f32.mrf.mxu0  ;;  %v5298_v60 = vpop.f32.mrf.mxu1 }
 0x10c   : > { %v5300_v61 = vpop.f32.mrf.mxu0  ;;  %v5302_v62 = vpop.f32.mrf.mxu1 }
 0x10e   : > { %v5304_v63 = vpop.f32.mrf.mxu0  ;;  %v5306_v1 = vpop.f32.mrf.mxu1 }
 0x110   : > { %v5308_v2 = vpop.f32.mrf.mxu0  ;;  %v5310_v3 = vpop.f32.mrf.mxu1 }
 0x112   : > { %v5312_v4 = vpop.f32.mrf.mxu0  ;;  %v5314_v5 = vpop.f32.mrf.mxu1 }
 0x114   : > { %v5316_v6 = vpop.f32.mrf.mxu0  ;;  %v5318_v7 = vpop.f32.mrf.mxu1 }
 0x116   : > { %v5320_v8 = vpop.f32.mrf.mxu0  ;;  %v5322_v9 = vpop.f32.mrf.mxu1 }
 0x118   : > { %v5324_v10 = vpop.f32.mrf.mxu0  ;;  %v5326_v11 = vpop.f32.mrf.mxu1 }
 0x11a   : > { %v5328_v12 = vpop.f32.mrf.mxu0  ;;  %v5330_v13 = vpop.f32.mrf.mxu1 }
 0x11c   : > { %v5332_v14 = vpop.f32.mrf.mxu0  ;;  %v5334_v15 = vpop.f32.mrf.mxu1 }
 0x11e   : > { %v5336_v16 = vpop.f32.mrf.mxu0  ;;  %v5338_v17 = vpop.f32.mrf.mxu1 }
 0x120   : > { %v5340_v18 = vpop.f32.mrf.mxu0  ;;  %v5342_v19 = vpop.f32.mrf.mxu1 }
 0x122   : > { %v488_v20 = vpop.f32.mrf.mxu0  ;;  %v649_v21 = vpop.f32.mrf.mxu1 }
 0x124   : > { %v492_v22 = vpop.f32.mrf.mxu0  ;;  %v653_v23 = vpop.f32.mrf.mxu1 }
 0x126   : > { %v494_v26 = vpop.f32.mrf.mxu0  ;;  %v655_v27 = vpop.f32.mrf.mxu1 }
 0x127   : > { %v1097_v33 = vmax.f32 %v494_v26, 0.0 }
 0x128   : > { %v498_v28 = vpop.f32.mrf.mxu0  ;;  %v659_v29 = vpop.f32.mrf.mxu1 }
 0x129   : > { %v1104_v30 = vmax.f32 %v498_v28, 0.0  ;;  %v1106_v44 = vmax.f32 %v659_v29, 0.0  ;;  %v1091_v28 = vmax.f32 %v649_v21, 0.0  ;;  %v1088_v29 = vmax.f32 %v5340_v18, 0.0 }
 0x12a   : > { %v500_v31 = vpop.f32.mrf.mxu0  ;;  %v661_v32 = vpop.f32.mrf.mxu1 }
 0x12b   : > { %v1105_v42 = vmax.f32 %v500_v31, 0.0  ;;  %v1107_v41 = vmax.f32 %v661_v32, 0.0 }
 0x12c   : > { %v504_v0 = vpop.f32.mrf.mxu0  ;;  %v665_v34 = vpop.f32.mrf.mxu1 }
 0x12d   : > { %v1112_v38 = vmax.f32 %v504_v0, 0.0  ;;  %v1114_v37 = vmax.f32 %v665_v34, 0.0  ;;  %v1096_v0 = vmax.f32 %v492_v22, 0.0  ;;  %v1098_v34 = vmax.f32 %v653_v23, 0.0 }
 0x12e   : > { %v506_v36 = vpop.f32.mrf.mxu0  ;;  %v667_v24 = vpop.f32.mrf.mxu1  ;;  %v1083_v22 = vmax.f32 %v5338_v17, 0.0  ;;  %v1075_v23 = vmax.f32 %v5330_v13, 0.0  ;;  %v1074_v17 = vmax.f32 %v5326_v11, 0.0  ;;  %v1066_v13 = vmax.f32 %v5318_v7, 0.0 }
 0x12f   : > { %v1113_v35 = vmax.f32 %v506_v36, 0.0  ;;  %v1115_v25 = vmax.f32 %v667_v24, 0.0  ;;  %v1099_v36 = vmax.f32 %v655_v27, 0.0  ;;  %v1067_v27 = vmax.f32 %v5322_v9, 0.0 }
 0x130   : > { %v5353_v40 = vpop.f32.mrf.mxu0  ;;  %v5355_v39 = vpop.f32.mrf.mxu1  ;;  %v1057_v11 = vmax.f32 %v5312_v4, 0.0  ;;  %v1058_v9 = vmax.f32 %v5310_v3, 0.0  ;;  %v1049_v7 = vmax.f32 %v5304_v63, 0.0  ;;  %v1048_v4 = vmax.f32 %v5300_v61, 0.0 }
 0x131   : > { %7279 = vst [vmem:[#allocation21_spill] sm:$0xff] %v5353_v40  ;;  %7280 = vst [vmem:[#allocation22_spill] sm:$0xff] %v5355_v39  ;;  %1568 = vmatprep.subr.mxu0 %v1113_v35  ;;  %2017 = vmatprep.subr.mxu1 %v1115_v25  ;;  %v1089_v35 = vmax.f32 %v488_v20, 0.0  ;;  %v1082_v20 = vmax.f32 %v5334_v15, 0.0  ;;  %v1065_v15 = vmax.f32 %v5320_v8, 0.0  ;;  %v1059_v25 = vmax.f32 %v5314_v5, 0.0 }
 0x132   : > { %v5357_v43 = vpop.f32.mrf.mxu0  ;;  %v5359_v46 = vpop.f32.mrf.mxu1  ;;  %1569 = vmatpush1.msra.mxu0 %v1112_v38  ;;  %2018 = vmatpush1.msra.mxu1 %v1114_v37  ;;  %v1090_v37 = vmax.f32 %v5342_v19, 0.0  ;;  %v1073_v19 = vmax.f32 %v5328_v12, 0.0  ;;  %v1064_v12 = vmax.f32 %v5316_v6, 0.0  ;;  %v1056_v8 = vmax.f32 %v5308_v2, 0.0 }
 0x133   : > { %7281 = vst [vmem:[#allocation23_spill] sm:$0xff] %v5357_v43  ;;  %7282 = vst [vmem:[#allocation24_spill] sm:$0xff] %v5359_v46  ;;  %1570 = vmatprep.subr.mxu0 %v1105_v42  ;;  %2019 = vmatprep.subr.mxu1 %v1107_v41  ;;  %v1081_v41 = vmax.f32 %v5336_v16, 0.0  ;;  %v1072_v16 = vmax.f32 %v5324_v10, 0.0  ;;  %v1050_v5 = vmax.f32 %v5302_v62, 0.0  ;;  %v1041_v3 = vmax.f32 %v5296_v59, 0.0 }
 0x134   : > { %v5361_v24 = vpop.f32.mrf.mxu0  ;;  %v5363_v31 = vpop.f32.mrf.mxu1  ;;  %1571 = vmatpush1.msra.mxu0 %v1104_v30  ;;  %2020 = vmatpush1.msra.mxu1 %v1106_v44  ;;  %v1080_v44 = vmax.f32 %v5332_v14, 0.0  ;;  %v1040_v63 = vmax.f32 %v5292_v57, 0.0  ;;  %v1033_v62 = vmax.f32 %v5288_v55, 0.0  ;;  %v1032_v59 = vmax.f32 %v5284_v53, 0.0  ;;  %v1201_v43 = vld [vmem:[%s7224_s3 + $0x88] sm:$0xff] }
 0x135   : > { %7283 = vst [vmem:[#allocation25_spill] sm:$0xff] %v5361_v24  ;;  %7284 = vst [vmem:[#allocation26_spill] sm:$0xff] %v5363_v31  ;;  %1572 = vmatprep.subr.mxu0 %v1097_v33  ;;  %2021 = vmatprep.subr.mxu1 %v1099_v36  ;;  %v1051_v33 = vmax.f32 %v5306_v1, 0.0  ;;  %v1042_v1 = vmax.f32 %v5294_v58, 0.0  ;;  %v1025_v58 = vmax.f32 %v5280_v51, 0.0  ;;  %v1024_v55 = vmax.f32 %v5276_v49, 0.0 }
 0x136   : > { %v5367_v38 = vpop.f32.mrf.mxu0  ;;  %v5369_v42 = vpop.f32.mrf.mxu1  ;;  %1573 = vmatpush1.msra.mxu0 %v1096_v0  ;;  %2022 = vmatpush1.msra.mxu1 %v1098_v34  ;;  %v1043_v0 = vmax.f32 %v5298_v60, 0.0  ;;  %v1034_v60 = vmax.f32 %v5286_v54, 0.0  ;;  %v1017_v54 = vmax.f32 %v5272_v47, 0.0  ;;  %v1016_v51 = vmax.f32 %v5268_v45, 0.0  ;;  %v7296_v47 = vld [vmem:[#allocation16_spill] sm:$0xff] }
 0x137   : > { %7285 = vst [vmem:[#allocation27_spill] sm:$0xff] %v5367_v38  ;;  %7286 = vst [vmem:[#allocation28_spill] sm:$0xff] %v5369_v42  ;;  %1574 = vmatprep.subr.mxu0 %v1089_v35  ;;  %2023 = vmatprep.subr.mxu1 %v1091_v28  ;;  %v1035_v35 = vmax.f32 %v5290_v56, 0.0  ;;  %v1026_v56 = vmax.f32 %v5278_v50, 0.0  ;;  %v7294_v50 = vld [vmem:[#allocation18_spill] sm:$0xff] }
 0x138   : > { %v5375_v21 = vpop.f32.mrf.mxu0  ;;  %v5377_v18 = vpop.f32.mrf.mxu1  ;;  %1575 = vmatpush1.msra.mxu0 %v1088_v29  ;;  %2024 = vmatpush1.msra.mxu1 %v1090_v37  ;;  %v1027_v29 = vmax.f32 %v5282_v52, 0.0  ;;  %v7293_v52 = vld [vmem:[#allocation20_spill] sm:$0xff] }
 0x139   : > { %7287 = vst [vmem:[#allocation29_spill] sm:$0xff] %v5375_v21  ;;  %7288 = vst [vmem:[#allocation30_spill] sm:$0xff] %v5377_v18  ;;  %1576 = vmatprep.subr.mxu0 %v1081_v41  ;;  %2025 = vmatprep.subr.mxu1 %v1083_v22  ;;  %v1019_v41 = vmax.f32 %v5274_v48, 0.0  ;;  %v1018_v22 = vmax.f32 %v7293_v52, 0.0  ;;  %v1008_v48 = vmax.f32 %v7296_v47, 0.0  ;;  %v1190_v47 = vld [vmem:[%s7224_s3 + $0x30] sm:$0xff] }
 0x13a   : > { %v5383_v26 = vpop.f32.mrf.mxu0  ;;  %v5385_v14 = vpop.f32.mrf.mxu1  ;;  %1577 = vmatpush1.msra.mxu0 %v1080_v44  ;;  %2026 = vmatpush1.msra.mxu1 %v1082_v20  ;;  %v1009_v20 = vmax.f32 %v7294_v50, 0.0  ;;  %v1121_v50 = vld [vmem:[#allocation2 + $0x8] sm:$0xff] }
 0x13b   : > { %7289 = vst [vmem:[#allocation31_spill] sm:$0xff] %v5383_v26  ;;  %7290 = vst [vmem:[#allocation32_spill] sm:$0xff] %v5385_v14  ;;  %1578 = vmatprep.subr.mxu0 %v1073_v19  ;;  %2027 = vmatprep.subr.mxu1 %v1075_v23  ;;  %v7295_v19 = vld [vmem:[#allocation19_spill] sm:$0xff] }
 0x13c   : > { %v5391_v32 = vpop.f32.mrf.mxu0  ;;  %v5393_v10 = vpop.f32.mrf.mxu1  ;;  %1579 = vmatpush1.msra.mxu0 %v1072_v16  ;;  %2028 = vmatpush1.msra.mxu1 %v1074_v17  ;;  %v1011_v23 = vmax.f32 %v7295_v19, 0.0  ;;  %v7297_v16 = vld [vmem:[#allocation17_spill] sm:$0xff] }
 0x13d   : > { %7291 = vst [vmem:[#allocation33_spill] sm:$0xff] %v5391_v32  ;;  %7292 = vst [vmem:[#allocation34_spill] sm:$0xff] %v5393_v10  ;;  %1580 = vmatprep.subr.mxu0 %v1065_v15  ;;  %2029 = vmatprep.subr.mxu1 %v1067_v27  ;;  %v1010_v17 = vmax.f32 %v7297_v16, 0.0  ;;  %v7298_v27 = vld [vmem:[#allocation14_spill] sm:$0xff] }
 0x13e   : > { %v5399_v30 = vpop.f32.mrf.mxu0  ;;  %v5401_v6 = vpop.f32.mrf.mxu1  ;;  %1581 = vmatpush1.msra.mxu0 %v1064_v12  ;;  %2030 = vmatpush1.msra.mxu1 %v1066_v13  ;;  %v1001_v12 = vmax.f32 %v7298_v27, 0.0  ;;  %v7299_v13 = vld [vmem:[#allocation15_spill] sm:$0xff] }
 0x13f   : > { %1582 = vmatprep.subr.mxu0 %v1057_v11  ;;  %2031 = vmatprep.subr.mxu1 %v1059_v25  ;;  %v1003_v11 = vmax.f32 %v7299_v13, 0.0  ;;  %v7300_v25 = vld [vmem:[#allocation12_spill] sm:$0xff]  ;;  %v1191_v13 = vld [vmem:[%s7224_s3 + $0x38] sm:$0xff] }
 0x140   : > { %v5407_v36 = vpop.f32.mrf.mxu0  ;;  %v5409_v2 = vpop.f32.mrf.mxu1  ;;  %1583 = vmatpush1.msra.mxu0 %v1056_v8  ;;  %2032 = vmatpush1.msra.mxu1 %v1058_v9  ;;  %v1000_v8 = vmax.f32 %v7300_v25, 0.0  ;;  %v7301_v9 = vld [vmem:[#allocation13_spill] sm:$0xff] }
 0x141   : > { %1584 = vmatprep.subr.mxu0 %v1049_v7  ;;  %2033 = vmatprep.subr.mxu1 %v1051_v33  ;;  %v1002_v7 = vmax.f32 %v7301_v9, 0.0  ;;  %v1123_v9 = vld [vmem:[#allocation2 + $0x18] sm:$0xff] }
 0x142   : > { %v5415_v34 = vpop.f32.mrf.mxu0  ;;  %v5417_v61 = vpop.f32.mrf.mxu1  ;;  %1585 = vmatpush1.msra.mxu0 %v1048_v4  ;;  %2034 = vmatpush1.msra.mxu1 %v1050_v5  ;;  %v7302_v5 = vld [vmem:[#allocation10_spill] sm:$0xff] }
 0x143   : > { %1586 = vmatprep.subr.mxu0 %v1041_v3  ;;  %2035 = vmatprep.subr.mxu1 %v1043_v0  ;;  %v993_v3 = vmax.f32 %v7302_v5, 0.0  ;;  %v7303_v0 = vld [vmem:[#allocation11_spill] sm:$0xff] }
 0x144   : > { %v5423_v28 = vpop.f32.mrf.mxu0  ;;  %v5425_v57 = vpop.f32.mrf.mxu1  ;;  %1587 = vmatpush1.msra.mxu0 %v1040_v63  ;;  %2036 = vmatpush1.msra.mxu1 %v1042_v1  ;;  %v995_v63 = vmax.f32 %v7303_v0, 0.0  ;;  %v7304_v1 = vld [vmem:[#allocation8_spill] sm:$0xff]  ;;  %v1194_v0 = vld [vmem:[%s7224_s3 + $0x50] sm:$0xff] }
 0x145   : > { %1588 = vmatprep.subr.mxu0 %v1033_v62  ;;  %2037 = vmatprep.subr.mxu1 %v1035_v35  ;;  %v992_v62 = vmax.f32 %v7304_v1, 0.0  ;;  %v7305_v35 = vld [vmem:[#allocation9_spill] sm:$0xff] }
 0x146   : > { %v5431_v37 = vpop.f32.mrf.mxu0  ;;  %v5433_v53 = vpop.f32.mrf.mxu1  ;;  %1589 = vmatpush1.msra.mxu0 %v1032_v59  ;;  %2038 = vmatpush1.msra.mxu1 %v1034_v60  ;;  %v994_v59 = vmax.f32 %v7305_v35, 0.0 }
 0x147   : > { %1590 = vmatprep.subr.mxu0 %v1025_v58  ;;  %2039 = vmatprep.subr.mxu1 %v1027_v29  ;;  %v1120_v29 = vld [vmem:[#allocation2] sm:$0xff] }
 0x148   : > { %v5439_v44 = vpop.f32.mrf.mxu0  ;;  %v5441_v49 = vpop.f32.mrf.mxu1  ;;  %1591 = vmatpush1.msra.mxu0 %v1024_v55  ;;  %2040 = vmatpush1.msra.mxu1 %v1026_v56 }
 0x149   : > { %1592 = vmatprep.subr.mxu0 %v1017_v54  ;;  %2041 = vmatprep.subr.mxu1 %v1019_v41  ;;  %v1187_v54 = vld [vmem:[%s7224_s3 + $0x18] sm:$0xff]  ;;  %v1188_v41 = vld [vmem:[%s7224_s3 + $0x20] sm:$0xff] }
 0x14a   : > { %v5447_v15 = vpop.f32.mrf.mxu0  ;;  %v5449_v45 = vpop.f32.mrf.mxu1  ;;  %1593 = vmatpush1.msra.mxu0 %v1016_v51  ;;  %2042 = vmatpush1.msra.mxu1 %v1018_v22  ;;  %v7306_v22 = vmov 0.0  }
 0x14b   : > { %1594 = vmatprep.subr.mxu0 %v1009_v20  ;;  %2043 = vmatprep.subr.mxu1 %v1011_v23  ;;  %v1189_v23 = vld [vmem:[%s7224_s3 + $0x28] sm:$0xff] }
 0x14c   : > { %v5455_v33 = vpop.f32.mrf.mxu0  ;;  %v5457_v4 = vpop.f32.mrf.mxu1  ;;  %1595 = vmatpush1.msra.mxu0 %v1008_v48  ;;  %2044 = vmatpush1.msra.mxu1 %v1010_v17  ;;  %v1122_v17 = vld [vmem:[#allocation2 + $0x10] sm:$0xff] }
 0x14d   : > { %1596 = vmatprep.subr.mxu0 %v1001_v12  ;;  %2045 = vmatprep.subr.mxu1 %v1003_v11  ;;  %v1192_v11 = vld [vmem:[%s7224_s3 + $0x40] sm:$0xff] }
 0x14e   : > { %v5463_v60 = vpop.f32.mrf.mxu0  ;;  %v5465_v58 = vpop.f32.mrf.mxu1  ;;  %1597 = vmatpush1.msra.mxu0 %v1000_v8  ;;  %2046 = vmatpush1.msra.mxu1 %v1002_v7 }
 0x14f   : > { %1598 = vmatprep.subr.mxu0 %v993_v3  ;;  %2047 = vmatprep.subr.mxu1 %v995_v63  ;;  %v1193_v3 = vld [vmem:[%s7224_s3 + $0x48] sm:$0xff] }
 0x150   : > { %v5467_v55 = vpop.f32.mrf.mxu0  ;;  %v5469_v56 = vpop.f32.mrf.mxu1  ;;  %1599 = vmatpush1.msra.mxu0 %v992_v62  ;;  %2048 = vmatpush1.msra.mxu1 %v994_v59  ;;  %v1124_v62 = vld [vmem:[#allocation2 + $0x20] sm:$0xff] }
 0x151   : > { %1633 = vmatmul.mubr.f32.vlgmr.msra.gmra.mxu0 %v1120_v29  ;;  %2082 = vmatmul.mubr.f32.vlgmr.msra.gmra.mxu1 %v1120_v29  ;;  %v1195_v29 = vld [vmem:[%s7224_s3 + $0x58] sm:$0xff] }
 0x152   : > { %v5477_v51 = vpop.f32.mrf.mxu0  ;;  %v5479_v52 = vpop.f32.mrf.mxu1  ;;  %1638 = vmatprep.mubr.f32.mxu0 %v7306_v22  ;;  %2087 = vmatprep.mubr.f32.mxu1 %v7306_v22 }
 0x153   : > { %1265 = vperm.xlu1 %4657, %v1187_v54   ;;  %1270 = vperm.xlu0 %4656, %v1188_v41   ;;  %v1196_v54 = vld [vmem:[%s7224_s3 + $0x60] sm:$0xff] }
 0x154   : > { %v5483_v20 = vpop.f32.mrf.mxu0  ;;  %v5485_v19 = vpop.f32.mrf.mxu1 }
 0x155   : > { %1639 = vmatmul.mubr.f32.gmra.mxu0 %v1121_v50  ;;  %2088 = vmatmul.mubr.f32.gmra.mxu1 %v1121_v50 }
 0x156   : > { %v5493_v48 = vpop.f32.mrf.mxu0  ;;  %v5495_v16 = vpop.f32.mrf.mxu1  ;;  %1644 = vmatprep.mubr.f32.mxu0 %v7306_v22  ;;  %2093 = vmatprep.mubr.f32.mxu1 %v7306_v22 }
 0x157   : > { %1275 = vperm.xlu1 %4657, %v1189_v23   ;;  %1280 = vperm.xlu0 %4656, %v1190_v47   ;;  %v1125_v23 = vld [vmem:[#allocation2 + $0x28] sm:$0xff] }
 0x158   : > { %v5499_v27 = vpop.f32.mrf.mxu0  ;;  %v5501_v12 = vpop.f32.mrf.mxu1 }
 0x159   : > { %1645 = vmatmul.mubr.f32.gmra.mxu0 %v1122_v17  ;;  %2094 = vmatmul.mubr.f32.gmra.mxu1 %v1122_v17 }
 0x15a   : > { %v5509_v25 = vpop.f32.mrf.mxu0  ;;  %v5511_v8 = vpop.f32.mrf.mxu1  ;;  %1650 = vmatprep.mubr.f32.mxu0 %v7306_v22  ;;  %2099 = vmatprep.mubr.f32.mxu1 %v7306_v22 }
 0x15b   : > { %1285 = vperm.xlu1 %4657, %v1191_v13   ;;  %1290 = vperm.xlu0 %4656, %v1192_v11   ;;  %v1197_v13 = vld [vmem:[%s7224_s3 + $0x68] sm:$0xff]  ;;  %v1198_v11 = vld [vmem:[%s7224_s3 + $0x70] sm:$0xff] }
 0x15c   : > { %v5515_v7 = vpop.f32.mrf.mxu0  ;;  %v5517_v5 = vpop.f32.mrf.mxu1 }
 0x15d   : > { %1651 = vmatmul.mubr.f32.gmra.mxu0 %v1123_v9  ;;  %2100 = vmatmul.mubr.f32.gmra.mxu1 %v1123_v9 }
 0x15e   : > { %v5525_v63 = vpop.f32.mrf.mxu0  ;;  %v5527_v1 = vpop.f32.mrf.mxu1  ;;  %1656 = vmatprep.mubr.f32.mxu0 %v7306_v22  ;;  %2105 = vmatprep.mubr.f32.mxu1 %v7306_v22 }
 0x15f   : > { %1295 = vperm.xlu1 %4657, %v1193_v3   ;;  %1300 = vperm.xlu0 %4656, %v1194_v0   ;;  %v1126_v0 = vld [vmem:[#allocation2 + $0x30] sm:$0xff] }
 0x160   : > { %v5531_v35 = vpop.f32.mrf.mxu0  ;;  %v5533_v59 = vpop.f32.mrf.mxu1 }
 0x161   : > { %1657 = vmatmul.mubr.f32.gmra.mxu0 %v1124_v62  ;;  %2106 = vmatmul.mubr.f32.gmra.mxu1 %v1124_v62 }
 0x162   : > { %v5541_v41 = vpop.f32.mrf.mxu0  ;;  %v5543_v50 = vpop.f32.mrf.mxu1  ;;  %1662 = vmatprep.mubr.f32.mxu0 %v7306_v22  ;;  %2111 = vmatprep.mubr.f32.mxu1 %v7306_v22 }
 0x163   : > { %1305 = vperm.xlu1 %4657, %v1195_v29   ;;  %1310 = vperm.xlu0 %4656, %v1196_v54   ;;  %v1199_v54 = vld [vmem:[%s7224_s3 + $0x78] sm:$0xff] }
 0x164   : > { %v5547_v47 = vpop.f32.mrf.mxu0  ;;  %v5549_v17 = vpop.f32.mrf.mxu1 }
 0x165   : > { %1663 = vmatmul.mubr.f32.gmra.mxu0 %v1125_v23  ;;  %2112 = vmatmul.mubr.f32.gmra.mxu1 %v1125_v23  ;;  %v1200_v23 = vld [vmem:[%s7224_s3 + $0x80] sm:$0xff] }
 0x166   : > { %v5557_v9 = vpop.f32.mrf.mxu0  ;;  %v5559_v3 = vpop.f32.mrf.mxu1  ;;  %1668 = vmatprep.mubr.f32.mxu0 %v7306_v22  ;;  %2117 = vmatprep.mubr.f32.mxu1 %v7306_v22 }
 0x167   : > { %1315 = vperm.xlu1 %4657, %v1197_v13   ;;  %1320 = vperm.xlu0 %4656, %v1198_v11   ;;  %v1127_v13 = vld [vmem:[#allocation2 + $0x38] sm:$0xff]  ;;  %v1101_v10 = vmax.f32 %v5557_v9, 0.0  ;;  %v1103_v32 = vmax.f32 %v5559_v3, 0.0  ;;  %v7310_v9 = vld [vmem:[#allocation32_spill] sm:$0xff] }
 0x168   : > { %v820_v62 = vpop.f32.mrf.mxu0  ;;  %v981_v29 = vpop.f32.mrf.mxu1  ;;  %v1015_v3 = vmax.f32 %v7310_v9, 0.0  ;;  %v1150_v9 = vld [vmem:[#allocation2 + $0xf0] sm:$0xff] }
 0x169   : > { %1669 = vmatmul.mubr.f32.gmra.mxu0 %v1126_v0  ;;  %2118 = vmatmul.mubr.f32.gmra.mxu1 %v1126_v0  ;;  %v1202_v0 = vld [vmem:[%s7224_s3 + $0x90] sm:$0xff]  ;;  %v1110_v26 = vmax.f32 %v981_v29, 0.0 }
 0x16a   : > { %v822_v39 = vpop.f32.mrf.mxu0  ;;  %v983_v40 = vpop.f32.mrf.mxu1  ;;  %1674 = vmatprep.mubr.f32.mxu0 %v7306_v22  ;;  %2123 = vmatprep.mubr.f32.mxu1 %v7306_v22 }
 0x16b   : > { %1325 = vperm.xlu1 %4657, %v1199_v54   ;;  %1330 = vperm.xlu0 %4656, %v1200_v23   ;;  %v1128_v54 = vld [vmem:[#allocation2 + $0x40] sm:$0xff]  ;;  %v1109_v21 = vmax.f32 %v822_v39, 0.0  ;;  %v1111_v14 = vmax.f32 %v983_v40, 0.0  ;;  %v1102_v39 = vmax.f32 %v5549_v17, 0.0  ;;  %v1093_v40 = vmax.f32 %v5541_v41, 0.0 }
 0x16c   : > { %v826_v11 = vpop.f32.mrf.mxu0  ;;  %v987_v46 = vpop.f32.mrf.mxu1  ;;  %v1038_v41 = vmax.f32 %v5425_v57, 0.0  ;;  %v1023_v57 = vmax.f32 %v5401_v6, 0.0 }
 0x16d   : > { %1675 = vmatmul.mubr.f32.gmra.mxu0 %v1127_v13  ;;  %2124 = vmatmul.mubr.f32.gmra.mxu1 %v1127_v13  ;;  %v1116_v23 = vmax.f32 %v826_v11, 0.0  ;;  %v1118_v42 = vmax.f32 %v987_v46, 0.0  ;;  %v1108_v13 = vmax.f32 %v820_v62, 0.0  ;;  %v1129_v46 = vld [vmem:[#allocation2 + $0x48] sm:$0xff]  ;;  %v7312_v62 = vld [vmem:[#allocation30_spill] sm:$0xff]  ;;  %v7313_v11 = vld [vmem:[#allocation27_spill] sm:$0xff] }
 0x16e   : > { %v828_v31 = vpop.f32.mrf.mxu0  ;;  %v989_v24 = vpop.f32.mrf.mxu1  ;;  %1680 = vmatprep.mubr.f32.mxu0 %v7306_v22  ;;  %2129 = vmatprep.mubr.f32.mxu1 %v7306_v22  ;;  %v1014_v29 = vmax.f32 %v7312_v62, 0.0  ;;  %v1152_v62 = vld [vmem:[#allocation2 + $0x100] sm:$0xff] }
 0x16f   : > { %v1117_v38 = vmax.f32 %v828_v31, 0.0  ;;  %v1119_v18 = vmax.f32 %v989_v24, 0.0  ;;  %1335 = vperm.xlu1 %4657, %v1201_v43   ;;  %1340 = vperm.xlu0 %4656, %v1202_v0   ;;  %v1100_v43 = vmax.f32 %v5547_v47, 0.0  ;;  %v1095_v24 = vmax.f32 %v5543_v50, 0.0  ;;  %v7308_v47 = vld [vmem:[#allocation34_spill] sm:$0xff] }
 0x170   : > { %v1092_v31 = vmax.f32 %v5531_v35, 0.0  ;;  %v1070_v35 = vmax.f32 %v5485_v19, 0.0  ;;  %v1055_v19 = vmax.f32 %v5465_v58, 0.0  ;;  %v1046_v58 = vmax.f32 %v5441_v49, 0.0 }
 0x171   : > { %1681 = vmatmul.mubr.f32.gmra.mxu0 %v1128_v54  ;;  %2130 = vmatmul.mubr.f32.gmra.mxu1 %v1128_v54  ;;  %v1031_v49 = vmax.f32 %v5417_v61, 0.0  ;;  %v7307_v61 = vld [vmem:[#allocation33_spill] sm:$0xff]  ;;  %v1022_v17 = vmax.f32 %v7308_v47, 0.0  ;;  %v1005_v0 = vmax.f32 %v7313_v11, 0.0  ;;  %v7314_v54 = vld [vmem:[#allocation28_spill] sm:$0xff] }
 0x172   : > { %2466 = vmatprep.subr.mxu0 %v1117_v38  ;;  %2915 = vmatprep.subr.mxu1 %v1119_v18  ;;  %v1094_v38 = vmax.f32 %v5533_v59, 0.0  ;;  %v1130_v18 = vld [vmem:[#allocation2 + $0x50] sm:$0xff]  ;;  %v1054_v59 = vmax.f32 %v5457_v4, 0.0  ;;  %v1039_v4 = vmax.f32 %v5433_v53, 0.0  ;;  %v1030_v53 = vmax.f32 %v5409_v2, 0.0  ;;  %v1148_v47 = vld [vmem:[#allocation2 + $0xe0] sm:$0xff] }
 0x173   : > { %2467 = vmatpush1.msra.mxu0 %v1116_v23  ;;  %2916 = vmatpush1.msra.mxu1 %v1118_v42  ;;  %v1085_v42 = vmax.f32 %v5525_v63, 0.0  ;;  %v1076_v63 = vmax.f32 %v5499_v27, 0.0  ;;  %v1061_v27 = vmax.f32 %v5477_v51, 0.0  ;;  %v1132_v51 = vld [vmem:[#allocation2 + $0x60] sm:$0xff]  ;;  %v1020_v50 = vmax.f32 %v7307_v61, 0.0  ;;  %v1225_v61 = vld [vmem:[%s7224_s3 + $0x148] sm:$0xff] }
 0x174   : > { %2468 = vmatprep.subr.mxu0 %v1109_v21  ;;  %2917 = vmatprep.subr.mxu1 %v1111_v14  ;;  %v1087_v21 = vmax.f32 %v5527_v1, 0.0  ;;  %v1084_v14 = vmax.f32 %v5515_v7, 0.0  ;;  %v1078_v1 = vmax.f32 %v5501_v12, 0.0  ;;  %v1069_v7 = vmax.f32 %v5493_v48, 0.0  ;;  %v1153_v11 = vld [vmem:[#allocation2 + $0x108] sm:$0xff] }
 0x175   : > { %1686 = vmatprep.mubr.f32.mxu0 %v7306_v22  ;;  %2135 = vmatprep.mubr.f32.mxu1 %v7306_v22  ;;  %v1063_v12 = vmax.f32 %v5479_v52, 0.0  ;;  %v1060_v48 = vmax.f32 %v5467_v55, 0.0  ;;  %v1052_v52 = vmax.f32 %v5455_v33, 0.0  ;;  %v1045_v55 = vmax.f32 %v5447_v15, 0.0  ;;  %v1133_v15 = vld [vmem:[#allocation2 + $0x68] sm:$0xff] }
 0x176   : > { %2469 = vmatpush1.msra.mxu0 %v1108_v13  ;;  %2918 = vmatpush1.msra.mxu1 %v1110_v26  ;;  %v1086_v26 = vmax.f32 %v5517_v5, 0.0  ;;  %v1071_v5 = vmax.f32 %v5495_v16, 0.0  ;;  %v1062_v16 = vmax.f32 %v5469_v56, 0.0  ;;  %v1047_v56 = vmax.f32 %v5449_v45, 0.0  ;;  %v1135_v13 = vld [vmem:[#allocation2 + $0x78] sm:$0xff] }
 0x177   : > { %1687 = vmatmul.mubr.f32.gmra.mxu0 %v1129_v46  ;;  %2136 = vmatmul.mubr.f32.gmra.mxu1 %v1129_v46  ;;  %v1037_v33 = vmax.f32 %v5431_v37, 0.0  ;;  %v1036_v45 = vmax.f32 %v5423_v28, 0.0  ;;  %v1028_v37 = vmax.f32 %v5407_v36, 0.0  ;;  %v1021_v28 = vmax.f32 %v5399_v30, 0.0  ;;  %v7309_v36 = vld [vmem:[#allocation31_spill] sm:$0xff]  ;;  %v7311_v30 = vld [vmem:[#allocation29_spill] sm:$0xff] }
 0x178   : > { %2470 = vmatprep.subr.mxu0 %v1101_v10  ;;  %2919 = vmatprep.subr.mxu1 %v1103_v32  ;;  %v1077_v10 = vmax.f32 %v5509_v25, 0.0  ;;  %v1079_v32 = vmax.f32 %v5511_v8, 0.0  ;;  %v1131_v25 = vld [vmem:[#allocation2 + $0x58] sm:$0xff]  ;;  %v1068_v8 = vmax.f32 %v5483_v20, 0.0  ;;  %v1053_v20 = vmax.f32 %v5463_v60, 0.0  ;;  %v7315_v46 = vld [vmem:[#allocation25_spill] sm:$0xff] }
 0x179   : > { %2471 = vmatpush1.msra.mxu0 %v1100_v43  ;;  %2920 = vmatpush1.msra.mxu1 %v1102_v39  ;;  %v1044_v60 = vmax.f32 %v5439_v44, 0.0  ;;  %v1029_v44 = vmax.f32 %v5415_v34, 0.0  ;;  %v1134_v34 = vld [vmem:[#allocation2 + $0x70] sm:$0xff]  ;;  %v1013_v2 = vmax.f32 %v7309_v36, 0.0  ;;  %v1012_v6 = vmax.f32 %v7311_v30, 0.0  ;;  %v1149_v36 = vld [vmem:[#allocation2 + $0xe8] sm:$0xff] }
 0x17a   : > { %2472 = vmatprep.subr.mxu0 %v1093_v40  ;;  %2921 = vmatprep.subr.mxu1 %v1095_v24  ;;  %v1007_v23 = vmax.f32 %v7314_v54, 0.0  ;;  %v1004_v43 = vmax.f32 %v7315_v46, 0.0  ;;  %v7316_v39 = vld [vmem:[#allocation26_spill] sm:$0xff]  ;;  %v7317_v24 = vld [vmem:[#allocation23_spill] sm:$0xff] }
 0x17b   : > { %1692 = vmatprep.mubr.f32.mxu0 %v7306_v22  ;;  %2141 = vmatprep.mubr.f32.mxu1 %v7306_v22  ;;  %v1006_v40 = vmax.f32 %v7316_v39, 0.0  ;;  %v1151_v30 = vld [vmem:[#allocation2 + $0xf8] sm:$0xff]  ;;  %v1154_v54 = vld [vmem:[#allocation2 + $0x110] sm:$0xff] }
 0x17c   : > { %2473 = vmatpush1.msra.mxu0 %v1092_v31  ;;  %2922 = vmatpush1.msra.mxu1 %v1094_v38  ;;  %v997_v31 = vmax.f32 %v7317_v24, 0.0  ;;  %v7318_v38 = vld [vmem:[#allocation24_spill] sm:$0xff]  ;;  %v1234_v46 = vld [vmem:[%s7224_s3 + $0x190] sm:$0xff]  ;;  %v1235_v39 = vld [vmem:[%s7224_s3 + $0x198] sm:$0xff] }
 0x17d   : > { %1693 = vmatmul.mubr.f32.gmra.mxu0 %v1130_v18  ;;  %2142 = vmatmul.mubr.f32.gmra.mxu1 %v1130_v18  ;;  %v1236_v24 = vld [vmem:[%s7224_s3 + $0x1a0] sm:$0xff] }
 0x17e   : > { %2474 = vmatprep.subr.mxu0 %v1085_v42  ;;  %2923 = vmatprep.subr.mxu1 %v1087_v21  ;;  %v999_v42 = vmax.f32 %v7318_v38, 0.0  ;;  %v7319_v21 = vld [vmem:[#allocation21_spill] sm:$0xff] }
 0x17f   : > { %2475 = vmatpush1.msra.mxu0 %v1084_v14  ;;  %2924 = vmatpush1.msra.mxu1 %v1086_v26  ;;  %v996_v18 = vmax.f32 %v7319_v21, 0.0  ;;  %v7320_v14 = vld [vmem:[#allocation22_spill] sm:$0xff]  ;;  %v1237_v38 = vld [vmem:[%s7224_s3 + $0x1a8] sm:$0xff] }
 0x180   : > { %2476 = vmatprep.subr.mxu0 %v1077_v10  ;;  %2925 = vmatprep.subr.mxu1 %v1079_v32  ;;  %v998_v26 = vmax.f32 %v7320_v14, 0.0  ;;  %v1136_v10 = vld [vmem:[#allocation2 + $0x80] sm:$0xff]  ;;  %v1203_v32 = vld [vmem:[%s7224_s3 + $0x98] sm:$0xff]  ;;  %v1238_v21 = vld [vmem:[%s7224_s3 + $0x1b0] sm:$0xff] }
 0x181   : > { %1698 = vmatprep.mubr.f32.mxu0 %v7306_v22  ;;  %2147 = vmatprep.mubr.f32.mxu1 %v7306_v22  ;;  %v1239_v14 = vld [vmem:[%s7224_s3 + $0x1b8] sm:$0xff] }
 0x182   : > { %2477 = vmatpush1.msra.mxu0 %v1076_v63  ;;  %2926 = vmatpush1.msra.mxu1 %v1078_v1  ;;  %v1204_v63 = vld [vmem:[%s7224_s3 + $0xa0] sm:$0xff]  ;;  %v1137_v1 = vld [vmem:[#allocation2 + $0x88] sm:$0xff] }
 0x183   : > { %1699 = vmatmul.mubr.f32.gmra.mxu0 %v1131_v25  ;;  %2148 = vmatmul.mubr.f32.gmra.mxu1 %v1131_v25  ;;  %v1138_v25 = vld [vmem:[#allocation2 + $0x90] sm:$0xff] }
 0x184   : > { %2478 = vmatprep.subr.mxu0 %v1069_v7  ;;  %2927 = vmatprep.subr.mxu1 %v1071_v5  ;;  %v1205_v7 = vld [vmem:[%s7224_s3 + $0xa8] sm:$0xff]  ;;  %v1206_v5 = vld [vmem:[%s7224_s3 + $0xb0] sm:$0xff] }
 0x185   : > { %2479 = vmatpush1.msra.mxu0 %v1068_v8  ;;  %2928 = vmatpush1.msra.mxu1 %v1070_v35  ;;  %v1207_v8 = vld [vmem:[%s7224_s3 + $0xb8] sm:$0xff]  ;;  %v1208_v35 = vld [vmem:[%s7224_s3 + $0xc0] sm:$0xff] }
 0x186   : > { %2480 = vmatprep.subr.mxu0 %v1061_v27  ;;  %2929 = vmatprep.subr.mxu1 %v1063_v12  ;;  %v1139_v27 = vld [vmem:[#allocation2 + $0x98] sm:$0xff]  ;;  %v1209_v12 = vld [vmem:[%s7224_s3 + $0xc8] sm:$0xff] }
 0x187   : > { %1704 = vmatprep.mubr.f32.mxu0 %v7306_v22  ;;  %2153 = vmatprep.mubr.f32.mxu1 %v7306_v22 }
 0x188   : > { %2481 = vmatpush1.msra.mxu0 %v1060_v48  ;;  %2930 = vmatpush1.msra.mxu1 %v1062_v16  ;;  %v1210_v48 = vld [vmem:[%s7224_s3 + $0xd0] sm:$0xff]  ;;  %v1140_v16 = vld [vmem:[#allocation2 + $0xa0] sm:$0xff] }
 0x189   : > { %1705 = vmatmul.mubr.f32.gmra.mxu0 %v1132_v51  ;;  %2154 = vmatmul.mubr.f32.gmra.mxu1 %v1132_v51  ;;  %v1141_v51 = vld [vmem:[#allocation2 + $0xa8] sm:$0xff] }
 0x18a   : > { %2482 = vmatprep.subr.mxu0 %v1053_v20  ;;  %2931 = vmatprep.subr.mxu1 %v1055_v19  ;;  %v1211_v20 = vld [vmem:[%s7224_s3 + $0xd8] sm:$0xff]  ;;  %v1212_v19 = vld [vmem:[%s7224_s3 + $0xe0] sm:$0xff] }
 0x18b   : > { %2483 = vmatpush1.msra.mxu0 %v1052_v52  ;;  %2932 = vmatpush1.msra.mxu1 %v1054_v59  ;;  %v1213_v52 = vld [vmem:[%s7224_s3 + $0xe8] sm:$0xff]  ;;  %v1214_v59 = vld [vmem:[%s7224_s3 + $0xf0] sm:$0xff] }
 0x18c   : > { %2484 = vmatprep.subr.mxu0 %v1045_v55  ;;  %2933 = vmatprep.subr.mxu1 %v1047_v56  ;;  %v1142_v55 = vld [vmem:[#allocation2 + $0xb0] sm:$0xff]  ;;  %v1215_v56 = vld [vmem:[%s7224_s3 + $0xf8] sm:$0xff] }
 0x18d   : > { %1710 = vmatprep.mubr.f32.mxu0 %v7306_v22  ;;  %2159 = vmatprep.mubr.f32.mxu1 %v7306_v22 }
 0x18e   : > { %2485 = vmatpush1.msra.mxu0 %v1044_v60  ;;  %2934 = vmatpush1.msra.mxu1 %v1046_v58  ;;  %v1216_v60 = vld [vmem:[%s7224_s3 + $0x100] sm:$0xff]  ;;  %v1143_v58 = vld [vmem:[#allocation2 + $0xb8] sm:$0xff] }
 0x18f   : > { %1711 = vmatmul.mubr.f32.gmra.mxu0 %v1133_v15  ;;  %2160 = vmatmul.mubr.f32.gmra.mxu1 %v1133_v15  ;;  %v1144_v15 = vld [vmem:[#allocation2 + $0xc0] sm:$0xff] }
 0x190   : > { %2486 = vmatprep.subr.mxu0 %v1037_v33  ;;  %2935 = vmatprep.subr.mxu1 %v1039_v4  ;;  %v1217_v33 = vld [vmem:[%s7224_s3 + $0x108] sm:$0xff]  ;;  %v1218_v4 = vld [vmem:[%s7224_s3 + $0x110] sm:$0xff] }
 0x191   : > { %2487 = vmatpush1.msra.mxu0 %v1036_v45  ;;  %2936 = vmatpush1.msra.mxu1 %v1038_v41  ;;  %v1219_v45 = vld [vmem:[%s7224_s3 + $0x118] sm:$0xff]  ;;  %v1220_v41 = vld [vmem:[%s7224_s3 + $0x120] sm:$0xff] }
 0x192   : > { %2488 = vmatprep.subr.mxu0 %v1029_v44  ;;  %2937 = vmatprep.subr.mxu1 %v1031_v49  ;;  %v1145_v44 = vld [vmem:[#allocation2 + $0xc8] sm:$0xff] }
 0x193   : > { %1716 = vmatprep.mubr.f32.mxu0 %v7306_v22  ;;  %2165 = vmatprep.mubr.f32.mxu1 %v7306_v22  ;;  %v1221_v49 = vld [vmem:[%s7224_s3 + $0x128] sm:$0xff] }
 0x194   : > { %2489 = vmatpush1.msra.mxu0 %v1028_v37  ;;  %2938 = vmatpush1.msra.mxu1 %v1030_v53  ;;  %v1222_v37 = vld [vmem:[%s7224_s3 + $0x130] sm:$0xff] }
 0x195   : > { %1717 = vmatmul.mubr.f32.gmra.mxu0 %v1134_v34  ;;  %2166 = vmatmul.mubr.f32.gmra.mxu1 %v1134_v34  ;;  %v1146_v53 = vld [vmem:[#allocation2 + $0xd0] sm:$0xff]  ;;  %v1147_v34 = vld [vmem:[#allocation2 + $0xd8] sm:$0xff] }
 0x196   : > { %2490 = vmatprep.subr.mxu0 %v1021_v28  ;;  %2939 = vmatprep.subr.mxu1 %v1023_v57  ;;  %v1223_v28 = vld [vmem:[%s7224_s3 + $0x138] sm:$0xff]  ;;  %v1224_v57 = vld [vmem:[%s7224_s3 + $0x140] sm:$0xff] }
 0x197   : > { %2491 = vmatpush1.msra.mxu0 %v1020_v50  ;;  %2940 = vmatpush1.msra.mxu1 %v1022_v17  ;;  %v1226_v50 = vld [vmem:[%s7224_s3 + $0x150] sm:$0xff]  ;;  %v1227_v17 = vld [vmem:[%s7224_s3 + $0x158] sm:$0xff] }
 0x198   : > { %2492 = vmatprep.subr.mxu0 %v1013_v2  ;;  %2941 = vmatprep.subr.mxu1 %v1015_v3  ;;  %v1228_v2 = vld [vmem:[%s7224_s3 + $0x160] sm:$0xff]  ;;  %v1229_v3 = vld [vmem:[%s7224_s3 + $0x168] sm:$0xff] }
 0x199   : > { %1722 = vmatprep.mubr.f32.mxu0 %v7306_v22  ;;  %2171 = vmatprep.mubr.f32.mxu1 %v7306_v22 }
 0x19a   : > { %2493 = vmatpush1.msra.mxu0 %v1012_v6  ;;  %2942 = vmatpush1.msra.mxu1 %v1014_v29  ;;  %v1230_v6 = vld [vmem:[%s7224_s3 + $0x170] sm:$0xff]  ;;  %v1231_v29 = vld [vmem:[%s7224_s3 + $0x178] sm:$0xff] }
 0x19b   : > { %1723 = vmatmul.mubr.f32.gmra.mxu0 %v1135_v13  ;;  %2172 = vmatmul.mubr.f32.gmra.mxu1 %v1135_v13  ;;  %v1155_v13 = vld [vmem:[#allocation2 + $0x118] sm:$0xff] }
 0x19c   : > { %2494 = vmatprep.subr.mxu0 %v1005_v0  ;;  %2943 = vmatprep.subr.mxu1 %v1007_v23  ;;  %v1232_v0 = vld [vmem:[%s7224_s3 + $0x180] sm:$0xff]  ;;  %v1233_v23 = vld [vmem:[%s7224_s3 + $0x188] sm:$0xff] }
 0x19d   : > { %2495 = vmatpush1.msra.mxu0 %v1004_v43  ;;  %2944 = vmatpush1.msra.mxu1 %v1006_v40  ;;  %v1156_v43 = vld [vmem:[#allocation2 + $0x120] sm:$0xff]  ;;  %v1157_v40 = vld [vmem:[#allocation2 + $0x128] sm:$0xff] }
 0x19e   : > { %2496 = vmatprep.subr.mxu0 %v997_v31  ;;  %2945 = vmatprep.subr.mxu1 %v999_v42  ;;  %v1158_v31 = vld [vmem:[#allocation2 + $0x130] sm:$0xff]  ;;  %v1159_v42 = vld [vmem:[#allocation2 + $0x138] sm:$0xff] }
 0x19f   : > { %1728 = vmatprep.mubr.f32.mxu0 %v7306_v22  ;;  %2177 = vmatprep.mubr.f32.mxu1 %v7306_v22 }
 0x1a0   : > { %2497 = vmatpush1.msra.mxu0 %v996_v18  ;;  %2946 = vmatpush1.msra.mxu1 %v998_v26  ;;  %v1160_v18 = vld [vmem:[#allocation2 + $0x140] sm:$0xff]  ;;  %v1161_v26 = vld [vmem:[#allocation2 + $0x148] sm:$0xff] }
 0x1a1   : > { %1729 = vmatmul.mubr.f32.gmra.mxu0 %v1136_v10  ;;  %2178 = vmatmul.mubr.f32.gmra.mxu1 %v1136_v10  ;;  %v1240_v10 = vld [vmem:[%s7224_s3 + $0x1c0] sm:$0xff] }
 0x1a2   : > { %1734 = vmatprep.mubr.f32.mxu0 %v7306_v22  ;;  %2183 = vmatprep.mubr.f32.mxu1 %v7306_v22 }
 0x1a3   : > { %1345 = vperm.xlu1 %4657, %v1203_v32   ;;  %1350 = vperm.xlu0 %4656, %v1204_v63   ;;  %v1162_v32 = vld [vmem:[#allocation2 + $0x150] sm:$0xff]  ;;  %v1241_v63 = vld [vmem:[%s7224_s3 + $0x1c8] sm:$0xff] }
 0x1a5   : > { %1735 = vmatmul.mubr.f32.gmra.mxu0 %v1137_v1  ;;  %2184 = vmatmul.mubr.f32.gmra.mxu1 %v1137_v1  ;;  %v1163_v1 = vld [vmem:[#allocation2 + $0x158] sm:$0xff] }
 0x1a6   : > { %1740 = vmatprep.mubr.f32.mxu0 %v7306_v22  ;;  %2189 = vmatprep.mubr.f32.mxu1 %v7306_v22 }
 0x1a7   : > { %1355 = vperm.xlu1 %4657, %v1205_v7   ;;  %1360 = vperm.xlu0 %4656, %v1206_v5   ;;  %v5822_v7 = vpop.permute.xlu0 %1250  ;;  %v1242_v5 = vld [vmem:[%s7224_s3 + $0x1d0] sm:$0xff] }
 0x1a9   : > { %1741 = vmatmul.mubr.f32.gmra.mxu0 %v1138_v25  ;;  %2190 = vmatmul.mubr.f32.gmra.mxu1 %v1138_v25  ;;  %v1164_v25 = vld [vmem:[#allocation2 + $0x160] sm:$0xff] }
 0x1aa   : > { %1746 = vmatprep.mubr.f32.mxu0 %v7306_v22  ;;  %2195 = vmatprep.mubr.f32.mxu1 %v7306_v22 }
 0x1ab   : > { %1365 = vperm.xlu1 %4657, %v1207_v8   ;;  %1370 = vperm.xlu0 %4656, %v1208_v35  }
 0x1ad   : > { %1747 = vmatmul.mubr.f32.gmra.mxu0 %v1139_v27  ;;  %2196 = vmatmul.mubr.f32.gmra.mxu1 %v1139_v27  ;;  %v1243_v27 = vld [vmem:[%s7224_s3 + $0x1d8] sm:$0xff] }
 0x1ae   : > { %1752 = vmatprep.mubr.f32.mxu0 %v7306_v22  ;;  %2201 = vmatprep.mubr.f32.mxu1 %v7306_v22 }
 0x1af   : > { %1375 = vperm.xlu1 %4657, %v1209_v12   ;;  %1380 = vperm.xlu0 %4656, %v1210_v48   ;;  %v1165_v12 = vld [vmem:[#allocation2 + $0x168] sm:$0xff] }
 0x1b1   : > { %1753 = vmatmul.mubr.f32.gmra.mxu0 %v1140_v16  ;;  %2202 = vmatmul.mubr.f32.gmra.mxu1 %v1140_v16 }
 0x1b2   : > { %1758 = vmatprep.mubr.f32.mxu0 %v7306_v22  ;;  %2207 = vmatprep.mubr.f32.mxu1 %v7306_v22 }
 0x1b3   : > { %1385 = vperm.xlu1 %4657, %v1211_v20   ;;  %1390 = vperm.xlu0 %4656, %v1212_v19   ;;  %v5839_v20 = vpop.permute.xlu0 %1255 }
 0x1b5   : > { %1759 = vmatmul.mubr.f32.gmra.mxu0 %v1141_v51  ;;  %2208 = vmatmul.mubr.f32.gmra.mxu1 %v1141_v51 }
 0x1b6   : > { %1764 = vmatprep.mubr.f32.mxu0 %v7306_v22  ;;  %2213 = vmatprep.mubr.f32.mxu1 %v7306_v22 }
 0x1b7   : > { %1395 = vperm.xlu1 %4657, %v1213_v52   ;;  %1400 = vperm.xlu0 %4656, %v1214_v59  }
 0x1b9   : > { %1765 = vmatmul.mubr.f32.gmra.mxu0 %v1142_v55  ;;  %2214 = vmatmul.mubr.f32.gmra.mxu1 %v1142_v55 }
 0x1ba   : > { %1770 = vmatprep.mubr.f32.mxu0 %v7306_v22  ;;  %2219 = vmatprep.mubr.f32.mxu1 %v7306_v22 }
 0x1bb   : > { %1405 = vperm.xlu1 %4657, %v1215_v56   ;;  %1410 = vperm.xlu0 %4656, %v1216_v60   ;;  %v5843_v60 = vpop.permute.xlu1 %1260 }
 0x1bd   : > { %1771 = vmatmul.mubr.f32.gmra.mxu0 %v1143_v58  ;;  %2220 = vmatmul.mubr.f32.gmra.mxu1 %v1143_v58 }
 0x1be   : > { %1776 = vmatprep.mubr.f32.mxu0 %v7306_v22  ;;  %2225 = vmatprep.mubr.f32.mxu1 %v7306_v22 }
 0x1bf   : > { %1415 = vperm.xlu1 %4657, %v1217_v33   ;;  %1420 = vperm.xlu0 %4656, %v1218_v4   ;;  %v1244_v4 = vld [vmem:[%s7224_s3 + $0x1e0] sm:$0xff] }
 0x1c1   : > { %1777 = vmatmul.mubr.f32.gmra.mxu0 %v1144_v15  ;;  %2226 = vmatmul.mubr.f32.gmra.mxu1 %v1144_v15  ;;  %v1166_v15 = vld [vmem:[#allocation2 + $0x170] sm:$0xff] }
 0x1c2   : > { %1782 = vmatprep.mubr.f32.mxu0 %v7306_v22  ;;  %2231 = vmatprep.mubr.f32.mxu1 %v7306_v22 }
 0x1c3   : > { %1425 = vperm.xlu1 %4657, %v1219_v45   ;;  %1430 = vperm.xlu0 %4656, %v1220_v41  }
 0x1c5   : > { %1783 = vmatmul.mubr.f32.gmra.mxu0 %v1145_v44  ;;  %2232 = vmatmul.mubr.f32.gmra.mxu1 %v1145_v44 }
 0x1c6   : > { %1788 = vmatprep.mubr.f32.mxu0 %v7306_v22  ;;  %2237 = vmatprep.mubr.f32.mxu1 %v7306_v22 }
 0x1c7   : > { %1435 = vperm.xlu1 %4657, %v1221_v49   ;;  %1440 = vperm.xlu0 %4656, %v1222_v37  }
 0x1c9   : > { %1789 = vmatmul.mubr.f32.gmra.mxu0 %v1146_v53  ;;  %2238 = vmatmul.mubr.f32.gmra.mxu1 %v1146_v53 }
 0x1ca   : > { %1794 = vmatprep.mubr.f32.mxu0 %v7306_v22  ;;  %2243 = vmatprep.mubr.f32.mxu1 %v7306_v22 }
 0x1cb   : > { %1445 = vperm.xlu1 %4657, %v1223_v28   ;;  %1450 = vperm.xlu0 %4656, %v1224_v57  }
 0x1cd   : > { %1795 = vmatmul.mubr.f32.gmra.mxu0 %v1147_v34  ;;  %2244 = vmatmul.mubr.f32.gmra.mxu1 %v1147_v34 }
 0x1ce   : > { %1800 = vmatprep.mubr.f32.mxu0 %v7306_v22  ;;  %2249 = vmatprep.mubr.f32.mxu1 %v7306_v22 }
 0x1cf   : > { %1455 = vperm.xlu1 %4657, %v1225_v61   ;;  %1460 = vperm.xlu0 %4656, %v1226_v50  }
 0x1d1   : > { %1801 = vmatmul.mubr.f32.gmra.mxu0 %v1148_v47  ;;  %2250 = vmatmul.mubr.f32.gmra.mxu1 %v1148_v47 }
 0x1d2   : > { %1806 = vmatprep.mubr.f32.mxu0 %v7306_v22  ;;  %2255 = vmatprep.mubr.f32.mxu1 %v7306_v22 }
 0x1d3   : > { %1465 = vperm.xlu1 %4657, %v1227_v17   ;;  %1470 = vperm.xlu0 %4656, %v1228_v2   ;;  %v1245_v17 = vld [vmem:[%s7224_s3 + $0x1e8] sm:$0xff] }
 0x1d5   : > { %1807 = vmatmul.mubr.f32.gmra.mxu0 %v1149_v36  ;;  %2256 = vmatmul.mubr.f32.gmra.mxu1 %v1149_v36  ;;  %v1167_v36 = vld [vmem:[#allocation2 + $0x178] sm:$0xff] }
 0x1d6   : > { %1812 = vmatprep.mubr.f32.mxu0 %v7306_v22  ;;  %2261 = vmatprep.mubr.f32.mxu1 %v7306_v22 }
 0x1d7   : > { %1475 = vperm.xlu1 %4657, %v1229_v3   ;;  %1480 = vperm.xlu0 %4656, %v1230_v6   ;;  %v5869_v6 = vpop.permute.xlu1 %1265 }
 0x1d9   : > { %1813 = vmatmul.mubr.f32.gmra.mxu0 %v1150_v9  ;;  %2262 = vmatmul.mubr.f32.gmra.mxu1 %v1150_v9 }
 0x1da   : > { %1818 = vmatprep.mubr.f32.mxu0 %v7306_v22  ;;  %2267 = vmatprep.mubr.f32.mxu1 %v7306_v22 }
 0x1db   : > { %1485 = vperm.xlu1 %4657, %v1231_v29   ;;  %1490 = vperm.xlu0 %4656, %v1232_v0  }
 0x1dd   : > { %1819 = vmatmul.mubr.f32.gmra.mxu0 %v1151_v30  ;;  %2268 = vmatmul.mubr.f32.gmra.mxu1 %v1151_v30 }
 0x1de   : > { %1824 = vmatprep.mubr.f32.mxu0 %v7306_v22  ;;  %2273 = vmatprep.mubr.f32.mxu1 %v7306_v22 }
 0x1df   : > { %1495 = vperm.xlu1 %4657, %v1233_v23   ;;  %1500 = vperm.xlu0 %4656, %v1234_v46  }
 0x1e1   : > { %1825 = vmatmul.mubr.f32.gmra.mxu0 %v1152_v62  ;;  %2274 = vmatmul.mubr.f32.gmra.mxu1 %v1152_v62 }
 0x1e2   : > { %1830 = vmatprep.mubr.f32.mxu0 %v7306_v22  ;;  %2279 = vmatprep.mubr.f32.mxu1 %v7306_v22 }
 0x1e3   : > { %1505 = vperm.xlu1 %4657, %v1235_v39   ;;  %1510 = vperm.xlu0 %4656, %v1236_v24   ;;  %v1168_v39 = vld [vmem:[#allocation2 + $0x180] sm:$0xff] }
 0x1e5   : > { %1831 = vmatmul.mubr.f32.gmra.mxu0 %v1153_v11  ;;  %2280 = vmatmul.mubr.f32.gmra.mxu1 %v1153_v11 }
 0x1e6   : > { %1836 = vmatprep.mubr.f32.mxu0 %v7306_v22  ;;  %2285 = vmatprep.mubr.f32.mxu1 %v7306_v22 }
 0x1e7   : > { %1515 = vperm.xlu1 %4657, %v1237_v38   ;;  %1520 = vperm.xlu0 %4656, %v1238_v21  }
 0x1e9   : > { %1837 = vmatmul.mubr.f32.gmra.mxu0 %v1154_v54  ;;  %2286 = vmatmul.mubr.f32.gmra.mxu1 %v1154_v54 }
 0x1ea   : > { %1842 = vmatprep.mubr.f32.mxu0 %v7306_v22  ;;  %2291 = vmatprep.mubr.f32.mxu1 %v7306_v22 }
 0x1eb   : > { %1525 = vperm.xlu1 %4657, %v1239_v14   ;;  %1530 = vperm.xlu0 %4656, %v1240_v10  }
 0x1ed   : > { %1843 = vmatmul.mubr.f32.gmra.mxu0 %v1155_v13  ;;  %2292 = vmatmul.mubr.f32.gmra.mxu1 %v1155_v13 }
 0x1ee   : > { %1848 = vmatprep.mubr.f32.mxu0 %v7306_v22  ;;  %2297 = vmatprep.mubr.f32.mxu1 %v7306_v22 }
 0x1ef   : > { %1535 = vperm.xlu1 %4657, %v1241_v63   ;;  %1540 = vperm.xlu0 %4656, %v1242_v5   ;;  %v1247_v5 = vld [vmem:[%s7224_s3 + $0x1f8] sm:$0xff] }
 0x1f1   : > { %1849 = vmatmul.mubr.f32.gmra.mxu0 %v1156_v43  ;;  %2298 = vmatmul.mubr.f32.gmra.mxu1 %v1156_v43  ;;  %v1246_v43 = vld [vmem:[%s7224_s3 + $0x1f0] sm:$0xff] }
 0x1f2   : > { %1854 = vmatprep.mubr.f32.mxu0 %v7306_v22  ;;  %2303 = vmatprep.mubr.f32.mxu1 %v7306_v22 }
 0x1f3   : > { %1545 = vperm.xlu1 %4657, %v1243_v27   ;;  %1550 = vperm.xlu0 %4656, %v1244_v4  }
 0x1f5   : > { %1855 = vmatmul.mubr.f32.gmra.mxu0 %v1157_v40  ;;  %2304 = vmatmul.mubr.f32.gmra.mxu1 %v1157_v40 }
 0x1f6   : > { %1860 = vmatprep.mubr.f32.mxu0 %v7306_v22  ;;  %2309 = vmatprep.mubr.f32.mxu1 %v7306_v22 }
 0x1f7   : > { %1555 = vperm.xlu1 %4657, %v1245_v17   ;;  %1560 = vperm.xlu0 %4656, %v1246_v43  }
 0x1f9   : > { %1861 = vmatmul.mubr.f32.gmra.mxu0 %v1158_v31  ;;  %2310 = vmatmul.mubr.f32.gmra.mxu1 %v1158_v31 }
 0x1fa   : > { %1866 = vmatprep.mubr.f32.mxu0 %v7306_v22  ;;  %2315 = vmatprep.mubr.f32.mxu1 %v7306_v22 }
 0x1fb   : > { %1565 = vperm.xlu1 %4657, %v1247_v5  }
 0x1fd   : > { %1867 = vmatmul.mubr.f32.gmra.mxu0 %v1159_v42  ;;  %2316 = vmatmul.mubr.f32.gmra.mxu1 %v1159_v42  ;;  %v5884_v42 = vpop.permute.xlu0 %1270 }
 0x1fe   : > { %1872 = vmatprep.mubr.f32.mxu0 %v7306_v22  ;;  %2321 = vmatprep.mubr.f32.mxu1 %v7306_v22 }
 0x201   : > { %1873 = vmatmul.mubr.f32.gmra.mxu0 %v1160_v18  ;;  %2322 = vmatmul.mubr.f32.gmra.mxu1 %v1160_v18 }
 0x202   : > { %1878 = vmatprep.mubr.f32.mxu0 %v7306_v22  ;;  %2327 = vmatprep.mubr.f32.mxu1 %v7306_v22 }
 0x205   : > { %1879 = vmatmul.mubr.f32.gmra.mxu0 %v1161_v26  ;;  %2328 = vmatmul.mubr.f32.gmra.mxu1 %v1161_v26 }
 0x206   : > { %1884 = vmatprep.mubr.f32.mxu0 %v7306_v22  ;;  %2333 = vmatprep.mubr.f32.mxu1 %v7306_v22 }
 0x209   : > { %1885 = vmatmul.mubr.f32.gmra.mxu0 %v1162_v32  ;;  %2334 = vmatmul.mubr.f32.gmra.mxu1 %v1162_v32 }
 0x20a   : > { %1890 = vmatprep.mubr.f32.mxu0 %v7306_v22  ;;  %2339 = vmatprep.mubr.f32.mxu1 %v7306_v22 }
 0x20d   : > { %1891 = vmatmul.mubr.f32.gmra.mxu0 %v1163_v1  ;;  %2340 = vmatmul.mubr.f32.gmra.mxu1 %v1163_v1 }
 0x20e   : > { %1896 = vmatprep.mubr.f32.mxu0 %v7306_v22  ;;  %2345 = vmatprep.mubr.f32.mxu1 %v7306_v22 }
 0x211   : > { %1897 = vmatmul.mubr.f32.gmra.mxu0 %v1164_v25  ;;  %2346 = vmatmul.mubr.f32.gmra.mxu1 %v1164_v25  ;;  %v1634_v8 = vpop.f32.mrf.mxu0  ;;  %v2083_v35 = vpop.f32.mrf.mxu1  ;;  %v1169_v25 = vld [vmem:[#allocation2 + $0x188] sm:$0xff] }
 0x212   : > { %1902 = vmatprep.mubr.f32.mxu0 %v7306_v22  ;;  %2351 = vmatprep.mubr.f32.mxu1 %v7306_v22  ;;  %v1635_v48 = vadd.f32 %v1634_v8, %v5822_v7  ;;  %v2084_v16 = vadd.f32 %v2083_v35, %v5822_v7 }
 0x213   : > { %v1636_v19 = vpop.f32.mrf.mxu0  ;;  %v2085_v51 = vpop.f32.mrf.mxu1 }
 0x214   : > { %v1637_v52 = vadd.f32 %v1636_v19, %v5822_v7  ;;  %v2086_v59 = vadd.f32 %v2085_v51, %v5822_v7  ;;  %v3364_v55 = vmax.f32 %v1635_v48, 0.0  ;;  %v3366_v56 = vmax.f32 %v2084_v16, 0.0  ;;  %v5899_v48 = vpop.permute.xlu1 %1275 }
 0x215   : > { %1903 = vmatmul.mubr.f32.gmra.mxu0 %v1165_v12  ;;  %2352 = vmatmul.mubr.f32.gmra.mxu1 %v1165_v12  ;;  %v1640_v58 = vpop.f32.mrf.mxu0  ;;  %v2089_v33 = vpop.f32.mrf.mxu1 }
 0x216   : > { %1908 = vmatprep.mubr.f32.mxu0 %v7306_v22  ;;  %2357 = vmatprep.mubr.f32.mxu1 %v7306_v22  ;;  %v3365_v45 = vmax.f32 %v1637_v52, 0.0  ;;  %v3367_v41 = vmax.f32 %v2086_v59, 0.0  ;;  %3876 = vst [vmem:[%s5850_s13] sm:$0xff] %v3364_v55  ;;  %3878 = vst [vmem:[%s5850_s13 + $0x10] sm:$0xff] %v3366_v56  ;;  %v1641_v44 = vadd.f32 %v1640_v58, %v5839_v20 }
 0x217   : > { %v2090_v49 = vadd.f32 %v2089_v33, %v5839_v20  ;;  %v1642_v37 = vpop.f32.mrf.mxu0  ;;  %v2091_v53 = vpop.f32.mrf.mxu1  ;;  %v1170_v33 = vld [vmem:[#allocation2 + $0x190] sm:$0xff] }
 0x218   : > { %3877 = vst [vmem:[%s5850_s13 + $0x8] sm:$0xff] %v3365_v45  ;;  %3879 = vst [vmem:[%s5850_s13 + $0x18] sm:$0xff] %v3367_v41  ;;  %v1643_v28 = vadd.f32 %v1642_v37, %v5839_v20  ;;  %v2092_v57 = vadd.f32 %v2091_v53, %v5839_v20  ;;  %v3372_v34 = vmax.f32 %v1641_v44, 0.0  ;;  %v5911_v44 = vpop.permute.xlu0 %1280 }
 0x219   : > { %v3374_v61 = vmax.f32 %v2090_v49, 0.0  ;;  %1909 = vmatmul.mubr.f32.gmra.mxu0 %v1166_v15  ;;  %2358 = vmatmul.mubr.f32.gmra.mxu1 %v1166_v15  ;;  %v1646_v50 = vpop.f32.mrf.mxu0  ;;  %v2095_v47 = vpop.f32.mrf.mxu1 }
 0x21a   : > { %1914 = vmatprep.mubr.f32.mxu0 %v7306_v22  ;;  %2363 = vmatprep.mubr.f32.mxu1 %v7306_v22  ;;  %v3373_v2 = vmax.f32 %v1643_v28, 0.0  ;;  %v3375_v9 = vmax.f32 %v2092_v57, 0.0  ;;  %3884 = vst [vmem:[%s5850_s13 + $0x40] sm:$0xff] %v3372_v34  ;;  %v1647_v3 = vadd.f32 %v1646_v50, %v5843_v60  ;;  %v2096_v30 = vadd.f32 %v2095_v47, %v5843_v60  ;;  %v1171_v47 = vld [vmem:[#allocation2 + $0x198] sm:$0xff] }
 0x21b   : > { %3886 = vst [vmem:[%s5850_s13 + $0x50] sm:$0xff] %v3374_v61  ;;  %v1648_v62 = vpop.f32.mrf.mxu0  ;;  %v2097_v29 = vpop.f32.mrf.mxu1 }
 0x21c   : > { %3885 = vst [vmem:[%s5850_s13 + $0x48] sm:$0xff] %v3373_v2  ;;  %3887 = vst [vmem:[%s5850_s13 + $0x58] sm:$0xff] %v3375_v9  ;;  %v1649_v11 = vadd.f32 %v1648_v62, %v5843_v60  ;;  %v2098_v0 = vadd.f32 %v2097_v29, %v5843_v60  ;;  %v3380_v54 = vmax.f32 %v1647_v3, 0.0  ;;  %v3382_v23 = vmax.f32 %v2096_v30, 0.0  ;;  %v5923_v3 = vpop.permute.xlu1 %1285 }
 0x21d   : > { %1915 = vmatmul.mubr.f32.gmra.mxu0 %v1167_v36  ;;  %2364 = vmatmul.mubr.f32.gmra.mxu1 %v1167_v36  ;;  %v1652_v13 = vpop.f32.mrf.mxu0  ;;  %v2101_v46 = vpop.f32.mrf.mxu1 }
 0x21e   : > { %1920 = vmatprep.mubr.f32.mxu0 %v7306_v22  ;;  %2369 = vmatprep.mubr.f32.mxu1 %v7306_v22  ;;  %v3381_v40 = vmax.f32 %v1649_v11, 0.0  ;;  %v3383_v24 = vmax.f32 %v2098_v0, 0.0  ;;  %3892 = vst [vmem:[%s5850_s13 + $0x80] sm:$0xff] %v3380_v54  ;;  %3894 = vst [vmem:[%s5850_s13 + $0x90] sm:$0xff] %v3382_v23  ;;  %v1653_v31 = vadd.f32 %v1652_v13, %v5869_v6 }
 0x21f   : > { %v2102_v38 = vadd.f32 %v2101_v46, %v5869_v6  ;;  %v1654_v21 = vpop.f32.mrf.mxu0  ;;  %v2103_v18 = vpop.f32.mrf.mxu1  ;;  %v1172_v46 = vld [vmem:[#allocation2 + $0x1a0] sm:$0xff] }
 0x220   : > { %3893 = vst [vmem:[%s5850_s13 + $0x88] sm:$0xff] %v3381_v40  ;;  %3895 = vst [vmem:[%s5850_s13 + $0x98] sm:$0xff] %v3383_v24  ;;  %v1655_v14 = vadd.f32 %v1654_v21, %v5869_v6  ;;  %v2104_v26 = vadd.f32 %v2103_v18, %v5869_v6  ;;  %v3388_v10 = vmax.f32 %v1653_v31, 0.0  ;;  %v5935_v31 = vpop.permute.xlu0 %1290 }
 0x221   : > { %v3390_v32 = vmax.f32 %v2102_v38, 0.0  ;;  %1921 = vmatmul.mubr.f32.gmra.mxu0 %v1168_v39  ;;  %2370 = vmatmul.mubr.f32.gmra.mxu1 %v1168_v39  ;;  %v1658_v63 = vpop.f32.mrf.mxu0  ;;  %v2107_v1 = vpop.f32.mrf.mxu1 }
 0x222   : > { %1926 = vmatprep.mubr.f32.mxu0 %v7306_v22  ;;  %2375 = vmatprep.mubr.f32.mxu1 %v7306_v22  ;;  %v3389_v8 = vmax.f32 %v1655_v14, 0.0  ;;  %v3391_v35 = vmax.f32 %v2104_v26, 0.0  ;;  %3900 = vst [vmem:[%s5850_s13 + $0xc0] sm:$0xff] %v3388_v10  ;;  %v1659_v27 = vadd.f32 %v1658_v63, %v5884_v42  ;;  %v2108_v12 = vadd.f32 %v2107_v1, %v5884_v42  ;;  %v1173_v1 = vld [vmem:[#allocation2 + $0x1a8] sm:$0xff] }
 0x223   : > { %3902 = vst [vmem:[%s5850_s13 + $0xd0] sm:$0xff] %v3390_v32  ;;  %v1660_v16 = vpop.f32.mrf.mxu0  ;;  %v2109_v19 = vpop.f32.mrf.mxu1 }
 0x224   : > { %3901 = vst [vmem:[%s5850_s13 + $0xc8] sm:$0xff] %v3389_v8  ;;  %3903 = vst [vmem:[%s5850_s13 + $0xd8] sm:$0xff] %v3391_v35  ;;  %v1661_v51 = vadd.f32 %v1660_v16, %v5884_v42  ;;  %v2110_v52 = vadd.f32 %v2109_v19, %v5884_v42  ;;  %v3396_v59 = vmax.f32 %v1659_v27, 0.0  ;;  %v3398_v55 = vmax.f32 %v2108_v12, 0.0 }
 0x225   : > { %1927 = vmatmul.mubr.f32.gmra.mxu0 %v1169_v25  ;;  %2376 = vmatmul.mubr.f32.gmra.mxu1 %v1169_v25  ;;  %v1664_v56 = vpop.f32.mrf.mxu0  ;;  %v2113_v58 = vpop.f32.mrf.mxu1 }
 0x226   : > { %1932 = vmatprep.mubr.f32.mxu0 %v7306_v22  ;;  %2381 = vmatprep.mubr.f32.mxu1 %v7306_v22  ;;  %v3397_v4 = vmax.f32 %v1661_v51, 0.0  ;;  %v3399_v15 = vmax.f32 %v2110_v52, 0.0  ;;  %3908 = vst [vmem:[%s5850_s13 + $0x100] sm:$0xff] %v3396_v59  ;;  %3910 = vst [vmem:[%s5850_s13 + $0x110] sm:$0xff] %v3398_v55  ;;  %v1665_v45 = vadd.f32 %v1664_v56, %v5899_v48  ;;  %v5951_v59 = vpop.permute.xlu1 %1295  ;;  %v1174_v55 = vld [vmem:[#allocation2 + $0x1b0] sm:$0xff] }
 0x227   : > { %v2114_v41 = vadd.f32 %v2113_v58, %v5899_v48  ;;  %v1666_v49 = vpop.f32.mrf.mxu0  ;;  %v2115_v37 = vpop.f32.mrf.mxu1 }
 0x228   : > { %3909 = vst [vmem:[%s5850_s13 + $0x108] sm:$0xff] %v3397_v4  ;;  %3911 = vst [vmem:[%s5850_s13 + $0x118] sm:$0xff] %v3399_v15  ;;  %v1667_v53 = vadd.f32 %v1666_v49, %v5899_v48  ;;  %v2116_v28 = vadd.f32 %v2115_v37, %v5899_v48  ;;  %v3404_v57 = vmax.f32 %v1665_v45, 0.0  ;;  %v1175_v37 = vld [vmem:[#allocation2 + $0x1b8] sm:$0xff] }
 0x229   : > { %v3406_v34 = vmax.f32 %v2114_v41, 0.0  ;;  %1933 = vmatmul.mubr.f32.gmra.mxu0 %v1170_v33  ;;  %2382 = vmatmul.mubr.f32.gmra.mxu1 %v1170_v33  ;;  %v1670_v61 = vpop.f32.mrf.mxu0  ;;  %v2119_v50 = vpop.f32.mrf.mxu1 }
 0x22a   : > { %1938 = vmatprep.mubr.f32.mxu0 %v7306_v22  ;;  %2387 = vmatprep.mubr.f32.mxu1 %v7306_v22  ;;  %v3405_v17 = vmax.f32 %v1667_v53, 0.0  ;;  %v3407_v36 = vmax.f32 %v2116_v28, 0.0  ;;  %3916 = vst [vmem:[%s5850_s13 + $0x140] sm:$0xff] %v3404_v57  ;;  %v1671_v2 = vadd.f32 %v1670_v61, %v5911_v44  ;;  %v2120_v9 = vadd.f32 %v2119_v50, %v5911_v44  ;;  %v5965_v61 = vpop.permute.xlu0 %1300 }
 0x22b   : > { %3918 = vst [vmem:[%s5850_s13 + $0x150] sm:$0xff] %v3406_v34  ;;  %v1672_v30 = vpop.f32.mrf.mxu0  ;;  %v2121_v62 = vpop.f32.mrf.mxu1 }
 0x22c   : > { %3917 = vst [vmem:[%s5850_s13 + $0x148] sm:$0xff] %v3405_v17  ;;  %3919 = vst [vmem:[%s5850_s13 + $0x158] sm:$0xff] %v3407_v36  ;;  %v1673_v29 = vadd.f32 %v1672_v30, %v5911_v44  ;;  %v2122_v11 = vadd.f32 %v2121_v62, %v5911_v44  ;;  %v3412_v0 = vmax.f32 %v1671_v2, 0.0  ;;  %v3414_v54 = vmax.f32 %v2120_v9, 0.0  ;;  %v1176_v2 = vld [vmem:[#allocation2 + $0x1c0] sm:$0xff] }
 0x22d   : > { %1939 = vmatmul.mubr.f32.gmra.mxu0 %v1171_v47  ;;  %2388 = vmatmul.mubr.f32.gmra.mxu1 %v1171_v47  ;;  %v1676_v23 = vpop.f32.mrf.mxu0  ;;  %v2125_v13 = vpop.f32.mrf.mxu1 }
 0x22e   : > { %1944 = vmatprep.mubr.f32.mxu0 %v7306_v22  ;;  %2393 = vmatprep.mubr.f32.mxu1 %v7306_v22  ;;  %v3413_v43 = vmax.f32 %v1673_v29, 0.0  ;;  %v3415_v39 = vmax.f32 %v2122_v11, 0.0  ;;  %3924 = vst [vmem:[%s5850_s13 + $0x180] sm:$0xff] %v3412_v0  ;;  %3926 = vst [vmem:[%s5850_s13 + $0x190] sm:$0xff] %v3414_v54  ;;  %v1677_v40 = vadd.f32 %v1676_v23, %v5923_v3 }
 0x22f   : > { %v2126_v24 = vadd.f32 %v2125_v13, %v5923_v3  ;;  %v1678_v38 = vpop.f32.mrf.mxu0  ;;  %v2127_v21 = vpop.f32.mrf.mxu1 }
 0x230   : > { %3925 = vst [vmem:[%s5850_s13 + $0x188] sm:$0xff] %v3413_v43  ;;  %3927 = vst [vmem:[%s5850_s13 + $0x198] sm:$0xff] %v3415_v39  ;;  %v1679_v18 = vadd.f32 %v1678_v38, %v5923_v3  ;;  %v2128_v14 = vadd.f32 %v2127_v21, %v5923_v3  ;;  %v3420_v26 = vmax.f32 %v1677_v40, 0.0  ;;  %v5977_v13 = vpop.permute.xlu1 %1305 }
 0x231   : > { %v3422_v10 = vmax.f32 %v2126_v24, 0.0  ;;  %1945 = vmatmul.mubr.f32.gmra.mxu0 %v1172_v46  ;;  %2394 = vmatmul.mubr.f32.gmra.mxu1 %v1172_v46  ;;  %v1682_v32 = vpop.f32.mrf.mxu0  ;;  %v2131_v63 = vpop.f32.mrf.mxu1  ;;  %v1177_v46 = vld [vmem:[#allocation2 + $0x1c8] sm:$0xff] }
 0x232   : > { %1950 = vmatprep.mubr.f32.mxu0 %v7306_v22  ;;  %2399 = vmatprep.mubr.f32.mxu1 %v7306_v22  ;;  %v3421_v5 = vmax.f32 %v1679_v18, 0.0  ;;  %v3423_v25 = vmax.f32 %v2128_v14, 0.0  ;;  %3932 = vst [vmem:[%s5850_s13 + $0x1c0] sm:$0xff] %v3420_v26  ;;  %v1683_v8 = vadd.f32 %v1682_v32, %v5935_v31  ;;  %v2132_v35 = vadd.f32 %v2131_v63, %v5935_v31  ;;  %v1178_v26 = vld [vmem:[#allocation2 + $0x1d0] sm:$0xff] }
 0x233   : > { %3934 = vst [vmem:[%s5850_s13 + $0x1d0] sm:$0xff] %v3422_v10  ;;  %v1684_v27 = vpop.f32.mrf.mxu0  ;;  %v2133_v12 = vpop.f32.mrf.mxu1 }
 0x234   : > { %3933 = vst [vmem:[%s5850_s13 + $0x1c8] sm:$0xff] %v3421_v5  ;;  %3935 = vst [vmem:[%s5850_s13 + $0x1d8] sm:$0xff] %v3423_v25  ;;  %v1685_v16 = vadd.f32 %v1684_v27, %v5935_v31  ;;  %v2134_v19 = vadd.f32 %v2133_v12, %v5935_v31  ;;  %v3428_v51 = vmax.f32 %v1683_v8, 0.0  ;;  %v3430_v52 = vmax.f32 %v2132_v35, 0.0  ;;  %v5991_v5 = vpop.permute.xlu0 %1310  ;;  %v1179_v12 = vld [vmem:[#allocation2 + $0x1d8] sm:$0xff] }
 0x235   : > { %1951 = vmatmul.mubr.f32.gmra.mxu0 %v1173_v1  ;;  %2400 = vmatmul.mubr.f32.gmra.mxu1 %v1173_v1 }
 0x236   : > { %1956 = vmatprep.mubr.f32.mxu0 %v7306_v22  ;;  %2405 = vmatprep.mubr.f32.mxu1 %v7306_v22  ;;  %v3429_v56 = vmax.f32 %v1685_v16, 0.0  ;;  %v3431_v58 = vmax.f32 %v2134_v19, 0.0  ;;  %3940 = vst [vmem:[%s5850_s13 + $0x200] sm:$0xff] %v3428_v51  ;;  %3942 = vst [vmem:[%s5850_s13 + $0x210] sm:$0xff] %v3430_v52 }
 0x237   : > { %v1688_v33 = vpop.f32.mrf.mxu0  ;;  %v2137_v4 = vpop.f32.mrf.mxu1 }
 0x238   : > { %3941 = vst [vmem:[%s5850_s13 + $0x208] sm:$0xff] %v3429_v56  ;;  %3943 = vst [vmem:[%s5850_s13 + $0x218] sm:$0xff] %v3431_v58  ;;  %v1689_v15 = vadd.f32 %v1688_v33, %v5951_v59  ;;  %v2138_v45 = vadd.f32 %v2137_v4, %v5951_v59  ;;  %v6003_v4 = vpop.permute.xlu1 %1315 }
 0x239   : > { %1957 = vmatmul.mubr.f32.gmra.mxu0 %v1174_v55  ;;  %2406 = vmatmul.mubr.f32.gmra.mxu1 %v1174_v55  ;;  %v1690_v41 = vpop.f32.mrf.mxu0  ;;  %v2139_v49 = vpop.f32.mrf.mxu1 }
 0x23a   : > { %1962 = vmatprep.mubr.f32.mxu0 %v7306_v22  ;;  %2411 = vmatprep.mubr.f32.mxu1 %v7306_v22  ;;  %v1691_v53 = vadd.f32 %v1690_v41, %v5951_v59  ;;  %v2140_v28 = vadd.f32 %v2139_v49, %v5951_v59  ;;  %v3436_v57 = vmax.f32 %v1689_v15, 0.0  ;;  %v3438_v34 = vmax.f32 %v2138_v45, 0.0  ;;  %v1180_v15 = vld [vmem:[#allocation2 + $0x1e0] sm:$0xff] }
 0x23c   : > { %v3437_v50 = vmax.f32 %v1691_v53, 0.0  ;;  %v3439_v47 = vmax.f32 %v2140_v28, 0.0  ;;  %3948 = vst [vmem:[%s5850_s13 + $0x240] sm:$0xff] %v3436_v57  ;;  %3950 = vst [vmem:[%s5850_s13 + $0x250] sm:$0xff] %v3438_v34 }
 0x23d   : > { %1963 = vmatmul.mubr.f32.gmra.mxu0 %v1175_v37  ;;  %2412 = vmatmul.mubr.f32.gmra.mxu1 %v1175_v37  ;;  %v1694_v17 = vpop.f32.mrf.mxu0  ;;  %v2143_v36 = vpop.f32.mrf.mxu1 }
 0x23e   : > { %1968 = vmatprep.mubr.f32.mxu0 %v7306_v22  ;;  %2417 = vmatprep.mubr.f32.mxu1 %v7306_v22  ;;  %3949 = vst [vmem:[%s5850_s13 + $0x248] sm:$0xff] %v3437_v50  ;;  %3951 = vst [vmem:[%s5850_s13 + $0x258] sm:$0xff] %v3439_v47  ;;  %v1695_v9 = vadd.f32 %v1694_v17, %v5965_v61  ;;  %v2144_v30 = vadd.f32 %v2143_v36, %v5965_v61  ;;  %v1181_v50 = vld [vmem:[#allocation2 + $0x1e8] sm:$0xff] }
 0x23f   : > { %v1696_v62 = vpop.f32.mrf.mxu0  ;;  %v2145_v29 = vpop.f32.mrf.mxu1 }
 0x240   : > { %v1697_v11 = vadd.f32 %v1696_v62, %v5965_v61  ;;  %v2146_v0 = vadd.f32 %v2145_v29, %v5965_v61  ;;  %v3444_v54 = vmax.f32 %v1695_v9, 0.0  ;;  %v3446_v23 = vmax.f32 %v2144_v30, 0.0  ;;  %v6017_v9 = vpop.permute.xlu0 %1320 }
 0x241   : > { %1969 = vmatmul.mubr.f32.gmra.mxu0 %v1176_v2  ;;  %2418 = vmatmul.mubr.f32.gmra.mxu1 %v1176_v2 }
 0x242   : > { %1974 = vmatprep.mubr.f32.mxu0 %v7306_v22  ;;  %2423 = vmatprep.mubr.f32.mxu1 %v7306_v22  ;;  %v3445_v43 = vmax.f32 %v1697_v11, 0.0  ;;  %v3447_v39 = vmax.f32 %v2146_v0, 0.0  ;;  %3956 = vst [vmem:[%s5850_s13 + $0x280] sm:$0xff] %v3444_v54  ;;  %3958 = vst [vmem:[%s5850_s13 + $0x290] sm:$0xff] %v3446_v23  ;;  %v1182_v0 = vld [vmem:[#allocation2 + $0x1f0] sm:$0xff] }
 0x243   : > { %v1700_v40 = vpop.f32.mrf.mxu0  ;;  %v2149_v24 = vpop.f32.mrf.mxu1 }
 0x244   : > { %3957 = vst [vmem:[%s5850_s13 + $0x288] sm:$0xff] %v3445_v43  ;;  %3959 = vst [vmem:[%s5850_s13 + $0x298] sm:$0xff] %v3447_v39  ;;  %v1701_v38 = vadd.f32 %v1700_v40, %v5977_v13  ;;  %v2150_v21 = vadd.f32 %v2149_v24, %v5977_v13 }
 0x245   : > { %1975 = vmatmul.mubr.f32.gmra.mxu0 %v1177_v46  ;;  %2424 = vmatmul.mubr.f32.gmra.mxu1 %v1177_v46  ;;  %v1702_v18 = vpop.f32.mrf.mxu0  ;;  %v2151_v14 = vpop.f32.mrf.mxu1 }
 0x246   : > { %1980 = vmatprep.mubr.f32.mxu0 %v7306_v22  ;;  %2429 = vmatprep.mubr.f32.mxu1 %v7306_v22  ;;  %v1703_v10 = vadd.f32 %v1702_v18, %v5977_v13  ;;  %v2152_v32 = vadd.f32 %v2151_v14, %v5977_v13  ;;  %v3452_v63 = vmax.f32 %v1701_v38, 0.0  ;;  %v3454_v1 = vmax.f32 %v2150_v21, 0.0  ;;  %v6029_v21 = vpop.permute.xlu1 %1325  ;;  %v1183_v18 = vld [vmem:[#allocation2 + $0x1f8] sm:$0xff] }
 0x248   : > { %v3453_v25 = vmax.f32 %v1703_v10, 0.0  ;;  %v3455_v8 = vmax.f32 %v2152_v32, 0.0  ;;  %3964 = vst [vmem:[%s5850_s13 + $0x2c0] sm:$0xff] %v3452_v63  ;;  %3966 = vst [vmem:[%s5850_s13 + $0x2d0] sm:$0xff] %v3454_v1 }
 0x249   : > { %1981 = vmatmul.mubr.f32.gmra.mxu0 %v1178_v26  ;;  %2430 = vmatmul.mubr.f32.gmra.mxu1 %v1178_v26  ;;  %v1706_v35 = vpop.f32.mrf.mxu0  ;;  %v2155_v27 = vpop.f32.mrf.mxu1 }
 0x24a   : > { %1986 = vmatprep.mubr.f32.mxu0 %v7306_v22  ;;  %2435 = vmatprep.mubr.f32.mxu1 %v7306_v22  ;;  %3965 = vst [vmem:[%s5850_s13 + $0x2c8] sm:$0xff] %v3453_v25  ;;  %3967 = vst [vmem:[%s5850_s13 + $0x2d8] sm:$0xff] %v3455_v8  ;;  %v1707_v16 = vadd.f32 %v1706_v35, %v5991_v5  ;;  %v2156_v19 = vadd.f32 %v2155_v27, %v5991_v5 }
 0x24b   : > { %v1708_v51 = vpop.f32.mrf.mxu0  ;;  %v2157_v52 = vpop.f32.mrf.mxu1 }
 0x24c   : > { %v1709_v55 = vadd.f32 %v1708_v51, %v5991_v5  ;;  %v2158_v56 = vadd.f32 %v2157_v52, %v5991_v5  ;;  %v3460_v58 = vmax.f32 %v1707_v16, 0.0  ;;  %v3462_v33 = vmax.f32 %v2156_v19, 0.0  ;;  %v6043_v19 = vpop.permute.xlu0 %1330 }
 0x24d   : > { %1987 = vmatmul.mubr.f32.gmra.mxu0 %v1179_v12  ;;  %2436 = vmatmul.mubr.f32.gmra.mxu1 %v1179_v12 }
 0x24e   : > { %1992 = vmatprep.mubr.f32.mxu0 %v7306_v22  ;;  %2441 = vmatprep.mubr.f32.mxu1 %v7306_v22  ;;  %v3461_v45 = vmax.f32 %v1709_v55, 0.0  ;;  %v3463_v41 = vmax.f32 %v2158_v56, 0.0  ;;  %3972 = vst [vmem:[%s5850_s13 + $0x300] sm:$0xff] %v3460_v58  ;;  %3974 = vst [vmem:[%s5850_s13 + $0x310] sm:$0xff] %v3462_v33  ;;  %v4658_v58 = vld [vmem:[#allocation2] sm:$0xff] }
 0x24f   : > { %v1712_v49 = vpop.f32.mrf.mxu0  ;;  %v2161_v37 = vpop.f32.mrf.mxu1 }
 0x250   : > { %3973 = vst [vmem:[%s5850_s13 + $0x308] sm:$0xff] %v3461_v45  ;;  %3975 = vst [vmem:[%s5850_s13 + $0x318] sm:$0xff] %v3463_v41  ;;  %v1713_v53 = vadd.f32 %v1712_v49, %v6003_v4  ;;  %v2162_v28 = vadd.f32 %v2161_v37, %v6003_v4  ;;  %v6053_v45 = vpop.permute.xlu1 %1335 }
 0x251   : > { %1993 = vmatmul.mubr.f32.gmra.mxu0 %v1180_v15  ;;  %2442 = vmatmul.mubr.f32.gmra.mxu1 %v1180_v15  ;;  %v1714_v57 = vpop.f32.mrf.mxu0  ;;  %v2163_v34 = vpop.f32.mrf.mxu1 }
 0x252   : > { %1998 = vmatprep.mubr.f32.mxu0 %v7306_v22  ;;  %2447 = vmatprep.mubr.f32.mxu1 %v7306_v22  ;;  %v1715_v47 = vadd.f32 %v1714_v57, %v6003_v4  ;;  %v2164_v17 = vadd.f32 %v2163_v34, %v6003_v4  ;;  %v3468_v36 = vmax.f32 %v1713_v53, 0.0  ;;  %v3470_v2 = vmax.f32 %v2162_v28, 0.0 }
 0x254   : > { %v3469_v30 = vmax.f32 %v1715_v47, 0.0  ;;  %v3471_v62 = vmax.f32 %v2164_v17, 0.0  ;;  %3980 = vst [vmem:[%s5850_s13 + $0x340] sm:$0xff] %v3468_v36  ;;  %3982 = vst [vmem:[%s5850_s13 + $0x350] sm:$0xff] %v3470_v2  ;;  %v4659_v47 = vld [vmem:[#allocation2 + $0x8] sm:$0xff] }
 0x255   : > { %1999 = vmatmul.mubr.f32.gmra.mxu0 %v1181_v50  ;;  %2448 = vmatmul.mubr.f32.gmra.mxu1 %v1181_v50  ;;  %v1718_v29 = vpop.f32.mrf.mxu0  ;;  %v2167_v11 = vpop.f32.mrf.mxu1 }
 0x256   : > { %2004 = vmatprep.mubr.f32.mxu0 %v7306_v22  ;;  %2453 = vmatprep.mubr.f32.mxu1 %v7306_v22  ;;  %3981 = vst [vmem:[%s5850_s13 + $0x348] sm:$0xff] %v3469_v30  ;;  %3983 = vst [vmem:[%s5850_s13 + $0x358] sm:$0xff] %v3471_v62  ;;  %v1719_v54 = vadd.f32 %v1718_v29, %v6017_v9  ;;  %v2168_v23 = vadd.f32 %v2167_v11, %v6017_v9  ;;  %v6063_v62 = vpop.permute.xlu0 %1340 }
 0x257   : > { %v1720_v46 = vpop.f32.mrf.mxu0  ;;  %v2169_v43 = vpop.f32.mrf.mxu1 }
 0x258   : > { %v1721_v39 = vadd.f32 %v1720_v46, %v6017_v9  ;;  %v2170_v40 = vadd.f32 %v2169_v43, %v6017_v9  ;;  %v3476_v24 = vmax.f32 %v1719_v54, 0.0  ;;  %v3478_v38 = vmax.f32 %v2168_v23, 0.0 }
 0x259   : > { %2005 = vmatmul.mubr.f32.gmra.mxu0 %v1182_v0  ;;  %2454 = vmatmul.mubr.f32.gmra.mxu1 %v1182_v0 }
 0x25a   : > { %2010 = vmatprep.mubr.f32.mxu0 %v7306_v22  ;;  %2459 = vmatprep.mubr.f32.mxu1 %v7306_v22  ;;  %v3477_v14 = vmax.f32 %v1721_v39, 0.0  ;;  %v3479_v26 = vmax.f32 %v2170_v40, 0.0  ;;  %3988 = vst [vmem:[%s5850_s13 + $0x380] sm:$0xff] %v3476_v24  ;;  %3990 = vst [vmem:[%s5850_s13 + $0x390] sm:$0xff] %v3478_v38  ;;  %v4660_v40 = vld [vmem:[#allocation2 + $0x10] sm:$0xff] }
 0x25b   : > { %v1724_v10 = vpop.f32.mrf.mxu0  ;;  %v2173_v32 = vpop.f32.mrf.mxu1 }
 0x25c   : > { %3989 = vst [vmem:[%s5850_s13 + $0x388] sm:$0xff] %v3477_v14  ;;  %3991 = vst [vmem:[%s5850_s13 + $0x398] sm:$0xff] %v3479_v26  ;;  %v1725_v63 = vadd.f32 %v1724_v10, %v6029_v21  ;;  %v2174_v1 = vadd.f32 %v2173_v32, %v6029_v21  ;;  %v6075_v26 = vpop.permute.xlu1 %1345 }
 0x25d   : > { %2011 = vmatmul.mubr.f32.gmra.mxu0 %v1183_v18  ;;  %2460 = vmatmul.mubr.f32.gmra.mxu1 %v1183_v18  ;;  %v1726_v25 = vpop.f32.mrf.mxu0  ;;  %v2175_v8 = vpop.f32.mrf.mxu1 }
 0x25e   : > { %2530 = vmatprep.mubr.f32.mxu0 %v7306_v22  ;;  %2979 = vmatprep.mubr.f32.mxu1 %v7306_v22  ;;  %v1727_v35 = vadd.f32 %v1726_v25, %v6029_v21  ;;  %v2176_v27 = vadd.f32 %v2175_v8, %v6029_v21  ;;  %v3484_v12 = vmax.f32 %v1725_v63, 0.0  ;;  %v3486_v16 = vmax.f32 %v2174_v1, 0.0 }
 0x260   : > { %v3485_v51 = vmax.f32 %v1727_v35, 0.0  ;;  %v3487_v52 = vmax.f32 %v2176_v27, 0.0  ;;  %3996 = vst [vmem:[%s5850_s13 + $0x3c0] sm:$0xff] %v3484_v12  ;;  %3998 = vst [vmem:[%s5850_s13 + $0x3d0] sm:$0xff] %v3486_v16  ;;  %v4661_v12 = vld [vmem:[#allocation2 + $0x18] sm:$0xff] }
 0x261   : > { %v1730_v55 = vpop.f32.mrf.mxu0  ;;  %v2179_v56 = vpop.f32.mrf.mxu1  ;;  %2531 = vmatmul.mubr.f32.vlgmr.msra.gmra.mxu0 %v4658_v58  ;;  %2980 = vmatmul.mubr.f32.vlgmr.msra.gmra.mxu1 %v4658_v58 }
 0x262   : > { %2536 = vmatprep.mubr.f32.mxu0 %v7306_v22  ;;  %2985 = vmatprep.mubr.f32.mxu1 %v7306_v22  ;;  %3997 = vst [vmem:[%s5850_s13 + $0x3c8] sm:$0xff] %v3485_v51  ;;  %3999 = vst [vmem:[%s5850_s13 + $0x3d8] sm:$0xff] %v3487_v52  ;;  %v1731_v33 = vadd.f32 %v1730_v55, %v6043_v19  ;;  %v2180_v15 = vadd.f32 %v2179_v56, %v6043_v19  ;;  %v6087_v56 = vpop.permute.xlu0 %1350 }
 0x263   : > { %v1732_v41 = vpop.f32.mrf.mxu0  ;;  %v2181_v49 = vpop.f32.mrf.mxu1 }
 0x264   : > { %v1733_v37 = vadd.f32 %v1732_v41, %v6043_v19  ;;  %v2182_v53 = vadd.f32 %v2181_v49, %v6043_v19  ;;  %v3492_v28 = vmax.f32 %v1731_v33, 0.0  ;;  %v3494_v57 = vmax.f32 %v2180_v15, 0.0 }
 0x265   : > { %v1736_v34 = vpop.f32.mrf.mxu0  ;;  %v2185_v50 = vpop.f32.mrf.mxu1  ;;  %2537 = vmatmul.mubr.f32.gmra.mxu0 %v4659_v47  ;;  %2986 = vmatmul.mubr.f32.gmra.mxu1 %v4659_v47 }
 0x266   : > { %2542 = vmatprep.mubr.f32.mxu0 %v7306_v22  ;;  %2991 = vmatprep.mubr.f32.mxu1 %v7306_v22  ;;  %v3493_v17 = vmax.f32 %v1733_v37, 0.0  ;;  %v3495_v36 = vmax.f32 %v2182_v53, 0.0  ;;  %4004 = vst [vmem:[%s5850_s13 + $0x400] sm:$0xff] %v3492_v28  ;;  %4006 = vst [vmem:[%s5850_s13 + $0x410] sm:$0xff] %v3494_v57  ;;  %v1737_v2 = vadd.f32 %v1736_v34, %v6053_v45  ;;  %v4662_v57 = vld [vmem:[#allocation2 + $0x20] sm:$0xff] }
 0x267   : > { %v2186_v30 = vadd.f32 %v2185_v50, %v6053_v45  ;;  %v1738_v29 = vpop.f32.mrf.mxu0  ;;  %v2187_v11 = vpop.f32.mrf.mxu1 }
 0x268   : > { %4005 = vst [vmem:[%s5850_s13 + $0x408] sm:$0xff] %v3493_v17  ;;  %4007 = vst [vmem:[%s5850_s13 + $0x418] sm:$0xff] %v3495_v36  ;;  %v1739_v0 = vadd.f32 %v1738_v29, %v6053_v45  ;;  %v2188_v54 = vadd.f32 %v2187_v11, %v6053_v45  ;;  %v3500_v23 = vmax.f32 %v1737_v2, 0.0  ;;  %v6099_v36 = vpop.permute.xlu1 %1355 }
 0x269   : > { %v3502_v46 = vmax.f32 %v2186_v30, 0.0  ;;  %v1742_v43 = vpop.f32.mrf.mxu0  ;;  %v2191_v39 = vpop.f32.mrf.mxu1  ;;  %2543 = vmatmul.mubr.f32.gmra.mxu0 %v4660_v40  ;;  %2992 = vmatmul.mubr.f32.gmra.mxu1 %v4660_v40 }
 0x26a   : > { %2548 = vmatprep.mubr.f32.mxu0 %v7306_v22  ;;  %2997 = vmatprep.mubr.f32.mxu1 %v7306_v22  ;;  %v3501_v24 = vmax.f32 %v1739_v0, 0.0  ;;  %v3503_v38 = vmax.f32 %v2188_v54, 0.0  ;;  %4012 = vst [vmem:[%s5850_s13 + $0x440] sm:$0xff] %v3500_v23  ;;  %v1743_v18 = vadd.f32 %v1742_v43, %v6063_v62  ;;  %v2192_v14 = vadd.f32 %v2191_v39, %v6063_v62  ;;  %v4663_v43 = vld [vmem:[#allocation2 + $0x28] sm:$0xff] }
 0x26b   : > { %4014 = vst [vmem:[%s5850_s13 + $0x450] sm:$0xff] %v3502_v46  ;;  %v1744_v10 = vpop.f32.mrf.mxu0  ;;  %v2193_v32 = vpop.f32.mrf.mxu1 }
 0x26c   : > { %4013 = vst [vmem:[%s5850_s13 + $0x448] sm:$0xff] %v3501_v24  ;;  %4015 = vst [vmem:[%s5850_s13 + $0x458] sm:$0xff] %v3503_v38  ;;  %v1745_v63 = vadd.f32 %v1744_v10, %v6063_v62  ;;  %v2194_v1 = vadd.f32 %v2193_v32, %v6063_v62  ;;  %v3508_v25 = vmax.f32 %v1743_v18, 0.0  ;;  %v3510_v8 = vmax.f32 %v2192_v14, 0.0  ;;  %v6111_v18 = vpop.permute.xlu0 %1360 }
 0x26d   : > { %v1748_v35 = vpop.f32.mrf.mxu0  ;;  %v2197_v27 = vpop.f32.mrf.mxu1  ;;  %2549 = vmatmul.mubr.f32.gmra.mxu0 %v4661_v12  ;;  %2998 = vmatmul.mubr.f32.gmra.mxu1 %v4661_v12 }
 0x26e   : > { %2554 = vmatprep.mubr.f32.mxu0 %v7306_v22  ;;  %3003 = vmatprep.mubr.f32.mxu1 %v7306_v22  ;;  %v3509_v16 = vmax.f32 %v1745_v63, 0.0  ;;  %v3511_v51 = vmax.f32 %v2194_v1, 0.0  ;;  %4020 = vst [vmem:[%s5850_s13 + $0x480] sm:$0xff] %v3508_v25  ;;  %4022 = vst [vmem:[%s5850_s13 + $0x490] sm:$0xff] %v3510_v8  ;;  %v1749_v52 = vadd.f32 %v1748_v35, %v6075_v26 }
 0x26f   : > { %v2198_v55 = vadd.f32 %v2197_v27, %v6075_v26  ;;  %v1750_v58 = vpop.f32.mrf.mxu0  ;;  %v2199_v33 = vpop.f32.mrf.mxu1  ;;  %v4664_v27 = vld [vmem:[#allocation2 + $0x30] sm:$0xff] }
 0x270   : > { %4021 = vst [vmem:[%s5850_s13 + $0x488] sm:$0xff] %v3509_v16  ;;  %4023 = vst [vmem:[%s5850_s13 + $0x498] sm:$0xff] %v3511_v51  ;;  %v1751_v15 = vadd.f32 %v1750_v58, %v6075_v26  ;;  %v2200_v41 = vadd.f32 %v2199_v33, %v6075_v26  ;;  %v3516_v49 = vmax.f32 %v1749_v52, 0.0 }
 0x271   : > { %v3518_v37 = vmax.f32 %v2198_v55, 0.0  ;;  %v1754_v53 = vpop.f32.mrf.mxu0  ;;  %v2203_v28 = vpop.f32.mrf.mxu1  ;;  %2555 = vmatmul.mubr.f32.gmra.mxu0 %v4662_v57  ;;  %3004 = vmatmul.mubr.f32.gmra.mxu1 %v4662_v57  ;;  %v4665_v57 = vld [vmem:[#allocation2 + $0x38] sm:$0xff] }
 0x272   : > { %2560 = vmatprep.mubr.f32.mxu0 %v7306_v22  ;;  %3009 = vmatprep.mubr.f32.mxu1 %v7306_v22  ;;  %v3517_v34 = vmax.f32 %v1751_v15, 0.0  ;;  %v3519_v50 = vmax.f32 %v2200_v41, 0.0  ;;  %4028 = vst [vmem:[%s5850_s13 + $0x4c0] sm:$0xff] %v3516_v49  ;;  %v1755_v47 = vadd.f32 %v1754_v53, %v6087_v56  ;;  %v2204_v17 = vadd.f32 %v2203_v28, %v6087_v56  ;;  %v6123_v55 = vpop.permute.xlu1 %1365 }
 0x273   : > { %4030 = vst [vmem:[%s5850_s13 + $0x4d0] sm:$0xff] %v3518_v37  ;;  %v1756_v2 = vpop.f32.mrf.mxu0  ;;  %v2205_v30 = vpop.f32.mrf.mxu1 }
 0x274   : > { %4029 = vst [vmem:[%s5850_s13 + $0x4c8] sm:$0xff] %v3517_v34  ;;  %4031 = vst [vmem:[%s5850_s13 + $0x4d8] sm:$0xff] %v3519_v50  ;;  %v1757_v29 = vadd.f32 %v1756_v2, %v6087_v56  ;;  %v2206_v11 = vadd.f32 %v2205_v30, %v6087_v56  ;;  %v3524_v0 = vmax.f32 %v1755_v47, 0.0  ;;  %v3526_v54 = vmax.f32 %v2204_v17, 0.0  ;;  %v6135_v2 = vpop.permute.xlu0 %1370 }
 0x275   : > { %v1760_v23 = vpop.f32.mrf.mxu0  ;;  %v2209_v46 = vpop.f32.mrf.mxu1  ;;  %2561 = vmatmul.mubr.f32.gmra.mxu0 %v4663_v43  ;;  %3010 = vmatmul.mubr.f32.gmra.mxu1 %v4663_v43 }
 0x276   : > { %2566 = vmatprep.mubr.f32.mxu0 %v7306_v22  ;;  %3015 = vmatprep.mubr.f32.mxu1 %v7306_v22  ;;  %v3525_v39 = vmax.f32 %v1757_v29, 0.0  ;;  %v3527_v40 = vmax.f32 %v2206_v11, 0.0  ;;  %4036 = vst [vmem:[%s5850_s13 + $0x500] sm:$0xff] %v3524_v0  ;;  %4038 = vst [vmem:[%s5850_s13 + $0x510] sm:$0xff] %v3526_v54  ;;  %v1761_v24 = vadd.f32 %v1760_v23, %v6099_v36 }
 0x277   : > { %v2210_v38 = vadd.f32 %v2209_v46, %v6099_v36  ;;  %v1762_v14 = vpop.f32.mrf.mxu0  ;;  %v2211_v10 = vpop.f32.mrf.mxu1 }
 0x278   : > { %4037 = vst [vmem:[%s5850_s13 + $0x508] sm:$0xff] %v3525_v39  ;;  %4039 = vst [vmem:[%s5850_s13 + $0x518] sm:$0xff] %v3527_v40  ;;  %v1763_v32 = vadd.f32 %v1762_v14, %v6099_v36  ;;  %v2212_v63 = vadd.f32 %v2211_v10, %v6099_v36  ;;  %v3532_v1 = vmax.f32 %v1761_v24, 0.0  ;;  %v4666_v39 = vld [vmem:[#allocation2 + $0x40] sm:$0xff]  ;;  %v6147_v10 = vpop.permute.xlu1 %1375 }
 0x279   : > { %v3534_v25 = vmax.f32 %v2210_v38, 0.0  ;;  %v1766_v8 = vpop.f32.mrf.mxu0  ;;  %v2215_v35 = vpop.f32.mrf.mxu1  ;;  %2567 = vmatmul.mubr.f32.gmra.mxu0 %v4664_v27  ;;  %3016 = vmatmul.mubr.f32.gmra.mxu1 %v4664_v27 }
 0x27a   : > { %2572 = vmatprep.mubr.f32.mxu0 %v7306_v22  ;;  %3021 = vmatprep.mubr.f32.mxu1 %v7306_v22  ;;  %v3533_v12 = vmax.f32 %v1763_v32, 0.0  ;;  %v3535_v16 = vmax.f32 %v2212_v63, 0.0  ;;  %4044 = vst [vmem:[%s5850_s13 + $0x540] sm:$0xff] %v3532_v1  ;;  %v1767_v51 = vadd.f32 %v1766_v8, %v6111_v18  ;;  %v2216_v52 = vadd.f32 %v2215_v35, %v6111_v18 }
 0x27b   : > { %4046 = vst [vmem:[%s5850_s13 + $0x550] sm:$0xff] %v3534_v25  ;;  %v1768_v58 = vpop.f32.mrf.mxu0  ;;  %v2217_v33 = vpop.f32.mrf.mxu1 }
 0x27c   : > { %4045 = vst [vmem:[%s5850_s13 + $0x548] sm:$0xff] %v3533_v12  ;;  %4047 = vst [vmem:[%s5850_s13 + $0x558] sm:$0xff] %v3535_v16  ;;  %v1769_v15 = vadd.f32 %v1768_v58, %v6111_v18  ;;  %v2218_v41 = vadd.f32 %v2217_v33, %v6111_v18  ;;  %v3540_v49 = vmax.f32 %v1767_v51, 0.0  ;;  %v3542_v37 = vmax.f32 %v2216_v52, 0.0  ;;  %v4667_v16 = vld [vmem:[#allocation2 + $0x48] sm:$0xff] }
 0x27d   : > { %v1772_v53 = vpop.f32.mrf.mxu0  ;;  %v2221_v28 = vpop.f32.mrf.mxu1  ;;  %2573 = vmatmul.mubr.f32.gmra.mxu0 %v4665_v57  ;;  %3022 = vmatmul.mubr.f32.gmra.mxu1 %v4665_v57 }
 0x27e   : > { %2578 = vmatprep.mubr.f32.mxu0 %v7306_v22  ;;  %3027 = vmatprep.mubr.f32.mxu1 %v7306_v22  ;;  %v3541_v34 = vmax.f32 %v1769_v15, 0.0  ;;  %v3543_v50 = vmax.f32 %v2218_v41, 0.0  ;;  %4052 = vst [vmem:[%s5850_s13 + $0x580] sm:$0xff] %v3540_v49  ;;  %4054 = vst [vmem:[%s5850_s13 + $0x590] sm:$0xff] %v3542_v37  ;;  %v1773_v47 = vadd.f32 %v1772_v53, %v6123_v55  ;;  %v6159_v15 = vpop.permute.xlu0 %1380 }
 0x27f   : > { %v2222_v17 = vadd.f32 %v2221_v28, %v6123_v55  ;;  %v1774_v30 = vpop.f32.mrf.mxu0  ;;  %v2223_v29 = vpop.f32.mrf.mxu1 }
 0x280   : > { %4053 = vst [vmem:[%s5850_s13 + $0x588] sm:$0xff] %v3541_v34  ;;  %4055 = vst [vmem:[%s5850_s13 + $0x598] sm:$0xff] %v3543_v50  ;;  %v1775_v11 = vadd.f32 %v1774_v30, %v6123_v55  ;;  %v2224_v0 = vadd.f32 %v2223_v29, %v6123_v55  ;;  %v3548_v54 = vmax.f32 %v1773_v47, 0.0  ;;  %v4668_v47 = vld [vmem:[#allocation2 + $0x50] sm:$0xff] }
 0x281   : > { %v3550_v23 = vmax.f32 %v2222_v17, 0.0  ;;  %v1778_v46 = vpop.f32.mrf.mxu0  ;;  %v2227_v43 = vpop.f32.mrf.mxu1  ;;  %2579 = vmatmul.mubr.f32.gmra.mxu0 %v4666_v39  ;;  %3028 = vmatmul.mubr.f32.gmra.mxu1 %v4666_v39 }
 0x282   : > { %2584 = vmatprep.mubr.f32.mxu0 %v7306_v22  ;;  %3033 = vmatprep.mubr.f32.mxu1 %v7306_v22  ;;  %v3549_v40 = vmax.f32 %v1775_v11, 0.0  ;;  %v3551_v24 = vmax.f32 %v2224_v0, 0.0  ;;  %4060 = vst [vmem:[%s5850_s13 + $0x5c0] sm:$0xff] %v3548_v54  ;;  %v1779_v38 = vadd.f32 %v1778_v46, %v6135_v2  ;;  %v2228_v14 = vadd.f32 %v2227_v43, %v6135_v2  ;;  %v6171_v0 = vpop.permute.xlu1 %1385 }
 0x283   : > { %4062 = vst [vmem:[%s5850_s13 + $0x5d0] sm:$0xff] %v3550_v23  ;;  %v1780_v32 = vpop.f32.mrf.mxu0  ;;  %v2229_v63 = vpop.f32.mrf.mxu1 }
 0x284   : > { %4061 = vst [vmem:[%s5850_s13 + $0x5c8] sm:$0xff] %v3549_v40  ;;  %4063 = vst [vmem:[%s5850_s13 + $0x5d8] sm:$0xff] %v3551_v24  ;;  %v1781_v1 = vadd.f32 %v1780_v32, %v6135_v2  ;;  %v2230_v25 = vadd.f32 %v2229_v63, %v6135_v2  ;;  %v3556_v8 = vmax.f32 %v1779_v38, 0.0  ;;  %v3558_v35 = vmax.f32 %v2228_v14, 0.0  ;;  %v4669_v14 = vld [vmem:[#allocation2 + $0x58] sm:$0xff] }
 0x285   : > { %v1784_v27 = vpop.f32.mrf.mxu0  ;;  %v2233_v12 = vpop.f32.mrf.mxu1  ;;  %2585 = vmatmul.mubr.f32.gmra.mxu0 %v4667_v16  ;;  %3034 = vmatmul.mubr.f32.gmra.mxu1 %v4667_v16 }
 0x286   : > { %2590 = vmatprep.mubr.f32.mxu0 %v7306_v22  ;;  %3039 = vmatprep.mubr.f32.mxu1 %v7306_v22  ;;  %v3557_v51 = vmax.f32 %v1781_v1, 0.0  ;;  %v3559_v52 = vmax.f32 %v2230_v25, 0.0  ;;  %4068 = vst [vmem:[%s5850_s13 + $0x600] sm:$0xff] %v3556_v8  ;;  %4070 = vst [vmem:[%s5850_s13 + $0x610] sm:$0xff] %v3558_v35  ;;  %v1785_v58 = vadd.f32 %v1784_v27, %v6147_v10  ;;  %v6183_v8 = vpop.permute.xlu0 %1390 }
 0x287   : > { %v2234_v33 = vadd.f32 %v2233_v12, %v6147_v10  ;;  %v1786_v41 = vpop.f32.mrf.mxu0  ;;  %v2235_v49 = vpop.f32.mrf.mxu1 }
 0x288   : > { %4069 = vst [vmem:[%s5850_s13 + $0x608] sm:$0xff] %v3557_v51  ;;  %4071 = vst [vmem:[%s5850_s13 + $0x618] sm:$0xff] %v3559_v52  ;;  %v1787_v37 = vadd.f32 %v1786_v41, %v6147_v10  ;;  %v2236_v53 = vadd.f32 %v2235_v49, %v6147_v10  ;;  %v3564_v28 = vmax.f32 %v1785_v58, 0.0  ;;  %v4670_v41 = vld [vmem:[#allocation2 + $0x60] sm:$0xff] }
 0x289   : > { %v3566_v57 = vmax.f32 %v2234_v33, 0.0  ;;  %v1790_v34 = vpop.f32.mrf.mxu0  ;;  %v2239_v50 = vpop.f32.mrf.mxu1  ;;  %2591 = vmatmul.mubr.f32.gmra.mxu0 %v4668_v47  ;;  %3040 = vmatmul.mubr.f32.gmra.mxu1 %v4668_v47 }
 0x28a   : > { %2596 = vmatprep.mubr.f32.mxu0 %v7306_v22  ;;  %3045 = vmatprep.mubr.f32.mxu1 %v7306_v22  ;;  %v3565_v17 = vmax.f32 %v1787_v37, 0.0  ;;  %v3567_v30 = vmax.f32 %v2236_v53, 0.0  ;;  %4076 = vst [vmem:[%s5850_s13 + $0x640] sm:$0xff] %v3564_v28  ;;  %v1791_v29 = vadd.f32 %v1790_v34, %v6159_v15  ;;  %v2240_v11 = vadd.f32 %v2239_v50, %v6159_v15 }
 0x28b   : > { %4078 = vst [vmem:[%s5850_s13 + $0x650] sm:$0xff] %v3566_v57  ;;  %v1792_v54 = vpop.f32.mrf.mxu0  ;;  %v2241_v23 = vpop.f32.mrf.mxu1 }
 0x28c   : > { %4077 = vst [vmem:[%s5850_s13 + $0x648] sm:$0xff] %v3565_v17  ;;  %4079 = vst [vmem:[%s5850_s13 + $0x658] sm:$0xff] %v3567_v30  ;;  %v1793_v46 = vadd.f32 %v1792_v54, %v6159_v15  ;;  %v2242_v43 = vadd.f32 %v2241_v23, %v6159_v15  ;;  %v3572_v39 = vmax.f32 %v1791_v29, 0.0  ;;  %v3574_v40 = vmax.f32 %v2240_v11, 0.0  ;;  %v6195_v57 = vpop.permute.xlu1 %1395  ;;  %v4671_v23 = vld [vmem:[#allocation2 + $0x68] sm:$0xff] }
 0x28d   : > { %v1796_v24 = vpop.f32.mrf.mxu0  ;;  %v2245_v38 = vpop.f32.mrf.mxu1  ;;  %2597 = vmatmul.mubr.f32.gmra.mxu0 %v4669_v14  ;;  %3046 = vmatmul.mubr.f32.gmra.mxu1 %v4669_v14 }
 0x28e   : > { %2602 = vmatprep.mubr.f32.mxu0 %v7306_v22  ;;  %3051 = vmatprep.mubr.f32.mxu1 %v7306_v22  ;;  %v3573_v32 = vmax.f32 %v1793_v46, 0.0  ;;  %v3575_v63 = vmax.f32 %v2242_v43, 0.0  ;;  %4084 = vst [vmem:[%s5850_s13 + $0x680] sm:$0xff] %v3572_v39  ;;  %4086 = vst [vmem:[%s5850_s13 + $0x690] sm:$0xff] %v3574_v40  ;;  %v1797_v1 = vadd.f32 %v1796_v24, %v6171_v0  ;;  %v6207_v24 = vpop.permute.xlu0 %1400 }
 0x28f   : > { %v2246_v25 = vadd.f32 %v2245_v38, %v6171_v0  ;;  %v1798_v35 = vpop.f32.mrf.mxu0  ;;  %v2247_v27 = vpop.f32.mrf.mxu1 }
 0x290   : > { %4085 = vst [vmem:[%s5850_s13 + $0x688] sm:$0xff] %v3573_v32  ;;  %4087 = vst [vmem:[%s5850_s13 + $0x698] sm:$0xff] %v3575_v63  ;;  %v1799_v12 = vadd.f32 %v1798_v35, %v6171_v0  ;;  %v2248_v16 = vadd.f32 %v2247_v27, %v6171_v0  ;;  %v3580_v51 = vmax.f32 %v1797_v1, 0.0 }
 0x291   : > { %v3582_v52 = vmax.f32 %v2246_v25, 0.0  ;;  %v1802_v58 = vpop.f32.mrf.mxu0  ;;  %v2251_v33 = vpop.f32.mrf.mxu1  ;;  %2603 = vmatmul.mubr.f32.gmra.mxu0 %v4670_v41  ;;  %3052 = vmatmul.mubr.f32.gmra.mxu1 %v4670_v41 }
 0x292   : > { %2608 = vmatprep.mubr.f32.mxu0 %v7306_v22  ;;  %3057 = vmatprep.mubr.f32.mxu1 %v7306_v22  ;;  %v3581_v49 = vmax.f32 %v1799_v12, 0.0  ;;  %v3583_v37 = vmax.f32 %v2248_v16, 0.0  ;;  %4092 = vst [vmem:[%s5850_s13 + $0x6c0] sm:$0xff] %v3580_v51  ;;  %v1803_v53 = vadd.f32 %v1802_v58, %v6183_v8  ;;  %v2252_v28 = vadd.f32 %v2251_v33, %v6183_v8  ;;  %v4672_v12 = vld [vmem:[#allocation2 + $0x70] sm:$0xff]  ;;  %v6219_v33 = vpop.permute.xlu1 %1405 }
 0x293   : > { %4094 = vst [vmem:[%s5850_s13 + $0x6d0] sm:$0xff] %v3582_v52  ;;  %v1804_v34 = vpop.f32.mrf.mxu0  ;;  %v2253_v50 = vpop.f32.mrf.mxu1 }
 0x294   : > { %4093 = vst [vmem:[%s5850_s13 + $0x6c8] sm:$0xff] %v3581_v49  ;;  %4095 = vst [vmem:[%s5850_s13 + $0x6d8] sm:$0xff] %v3583_v37  ;;  %v1805_v47 = vadd.f32 %v1804_v34, %v6183_v8  ;;  %v2254_v17 = vadd.f32 %v2253_v50, %v6183_v8  ;;  %v3588_v30 = vmax.f32 %v1803_v53, 0.0  ;;  %v3590_v29 = vmax.f32 %v2252_v28, 0.0 }
 0x295   : > { %v1808_v11 = vpop.f32.mrf.mxu0  ;;  %v2257_v54 = vpop.f32.mrf.mxu1  ;;  %2609 = vmatmul.mubr.f32.gmra.mxu0 %v4671_v23  ;;  %3058 = vmatmul.mubr.f32.gmra.mxu1 %v4671_v23 }
 0x296   : > { %2614 = vmatprep.mubr.f32.mxu0 %v7306_v22  ;;  %3063 = vmatprep.mubr.f32.mxu1 %v7306_v22  ;;  %v3589_v46 = vmax.f32 %v1805_v47, 0.0  ;;  %v3591_v43 = vmax.f32 %v2254_v17, 0.0  ;;  %4100 = vst [vmem:[%s5850_s13 + $0x700] sm:$0xff] %v3588_v30  ;;  %4102 = vst [vmem:[%s5850_s13 + $0x710] sm:$0xff] %v3590_v29  ;;  %v1809_v39 = vadd.f32 %v1808_v11, %v6195_v57  ;;  %v4673_v17 = vld [vmem:[#allocation2 + $0x78] sm:$0xff]  ;;  %v6231_v23 = vpop.permute.xlu0 %1410 }
 0x297   : > { %v2258_v40 = vadd.f32 %v2257_v54, %v6195_v57  ;;  %v1810_v38 = vpop.f32.mrf.mxu0  ;;  %v2259_v14 = vpop.f32.mrf.mxu1 }
 0x298   : > { %4101 = vst [vmem:[%s5850_s13 + $0x708] sm:$0xff] %v3589_v46  ;;  %4103 = vst [vmem:[%s5850_s13 + $0x718] sm:$0xff] %v3591_v43  ;;  %v1811_v32 = vadd.f32 %v1810_v38, %v6195_v57  ;;  %v2260_v63 = vadd.f32 %v2259_v14, %v6195_v57  ;;  %v3596_v1 = vmax.f32 %v1809_v39, 0.0 }
 0x299   : > { %v3598_v25 = vmax.f32 %v2258_v40, 0.0  ;;  %v1814_v35 = vpop.f32.mrf.mxu0  ;;  %v2263_v27 = vpop.f32.mrf.mxu1  ;;  %2615 = vmatmul.mubr.f32.gmra.mxu0 %v4672_v12  ;;  %3064 = vmatmul.mubr.f32.gmra.mxu1 %v4672_v12 }
 0x29a   : > { %2620 = vmatprep.mubr.f32.mxu0 %v7306_v22  ;;  %3069 = vmatprep.mubr.f32.mxu1 %v7306_v22  ;;  %v3597_v16 = vmax.f32 %v1811_v32, 0.0  ;;  %v3599_v51 = vmax.f32 %v2260_v63, 0.0  ;;  %4108 = vst [vmem:[%s5850_s13 + $0x740] sm:$0xff] %v3596_v1  ;;  %v1815_v52 = vadd.f32 %v1814_v35, %v6207_v24  ;;  %v2264_v58 = vadd.f32 %v2263_v27, %v6207_v24  ;;  %v4674_v1 = vld [vmem:[#allocation2 + $0x80] sm:$0xff] }
 0x29b   : > { %4110 = vst [vmem:[%s5850_s13 + $0x750] sm:$0xff] %v3598_v25  ;;  %v1816_v41 = vpop.f32.mrf.mxu0  ;;  %v2265_v49 = vpop.f32.mrf.mxu1 }
 0x29c   : > { %4109 = vst [vmem:[%s5850_s13 + $0x748] sm:$0xff] %v3597_v16  ;;  %4111 = vst [vmem:[%s5850_s13 + $0x758] sm:$0xff] %v3599_v51  ;;  %v1817_v37 = vadd.f32 %v1816_v41, %v6207_v24  ;;  %v2266_v53 = vadd.f32 %v2265_v49, %v6207_v24  ;;  %v3604_v28 = vmax.f32 %v1815_v52, 0.0  ;;  %v3606_v34 = vmax.f32 %v2264_v58, 0.0  ;;  %v6243_v16 = vpop.permute.xlu1 %1415 }
 0x29d   : > { %v1820_v50 = vpop.f32.mrf.mxu0  ;;  %v2269_v47 = vpop.f32.mrf.mxu1  ;;  %2621 = vmatmul.mubr.f32.gmra.mxu0 %v4673_v17  ;;  %3070 = vmatmul.mubr.f32.gmra.mxu1 %v4673_v17 }
 0x29e   : > { %2626 = vmatprep.mubr.f32.mxu0 %v7306_v22  ;;  %3075 = vmatprep.mubr.f32.mxu1 %v7306_v22  ;;  %v3605_v30 = vmax.f32 %v1817_v37, 0.0  ;;  %v3607_v29 = vmax.f32 %v2266_v53, 0.0  ;;  %4116 = vst [vmem:[%s5850_s13 + $0x780] sm:$0xff] %v3604_v28  ;;  %4118 = vst [vmem:[%s5850_s13 + $0x790] sm:$0xff] %v3606_v34  ;;  %v1821_v11 = vadd.f32 %v1820_v50, %v6219_v33  ;;  %v4675_v34 = vld [vmem:[#allocation2 + $0x88] sm:$0xff] }
 0x29f   : > { %v2270_v54 = vadd.f32 %v2269_v47, %v6219_v33  ;;  %v1822_v46 = vpop.f32.mrf.mxu0  ;;  %v2271_v43 = vpop.f32.mrf.mxu1 }
 0x2a0   : > { %4117 = vst [vmem:[%s5850_s13 + $0x788] sm:$0xff] %v3605_v30  ;;  %4119 = vst [vmem:[%s5850_s13 + $0x798] sm:$0xff] %v3607_v29  ;;  %v1823_v39 = vadd.f32 %v1822_v46, %v6219_v33  ;;  %v2272_v40 = vadd.f32 %v2271_v43, %v6219_v33  ;;  %v3612_v38 = vmax.f32 %v1821_v11, 0.0  ;;  %v6255_v29 = vpop.permute.xlu0 %1420 }
 0x2a1   : > { %v3614_v14 = vmax.f32 %v2270_v54, 0.0  ;;  %v1826_v32 = vpop.f32.mrf.mxu0  ;;  %v2275_v63 = vpop.f32.mrf.mxu1  ;;  %2627 = vmatmul.mubr.f32.gmra.mxu0 %v4674_v1  ;;  %3076 = vmatmul.mubr.f32.gmra.mxu1 %v4674_v1 }
 0x2a2   : > { %2632 = vmatprep.mubr.f32.mxu0 %v7306_v22  ;;  %3081 = vmatprep.mubr.f32.mxu1 %v7306_v22  ;;  %v3613_v25 = vmax.f32 %v1823_v39, 0.0  ;;  %v3615_v35 = vmax.f32 %v2272_v40, 0.0  ;;  %4124 = vst [vmem:[%s5850_s13 + $0x7c0] sm:$0xff] %v3612_v38  ;;  %v1827_v27 = vadd.f32 %v1826_v32, %v6231_v23  ;;  %v2276_v12 = vadd.f32 %v2275_v63, %v6231_v23  ;;  %v4676_v32 = vld [vmem:[#allocation2 + $0x90] sm:$0xff] }
 0x2a3   : > { %4126 = vst [vmem:[%s5850_s13 + $0x7d0] sm:$0xff] %v3614_v14  ;;  %v1828_v51 = vpop.f32.mrf.mxu0  ;;  %v2277_v52 = vpop.f32.mrf.mxu1 }
 0x2a4   : > { %4125 = vst [vmem:[%s5850_s13 + $0x7c8] sm:$0xff] %v3613_v25  ;;  %4127 = vst [vmem:[%s5850_s13 + $0x7d8] sm:$0xff] %v3615_v35  ;;  %v1829_v58 = vadd.f32 %v1828_v51, %v6231_v23  ;;  %v2278_v41 = vadd.f32 %v2277_v52, %v6231_v23  ;;  %v3620_v49 = vmax.f32 %v1827_v27, 0.0  ;;  %v3622_v37 = vmax.f32 %v2276_v12, 0.0  ;;  %v6267_v27 = vpop.permute.xlu1 %1425 }
 0x2a5   : > { %v1832_v53 = vpop.f32.mrf.mxu0  ;;  %v2281_v28 = vpop.f32.mrf.mxu1  ;;  %2633 = vmatmul.mubr.f32.gmra.mxu0 %v4675_v34  ;;  %3082 = vmatmul.mubr.f32.gmra.mxu1 %v4675_v34 }
 0x2a6   : > { %2638 = vmatprep.mubr.f32.mxu0 %v7306_v22  ;;  %3087 = vmatprep.mubr.f32.mxu1 %v7306_v22  ;;  %v3621_v50 = vmax.f32 %v1829_v58, 0.0  ;;  %v3623_v47 = vmax.f32 %v2278_v41, 0.0  ;;  %4132 = vst [vmem:[%s5850_s13 + $0x800] sm:$0xff] %v3620_v49  ;;  %4134 = vst [vmem:[%s5850_s13 + $0x810] sm:$0xff] %v3622_v37  ;;  %v1833_v17 = vadd.f32 %v1832_v53, %v6243_v16 }
 0x2a7   : > { %v2282_v30 = vadd.f32 %v2281_v28, %v6243_v16  ;;  %v1834_v11 = vpop.f32.mrf.mxu0  ;;  %v2283_v54 = vpop.f32.mrf.mxu1  ;;  %v4677_v28 = vld [vmem:[#allocation2 + $0x98] sm:$0xff] }
 0x2a8   : > { %4133 = vst [vmem:[%s5850_s13 + $0x808] sm:$0xff] %v3621_v50  ;;  %4135 = vst [vmem:[%s5850_s13 + $0x818] sm:$0xff] %v3623_v47  ;;  %v1835_v46 = vadd.f32 %v1834_v11, %v6243_v16  ;;  %v2284_v43 = vadd.f32 %v2283_v54, %v6243_v16  ;;  %v3628_v39 = vmax.f32 %v1833_v17, 0.0 }
 0x2a9   : > { %v3630_v40 = vmax.f32 %v2282_v30, 0.0  ;;  %v1838_v38 = vpop.f32.mrf.mxu0  ;;  %v2287_v14 = vpop.f32.mrf.mxu1  ;;  %2639 = vmatmul.mubr.f32.gmra.mxu0 %v4676_v32  ;;  %3088 = vmatmul.mubr.f32.gmra.mxu1 %v4676_v32  ;;  %v4678_v32 = vld [vmem:[#allocation2 + $0xa0] sm:$0xff] }
 0x2aa   : > { %2644 = vmatprep.mubr.f32.mxu0 %v7306_v22  ;;  %3093 = vmatprep.mubr.f32.mxu1 %v7306_v22  ;;  %v3629_v63 = vmax.f32 %v1835_v46, 0.0  ;;  %v3631_v1 = vmax.f32 %v2284_v43, 0.0  ;;  %4140 = vst [vmem:[%s5850_s13 + $0x840] sm:$0xff] %v3628_v39  ;;  %v1839_v25 = vadd.f32 %v1838_v38, %v6255_v29  ;;  %v2288_v35 = vadd.f32 %v2287_v14, %v6255_v29  ;;  %v6279_v30 = vpop.permute.xlu0 %1430 }
 0x2ab   : > { %4142 = vst [vmem:[%s5850_s13 + $0x850] sm:$0xff] %v3630_v40  ;;  %v1840_v12 = vpop.f32.mrf.mxu0  ;;  %v2289_v51 = vpop.f32.mrf.mxu1 }
 0x2ac   : > { %4141 = vst [vmem:[%s5850_s13 + $0x848] sm:$0xff] %v3629_v63  ;;  %4143 = vst [vmem:[%s5850_s13 + $0x858] sm:$0xff] %v3631_v1  ;;  %v1841_v52 = vadd.f32 %v1840_v12, %v6255_v29  ;;  %v2290_v58 = vadd.f32 %v2289_v51, %v6255_v29  ;;  %v3636_v41 = vmax.f32 %v1839_v25, 0.0  ;;  %v3638_v49 = vmax.f32 %v2288_v35, 0.0  ;;  %v6291_v12 = vpop.permute.xlu1 %1435 }
 0x2ad   : > { %v1844_v37 = vpop.f32.mrf.mxu0  ;;  %v2293_v53 = vpop.f32.mrf.mxu1  ;;  %2645 = vmatmul.mubr.f32.gmra.mxu0 %v4677_v28  ;;  %3094 = vmatmul.mubr.f32.gmra.mxu1 %v4677_v28 }
 0x2ae   : > { %2650 = vmatprep.mubr.f32.mxu0 %v7306_v22  ;;  %3099 = vmatprep.mubr.f32.mxu1 %v7306_v22  ;;  %v3637_v34 = vmax.f32 %v1841_v52, 0.0  ;;  %v3639_v50 = vmax.f32 %v2290_v58, 0.0  ;;  %4148 = vst [vmem:[%s5850_s13 + $0x880] sm:$0xff] %v3636_v41  ;;  %4150 = vst [vmem:[%s5850_s13 + $0x890] sm:$0xff] %v3638_v49  ;;  %v1845_v47 = vadd.f32 %v1844_v37, %v6267_v27 }
 0x2af   : > { %v2294_v17 = vadd.f32 %v2293_v53, %v6267_v27  ;;  %v1846_v11 = vpop.f32.mrf.mxu0  ;;  %v2295_v54 = vpop.f32.mrf.mxu1 }
 0x2b0   : > { %4149 = vst [vmem:[%s5850_s13 + $0x888] sm:$0xff] %v3637_v34  ;;  %4151 = vst [vmem:[%s5850_s13 + $0x898] sm:$0xff] %v3639_v50  ;;  %v1847_v46 = vadd.f32 %v1846_v11, %v6267_v27  ;;  %v2296_v43 = vadd.f32 %v2295_v54, %v6267_v27  ;;  %v3644_v39 = vmax.f32 %v1845_v47, 0.0  ;;  %v4679_v34 = vld [vmem:[#allocation2 + $0xa8] sm:$0xff]  ;;  %v6303_v54 = vpop.permute.xlu0 %1440 }
 0x2b1   : > { %v3646_v40 = vmax.f32 %v2294_v17, 0.0  ;;  %v1850_v38 = vpop.f32.mrf.mxu0  ;;  %v2299_v14 = vpop.f32.mrf.mxu1  ;;  %2651 = vmatmul.mubr.f32.gmra.mxu0 %v4678_v32  ;;  %3100 = vmatmul.mubr.f32.gmra.mxu1 %v4678_v32 }
 0x2b2   : > { %2656 = vmatprep.mubr.f32.mxu0 %v7306_v22  ;;  %3105 = vmatprep.mubr.f32.mxu1 %v7306_v22  ;;  %v3645_v63 = vmax.f32 %v1847_v46, 0.0  ;;  %v3647_v1 = vmax.f32 %v2296_v43, 0.0  ;;  %4156 = vst [vmem:[%s5850_s13 + $0x8c0] sm:$0xff] %v3644_v39  ;;  %v1851_v25 = vadd.f32 %v1850_v38, %v6279_v30  ;;  %v2300_v35 = vadd.f32 %v2299_v14, %v6279_v30 }
 0x2b3   : > { %4158 = vst [vmem:[%s5850_s13 + $0x8d0] sm:$0xff] %v3646_v40  ;;  %v1852_v51 = vpop.f32.mrf.mxu0  ;;  %v2301_v52 = vpop.f32.mrf.mxu1 }
 0x2b4   : > { %4157 = vst [vmem:[%s5850_s13 + $0x8c8] sm:$0xff] %v3645_v63  ;;  %4159 = vst [vmem:[%s5850_s13 + $0x8d8] sm:$0xff] %v3647_v1  ;;  %v1853_v58 = vadd.f32 %v1852_v51, %v6279_v30  ;;  %v2302_v41 = vadd.f32 %v2301_v52, %v6279_v30  ;;  %v3652_v49 = vmax.f32 %v1851_v25, 0.0  ;;  %v3654_v37 = vmax.f32 %v2300_v35, 0.0  ;;  %v4680_v1 = vld [vmem:[#allocation2 + $0xb0] sm:$0xff] }
 0x2b5   : > { %v1856_v53 = vpop.f32.mrf.mxu0  ;;  %v2305_v28 = vpop.f32.mrf.mxu1  ;;  %2657 = vmatmul.mubr.f32.gmra.mxu0 %v4679_v34  ;;  %3106 = vmatmul.mubr.f32.gmra.mxu1 %v4679_v34 }
 0x2b6   : > { %2662 = vmatprep.mubr.f32.mxu0 %v7306_v22  ;;  %3111 = vmatprep.mubr.f32.mxu1 %v7306_v22  ;;  %v3653_v50 = vmax.f32 %v1853_v58, 0.0  ;;  %v3655_v47 = vmax.f32 %v2302_v41, 0.0  ;;  %4164 = vst [vmem:[%s5850_s13 + $0x900] sm:$0xff] %v3652_v49  ;;  %4166 = vst [vmem:[%s5850_s13 + $0x910] sm:$0xff] %v3654_v37  ;;  %v1857_v17 = vadd.f32 %v1856_v53, %v6291_v12  ;;  %v6315_v58 = vpop.permute.xlu1 %1445 }
 0x2b7   : > { %v2306_v11 = vadd.f32 %v2305_v28, %v6291_v12  ;;  %v1858_v46 = vpop.f32.mrf.mxu0  ;;  %v2307_v43 = vpop.f32.mrf.mxu1 }
 0x2b8   : > { %4165 = vst [vmem:[%s5850_s13 + $0x908] sm:$0xff] %v3653_v50  ;;  %4167 = vst [vmem:[%s5850_s13 + $0x918] sm:$0xff] %v3655_v47  ;;  %v1859_v39 = vadd.f32 %v1858_v46, %v6291_v12  ;;  %v2308_v40 = vadd.f32 %v2307_v43, %v6291_v12  ;;  %v3660_v38 = vmax.f32 %v1857_v17, 0.0  ;;  %v4681_v17 = vld [vmem:[#allocation2 + $0xb8] sm:$0xff] }
 0x2b9   : > { %v3662_v14 = vmax.f32 %v2306_v11, 0.0  ;;  %v1862_v32 = vpop.f32.mrf.mxu0  ;;  %v2311_v63 = vpop.f32.mrf.mxu1  ;;  %2663 = vmatmul.mubr.f32.gmra.mxu0 %v4680_v1  ;;  %3112 = vmatmul.mubr.f32.gmra.mxu1 %v4680_v1 }
 0x2ba   : > { %2668 = vmatprep.mubr.f32.mxu0 %v7306_v22  ;;  %3117 = vmatprep.mubr.f32.mxu1 %v7306_v22  ;;  %v3661_v25 = vmax.f32 %v1859_v39, 0.0  ;;  %v3663_v35 = vmax.f32 %v2308_v40, 0.0  ;;  %4172 = vst [vmem:[%s5850_s13 + $0x940] sm:$0xff] %v3660_v38  ;;  %v1863_v51 = vadd.f32 %v1862_v32, %v6303_v54  ;;  %v2312_v52 = vadd.f32 %v2311_v63, %v6303_v54  ;;  %v6327_v40 = vpop.permute.xlu0 %1450 }
 0x2bb   : > { %4174 = vst [vmem:[%s5850_s13 + $0x950] sm:$0xff] %v3662_v14  ;;  %v1864_v41 = vpop.f32.mrf.mxu0  ;;  %v2313_v49 = vpop.f32.mrf.mxu1 }
 0x2bc   : > { %4173 = vst [vmem:[%s5850_s13 + $0x948] sm:$0xff] %v3661_v25  ;;  %4175 = vst [vmem:[%s5850_s13 + $0x958] sm:$0xff] %v3663_v35  ;;  %v1865_v37 = vadd.f32 %v1864_v41, %v6303_v54  ;;  %v2314_v53 = vadd.f32 %v2313_v49, %v6303_v54  ;;  %v3668_v28 = vmax.f32 %v1863_v51, 0.0  ;;  %v3670_v34 = vmax.f32 %v2312_v52, 0.0  ;;  %v4682_v52 = vld [vmem:[#allocation2 + $0xc0] sm:$0xff] }
 0x2bd   : > { %v1868_v50 = vpop.f32.mrf.mxu0  ;;  %v2317_v47 = vpop.f32.mrf.mxu1  ;;  %2669 = vmatmul.mubr.f32.gmra.mxu0 %v4681_v17  ;;  %3118 = vmatmul.mubr.f32.gmra.mxu1 %v4681_v17 }
 0x2be   : > { %2674 = vmatprep.mubr.f32.mxu0 %v7306_v22  ;;  %3123 = vmatprep.mubr.f32.mxu1 %v7306_v22  ;;  %v3669_v11 = vmax.f32 %v1865_v37, 0.0  ;;  %v3671_v46 = vmax.f32 %v2314_v53, 0.0  ;;  %4180 = vst [vmem:[%s5850_s13 + $0x980] sm:$0xff] %v3668_v28  ;;  %4182 = vst [vmem:[%s5850_s13 + $0x990] sm:$0xff] %v3670_v34  ;;  %v1869_v43 = vadd.f32 %v1868_v50, %v6315_v58  ;;  %v6339_v28 = vpop.permute.xlu1 %1455 }
 0x2bf   : > { %v2318_v39 = vadd.f32 %v2317_v47, %v6315_v58  ;;  %v1870_v38 = vpop.f32.mrf.mxu0  ;;  %v2319_v14 = vpop.f32.mrf.mxu1 }
 0x2c0   : > { %4181 = vst [vmem:[%s5850_s13 + $0x988] sm:$0xff] %v3669_v11  ;;  %4183 = vst [vmem:[%s5850_s13 + $0x998] sm:$0xff] %v3671_v46  ;;  %v1871_v32 = vadd.f32 %v1870_v38, %v6315_v58  ;;  %v2320_v63 = vadd.f32 %v2319_v14, %v6315_v58  ;;  %v3676_v1 = vmax.f32 %v1869_v43, 0.0  ;;  %v4683_v38 = vld [vmem:[#allocation2 + $0xc8] sm:$0xff] }
 0x2c1   : > { %v3678_v25 = vmax.f32 %v2318_v39, 0.0  ;;  %v1874_v35 = vpop.f32.mrf.mxu0  ;;  %v2323_v51 = vpop.f32.mrf.mxu1  ;;  %2675 = vmatmul.mubr.f32.gmra.mxu0 %v4682_v52  ;;  %3124 = vmatmul.mubr.f32.gmra.mxu1 %v4682_v52 }
 0x2c2   : > { %2680 = vmatprep.mubr.f32.mxu0 %v7306_v22  ;;  %3129 = vmatprep.mubr.f32.mxu1 %v7306_v22  ;;  %v3677_v41 = vmax.f32 %v1871_v32, 0.0  ;;  %v3679_v49 = vmax.f32 %v2320_v63, 0.0  ;;  %4188 = vst [vmem:[%s5850_s13 + $0x9c0] sm:$0xff] %v3676_v1  ;;  %v1875_v37 = vadd.f32 %v1874_v35, %v6327_v40  ;;  %v2324_v53 = vadd.f32 %v2323_v51, %v6327_v40 }
 0x2c3   : > { %4190 = vst [vmem:[%s5850_s13 + $0x9d0] sm:$0xff] %v3678_v25  ;;  %v1876_v34 = vpop.f32.mrf.mxu0  ;;  %v2325_v50 = vpop.f32.mrf.mxu1 }
 0x2c4   : > { %4189 = vst [vmem:[%s5850_s13 + $0x9c8] sm:$0xff] %v3677_v41  ;;  %4191 = vst [vmem:[%s5850_s13 + $0x9d8] sm:$0xff] %v3679_v49  ;;  %v1877_v47 = vadd.f32 %v1876_v34, %v6327_v40  ;;  %v2326_v17 = vadd.f32 %v2325_v50, %v6327_v40  ;;  %v3684_v11 = vmax.f32 %v1875_v37, 0.0  ;;  %v3686_v46 = vmax.f32 %v2324_v53, 0.0  ;;  %v6351_v25 = vpop.permute.xlu0 %1460  ;;  %v4684_v50 = vld [vmem:[#allocation2 + $0xd0] sm:$0xff] }
 0x2c5   : > { %v1880_v43 = vpop.f32.mrf.mxu0  ;;  %v2329_v39 = vpop.f32.mrf.mxu1  ;;  %2681 = vmatmul.mubr.f32.gmra.mxu0 %v4683_v38  ;;  %3130 = vmatmul.mubr.f32.gmra.mxu1 %v4683_v38 }
 0x2c6   : > { %2686 = vmatprep.mubr.f32.mxu0 %v7306_v22  ;;  %3135 = vmatprep.mubr.f32.mxu1 %v7306_v22  ;;  %v3685_v14 = vmax.f32 %v1877_v47, 0.0  ;;  %v3687_v32 = vmax.f32 %v2326_v17, 0.0  ;;  %4196 = vst [vmem:[%s5850_s13 + $0xa00] sm:$0xff] %v3684_v11  ;;  %4198 = vst [vmem:[%s5850_s13 + $0xa10] sm:$0xff] %v3686_v46  ;;  %v1881_v63 = vadd.f32 %v1880_v43, %v6339_v28  ;;  %v6363_v43 = vpop.permute.xlu1 %1465 }
 0x2c7   : > { %v2330_v1 = vadd.f32 %v2329_v39, %v6339_v28  ;;  %v1882_v35 = vpop.f32.mrf.mxu0  ;;  %v2331_v51 = vpop.f32.mrf.mxu1 }
 0x2c8   : > { %4197 = vst [vmem:[%s5850_s13 + $0xa08] sm:$0xff] %v3685_v14  ;;  %4199 = vst [vmem:[%s5850_s13 + $0xa18] sm:$0xff] %v3687_v32  ;;  %v1883_v52 = vadd.f32 %v1882_v35, %v6339_v28  ;;  %v2332_v41 = vadd.f32 %v2331_v51, %v6339_v28  ;;  %v3692_v49 = vmax.f32 %v1881_v63, 0.0 }
 0x2c9   : > { %v3694_v37 = vmax.f32 %v2330_v1, 0.0  ;;  %v1886_v53 = vpop.f32.mrf.mxu0  ;;  %v2335_v34 = vpop.f32.mrf.mxu1  ;;  %2687 = vmatmul.mubr.f32.gmra.mxu0 %v4684_v50  ;;  %3136 = vmatmul.mubr.f32.gmra.mxu1 %v4684_v50 }
 0x2ca   : > { %2692 = vmatprep.mubr.f32.mxu0 %v7306_v22  ;;  %3141 = vmatprep.mubr.f32.mxu1 %v7306_v22  ;;  %v3693_v47 = vmax.f32 %v1883_v52, 0.0  ;;  %v3695_v17 = vmax.f32 %v2332_v41, 0.0  ;;  %4204 = vst [vmem:[%s5850_s13 + $0xa40] sm:$0xff] %v3692_v49  ;;  %v1887_v11 = vadd.f32 %v1886_v53, %v6351_v25  ;;  %v2336_v46 = vadd.f32 %v2335_v34, %v6351_v25  ;;  %v4685_v52 = vld [vmem:[#allocation2 + $0xd8] sm:$0xff]  ;;  %v6375_v34 = vpop.permute.xlu0 %1470 }
 0x2cb   : > { %4206 = vst [vmem:[%s5850_s13 + $0xa50] sm:$0xff] %v3694_v37  ;;  %v1888_v39 = vpop.f32.mrf.mxu0  ;;  %v2337_v38 = vpop.f32.mrf.mxu1 }
 0x2cc   : > { %4205 = vst [vmem:[%s5850_s13 + $0xa48] sm:$0xff] %v3693_v47  ;;  %4207 = vst [vmem:[%s5850_s13 + $0xa58] sm:$0xff] %v3695_v17  ;;  %v1889_v14 = vadd.f32 %v1888_v39, %v6351_v25  ;;  %v2338_v32 = vadd.f32 %v2337_v38, %v6351_v25  ;;  %v3700_v63 = vmax.f32 %v1887_v11, 0.0  ;;  %v3702_v1 = vmax.f32 %v2336_v46, 0.0 }
 0x2cd   : > { %v1892_v35 = vpop.f32.mrf.mxu0  ;;  %v2341_v51 = vpop.f32.mrf.mxu1  ;;  %2693 = vmatmul.mubr.f32.gmra.mxu0 %v4685_v52  ;;  %3142 = vmatmul.mubr.f32.gmra.mxu1 %v4685_v52 }
 0x2ce   : > { %2698 = vmatprep.mubr.f32.mxu0 %v7306_v22  ;;  %3147 = vmatprep.mubr.f32.mxu1 %v7306_v22  ;;  %v3701_v41 = vmax.f32 %v1889_v14, 0.0  ;;  %v3703_v49 = vmax.f32 %v2338_v32, 0.0  ;;  %4212 = vst [vmem:[%s5850_s13 + $0xa80] sm:$0xff] %v3700_v63  ;;  %4214 = vst [vmem:[%s5850_s13 + $0xa90] sm:$0xff] %v3702_v1  ;;  %v1893_v37 = vadd.f32 %v1892_v35, %v6363_v43  ;;  %v4686_v32 = vld [vmem:[#allocation2 + $0xe0] sm:$0xff]  ;;  %v6387_v52 = vpop.permute.xlu1 %1475 }
 0x2cf   : > { %v2342_v53 = vadd.f32 %v2341_v51, %v6363_v43  ;;  %v1894_v50 = vpop.f32.mrf.mxu0  ;;  %v2343_v47 = vpop.f32.mrf.mxu1 }
 0x2d0   : > { %4213 = vst [vmem:[%s5850_s13 + $0xa88] sm:$0xff] %v3701_v41  ;;  %4215 = vst [vmem:[%s5850_s13 + $0xa98] sm:$0xff] %v3703_v49  ;;  %v1895_v17 = vadd.f32 %v1894_v50, %v6363_v43  ;;  %v2344_v11 = vadd.f32 %v2343_v47, %v6363_v43  ;;  %v3708_v46 = vmax.f32 %v1893_v37, 0.0 }
 0x2d1   : > { %v3710_v39 = vmax.f32 %v2342_v53, 0.0  ;;  %v1898_v38 = vpop.f32.mrf.mxu0  ;;  %v2347_v14 = vpop.f32.mrf.mxu1  ;;  %2699 = vmatmul.mubr.f32.gmra.mxu0 %v4686_v32  ;;  %3148 = vmatmul.mubr.f32.gmra.mxu1 %v4686_v32 }
 0x2d2   : > { %2704 = vmatprep.mubr.f32.mxu0 %v7306_v22  ;;  %3153 = vmatprep.mubr.f32.mxu1 %v7306_v22  ;;  %v3709_v63 = vmax.f32 %v1895_v17, 0.0  ;;  %v3711_v1 = vmax.f32 %v2344_v11, 0.0  ;;  %4220 = vst [vmem:[%s5850_s13 + $0xac0] sm:$0xff] %v3708_v46  ;;  %v1899_v35 = vadd.f32 %v1898_v38, %v6375_v34  ;;  %v2348_v51 = vadd.f32 %v2347_v14, %v6375_v34  ;;  %v4687_v46 = vld [vmem:[#allocation2 + $0xe8] sm:$0xff] }
 0x2d3   : > { %4222 = vst [vmem:[%s5850_s13 + $0xad0] sm:$0xff] %v3710_v39  ;;  %v1900_v41 = vpop.f32.mrf.mxu0  ;;  %v2349_v49 = vpop.f32.mrf.mxu1 }
 0x2d4   : > { %4221 = vst [vmem:[%s5850_s13 + $0xac8] sm:$0xff] %v3709_v63  ;;  %4223 = vst [vmem:[%s5850_s13 + $0xad8] sm:$0xff] %v3711_v1  ;;  %v1901_v37 = vadd.f32 %v1900_v41, %v6375_v34  ;;  %v2350_v53 = vadd.f32 %v2349_v49, %v6375_v34  ;;  %v3716_v50 = vmax.f32 %v1899_v35, 0.0  ;;  %v3718_v47 = vmax.f32 %v2348_v51, 0.0  ;;  %v6399_v63 = vpop.permute.xlu0 %1480 }
 0x2d5   : > { %v1904_v17 = vpop.f32.mrf.mxu0  ;;  %v2353_v11 = vpop.f32.mrf.mxu1  ;;  %2705 = vmatmul.mubr.f32.gmra.mxu0 %v4687_v46  ;;  %3154 = vmatmul.mubr.f32.gmra.mxu1 %v4687_v46  ;;  %7321 = vst [vmem:[#allocation20_spill] sm:$0xff] %v6399_v63 }
 0x2d6   : > { %2710 = vmatprep.mubr.f32.mxu0 %v7306_v22  ;;  %3159 = vmatprep.mubr.f32.mxu1 %v7306_v22  ;;  %v3717_v39 = vmax.f32 %v1901_v37, 0.0  ;;  %v3719_v38 = vmax.f32 %v2350_v53, 0.0  ;;  %4228 = vst [vmem:[%s5850_s13 + $0xb00] sm:$0xff] %v3716_v50  ;;  %4230 = vst [vmem:[%s5850_s13 + $0xb10] sm:$0xff] %v3718_v47  ;;  %v1905_v14 = vadd.f32 %v1904_v17, %v6387_v52  ;;  %v4688_v47 = vld [vmem:[#allocation2 + $0xf0] sm:$0xff] }
 0x2d7   : > { %v2354_v32 = vadd.f32 %v2353_v11, %v6387_v52  ;;  %v1906_v1 = vpop.f32.mrf.mxu0  ;;  %v2355_v35 = vpop.f32.mrf.mxu1 }
 0x2d8   : > { %4229 = vst [vmem:[%s5850_s13 + $0xb08] sm:$0xff] %v3717_v39  ;;  %4231 = vst [vmem:[%s5850_s13 + $0xb18] sm:$0xff] %v3719_v38  ;;  %v1907_v51 = vadd.f32 %v1906_v1, %v6387_v52  ;;  %v2356_v41 = vadd.f32 %v2355_v35, %v6387_v52  ;;  %v3724_v49 = vmax.f32 %v1905_v14, 0.0  ;;  %v6411_v38 = vpop.permute.xlu1 %1485 }
 0x2d9   : > { %v3726_v37 = vmax.f32 %v2354_v32, 0.0  ;;  %v1910_v53 = vpop.f32.mrf.mxu0  ;;  %v2359_v50 = vpop.f32.mrf.mxu1  ;;  %2711 = vmatmul.mubr.f32.gmra.mxu0 %v4688_v47  ;;  %3160 = vmatmul.mubr.f32.gmra.mxu1 %v4688_v47  ;;  %7322 = vst [vmem:[#allocation18_spill] sm:$0xff] %v6411_v38 }
 0x2da   : > { %2716 = vmatprep.mubr.f32.mxu0 %v7306_v22  ;;  %3165 = vmatprep.mubr.f32.mxu1 %v7306_v22  ;;  %v3725_v17 = vmax.f32 %v1907_v51, 0.0  ;;  %v3727_v11 = vmax.f32 %v2356_v41, 0.0  ;;  %4236 = vst [vmem:[%s5850_s13 + $0xb40] sm:$0xff] %v3724_v49  ;;  %v1911_v46 = vadd.f32 %v1910_v53, %v6399_v63  ;;  %v2360_v39 = vadd.f32 %v2359_v50, %v6399_v63  ;;  %v4689_v53 = vld [vmem:[#allocation2 + $0xf8] sm:$0xff] }
 0x2db   : > { %4238 = vst [vmem:[%s5850_s13 + $0xb50] sm:$0xff] %v3726_v37  ;;  %v1912_v14 = vpop.f32.mrf.mxu0  ;;  %v2361_v32 = vpop.f32.mrf.mxu1 }
 0x2dc   : > { %4237 = vst [vmem:[%s5850_s13 + $0xb48] sm:$0xff] %v3725_v17  ;;  %4239 = vst [vmem:[%s5850_s13 + $0xb58] sm:$0xff] %v3727_v11  ;;  %v1913_v1 = vadd.f32 %v1912_v14, %v6399_v63  ;;  %v2362_v35 = vadd.f32 %v2361_v32, %v6399_v63  ;;  %v3732_v51 = vmax.f32 %v1911_v46, 0.0  ;;  %v3734_v41 = vmax.f32 %v2360_v39, 0.0  ;;  %v6423_v46 = vpop.permute.xlu0 %1490 }
 0x2dd   : > { %v1916_v49 = vpop.f32.mrf.mxu0  ;;  %v2365_v37 = vpop.f32.mrf.mxu1  ;;  %2717 = vmatmul.mubr.f32.gmra.mxu0 %v4689_v53  ;;  %3166 = vmatmul.mubr.f32.gmra.mxu1 %v4689_v53  ;;  %7323 = vst [vmem:[#allocation19_spill] sm:$0xff] %v6423_v46 }
 0x2de   : > { %2722 = vmatprep.mubr.f32.mxu0 %v7306_v22  ;;  %3171 = vmatprep.mubr.f32.mxu1 %v7306_v22  ;;  %v3733_v50 = vmax.f32 %v1913_v1, 0.0  ;;  %v3735_v47 = vmax.f32 %v2362_v35, 0.0  ;;  %4244 = vst [vmem:[%s5850_s13 + $0xb80] sm:$0xff] %v3732_v51  ;;  %4246 = vst [vmem:[%s5850_s13 + $0xb90] sm:$0xff] %v3734_v41  ;;  %v1917_v17 = vadd.f32 %v1916_v49, %v6411_v38  ;;  %v4690_v49 = vld [vmem:[#allocation2 + $0x100] sm:$0xff] }
 0x2df   : > { %v2366_v11 = vadd.f32 %v2365_v37, %v6411_v38  ;;  %v1918_v39 = vpop.f32.mrf.mxu0  ;;  %v2367_v14 = vpop.f32.mrf.mxu1 }
 0x2e0   : > { %4245 = vst [vmem:[%s5850_s13 + $0xb88] sm:$0xff] %v3733_v50  ;;  %4247 = vst [vmem:[%s5850_s13 + $0xb98] sm:$0xff] %v3735_v47  ;;  %v1919_v32 = vadd.f32 %v1918_v39, %v6411_v38  ;;  %v2368_v53 = vadd.f32 %v2367_v14, %v6411_v38  ;;  %v3740_v1 = vmax.f32 %v1917_v17, 0.0 }
 0x2e1   : > { %v3742_v35 = vmax.f32 %v2366_v11, 0.0  ;;  %v1922_v51 = vpop.f32.mrf.mxu0  ;;  %v2371_v41 = vpop.f32.mrf.mxu1  ;;  %2723 = vmatmul.mubr.f32.gmra.mxu0 %v4690_v49  ;;  %3172 = vmatmul.mubr.f32.gmra.mxu1 %v4690_v49 }
 0x2e2   : > { %2728 = vmatprep.mubr.f32.mxu0 %v7306_v22  ;;  %3177 = vmatprep.mubr.f32.mxu1 %v7306_v22  ;;  %v3741_v37 = vmax.f32 %v1919_v32, 0.0  ;;  %v3743_v50 = vmax.f32 %v2368_v53, 0.0  ;;  %4252 = vst [vmem:[%s5850_s13 + $0xbc0] sm:$0xff] %v3740_v1  ;;  %v1923_v47 = vadd.f32 %v1922_v51, %v6423_v46  ;;  %v2372_v17 = vadd.f32 %v2371_v41, %v6423_v46  ;;  %v6435_v11 = vpop.permute.xlu1 %1495  ;;  %v4691_v51 = vld [vmem:[#allocation2 + $0x108] sm:$0xff] }
 0x2e3   : > { %4254 = vst [vmem:[%s5850_s13 + $0xbd0] sm:$0xff] %v3742_v35  ;;  %7324 = vst [vmem:[#allocation16_spill] sm:$0xff] %v6435_v11  ;;  %v1924_v39 = vpop.f32.mrf.mxu0  ;;  %v2373_v14 = vpop.f32.mrf.mxu1 }
 0x2e4   : > { %4253 = vst [vmem:[%s5850_s13 + $0xbc8] sm:$0xff] %v3741_v37  ;;  %4255 = vst [vmem:[%s5850_s13 + $0xbd8] sm:$0xff] %v3743_v50  ;;  %v1925_v49 = vadd.f32 %v1924_v39, %v6423_v46  ;;  %v2374_v38 = vadd.f32 %v2373_v14, %v6423_v46  ;;  %v3748_v32 = vmax.f32 %v1923_v47, 0.0  ;;  %v3750_v53 = vmax.f32 %v2372_v17, 0.0  ;;  %v6447_v17 = vpop.permute.xlu0 %1500 }
 0x2e5   : > { %v1928_v1 = vpop.f32.mrf.mxu0  ;;  %v2377_v35 = vpop.f32.mrf.mxu1  ;;  %2729 = vmatmul.mubr.f32.gmra.mxu0 %v4691_v51  ;;  %3178 = vmatmul.mubr.f32.gmra.mxu1 %v4691_v51  ;;  %7325 = vst [vmem:[#allocation17_spill] sm:$0xff] %v6447_v17 }
 0x2e6   : > { %2734 = vmatprep.mubr.f32.mxu0 %v7306_v22  ;;  %3183 = vmatprep.mubr.f32.mxu1 %v7306_v22  ;;  %v3749_v41 = vmax.f32 %v1925_v49, 0.0  ;;  %v3751_v37 = vmax.f32 %v2374_v38, 0.0  ;;  %4260 = vst [vmem:[%s5850_s13 + $0xc00] sm:$0xff] %v3748_v32  ;;  %4262 = vst [vmem:[%s5850_s13 + $0xc10] sm:$0xff] %v3750_v53  ;;  %v1929_v50 = vadd.f32 %v1928_v1, %v6435_v11  ;;  %v4692_v1 = vld [vmem:[#allocation2 + $0x110] sm:$0xff] }
 0x2e7   : > { %v2378_v47 = vadd.f32 %v2377_v35, %v6435_v11  ;;  %v1930_v39 = vpop.f32.mrf.mxu0  ;;  %v2379_v14 = vpop.f32.mrf.mxu1 }
 0x2e8   : > { %4261 = vst [vmem:[%s5850_s13 + $0xc08] sm:$0xff] %v3749_v41  ;;  %4263 = vst [vmem:[%s5850_s13 + $0xc18] sm:$0xff] %v3751_v37  ;;  %v1931_v51 = vadd.f32 %v1930_v39, %v6435_v11  ;;  %v2380_v46 = vadd.f32 %v2379_v14, %v6435_v11  ;;  %v3756_v49 = vmax.f32 %v1929_v50, 0.0 }
 0x2e9   : > { %v3758_v38 = vmax.f32 %v2378_v47, 0.0  ;;  %v1934_v32 = vpop.f32.mrf.mxu0  ;;  %v2383_v53 = vpop.f32.mrf.mxu1  ;;  %2735 = vmatmul.mubr.f32.gmra.mxu0 %v4692_v1  ;;  %3184 = vmatmul.mubr.f32.gmra.mxu1 %v4692_v1 }
 0x2ea   : > { %2740 = vmatprep.mubr.f32.mxu0 %v7306_v22  ;;  %3189 = vmatprep.mubr.f32.mxu1 %v7306_v22  ;;  %v3757_v35 = vmax.f32 %v1931_v51, 0.0  ;;  %v3759_v41 = vmax.f32 %v2380_v46, 0.0  ;;  %4268 = vst [vmem:[%s5850_s13 + $0xc40] sm:$0xff] %v3756_v49  ;;  %v1935_v37 = vadd.f32 %v1934_v32, %v6447_v17  ;;  %v2384_v50 = vadd.f32 %v2383_v53, %v6447_v17  ;;  %v6459_v47 = vpop.permute.xlu1 %1505  ;;  %v4693_v32 = vld [vmem:[#allocation2 + $0x118] sm:$0xff] }
 0x2eb   : > { %4270 = vst [vmem:[%s5850_s13 + $0xc50] sm:$0xff] %v3758_v38  ;;  %7326 = vst [vmem:[#allocation14_spill] sm:$0xff] %v6459_v47  ;;  %v1936_v39 = vpop.f32.mrf.mxu0  ;;  %v2385_v14 = vpop.f32.mrf.mxu1 }
 0x2ec   : > { %4269 = vst [vmem:[%s5850_s13 + $0xc48] sm:$0xff] %v3757_v35  ;;  %4271 = vst [vmem:[%s5850_s13 + $0xc58] sm:$0xff] %v3759_v41  ;;  %v1937_v1 = vadd.f32 %v1936_v39, %v6447_v17  ;;  %v2386_v11 = vadd.f32 %v2385_v14, %v6447_v17  ;;  %v3764_v51 = vmax.f32 %v1935_v37, 0.0  ;;  %v3766_v46 = vmax.f32 %v2384_v50, 0.0  ;;  %v6471_v50 = vpop.permute.xlu0 %1510 }
 0x2ed   : > { %v1940_v49 = vpop.f32.mrf.mxu0  ;;  %v2389_v38 = vpop.f32.mrf.mxu1  ;;  %2741 = vmatmul.mubr.f32.gmra.mxu0 %v4693_v32  ;;  %3190 = vmatmul.mubr.f32.gmra.mxu1 %v4693_v32  ;;  %7327 = vst [vmem:[#allocation15_spill] sm:$0xff] %v6471_v50 }
 0x2ee   : > { %2746 = vmatprep.mubr.f32.mxu0 %v7306_v22  ;;  %3195 = vmatprep.mubr.f32.mxu1 %v7306_v22  ;;  %v3765_v53 = vmax.f32 %v1937_v1, 0.0  ;;  %v3767_v35 = vmax.f32 %v2386_v11, 0.0  ;;  %4276 = vst [vmem:[%s5850_s13 + $0xc80] sm:$0xff] %v3764_v51  ;;  %4278 = vst [vmem:[%s5850_s13 + $0xc90] sm:$0xff] %v3766_v46  ;;  %v1941_v41 = vadd.f32 %v1940_v49, %v6459_v47  ;;  %v4694_v49 = vld [vmem:[#allocation2 + $0x120] sm:$0xff] }
 0x2ef   : > { %v2390_v37 = vadd.f32 %v2389_v38, %v6459_v47  ;;  %v1942_v39 = vpop.f32.mrf.mxu0  ;;  %v2391_v14 = vpop.f32.mrf.mxu1 }
 0x2f0   : > { %4277 = vst [vmem:[%s5850_s13 + $0xc88] sm:$0xff] %v3765_v53  ;;  %4279 = vst [vmem:[%s5850_s13 + $0xc98] sm:$0xff] %v3767_v35  ;;  %v1943_v32 = vadd.f32 %v1942_v39, %v6459_v47  ;;  %v2392_v17 = vadd.f32 %v2391_v14, %v6459_v47  ;;  %v3772_v1 = vmax.f32 %v1941_v41, 0.0 }
 0x2f1   : > { %v3774_v11 = vmax.f32 %v2390_v37, 0.0  ;;  %v1946_v51 = vpop.f32.mrf.mxu0  ;;  %v2395_v46 = vpop.f32.mrf.mxu1  ;;  %2747 = vmatmul.mubr.f32.gmra.mxu0 %v4694_v49  ;;  %3196 = vmatmul.mubr.f32.gmra.mxu1 %v4694_v49 }
 0x2f2   : > { %2752 = vmatprep.mubr.f32.mxu0 %v7306_v22  ;;  %3201 = vmatprep.mubr.f32.mxu1 %v7306_v22  ;;  %v3773_v38 = vmax.f32 %v1943_v32, 0.0  ;;  %v3775_v53 = vmax.f32 %v2392_v17, 0.0  ;;  %4284 = vst [vmem:[%s5850_s13 + $0xcc0] sm:$0xff] %v3772_v1  ;;  %v1947_v35 = vadd.f32 %v1946_v51, %v6471_v50  ;;  %v2396_v41 = vadd.f32 %v2395_v46, %v6471_v50  ;;  %v6483_v37 = vpop.permute.xlu1 %1515  ;;  %v4695_v51 = vld [vmem:[#allocation2 + $0x128] sm:$0xff] }
 0x2f3   : > { %4286 = vst [vmem:[%s5850_s13 + $0xcd0] sm:$0xff] %v3774_v11  ;;  %7328 = vst [vmem:[#allocation12_spill] sm:$0xff] %v6483_v37  ;;  %v1948_v39 = vpop.f32.mrf.mxu0  ;;  %v2397_v14 = vpop.f32.mrf.mxu1 }
 0x2f4   : > { %4285 = vst [vmem:[%s5850_s13 + $0xcc8] sm:$0xff] %v3773_v38  ;;  %4287 = vst [vmem:[%s5850_s13 + $0xcd8] sm:$0xff] %v3775_v53  ;;  %v1949_v49 = vadd.f32 %v1948_v39, %v6471_v50  ;;  %v2398_v47 = vadd.f32 %v2397_v14, %v6471_v50  ;;  %v3780_v32 = vmax.f32 %v1947_v35, 0.0  ;;  %v3782_v17 = vmax.f32 %v2396_v41, 0.0  ;;  %v6495_v41 = vpop.permute.xlu0 %1520 }
 0x2f5   : > { %v1952_v1 = vpop.f32.mrf.mxu0  ;;  %v2401_v11 = vpop.f32.mrf.mxu1  ;;  %2753 = vmatmul.mubr.f32.gmra.mxu0 %v4695_v51  ;;  %3202 = vmatmul.mubr.f32.gmra.mxu1 %v4695_v51  ;;  %7329 = vst [vmem:[#allocation13_spill] sm:$0xff] %v6495_v41 }
 0x2f6   : > { %2758 = vmatprep.mubr.f32.mxu0 %v7306_v22  ;;  %3207 = vmatprep.mubr.f32.mxu1 %v7306_v22  ;;  %v3781_v46 = vmax.f32 %v1949_v49, 0.0  ;;  %v3783_v38 = vmax.f32 %v2398_v47, 0.0  ;;  %4292 = vst [vmem:[%s5850_s13 + $0xd00] sm:$0xff] %v3780_v32  ;;  %4294 = vst [vmem:[%s5850_s13 + $0xd10] sm:$0xff] %v3782_v17  ;;  %v1953_v53 = vadd.f32 %v1952_v1, %v6483_v37  ;;  %v4696_v1 = vld [vmem:[#allocation2 + $0x130] sm:$0xff] }
 0x2f7   : > { %v2402_v35 = vadd.f32 %v2401_v11, %v6483_v37  ;;  %v1954_v39 = vpop.f32.mrf.mxu0  ;;  %v2403_v14 = vpop.f32.mrf.mxu1 }
 0x2f8   : > { %4293 = vst [vmem:[%s5850_s13 + $0xd08] sm:$0xff] %v3781_v46  ;;  %4295 = vst [vmem:[%s5850_s13 + $0xd18] sm:$0xff] %v3783_v38  ;;  %v1955_v51 = vadd.f32 %v1954_v39, %v6483_v37  ;;  %v2404_v50 = vadd.f32 %v2403_v14, %v6483_v37  ;;  %v3788_v49 = vmax.f32 %v1953_v53, 0.0 }
 0x2f9   : > { %v3790_v47 = vmax.f32 %v2402_v35, 0.0  ;;  %v1958_v32 = vpop.f32.mrf.mxu0  ;;  %v2407_v17 = vpop.f32.mrf.mxu1  ;;  %2759 = vmatmul.mubr.f32.gmra.mxu0 %v4696_v1  ;;  %3208 = vmatmul.mubr.f32.gmra.mxu1 %v4696_v1 }
 0x2fa   : > { %2764 = vmatprep.mubr.f32.mxu0 %v7306_v22  ;;  %3213 = vmatprep.mubr.f32.mxu1 %v7306_v22  ;;  %v3789_v11 = vmax.f32 %v1955_v51, 0.0  ;;  %v3791_v46 = vmax.f32 %v2404_v50, 0.0  ;;  %4300 = vst [vmem:[%s5850_s13 + $0xd40] sm:$0xff] %v3788_v49  ;;  %v1959_v38 = vadd.f32 %v1958_v32, %v6495_v41  ;;  %v2408_v53 = vadd.f32 %v2407_v17, %v6495_v41  ;;  %v6507_v35 = vpop.permute.xlu1 %1525  ;;  %v4697_v32 = vld [vmem:[#allocation2 + $0x138] sm:$0xff] }
 0x2fb   : > { %4302 = vst [vmem:[%s5850_s13 + $0xd50] sm:$0xff] %v3790_v47  ;;  %7330 = vst [vmem:[#allocation10_spill] sm:$0xff] %v6507_v35  ;;  %v1960_v39 = vpop.f32.mrf.mxu0  ;;  %v2409_v14 = vpop.f32.mrf.mxu1 }
 0x2fc   : > { %4301 = vst [vmem:[%s5850_s13 + $0xd48] sm:$0xff] %v3789_v11  ;;  %4303 = vst [vmem:[%s5850_s13 + $0xd58] sm:$0xff] %v3791_v46  ;;  %v1961_v1 = vadd.f32 %v1960_v39, %v6495_v41  ;;  %v2410_v37 = vadd.f32 %v2409_v14, %v6495_v41  ;;  %v3796_v51 = vmax.f32 %v1959_v38, 0.0  ;;  %v3798_v50 = vmax.f32 %v2408_v53, 0.0  ;;  %v6519_v53 = vpop.permute.xlu0 %1530 }
 0x2fd   : > { %v1964_v49 = vpop.f32.mrf.mxu0  ;;  %v2413_v47 = vpop.f32.mrf.mxu1  ;;  %2765 = vmatmul.mubr.f32.gmra.mxu0 %v4697_v32  ;;  %3214 = vmatmul.mubr.f32.gmra.mxu1 %v4697_v32  ;;  %7331 = vst [vmem:[#allocation11_spill] sm:$0xff] %v6519_v53 }
 0x2fe   : > { %2770 = vmatprep.mubr.f32.mxu0 %v7306_v22  ;;  %3219 = vmatprep.mubr.f32.mxu1 %v7306_v22  ;;  %v3797_v17 = vmax.f32 %v1961_v1, 0.0  ;;  %v3799_v11 = vmax.f32 %v2410_v37, 0.0  ;;  %4308 = vst [vmem:[%s5850_s13 + $0xd80] sm:$0xff] %v3796_v51  ;;  %4310 = vst [vmem:[%s5850_s13 + $0xd90] sm:$0xff] %v3798_v50  ;;  %v1965_v46 = vadd.f32 %v1964_v49, %v6507_v35  ;;  %v4698_v49 = vld [vmem:[#allocation2 + $0x140] sm:$0xff] }
 0x2ff   : > { %v2414_v38 = vadd.f32 %v2413_v47, %v6507_v35  ;;  %v1966_v39 = vpop.f32.mrf.mxu0  ;;  %v2415_v14 = vpop.f32.mrf.mxu1 }
 0x300   : > { %4309 = vst [vmem:[%s5850_s13 + $0xd88] sm:$0xff] %v3797_v17  ;;  %4311 = vst [vmem:[%s5850_s13 + $0xd98] sm:$0xff] %v3799_v11  ;;  %v1967_v32 = vadd.f32 %v1966_v39, %v6507_v35  ;;  %v2416_v41 = vadd.f32 %v2415_v14, %v6507_v35  ;;  %v3804_v1 = vmax.f32 %v1965_v46, 0.0 }
 0x301   : > { %v3806_v37 = vmax.f32 %v2414_v38, 0.0  ;;  %v1970_v51 = vpop.f32.mrf.mxu0  ;;  %v2419_v50 = vpop.f32.mrf.mxu1  ;;  %2771 = vmatmul.mubr.f32.gmra.mxu0 %v4698_v49  ;;  %3220 = vmatmul.mubr.f32.gmra.mxu1 %v4698_v49 }
 0x302   : > { %2776 = vmatprep.mubr.f32.mxu0 %v7306_v22  ;;  %3225 = vmatprep.mubr.f32.mxu1 %v7306_v22  ;;  %v3805_v47 = vmax.f32 %v1967_v32, 0.0  ;;  %v3807_v17 = vmax.f32 %v2416_v41, 0.0  ;;  %4316 = vst [vmem:[%s5850_s13 + $0xdc0] sm:$0xff] %v3804_v1  ;;  %v1971_v11 = vadd.f32 %v1970_v51, %v6519_v53  ;;  %v2420_v46 = vadd.f32 %v2419_v50, %v6519_v53  ;;  %v6531_v38 = vpop.permute.xlu1 %1535  ;;  %v4699_v51 = vld [vmem:[#allocation2 + $0x148] sm:$0xff] }
 0x303   : > { %4318 = vst [vmem:[%s5850_s13 + $0xdd0] sm:$0xff] %v3806_v37  ;;  %7332 = vst [vmem:[#allocation8_spill] sm:$0xff] %v6531_v38  ;;  %v1972_v39 = vpop.f32.mrf.mxu0  ;;  %v2421_v14 = vpop.f32.mrf.mxu1 }
 0x304   : > { %4317 = vst [vmem:[%s5850_s13 + $0xdc8] sm:$0xff] %v3805_v47  ;;  %4319 = vst [vmem:[%s5850_s13 + $0xdd8] sm:$0xff] %v3807_v17  ;;  %v1973_v49 = vadd.f32 %v1972_v39, %v6519_v53  ;;  %v2422_v35 = vadd.f32 %v2421_v14, %v6519_v53  ;;  %v3812_v32 = vmax.f32 %v1971_v11, 0.0  ;;  %v3814_v41 = vmax.f32 %v2420_v46, 0.0  ;;  %v6543_v46 = vpop.permute.xlu0 %1540 }
 0x305   : > { %v1976_v1 = vpop.f32.mrf.mxu0  ;;  %v2425_v37 = vpop.f32.mrf.mxu1  ;;  %2777 = vmatmul.mubr.f32.gmra.mxu0 %v4699_v51  ;;  %3226 = vmatmul.mubr.f32.gmra.mxu1 %v4699_v51  ;;  %7333 = vst [vmem:[#allocation9_spill] sm:$0xff] %v6543_v46 }
 0x306   : > { %2782 = vmatprep.mubr.f32.mxu0 %v7306_v22  ;;  %3231 = vmatprep.mubr.f32.mxu1 %v7306_v22  ;;  %v3813_v50 = vmax.f32 %v1973_v49, 0.0  ;;  %v3815_v47 = vmax.f32 %v2422_v35, 0.0  ;;  %4324 = vst [vmem:[%s5850_s13 + $0xe00] sm:$0xff] %v3812_v32  ;;  %4326 = vst [vmem:[%s5850_s13 + $0xe10] sm:$0xff] %v3814_v41  ;;  %v1977_v17 = vadd.f32 %v1976_v1, %v6531_v38  ;;  %v4700_v1 = vld [vmem:[#allocation2 + $0x150] sm:$0xff] }
 0x307   : > { %v2426_v11 = vadd.f32 %v2425_v37, %v6531_v38  ;;  %v1978_v39 = vpop.f32.mrf.mxu0  ;;  %v2427_v14 = vpop.f32.mrf.mxu1 }
 0x308   : > { %4325 = vst [vmem:[%s5850_s13 + $0xe08] sm:$0xff] %v3813_v50  ;;  %4327 = vst [vmem:[%s5850_s13 + $0xe18] sm:$0xff] %v3815_v47  ;;  %v1979_v51 = vadd.f32 %v1978_v39, %v6531_v38  ;;  %v2428_v53 = vadd.f32 %v2427_v14, %v6531_v38  ;;  %v3820_v49 = vmax.f32 %v1977_v17, 0.0 }
 0x309   : > { %v3822_v35 = vmax.f32 %v2426_v11, 0.0  ;;  %v1982_v32 = vpop.f32.mrf.mxu0  ;;  %v2431_v41 = vpop.f32.mrf.mxu1  ;;  %2783 = vmatmul.mubr.f32.gmra.mxu0 %v4700_v1  ;;  %3232 = vmatmul.mubr.f32.gmra.mxu1 %v4700_v1 }
 0x30a   : > { %2788 = vmatprep.mubr.f32.mxu0 %v7306_v22  ;;  %3237 = vmatprep.mubr.f32.mxu1 %v7306_v22  ;;  %v3821_v37 = vmax.f32 %v1979_v51, 0.0  ;;  %v3823_v50 = vmax.f32 %v2428_v53, 0.0  ;;  %4332 = vst [vmem:[%s5850_s13 + $0xe40] sm:$0xff] %v3820_v49  ;;  %v1983_v47 = vadd.f32 %v1982_v32, %v6543_v46  ;;  %v2432_v17 = vadd.f32 %v2431_v41, %v6543_v46  ;;  %v6555_v11 = vpop.permute.xlu1 %1545  ;;  %v4701_v32 = vld [vmem:[#allocation2 + $0x158] sm:$0xff] }
 0x30b   : > { %4334 = vst [vmem:[%s5850_s13 + $0xe50] sm:$0xff] %v3822_v35  ;;  %7334 = vst [vmem:[#allocation33_spill] sm:$0xff] %v6555_v11  ;;  %v1984_v39 = vpop.f32.mrf.mxu0  ;;  %v2433_v14 = vpop.f32.mrf.mxu1 }
 0x30c   : > { %4333 = vst [vmem:[%s5850_s13 + $0xe48] sm:$0xff] %v3821_v37  ;;  %4335 = vst [vmem:[%s5850_s13 + $0xe58] sm:$0xff] %v3823_v50  ;;  %v1985_v1 = vadd.f32 %v1984_v39, %v6543_v46  ;;  %v2434_v38 = vadd.f32 %v2433_v14, %v6543_v46  ;;  %v3828_v51 = vmax.f32 %v1983_v47, 0.0  ;;  %v3830_v53 = vmax.f32 %v2432_v17, 0.0  ;;  %v6567_v17 = vpop.permute.xlu0 %1550 }
 0x30d   : > { %v1988_v49 = vpop.f32.mrf.mxu0  ;;  %v2437_v35 = vpop.f32.mrf.mxu1  ;;  %2789 = vmatmul.mubr.f32.gmra.mxu0 %v4701_v32  ;;  %3238 = vmatmul.mubr.f32.gmra.mxu1 %v4701_v32  ;;  %7335 = vst [vmem:[#allocation34_spill] sm:$0xff] %v6567_v17 }
 0x30e   : > { %2794 = vmatprep.mubr.f32.mxu0 %v7306_v22  ;;  %3243 = vmatprep.mubr.f32.mxu1 %v7306_v22  ;;  %v3829_v41 = vmax.f32 %v1985_v1, 0.0  ;;  %v3831_v37 = vmax.f32 %v2434_v38, 0.0  ;;  %4340 = vst [vmem:[%s5850_s13 + $0xe80] sm:$0xff] %v3828_v51  ;;  %4342 = vst [vmem:[%s5850_s13 + $0xe90] sm:$0xff] %v3830_v53  ;;  %v1989_v50 = vadd.f32 %v1988_v49, %v6555_v11  ;;  %v4702_v49 = vld [vmem:[#allocation2 + $0x160] sm:$0xff] }
 0x30f   : > { %v2438_v47 = vadd.f32 %v2437_v35, %v6555_v11  ;;  %v1990_v39 = vpop.f32.mrf.mxu0  ;;  %v2439_v14 = vpop.f32.mrf.mxu1 }
 0x310   : > { %4341 = vst [vmem:[%s5850_s13 + $0xe88] sm:$0xff] %v3829_v41  ;;  %4343 = vst [vmem:[%s5850_s13 + $0xe98] sm:$0xff] %v3831_v37  ;;  %v1991_v32 = vadd.f32 %v1990_v39, %v6555_v11  ;;  %v2440_v46 = vadd.f32 %v2439_v14, %v6555_v11  ;;  %v3836_v1 = vmax.f32 %v1989_v50, 0.0 }
 0x311   : > { %v3838_v38 = vmax.f32 %v2438_v47, 0.0  ;;  %v1994_v51 = vpop.f32.mrf.mxu0  ;;  %v2443_v53 = vpop.f32.mrf.mxu1  ;;  %2795 = vmatmul.mubr.f32.gmra.mxu0 %v4702_v49  ;;  %3244 = vmatmul.mubr.f32.gmra.mxu1 %v4702_v49 }
 0x312   : > { %2800 = vmatprep.mubr.f32.mxu0 %v7306_v22  ;;  %3249 = vmatprep.mubr.f32.mxu1 %v7306_v22  ;;  %v3837_v35 = vmax.f32 %v1991_v32, 0.0  ;;  %v3839_v41 = vmax.f32 %v2440_v46, 0.0  ;;  %4348 = vst [vmem:[%s5850_s13 + $0xec0] sm:$0xff] %v3836_v1  ;;  %v1995_v37 = vadd.f32 %v1994_v51, %v6567_v17  ;;  %v2444_v50 = vadd.f32 %v2443_v53, %v6567_v17  ;;  %v6579_v47 = vpop.permute.xlu1 %1555  ;;  %v4703_v51 = vld [vmem:[#allocation2 + $0x168] sm:$0xff] }
 0x313   : > { %4350 = vst [vmem:[%s5850_s13 + $0xed0] sm:$0xff] %v3838_v38  ;;  %7336 = vst [vmem:[#allocation31_spill] sm:$0xff] %v6579_v47  ;;  %v1996_v39 = vpop.f32.mrf.mxu0  ;;  %v2445_v14 = vpop.f32.mrf.mxu1 }
 0x314   : > { %4349 = vst [vmem:[%s5850_s13 + $0xec8] sm:$0xff] %v3837_v35  ;;  %4351 = vst [vmem:[%s5850_s13 + $0xed8] sm:$0xff] %v3839_v41  ;;  %v1997_v49 = vadd.f32 %v1996_v39, %v6567_v17  ;;  %v2446_v11 = vadd.f32 %v2445_v14, %v6567_v17  ;;  %v3844_v32 = vmax.f32 %v1995_v37, 0.0  ;;  %v3846_v46 = vmax.f32 %v2444_v50, 0.0  ;;  %v6591_v50 = vpop.permute.xlu0 %1560 }
 0x315   : > { %v2000_v1 = vpop.f32.mrf.mxu0  ;;  %v2449_v38 = vpop.f32.mrf.mxu1  ;;  %2801 = vmatmul.mubr.f32.gmra.mxu0 %v4703_v51  ;;  %3250 = vmatmul.mubr.f32.gmra.mxu1 %v4703_v51  ;;  %7337 = vst [vmem:[#allocation32_spill] sm:$0xff] %v6591_v50 }
 0x316   : > { %2806 = vmatprep.mubr.f32.mxu0 %v7306_v22  ;;  %3255 = vmatprep.mubr.f32.mxu1 %v7306_v22  ;;  %v3845_v53 = vmax.f32 %v1997_v49, 0.0  ;;  %v3847_v35 = vmax.f32 %v2446_v11, 0.0  ;;  %4356 = vst [vmem:[%s5850_s13 + $0xf00] sm:$0xff] %v3844_v32  ;;  %4358 = vst [vmem:[%s5850_s13 + $0xf10] sm:$0xff] %v3846_v46  ;;  %v2001_v41 = vadd.f32 %v2000_v1, %v6579_v47  ;;  %v4704_v1 = vld [vmem:[#allocation2 + $0x170] sm:$0xff] }
 0x317   : > { %v2450_v37 = vadd.f32 %v2449_v38, %v6579_v47  ;;  %v2002_v39 = vpop.f32.mrf.mxu0  ;;  %v2451_v14 = vpop.f32.mrf.mxu1 }
 0x318   : > { %4357 = vst [vmem:[%s5850_s13 + $0xf08] sm:$0xff] %v3845_v53  ;;  %4359 = vst [vmem:[%s5850_s13 + $0xf18] sm:$0xff] %v3847_v35  ;;  %v2003_v51 = vadd.f32 %v2002_v39, %v6579_v47  ;;  %v2452_v17 = vadd.f32 %v2451_v14, %v6579_v47  ;;  %v3852_v49 = vmax.f32 %v2001_v41, 0.0 }
 0x319   : > { %v3854_v11 = vmax.f32 %v2450_v37, 0.0  ;;  %v2006_v32 = vpop.f32.mrf.mxu0  ;;  %v2455_v46 = vpop.f32.mrf.mxu1  ;;  %2807 = vmatmul.mubr.f32.gmra.mxu0 %v4704_v1  ;;  %3256 = vmatmul.mubr.f32.gmra.mxu1 %v4704_v1 }
 0x31a   : > { %2812 = vmatprep.mubr.f32.mxu0 %v7306_v22  ;;  %3261 = vmatprep.mubr.f32.mxu1 %v7306_v22  ;;  %v3853_v38 = vmax.f32 %v2003_v51, 0.0  ;;  %v3855_v53 = vmax.f32 %v2452_v17, 0.0  ;;  %4364 = vst [vmem:[%s5850_s13 + $0xf40] sm:$0xff] %v3852_v49  ;;  %v2007_v35 = vadd.f32 %v2006_v32, %v6591_v50  ;;  %v2456_v41 = vadd.f32 %v2455_v46, %v6591_v50  ;;  %v6603_v37 = vpop.permute.xlu1 %1565  ;;  %v4705_v32 = vld [vmem:[#allocation2 + $0x178] sm:$0xff] }
 0x31b   : > { %4366 = vst [vmem:[%s5850_s13 + $0xf50] sm:$0xff] %v3854_v11  ;;  %v2008_v39 = vpop.f32.mrf.mxu0  ;;  %v2457_v14 = vpop.f32.mrf.mxu1 }
 0x31c   : > { %4365 = vst [vmem:[%s5850_s13 + $0xf48] sm:$0xff] %v3853_v38  ;;  %4367 = vst [vmem:[%s5850_s13 + $0xf58] sm:$0xff] %v3855_v53  ;;  %v2009_v1 = vadd.f32 %v2008_v39, %v6591_v50  ;;  %v2458_v47 = vadd.f32 %v2457_v14, %v6591_v50  ;;  %v3860_v51 = vmax.f32 %v2007_v35, 0.0  ;;  %v3862_v17 = vmax.f32 %v2456_v41, 0.0 }
 0x31d   : > { %v2012_v49 = vpop.f32.mrf.mxu0  ;;  %v2461_v11 = vpop.f32.mrf.mxu1  ;;  %2813 = vmatmul.mubr.f32.gmra.mxu0 %v4705_v32  ;;  %3262 = vmatmul.mubr.f32.gmra.mxu1 %v4705_v32 }
 0x31e   : > { %2818 = vmatprep.mubr.f32.mxu0 %v7306_v22  ;;  %3267 = vmatprep.mubr.f32.mxu1 %v7306_v22  ;;  %v3861_v46 = vmax.f32 %v2009_v1, 0.0  ;;  %v3863_v38 = vmax.f32 %v2458_v47, 0.0  ;;  %4372 = vst [vmem:[%s5850_s13 + $0xf80] sm:$0xff] %v3860_v51  ;;  %4374 = vst [vmem:[%s5850_s13 + $0xf90] sm:$0xff] %v3862_v17  ;;  %v2013_v53 = vadd.f32 %v2012_v49, %v6603_v37  ;;  %v4706_v47 = vld [vmem:[#allocation2 + $0x180] sm:$0xff] }
 0x31f   : > { %v2462_v35 = vadd.f32 %v2461_v11, %v6603_v37  ;;  %v2014_v41 = vpop.f32.mrf.mxu0  ;;  %v2463_v39 = vpop.f32.mrf.mxu1 }
 0x320   : > { %4373 = vst [vmem:[%s5850_s13 + $0xf88] sm:$0xff] %v3861_v46  ;;  %4375 = vst [vmem:[%s5850_s13 + $0xf98] sm:$0xff] %v3863_v38  ;;  %v2015_v14 = vadd.f32 %v2014_v41, %v6603_v37  ;;  %v2464_v32 = vadd.f32 %v2463_v39, %v6603_v37  ;;  %v3868_v50 = vmax.f32 %v2013_v53, 0.0 }
 0x321   : > { %v3870_v63 = vmax.f32 %v2462_v35, 0.0  ;;  %v2532_v1 = vpop.f32.mrf.mxu0  ;;  %2819 = vmatmul.mubr.f32.gmra.mxu0 %v4706_v47  ;;  %v2981_v51 = vpop.f32.mrf.mxu1  ;;  %3268 = vmatmul.mubr.f32.gmra.mxu1 %v4706_v47 }
 0x322   : > { %v2533_v17 = vadd.f32 %v2532_v1, %v5822_v7  ;;  %v2982_v49 = vadd.f32 %v2981_v51, %v5822_v7  ;;  %2824 = vmatprep.mubr.f32.mxu0 %v7306_v22  ;;  %3273 = vmatprep.mubr.f32.mxu1 %v7306_v22  ;;  %v3869_v11 = vmax.f32 %v2015_v14, 0.0  ;;  %v3871_v46 = vmax.f32 %v2464_v32, 0.0  ;;  %4380 = vst [vmem:[%s5850_s13 + $0xfc0] sm:$0xff] %v3868_v50  ;;  %v4707_v51 = vld [vmem:[#allocation2 + $0x188] sm:$0xff] }
 0x323   : > { %4382 = vst [vmem:[%s5850_s13 + $0xfd0] sm:$0xff] %v3870_v63  ;;  %v2534_v38 = vpop.f32.mrf.mxu0  ;;  %v2983_v53 = vpop.f32.mrf.mxu1 }
 0x324   : > { %v3368_v35 = vmax.f32 %v2533_v17, 0.0  ;;  %v3370_v41 = vmax.f32 %v2982_v49, 0.0  ;;  %v2535_v39 = vadd.f32 %v2534_v38, %v5822_v7  ;;  %v2984_v1 = vadd.f32 %v2983_v53, %v5822_v7  ;;  %4381 = vst [vmem:[%s5850_s13 + $0xfc8] sm:$0xff] %v3869_v11  ;;  %4383 = vst [vmem:[%s5850_s13 + $0xfd8] sm:$0xff] %v3871_v46 }
 0x325   : > { %v2538_v47 = vpop.f32.mrf.mxu0  ;;  %2825 = vmatmul.mubr.f32.gmra.mxu0 %v4707_v51  ;;  %v2987_v14 = vpop.f32.mrf.mxu1  ;;  %3274 = vmatmul.mubr.f32.gmra.mxu1 %v4707_v51 }
 0x326   : > { %3880 = vst [vmem:[%s5850_s13 + $0x20] sm:$0xff] %v3368_v35  ;;  %3882 = vst [vmem:[%s5850_s13 + $0x30] sm:$0xff] %v3370_v41  ;;  %v3369_v63 = vmax.f32 %v2535_v39, 0.0  ;;  %v3371_v50 = vmax.f32 %v2984_v1, 0.0  ;;  %v2539_v32 = vadd.f32 %v2538_v47, %v5839_v20  ;;  %v2988_v17 = vadd.f32 %v2987_v14, %v5839_v20  ;;  %2830 = vmatprep.mubr.f32.mxu0 %v7306_v22  ;;  %v4708_v41 = vld [vmem:[#allocation2 + $0x190] sm:$0xff] }
 0x327   : > { %3279 = vmatprep.mubr.f32.mxu1 %v7306_v22  ;;  %v2540_v7 = vpop.f32.mrf.mxu0  ;;  %v2989_v49 = vpop.f32.mrf.mxu1 }
 0x328   : > { %3881 = vst [vmem:[%s5850_s13 + $0x28] sm:$0xff] %v3369_v63  ;;  %3883 = vst [vmem:[%s5850_s13 + $0x38] sm:$0xff] %v3371_v50  ;;  %v3376_v11 = vmax.f32 %v2539_v32, 0.0  ;;  %v3378_v46 = vmax.f32 %v2988_v17, 0.0  ;;  %v2541_v38 = vadd.f32 %v2540_v7, %v5839_v20  ;;  %v2990_v53 = vadd.f32 %v2989_v49, %v5839_v20 }
 0x329   : > { %v2544_v35 = vpop.f32.mrf.mxu0  ;;  %2831 = vmatmul.mubr.f32.gmra.mxu0 %v4708_v41  ;;  %v2993_v39 = vpop.f32.mrf.mxu1  ;;  %3280 = vmatmul.mubr.f32.gmra.mxu1 %v4708_v41 }
 0x32a   : > { %3888 = vst [vmem:[%s5850_s13 + $0x60] sm:$0xff] %v3376_v11  ;;  %3890 = vst [vmem:[%s5850_s13 + $0x70] sm:$0xff] %v3378_v46  ;;  %v3377_v1 = vmax.f32 %v2541_v38, 0.0  ;;  %v3379_v47 = vmax.f32 %v2990_v53, 0.0  ;;  %v2545_v51 = vadd.f32 %v2544_v35, %v5843_v60  ;;  %v2994_v14 = vadd.f32 %v2993_v39, %v5843_v60  ;;  %2836 = vmatprep.mubr.f32.mxu0 %v7306_v22  ;;  %v4709_v11 = vld [vmem:[#allocation2 + $0x198] sm:$0xff] }
 0x32b   : > { %3285 = vmatprep.mubr.f32.mxu1 %v7306_v22  ;;  %v2546_v20 = vpop.f32.mrf.mxu0  ;;  %v2995_v63 = vpop.f32.mrf.mxu1 }
 0x32c   : > { %3889 = vst [vmem:[%s5850_s13 + $0x68] sm:$0xff] %v3377_v1  ;;  %3891 = vst [vmem:[%s5850_s13 + $0x78] sm:$0xff] %v3379_v47  ;;  %v3384_v50 = vmax.f32 %v2545_v51, 0.0  ;;  %v3386_v32 = vmax.f32 %v2994_v14, 0.0  ;;  %v2547_v17 = vadd.f32 %v2546_v20, %v5843_v60  ;;  %v2996_v7 = vadd.f32 %v2995_v63, %v5843_v60  ;;  %v4710_v63 = vld [vmem:[#allocation2 + $0x1a0] sm:$0xff] }
 0x32d   : > { %v2550_v49 = vpop.f32.mrf.mxu0  ;;  %2837 = vmatmul.mubr.f32.gmra.mxu0 %v4709_v11  ;;  %v2999_v46 = vpop.f32.mrf.mxu1  ;;  %3286 = vmatmul.mubr.f32.gmra.mxu1 %v4709_v11 }
 0x32e   : > { %3896 = vst [vmem:[%s5850_s13 + $0xa0] sm:$0xff] %v3384_v50  ;;  %3898 = vst [vmem:[%s5850_s13 + $0xb0] sm:$0xff] %v3386_v32  ;;  %v3385_v38 = vmax.f32 %v2547_v17, 0.0  ;;  %v3387_v53 = vmax.f32 %v2996_v7, 0.0  ;;  %v2551_v35 = vadd.f32 %v2550_v49, %v5869_v6  ;;  %v3000_v41 = vadd.f32 %v2999_v46, %v5869_v6  ;;  %2842 = vmatprep.mubr.f32.mxu0 %v7306_v22 }
 0x32f   : > { %3291 = vmatprep.mubr.f32.mxu1 %v7306_v22  ;;  %v2552_v60 = vpop.f32.mrf.mxu0  ;;  %v3001_v39 = vpop.f32.mrf.mxu1 }
 0x330   : > { %3897 = vst [vmem:[%s5850_s13 + $0xa8] sm:$0xff] %v3385_v38  ;;  %3899 = vst [vmem:[%s5850_s13 + $0xb8] sm:$0xff] %v3387_v53  ;;  %v3392_v1 = vmax.f32 %v2551_v35, 0.0  ;;  %v3394_v47 = vmax.f32 %v3000_v41, 0.0  ;;  %v2553_v51 = vadd.f32 %v2552_v60, %v5869_v6  ;;  %v3002_v14 = vadd.f32 %v3001_v39, %v5869_v6  ;;  %v4711_v60 = vld [vmem:[#allocation2 + $0x1a8] sm:$0xff] }
 0x331   : > { %v2556_v20 = vpop.f32.mrf.mxu0  ;;  %2843 = vmatmul.mubr.f32.gmra.mxu0 %v4710_v63  ;;  %v3005_v50 = vpop.f32.mrf.mxu1  ;;  %3292 = vmatmul.mubr.f32.gmra.mxu1 %v4710_v63 }
 0x332   : > { %3904 = vst [vmem:[%s5850_s13 + $0xe0] sm:$0xff] %v3392_v1  ;;  %3906 = vst [vmem:[%s5850_s13 + $0xf0] sm:$0xff] %v3394_v47  ;;  %v3393_v32 = vmax.f32 %v2553_v51, 0.0  ;;  %v3395_v17 = vmax.f32 %v3002_v14, 0.0  ;;  %v2557_v7 = vadd.f32 %v2556_v20, %v5884_v42  ;;  %v3006_v49 = vadd.f32 %v3005_v50, %v5884_v42  ;;  %2848 = vmatprep.mubr.f32.mxu0 %v7306_v22 }
 0x333   : > { %3297 = vmatprep.mubr.f32.mxu1 %v7306_v22  ;;  %v2558_v6 = vpop.f32.mrf.mxu0  ;;  %v3007_v11 = vpop.f32.mrf.mxu1 }
 0x334   : > { %3905 = vst [vmem:[%s5850_s13 + $0xe8] sm:$0xff] %v3393_v32  ;;  %3907 = vst [vmem:[%s5850_s13 + $0xf8] sm:$0xff] %v3395_v17  ;;  %v3400_v46 = vmax.f32 %v2557_v7, 0.0  ;;  %v3402_v38 = vmax.f32 %v3006_v49, 0.0  ;;  %v2559_v53 = vadd.f32 %v2558_v6, %v5884_v42  ;;  %v3008_v35 = vadd.f32 %v3007_v11, %v5884_v42  ;;  %v4712_v49 = vld [vmem:[#allocation2 + $0x1b0] sm:$0xff] }
 0x335   : > { %v2562_v41 = vpop.f32.mrf.mxu0  ;;  %2849 = vmatmul.mubr.f32.gmra.mxu0 %v4711_v60  ;;  %v3011_v39 = vpop.f32.mrf.mxu1  ;;  %3298 = vmatmul.mubr.f32.gmra.mxu1 %v4711_v60 }
 0x336   : > { %3912 = vst [vmem:[%s5850_s13 + $0x120] sm:$0xff] %v3400_v46  ;;  %3914 = vst [vmem:[%s5850_s13 + $0x130] sm:$0xff] %v3402_v38  ;;  %v3401_v1 = vmax.f32 %v2559_v53, 0.0  ;;  %v3403_v47 = vmax.f32 %v3008_v35, 0.0  ;;  %v2563_v51 = vadd.f32 %v2562_v41, %v5899_v48  ;;  %v3012_v14 = vadd.f32 %v3011_v39, %v5899_v48  ;;  %2854 = vmatprep.mubr.f32.mxu0 %v7306_v22 }
 0x337   : > { %3303 = vmatprep.mubr.f32.mxu1 %v7306_v22  ;;  %v2564_v42 = vpop.f32.mrf.mxu0  ;;  %v3013_v20 = vpop.f32.mrf.mxu1 }
 0x338   : > { %3913 = vst [vmem:[%s5850_s13 + $0x128] sm:$0xff] %v3401_v1  ;;  %3915 = vst [vmem:[%s5850_s13 + $0x138] sm:$0xff] %v3403_v47  ;;  %v3408_v63 = vmax.f32 %v2563_v51, 0.0  ;;  %v3410_v50 = vmax.f32 %v3012_v14, 0.0  ;;  %v2565_v32 = vadd.f32 %v2564_v42, %v5899_v48  ;;  %v3014_v17 = vadd.f32 %v3013_v20, %v5899_v48  ;;  %v4713_v51 = vld [vmem:[#allocation2 + $0x1b8] sm:$0xff] }
 0x339   : > { %v2568_v7 = vpop.f32.mrf.mxu0  ;;  %2855 = vmatmul.mubr.f32.gmra.mxu0 %v4712_v49  ;;  %v3017_v6 = vpop.f32.mrf.mxu1  ;;  %3304 = vmatmul.mubr.f32.gmra.mxu1 %v4712_v49 }
 0x33a   : > { %3920 = vst [vmem:[%s5850_s13 + $0x160] sm:$0xff] %v3408_v63  ;;  %3922 = vst [vmem:[%s5850_s13 + $0x170] sm:$0xff] %v3410_v50  ;;  %v3409_v11 = vmax.f32 %v2565_v32, 0.0  ;;  %v3411_v46 = vmax.f32 %v3014_v17, 0.0  ;;  %v2569_v38 = vadd.f32 %v2568_v7, %v5911_v44  ;;  %v3018_v53 = vadd.f32 %v3017_v6, %v5911_v44  ;;  %2860 = vmatprep.mubr.f32.mxu0 %v7306_v22 }
 0x33b   : > { %3309 = vmatprep.mubr.f32.mxu1 %v7306_v22  ;;  %v2570_v48 = vpop.f32.mrf.mxu0  ;;  %v3019_v35 = vpop.f32.mrf.mxu1 }
 0x33c   : > { %3921 = vst [vmem:[%s5850_s13 + $0x168] sm:$0xff] %v3409_v11  ;;  %3923 = vst [vmem:[%s5850_s13 + $0x178] sm:$0xff] %v3411_v46  ;;  %v3416_v41 = vmax.f32 %v2569_v38, 0.0  ;;  %v3418_v60 = vmax.f32 %v3018_v53, 0.0  ;;  %v2571_v39 = vadd.f32 %v2570_v48, %v5911_v44  ;;  %v3020_v1 = vadd.f32 %v3019_v35, %v5911_v44  ;;  %v4714_v46 = vld [vmem:[#allocation2 + $0x1c0] sm:$0xff] }
 0x33d   : > { %v2574_v47 = vpop.f32.mrf.mxu0  ;;  %2861 = vmatmul.mubr.f32.gmra.mxu0 %v4713_v51  ;;  %v3023_v14 = vpop.f32.mrf.mxu1  ;;  %3310 = vmatmul.mubr.f32.gmra.mxu1 %v4713_v51 }
 0x33e   : > { %3928 = vst [vmem:[%s5850_s13 + $0x1a0] sm:$0xff] %v3416_v41  ;;  %3930 = vst [vmem:[%s5850_s13 + $0x1b0] sm:$0xff] %v3418_v60  ;;  %v3417_v42 = vmax.f32 %v2571_v39, 0.0  ;;  %v3419_v20 = vmax.f32 %v3020_v1, 0.0  ;;  %v2575_v63 = vadd.f32 %v2574_v47, %v5923_v3  ;;  %v3024_v50 = vadd.f32 %v3023_v14, %v5923_v3  ;;  %2866 = vmatprep.mubr.f32.mxu0 %v7306_v22 }
 0x33f   : > { %3315 = vmatprep.mubr.f32.mxu1 %v7306_v22  ;;  %v2576_v44 = vpop.f32.mrf.mxu0  ;;  %v3025_v32 = vpop.f32.mrf.mxu1 }
 0x340   : > { %3929 = vst [vmem:[%s5850_s13 + $0x1a8] sm:$0xff] %v3417_v42  ;;  %3931 = vst [vmem:[%s5850_s13 + $0x1b8] sm:$0xff] %v3419_v20  ;;  %v3424_v17 = vmax.f32 %v2575_v63, 0.0  ;;  %v3426_v7 = vmax.f32 %v3024_v50, 0.0  ;;  %v2577_v49 = vadd.f32 %v2576_v44, %v5923_v3  ;;  %v3026_v6 = vadd.f32 %v3025_v32, %v5923_v3  ;;  %v4715_v42 = vld [vmem:[#allocation2 + $0x1c8] sm:$0xff] }
 0x341   : > { %v2580_v11 = vpop.f32.mrf.mxu0  ;;  %2867 = vmatmul.mubr.f32.gmra.mxu0 %v4714_v46  ;;  %v3029_v38 = vpop.f32.mrf.mxu1  ;;  %3316 = vmatmul.mubr.f32.gmra.mxu1 %v4714_v46 }
 0x342   : > { %3936 = vst [vmem:[%s5850_s13 + $0x1e0] sm:$0xff] %v3424_v17  ;;  %3938 = vst [vmem:[%s5850_s13 + $0x1f0] sm:$0xff] %v3426_v7  ;;  %v3425_v53 = vmax.f32 %v2577_v49, 0.0  ;;  %v3427_v48 = vmax.f32 %v3026_v6, 0.0  ;;  %v2581_v35 = vadd.f32 %v2580_v11, %v5935_v31  ;;  %v3030_v41 = vadd.f32 %v3029_v38, %v5935_v31  ;;  %2872 = vmatprep.mubr.f32.mxu0 %v7306_v22  ;;  %v4716_v38 = vld [vmem:[#allocation2 + $0x1d0] sm:$0xff] }
 0x343   : > { %3321 = vmatprep.mubr.f32.mxu1 %v7306_v22  ;;  %v2582_v3 = vpop.f32.mrf.mxu0  ;;  %v3031_v60 = vpop.f32.mrf.mxu1 }
 0x344   : > { %3937 = vst [vmem:[%s5850_s13 + $0x1e8] sm:$0xff] %v3425_v53  ;;  %3939 = vst [vmem:[%s5850_s13 + $0x1f8] sm:$0xff] %v3427_v48  ;;  %v3432_v39 = vmax.f32 %v2581_v35, 0.0  ;;  %v3434_v1 = vmax.f32 %v3030_v41, 0.0  ;;  %v2583_v47 = vadd.f32 %v2582_v3, %v5935_v31  ;;  %v3032_v51 = vadd.f32 %v3031_v60, %v5935_v31 }
 0x345   : > { %v2586_v14 = vpop.f32.mrf.mxu0  ;;  %2873 = vmatmul.mubr.f32.gmra.mxu0 %v4715_v42  ;;  %v3035_v20 = vpop.f32.mrf.mxu1  ;;  %3322 = vmatmul.mubr.f32.gmra.mxu1 %v4715_v42  ;;  %v4717_v42 = vld [vmem:[#allocation2 + $0x1d8] sm:$0xff] }
 0x346   : > { %3944 = vst [vmem:[%s5850_s13 + $0x220] sm:$0xff] %v3432_v39  ;;  %3946 = vst [vmem:[%s5850_s13 + $0x230] sm:$0xff] %v3434_v1  ;;  %v3433_v63 = vmax.f32 %v2583_v47, 0.0  ;;  %v3435_v50 = vmax.f32 %v3032_v51, 0.0  ;;  %v2587_v44 = vadd.f32 %v2586_v14, %v5951_v59  ;;  %v3036_v32 = vadd.f32 %v3035_v20, %v5951_v59  ;;  %2878 = vmatprep.mubr.f32.mxu0 %v7306_v22 }
 0x347   : > { %3327 = vmatprep.mubr.f32.mxu1 %v7306_v22  ;;  %v2588_v31 = vpop.f32.mrf.mxu0  ;;  %v3037_v17 = vpop.f32.mrf.mxu1 }
 0x348   : > { %3945 = vst [vmem:[%s5850_s13 + $0x228] sm:$0xff] %v3433_v63  ;;  %3947 = vst [vmem:[%s5850_s13 + $0x238] sm:$0xff] %v3435_v50  ;;  %v3440_v7 = vmax.f32 %v2587_v44, 0.0  ;;  %v3442_v49 = vmax.f32 %v3036_v32, 0.0  ;;  %v2589_v6 = vadd.f32 %v2588_v31, %v5951_v59  ;;  %v3038_v11 = vadd.f32 %v3037_v17, %v5951_v59 }
 0x349   : > { %v2592_v46 = vpop.f32.mrf.mxu0  ;;  %2879 = vmatmul.mubr.f32.gmra.mxu0 %v4716_v38  ;;  %v3041_v53 = vpop.f32.mrf.mxu1  ;;  %3328 = vmatmul.mubr.f32.gmra.mxu1 %v4716_v38 }
 0x34a   : > { %3952 = vst [vmem:[%s5850_s13 + $0x260] sm:$0xff] %v3440_v7  ;;  %3954 = vst [vmem:[%s5850_s13 + $0x270] sm:$0xff] %v3442_v49  ;;  %v3441_v48 = vmax.f32 %v2589_v6, 0.0  ;;  %v3443_v35 = vmax.f32 %v3038_v11, 0.0  ;;  %v2593_v41 = vadd.f32 %v2592_v46, %v5965_v61  ;;  %v3042_v3 = vadd.f32 %v3041_v53, %v5965_v61  ;;  %2884 = vmatprep.mubr.f32.mxu0 %v7306_v22  ;;  %v4718_v46 = vld [vmem:[#allocation2 + $0x1e0] sm:$0xff] }
 0x34b   : > { %3333 = vmatprep.mubr.f32.mxu1 %v7306_v22  ;;  %v2594_v59 = vpop.f32.mrf.mxu0  ;;  %v3043_v60 = vpop.f32.mrf.mxu1 }
 0x34c   : > { %3953 = vst [vmem:[%s5850_s13 + $0x268] sm:$0xff] %v3441_v48  ;;  %3955 = vst [vmem:[%s5850_s13 + $0x278] sm:$0xff] %v3443_v35  ;;  %v3448_v39 = vmax.f32 %v2593_v41, 0.0  ;;  %v3450_v1 = vmax.f32 %v3042_v3, 0.0  ;;  %v2595_v47 = vadd.f32 %v2594_v59, %v5965_v61  ;;  %v3044_v51 = vadd.f32 %v3043_v60, %v5965_v61 }
 0x34d   : > { %v2598_v14 = vpop.f32.mrf.mxu0  ;;  %2885 = vmatmul.mubr.f32.gmra.mxu0 %v4717_v42  ;;  %v3047_v20 = vpop.f32.mrf.mxu1  ;;  %3334 = vmatmul.mubr.f32.gmra.mxu1 %v4717_v42 }
 0x34e   : > { %3960 = vst [vmem:[%s5850_s13 + $0x2a0] sm:$0xff] %v3448_v39  ;;  %3962 = vst [vmem:[%s5850_s13 + $0x2b0] sm:$0xff] %v3450_v1  ;;  %v3449_v63 = vmax.f32 %v2595_v47, 0.0  ;;  %v3451_v50 = vmax.f32 %v3044_v51, 0.0  ;;  %v2599_v44 = vadd.f32 %v2598_v14, %v5977_v13  ;;  %v3048_v32 = vadd.f32 %v3047_v20, %v5977_v13  ;;  %2890 = vmatprep.mubr.f32.mxu0 %v7306_v22  ;;  %v4719_v51 = vld [vmem:[#allocation2 + $0x1e8] sm:$0xff] }
 0x34f   : > { %3339 = vmatprep.mubr.f32.mxu1 %v7306_v22  ;;  %v2600_v61 = vpop.f32.mrf.mxu0  ;;  %v3049_v31 = vpop.f32.mrf.mxu1 }
 0x350   : > { %3961 = vst [vmem:[%s5850_s13 + $0x2a8] sm:$0xff] %v3449_v63  ;;  %3963 = vst [vmem:[%s5850_s13 + $0x2b8] sm:$0xff] %v3451_v50  ;;  %v3456_v17 = vmax.f32 %v2599_v44, 0.0  ;;  %v3458_v7 = vmax.f32 %v3048_v32, 0.0  ;;  %v2601_v49 = vadd.f32 %v2600_v61, %v5977_v13  ;;  %v3050_v6 = vadd.f32 %v3049_v31, %v5977_v13 }
 0x351   : > { %v2604_v11 = vpop.f32.mrf.mxu0  ;;  %2891 = vmatmul.mubr.f32.gmra.mxu0 %v4718_v46  ;;  %v3053_v38 = vpop.f32.mrf.mxu1  ;;  %3340 = vmatmul.mubr.f32.gmra.mxu1 %v4718_v46 }
 0x352   : > { %3968 = vst [vmem:[%s5850_s13 + $0x2e0] sm:$0xff] %v3456_v17  ;;  %3970 = vst [vmem:[%s5850_s13 + $0x2f0] sm:$0xff] %v3458_v7  ;;  %v3457_v53 = vmax.f32 %v2601_v49, 0.0  ;;  %v3459_v48 = vmax.f32 %v3050_v6, 0.0  ;;  %v2605_v35 = vadd.f32 %v2604_v11, %v5991_v5  ;;  %v3054_v41 = vadd.f32 %v3053_v38, %v5991_v5  ;;  %2896 = vmatprep.mubr.f32.mxu0 %v7306_v22  ;;  %v4720_v49 = vld [vmem:[#allocation2 + $0x1f0] sm:$0xff] }
 0x353   : > { %3345 = vmatprep.mubr.f32.mxu1 %v7306_v22  ;;  %v2606_v13 = vpop.f32.mrf.mxu0  ;;  %v3055_v3 = vpop.f32.mrf.mxu1 }
 0x354   : > { %3969 = vst [vmem:[%s5850_s13 + $0x2e8] sm:$0xff] %v3457_v53  ;;  %3971 = vst [vmem:[%s5850_s13 + $0x2f8] sm:$0xff] %v3459_v48  ;;  %v3464_v59 = vmax.f32 %v2605_v35, 0.0  ;;  %v3466_v60 = vmax.f32 %v3054_v41, 0.0  ;;  %v2607_v39 = vadd.f32 %v2606_v13, %v5991_v5  ;;  %v3056_v1 = vadd.f32 %v3055_v3, %v5991_v5 }
 0x355   : > { %v2610_v47 = vpop.f32.mrf.mxu0  ;;  %2897 = vmatmul.mubr.f32.gmra.mxu0 %v4719_v51  ;;  %v3059_v14 = vpop.f32.mrf.mxu1  ;;  %3346 = vmatmul.mubr.f32.gmra.mxu1 %v4719_v51 }
 0x356   : > { %3976 = vst [vmem:[%s5850_s13 + $0x320] sm:$0xff] %v3464_v59  ;;  %3978 = vst [vmem:[%s5850_s13 + $0x330] sm:$0xff] %v3466_v60  ;;  %v3465_v42 = vmax.f32 %v2607_v39, 0.0  ;;  %v3467_v20 = vmax.f32 %v3056_v1, 0.0  ;;  %v2611_v63 = vadd.f32 %v2610_v47, %v6003_v4  ;;  %v3060_v50 = vadd.f32 %v3059_v14, %v6003_v4  ;;  %2902 = vmatprep.mubr.f32.mxu0 %v7306_v22  ;;  %v4721_v60 = vld [vmem:[#allocation2 + $0x1f8] sm:$0xff] }
 0x357   : > { %3351 = vmatprep.mubr.f32.mxu1 %v7306_v22  ;;  %v2612_v5 = vpop.f32.mrf.mxu0  ;;  %v3061_v44 = vpop.f32.mrf.mxu1 }
 0x358   : > { %3977 = vst [vmem:[%s5850_s13 + $0x328] sm:$0xff] %v3465_v42  ;;  %3979 = vst [vmem:[%s5850_s13 + $0x338] sm:$0xff] %v3467_v20  ;;  %v3472_v32 = vmax.f32 %v2611_v63, 0.0  ;;  %v3474_v61 = vmax.f32 %v3060_v50, 0.0  ;;  %v2613_v31 = vadd.f32 %v2612_v5, %v6003_v4  ;;  %v3062_v17 = vadd.f32 %v3061_v44, %v6003_v4 }
 0x359   : > { %v2616_v7 = vpop.f32.mrf.mxu0  ;;  %2903 = vmatmul.mubr.f32.gmra.mxu0 %v4720_v49  ;;  %v3065_v6 = vpop.f32.mrf.mxu1  ;;  %3352 = vmatmul.mubr.f32.gmra.mxu1 %v4720_v49 }
 0x35a   : > { %3984 = vst [vmem:[%s5850_s13 + $0x360] sm:$0xff] %v3472_v32  ;;  %3986 = vst [vmem:[%s5850_s13 + $0x370] sm:$0xff] %v3474_v61  ;;  %v3473_v11 = vmax.f32 %v2613_v31, 0.0  ;;  %v3475_v46 = vmax.f32 %v3062_v17, 0.0  ;;  %v2617_v38 = vadd.f32 %v2616_v7, %v6017_v9  ;;  %v3066_v53 = vadd.f32 %v3065_v6, %v6017_v9  ;;  %2908 = vmatprep.mubr.f32.mxu0 %v7306_v22 }
 0x35b   : > { %3357 = vmatprep.mubr.f32.mxu1 %v7306_v22  ;;  %v2618_v4 = vpop.f32.mrf.mxu0  ;;  %v3067_v48 = vpop.f32.mrf.mxu1 }
 0x35c   : > { %3985 = vst [vmem:[%s5850_s13 + $0x368] sm:$0xff] %v3473_v11  ;;  %3987 = vst [vmem:[%s5850_s13 + $0x378] sm:$0xff] %v3475_v46  ;;  %v3480_v35 = vmax.f32 %v2617_v38, 0.0  ;;  %v3482_v41 = vmax.f32 %v3066_v53, 0.0  ;;  %v2619_v13 = vadd.f32 %v2618_v4, %v6017_v9  ;;  %v3068_v3 = vadd.f32 %v3067_v48, %v6017_v9 }
 0x35d   : > { %v2622_v59 = vpop.f32.mrf.mxu0  ;;  %2909 = vmatmul.mubr.f32.gmra.mxu0 %v4721_v60  ;;  %v3071_v39 = vpop.f32.mrf.mxu1  ;;  %3358 = vmatmul.mubr.f32.gmra.mxu1 %v4721_v60 }
 0x35e   : > { %3992 = vst [vmem:[%s5850_s13 + $0x3a0] sm:$0xff] %v3480_v35  ;;  %3994 = vst [vmem:[%s5850_s13 + $0x3b0] sm:$0xff] %v3482_v41  ;;  %v3481_v22 = vmax.f32 %v2619_v13, 0.0  ;;  %v3483_v1 = vmax.f32 %v3068_v3, 0.0  ;;  %v2623_v47 = vadd.f32 %v2622_v59, %v6029_v21  ;;  %v3072_v51 = vadd.f32 %v3071_v39, %v6029_v21 }
 0x35f   : > { %v2624_v14 = vpop.f32.mrf.mxu0  ;;  %v3073_v42 = vpop.f32.mrf.mxu1 }
 0x360   : > { %3993 = vst [vmem:[%s5850_s13 + $0x3a8] sm:$0xff] %v3481_v22  ;;  %3995 = vst [vmem:[%s5850_s13 + $0x3b8] sm:$0xff] %v3483_v1  ;;  %v3488_v9 = vmax.f32 %v2623_v47, 0.0  ;;  %v3490_v20 = vmax.f32 %v3072_v51, 0.0  ;;  %v2625_v63 = vadd.f32 %v2624_v14, %v6029_v21  ;;  %v3074_v50 = vadd.f32 %v3073_v42, %v6029_v21 }
 0x361   : > { %v2628_v5 = vpop.f32.mrf.mxu0  ;;  %v3077_v44 = vpop.f32.mrf.mxu1 }
 0x362   : > { %4000 = vst [vmem:[%s5850_s13 + $0x3e0] sm:$0xff] %v3488_v9  ;;  %4002 = vst [vmem:[%s5850_s13 + $0x3f0] sm:$0xff] %v3490_v20  ;;  %v3489_v32 = vmax.f32 %v2625_v63, 0.0  ;;  %v3491_v61 = vmax.f32 %v3074_v50, 0.0  ;;  %v2629_v31 = vadd.f32 %v2628_v5, %v6043_v19  ;;  %v3078_v17 = vadd.f32 %v3077_v44, %v6043_v19 }
 0x363   : > { %v2630_v7 = vpop.f32.mrf.mxu0  ;;  %v3079_v49 = vpop.f32.mrf.mxu1 }
 0x364   : > { %4001 = vst [vmem:[%s5850_s13 + $0x3e8] sm:$0xff] %v3489_v32  ;;  %4003 = vst [vmem:[%s5850_s13 + $0x3f8] sm:$0xff] %v3491_v61  ;;  %v3496_v6 = vmax.f32 %v2629_v31, 0.0  ;;  %v3498_v21 = vmax.f32 %v3078_v17, 0.0  ;;  %v2631_v11 = vadd.f32 %v2630_v7, %v6043_v19  ;;  %v3080_v46 = vadd.f32 %v3079_v49, %v6043_v19 }
 0x365   : > { %v2634_v38 = vpop.f32.mrf.mxu0  ;;  %v3083_v53 = vpop.f32.mrf.mxu1 }
 0x366   : > { %4008 = vst [vmem:[%s5850_s13 + $0x420] sm:$0xff] %v3496_v6  ;;  %4010 = vst [vmem:[%s5850_s13 + $0x430] sm:$0xff] %v3498_v21  ;;  %v3497_v4 = vmax.f32 %v2631_v11, 0.0  ;;  %v3499_v48 = vmax.f32 %v3080_v46, 0.0  ;;  %v2635_v35 = vadd.f32 %v2634_v38, %v6053_v45  ;;  %v3084_v41 = vadd.f32 %v3083_v53, %v6053_v45 }
 0x367   : > { %v2636_v13 = vpop.f32.mrf.mxu0  ;;  %v3085_v3 = vpop.f32.mrf.mxu1 }
 0x368   : > { %4009 = vst [vmem:[%s5850_s13 + $0x428] sm:$0xff] %v3497_v4  ;;  %4011 = vst [vmem:[%s5850_s13 + $0x438] sm:$0xff] %v3499_v48  ;;  %v3504_v59 = vmax.f32 %v2635_v35, 0.0  ;;  %v3506_v19 = vmax.f32 %v3084_v41, 0.0  ;;  %v2637_v60 = vadd.f32 %v2636_v13, %v6053_v45  ;;  %v3086_v39 = vadd.f32 %v3085_v3, %v6053_v45 }
 0x369   : > { %v2640_v22 = vpop.f32.mrf.mxu0  ;;  %v3089_v1 = vpop.f32.mrf.mxu1 }
 0x36a   : > { %4016 = vst [vmem:[%s5850_s13 + $0x460] sm:$0xff] %v3504_v59  ;;  %4018 = vst [vmem:[%s5850_s13 + $0x470] sm:$0xff] %v3506_v19  ;;  %v3505_v47 = vmax.f32 %v2637_v60, 0.0  ;;  %v3507_v51 = vmax.f32 %v3086_v39, 0.0  ;;  %v2641_v14 = vadd.f32 %v2640_v22, %v6063_v62  ;;  %v3090_v42 = vadd.f32 %v3089_v1, %v6063_v62 }
 0x36b   : > { %v2642_v9 = vpop.f32.mrf.mxu0  ;;  %v3091_v20 = vpop.f32.mrf.mxu1 }
 0x36c   : > { %4017 = vst [vmem:[%s5850_s13 + $0x468] sm:$0xff] %v3505_v47  ;;  %4019 = vst [vmem:[%s5850_s13 + $0x478] sm:$0xff] %v3507_v51  ;;  %v3512_v63 = vmax.f32 %v2641_v14, 0.0  ;;  %v3514_v45 = vmax.f32 %v3090_v42, 0.0  ;;  %v2643_v50 = vadd.f32 %v2642_v9, %v6063_v62  ;;  %v3092_v5 = vadd.f32 %v3091_v20, %v6063_v62 }
 0x36d   : > { %v2646_v44 = vpop.f32.mrf.mxu0  ;;  %v3095_v32 = vpop.f32.mrf.mxu1 }
 0x36e   : > { %4024 = vst [vmem:[%s5850_s13 + $0x4a0] sm:$0xff] %v3512_v63  ;;  %4026 = vst [vmem:[%s5850_s13 + $0x4b0] sm:$0xff] %v3514_v45  ;;  %v3513_v61 = vmax.f32 %v2643_v50, 0.0  ;;  %v3515_v31 = vmax.f32 %v3092_v5, 0.0  ;;  %v2647_v17 = vadd.f32 %v2646_v44, %v6075_v26  ;;  %v3096_v7 = vadd.f32 %v3095_v32, %v6075_v26 }
 0x36f   : > { %v2648_v49 = vpop.f32.mrf.mxu0  ;;  %v3097_v6 = vpop.f32.mrf.mxu1 }
 0x370   : > { %4025 = vst [vmem:[%s5850_s13 + $0x4a8] sm:$0xff] %v3513_v61  ;;  %4027 = vst [vmem:[%s5850_s13 + $0x4b8] sm:$0xff] %v3515_v31  ;;  %v3520_v21 = vmax.f32 %v2647_v17, 0.0  ;;  %v3522_v62 = vmax.f32 %v3096_v7, 0.0  ;;  %v2649_v11 = vadd.f32 %v2648_v49, %v6075_v26  ;;  %v3098_v46 = vadd.f32 %v3097_v6, %v6075_v26 }
 0x371   : > { %v2652_v38 = vpop.f32.mrf.mxu0  ;;  %v3101_v53 = vpop.f32.mrf.mxu1 }
 0x372   : > { %4032 = vst [vmem:[%s5850_s13 + $0x4e0] sm:$0xff] %v3520_v21  ;;  %4034 = vst [vmem:[%s5850_s13 + $0x4f0] sm:$0xff] %v3522_v62  ;;  %v3521_v4 = vmax.f32 %v2649_v11, 0.0  ;;  %v3523_v48 = vmax.f32 %v3098_v46, 0.0  ;;  %v2653_v35 = vadd.f32 %v2652_v38, %v6087_v56  ;;  %v3102_v41 = vadd.f32 %v3101_v53, %v6087_v56 }
 0x373   : > { %v2654_v13 = vpop.f32.mrf.mxu0  ;;  %v3103_v3 = vpop.f32.mrf.mxu1 }
 0x374   : > { %4033 = vst [vmem:[%s5850_s13 + $0x4e8] sm:$0xff] %v3521_v4  ;;  %4035 = vst [vmem:[%s5850_s13 + $0x4f8] sm:$0xff] %v3523_v48  ;;  %v3528_v59 = vmax.f32 %v2653_v35, 0.0  ;;  %v3530_v26 = vmax.f32 %v3102_v41, 0.0  ;;  %v2655_v19 = vadd.f32 %v2654_v13, %v6087_v56  ;;  %v3104_v60 = vadd.f32 %v3103_v3, %v6087_v56 }
 0x375   : > { %v2658_v39 = vpop.f32.mrf.mxu0  ;;  %v3107_v22 = vpop.f32.mrf.mxu1 }
 0x376   : > { %4040 = vst [vmem:[%s5850_s13 + $0x520] sm:$0xff] %v3528_v59  ;;  %4042 = vst [vmem:[%s5850_s13 + $0x530] sm:$0xff] %v3530_v26  ;;  %v3529_v1 = vmax.f32 %v2655_v19, 0.0  ;;  %v3531_v47 = vmax.f32 %v3104_v60, 0.0  ;;  %v2659_v51 = vadd.f32 %v2658_v39, %v6099_v36  ;;  %v3108_v14 = vadd.f32 %v3107_v22, %v6099_v36 }
 0x377   : > { %v2660_v42 = vpop.f32.mrf.mxu0  ;;  %v3109_v9 = vpop.f32.mrf.mxu1 }
 0x378   : > { %4041 = vst [vmem:[%s5850_s13 + $0x528] sm:$0xff] %v3529_v1  ;;  %4043 = vst [vmem:[%s5850_s13 + $0x538] sm:$0xff] %v3531_v47  ;;  %v3536_v20 = vmax.f32 %v2659_v51, 0.0  ;;  %v3538_v56 = vmax.f32 %v3108_v14, 0.0  ;;  %v2661_v63 = vadd.f32 %v2660_v42, %v6099_v36  ;;  %v3110_v45 = vadd.f32 %v3109_v9, %v6099_v36 }
 0x379   : > { %v2664_v50 = vpop.f32.mrf.mxu0  ;;  %v3113_v5 = vpop.f32.mrf.mxu1 }
 0x37a   : > { %4048 = vst [vmem:[%s5850_s13 + $0x560] sm:$0xff] %v3536_v20  ;;  %4050 = vst [vmem:[%s5850_s13 + $0x570] sm:$0xff] %v3538_v56  ;;  %v3537_v44 = vmax.f32 %v2661_v63, 0.0  ;;  %v3539_v32 = vmax.f32 %v3110_v45, 0.0  ;;  %v2665_v61 = vadd.f32 %v2664_v50, %v6111_v18  ;;  %v3114_v31 = vadd.f32 %v3113_v5, %v6111_v18 }
 0x37b   : > { %v2666_v17 = vpop.f32.mrf.mxu0  ;;  %v3115_v7 = vpop.f32.mrf.mxu1 }
 0x37c   : > { %4049 = vst [vmem:[%s5850_s13 + $0x568] sm:$0xff] %v3537_v44  ;;  %4051 = vst [vmem:[%s5850_s13 + $0x578] sm:$0xff] %v3539_v32  ;;  %v3544_v49 = vmax.f32 %v2665_v61, 0.0  ;;  %v3546_v36 = vmax.f32 %v3114_v31, 0.0  ;;  %v2667_v6 = vadd.f32 %v2666_v17, %v6111_v18  ;;  %v3116_v21 = vadd.f32 %v3115_v7, %v6111_v18 }
 0x37d   : > { %v2670_v62 = vpop.f32.mrf.mxu0  ;;  %v3119_v11 = vpop.f32.mrf.mxu1 }
 0x37e   : > { %4056 = vst [vmem:[%s5850_s13 + $0x5a0] sm:$0xff] %v3544_v49  ;;  %4058 = vst [vmem:[%s5850_s13 + $0x5b0] sm:$0xff] %v3546_v36  ;;  %v3545_v46 = vmax.f32 %v2667_v6, 0.0  ;;  %v3547_v38 = vmax.f32 %v3116_v21, 0.0  ;;  %v2671_v53 = vadd.f32 %v2670_v62, %v6123_v55  ;;  %v3120_v4 = vadd.f32 %v3119_v11, %v6123_v55 }
 0x37f   : > { %v2672_v48 = vpop.f32.mrf.mxu0  ;;  %v3121_v35 = vpop.f32.mrf.mxu1 }
 0x380   : > { %4057 = vst [vmem:[%s5850_s13 + $0x5a8] sm:$0xff] %v3545_v46  ;;  %4059 = vst [vmem:[%s5850_s13 + $0x5b8] sm:$0xff] %v3547_v38  ;;  %v3552_v41 = vmax.f32 %v2671_v53, 0.0  ;;  %v3554_v18 = vmax.f32 %v3120_v4, 0.0  ;;  %v2673_v13 = vadd.f32 %v2672_v48, %v6123_v55  ;;  %v3122_v3 = vadd.f32 %v3121_v35, %v6123_v55 }
 0x381   : > { %v2676_v59 = vpop.f32.mrf.mxu0  ;;  %v3125_v26 = vpop.f32.mrf.mxu1 }
 0x382   : > { %4064 = vst [vmem:[%s5850_s13 + $0x5e0] sm:$0xff] %v3552_v41  ;;  %4066 = vst [vmem:[%s5850_s13 + $0x5f0] sm:$0xff] %v3554_v18  ;;  %v3553_v19 = vmax.f32 %v2673_v13, 0.0  ;;  %v3555_v60 = vmax.f32 %v3122_v3, 0.0  ;;  %v2677_v39 = vadd.f32 %v2676_v59, %v6135_v2  ;;  %v3126_v22 = vadd.f32 %v3125_v26, %v6135_v2 }
 0x383   : > { %v2678_v1 = vpop.f32.mrf.mxu0  ;;  %v3127_v47 = vpop.f32.mrf.mxu1 }
 0x384   : > { %4065 = vst [vmem:[%s5850_s13 + $0x5e8] sm:$0xff] %v3553_v19  ;;  %4067 = vst [vmem:[%s5850_s13 + $0x5f8] sm:$0xff] %v3555_v60  ;;  %v3560_v51 = vmax.f32 %v2677_v39, 0.0  ;;  %v3562_v55 = vmax.f32 %v3126_v22, 0.0  ;;  %v2679_v14 = vadd.f32 %v2678_v1, %v6135_v2  ;;  %v3128_v42 = vadd.f32 %v3127_v47, %v6135_v2 }
 0x385   : > { %v2682_v9 = vpop.f32.mrf.mxu0  ;;  %v3131_v20 = vpop.f32.mrf.mxu1 }
 0x386   : > { %4072 = vst [vmem:[%s5850_s13 + $0x620] sm:$0xff] %v3560_v51  ;;  %4074 = vst [vmem:[%s5850_s13 + $0x630] sm:$0xff] %v3562_v55  ;;  %v3561_v56 = vmax.f32 %v2679_v14, 0.0  ;;  %v3563_v63 = vmax.f32 %v3128_v42, 0.0  ;;  %v2683_v45 = vadd.f32 %v2682_v9, %v6147_v10  ;;  %v3132_v50 = vadd.f32 %v3131_v20, %v6147_v10 }
 0x387   : > { %v2684_v5 = vpop.f32.mrf.mxu0  ;;  %v3133_v44 = vpop.f32.mrf.mxu1 }
 0x388   : > { %4073 = vst [vmem:[%s5850_s13 + $0x628] sm:$0xff] %v3561_v56  ;;  %4075 = vst [vmem:[%s5850_s13 + $0x638] sm:$0xff] %v3563_v63  ;;  %v3568_v32 = vmax.f32 %v2683_v45, 0.0  ;;  %v3570_v2 = vmax.f32 %v3132_v50, 0.0  ;;  %v2685_v61 = vadd.f32 %v2684_v5, %v6147_v10  ;;  %v3134_v31 = vadd.f32 %v3133_v44, %v6147_v10 }
 0x389   : > { %v2688_v17 = vpop.f32.mrf.mxu0  ;;  %v3137_v7 = vpop.f32.mrf.mxu1 }
 0x38a   : > { %4080 = vst [vmem:[%s5850_s13 + $0x660] sm:$0xff] %v3568_v32  ;;  %4082 = vst [vmem:[%s5850_s13 + $0x670] sm:$0xff] %v3570_v2  ;;  %v3569_v49 = vmax.f32 %v2685_v61, 0.0  ;;  %v3571_v36 = vmax.f32 %v3134_v31, 0.0  ;;  %v2689_v6 = vadd.f32 %v2688_v17, %v6159_v15  ;;  %v3138_v21 = vadd.f32 %v3137_v7, %v6159_v15 }
 0x38b   : > { %v2690_v62 = vpop.f32.mrf.mxu0  ;;  %v3139_v11 = vpop.f32.mrf.mxu1 }
 0x38c   : > { %4081 = vst [vmem:[%s5850_s13 + $0x668] sm:$0xff] %v3569_v49  ;;  %4083 = vst [vmem:[%s5850_s13 + $0x678] sm:$0xff] %v3571_v36  ;;  %v3576_v46 = vmax.f32 %v2689_v6, 0.0  ;;  %v3578_v10 = vmax.f32 %v3138_v21, 0.0  ;;  %v2691_v38 = vadd.f32 %v2690_v62, %v6159_v15  ;;  %v3140_v53 = vadd.f32 %v3139_v11, %v6159_v15 }
 0x38d   : > { %v2694_v4 = vpop.f32.mrf.mxu0  ;;  %v3143_v48 = vpop.f32.mrf.mxu1 }
 0x38e   : > { %4088 = vst [vmem:[%s5850_s13 + $0x6a0] sm:$0xff] %v3576_v46  ;;  %4090 = vst [vmem:[%s5850_s13 + $0x6b0] sm:$0xff] %v3578_v10  ;;  %v3577_v35 = vmax.f32 %v2691_v38, 0.0  ;;  %v3579_v41 = vmax.f32 %v3140_v53, 0.0  ;;  %v2695_v18 = vadd.f32 %v2694_v4, %v6171_v0  ;;  %v3144_v13 = vadd.f32 %v3143_v48, %v6171_v0 }
 0x38f   : > { %v2696_v3 = vpop.f32.mrf.mxu0  ;;  %v3145_v59 = vpop.f32.mrf.mxu1 }
 0x390   : > { %4089 = vst [vmem:[%s5850_s13 + $0x6a8] sm:$0xff] %v3577_v35  ;;  %4091 = vst [vmem:[%s5850_s13 + $0x6b8] sm:$0xff] %v3579_v41  ;;  %v3584_v26 = vmax.f32 %v2695_v18, 0.0  ;;  %v3586_v15 = vmax.f32 %v3144_v13, 0.0  ;;  %v2697_v19 = vadd.f32 %v2696_v3, %v6171_v0  ;;  %v3146_v60 = vadd.f32 %v3145_v59, %v6171_v0 }
 0x391   : > { %v2700_v39 = vpop.f32.mrf.mxu0  ;;  %v3149_v22 = vpop.f32.mrf.mxu1 }
 0x392   : > { %4096 = vst [vmem:[%s5850_s13 + $0x6e0] sm:$0xff] %v3584_v26  ;;  %4098 = vst [vmem:[%s5850_s13 + $0x6f0] sm:$0xff] %v3586_v15  ;;  %v3585_v1 = vmax.f32 %v2697_v19, 0.0  ;;  %v3587_v47 = vmax.f32 %v3146_v60, 0.0  ;;  %v2701_v51 = vadd.f32 %v2700_v39, %v6183_v8  ;;  %v3150_v55 = vadd.f32 %v3149_v22, %v6183_v8 }
 0x393   : > { %v2702_v14 = vpop.f32.mrf.mxu0  ;;  %v3151_v42 = vpop.f32.mrf.mxu1 }
 0x394   : > { %4097 = vst [vmem:[%s5850_s13 + $0x6e8] sm:$0xff] %v3585_v1  ;;  %4099 = vst [vmem:[%s5850_s13 + $0x6f8] sm:$0xff] %v3587_v47  ;;  %v3592_v9 = vmax.f32 %v2701_v51, 0.0  ;;  %v3594_v0 = vmax.f32 %v3150_v55, 0.0  ;;  %v2703_v20 = vadd.f32 %v2702_v14, %v6183_v8  ;;  %v3152_v56 = vadd.f32 %v3151_v42, %v6183_v8 }
 0x395   : > { %v2706_v63 = vpop.f32.mrf.mxu0  ;;  %v3155_v45 = vpop.f32.mrf.mxu1 }
 0x396   : > { %4104 = vst [vmem:[%s5850_s13 + $0x720] sm:$0xff] %v3592_v9  ;;  %4106 = vst [vmem:[%s5850_s13 + $0x730] sm:$0xff] %v3594_v0  ;;  %v3593_v50 = vmax.f32 %v2703_v20, 0.0  ;;  %v3595_v5 = vmax.f32 %v3152_v56, 0.0  ;;  %v2707_v44 = vadd.f32 %v2706_v63, %v6195_v57  ;;  %v3156_v32 = vadd.f32 %v3155_v45, %v6195_v57 }
 0x397   : > { %v2708_v2 = vpop.f32.mrf.mxu0  ;;  %v3157_v61 = vpop.f32.mrf.mxu1 }
 0x398   : > { %4105 = vst [vmem:[%s5850_s13 + $0x728] sm:$0xff] %v3593_v50  ;;  %4107 = vst [vmem:[%s5850_s13 + $0x738] sm:$0xff] %v3595_v5  ;;  %v3600_v31 = vmax.f32 %v2707_v44, 0.0  ;;  %v3602_v8 = vmax.f32 %v3156_v32, 0.0  ;;  %v2709_v17 = vadd.f32 %v2708_v2, %v6195_v57  ;;  %v3158_v7 = vadd.f32 %v3157_v61, %v6195_v57 }
 0x399   : > { %v2712_v49 = vpop.f32.mrf.mxu0  ;;  %v3161_v36 = vpop.f32.mrf.mxu1 }
 0x39a   : > { %4112 = vst [vmem:[%s5850_s13 + $0x760] sm:$0xff] %v3600_v31  ;;  %4114 = vst [vmem:[%s5850_s13 + $0x770] sm:$0xff] %v3602_v8  ;;  %v3601_v6 = vmax.f32 %v2709_v17, 0.0  ;;  %v3603_v21 = vmax.f32 %v3158_v7, 0.0  ;;  %v2713_v62 = vadd.f32 %v2712_v49, %v6207_v24  ;;  %v3162_v11 = vadd.f32 %v3161_v36, %v6207_v24 }
 0x39b   : > { %v2714_v46 = vpop.f32.mrf.mxu0  ;;  %v3163_v10 = vpop.f32.mrf.mxu1 }
 0x39c   : > { %4113 = vst [vmem:[%s5850_s13 + $0x768] sm:$0xff] %v3601_v6  ;;  %4115 = vst [vmem:[%s5850_s13 + $0x778] sm:$0xff] %v3603_v21  ;;  %v3608_v38 = vmax.f32 %v2713_v62, 0.0  ;;  %v3610_v57 = vmax.f32 %v3162_v11, 0.0  ;;  %v2715_v53 = vadd.f32 %v2714_v46, %v6207_v24  ;;  %v3164_v4 = vadd.f32 %v3163_v10, %v6207_v24 }
 0x39d   : > { %v2718_v48 = vpop.f32.mrf.mxu0  ;;  %v3167_v35 = vpop.f32.mrf.mxu1 }
 0x39e   : > { %4120 = vst [vmem:[%s5850_s13 + $0x7a0] sm:$0xff] %v3608_v38  ;;  %4122 = vst [vmem:[%s5850_s13 + $0x7b0] sm:$0xff] %v3610_v57  ;;  %v3609_v41 = vmax.f32 %v2715_v53, 0.0  ;;  %v3611_v18 = vmax.f32 %v3164_v4, 0.0  ;;  %v2719_v13 = vadd.f32 %v2718_v48, %v6219_v33  ;;  %v3168_v3 = vadd.f32 %v3167_v35, %v6219_v33 }
 0x39f   : > { %v2720_v59 = vpop.f32.mrf.mxu0  ;;  %v3169_v26 = vpop.f32.mrf.mxu1 }
 0x3a0   : > { %4121 = vst [vmem:[%s5850_s13 + $0x7a8] sm:$0xff] %v3609_v41  ;;  %4123 = vst [vmem:[%s5850_s13 + $0x7b8] sm:$0xff] %v3611_v18  ;;  %v3616_v15 = vmax.f32 %v2719_v13, 0.0  ;;  %v3618_v24 = vmax.f32 %v3168_v3, 0.0  ;;  %v2721_v19 = vadd.f32 %v2720_v59, %v6219_v33  ;;  %v3170_v60 = vadd.f32 %v3169_v26, %v6219_v33 }
 0x3a1   : > { %v2724_v39 = vpop.f32.mrf.mxu0  ;;  %v3173_v22 = vpop.f32.mrf.mxu1 }
 0x3a2   : > { %4128 = vst [vmem:[%s5850_s13 + $0x7e0] sm:$0xff] %v3616_v15  ;;  %4130 = vst [vmem:[%s5850_s13 + $0x7f0] sm:$0xff] %v3618_v24  ;;  %v3617_v1 = vmax.f32 %v2721_v19, 0.0  ;;  %v3619_v47 = vmax.f32 %v3170_v60, 0.0  ;;  %v2725_v51 = vadd.f32 %v2724_v39, %v6231_v23  ;;  %v3174_v55 = vadd.f32 %v3173_v22, %v6231_v23 }
 0x3a3   : > { %v2726_v14 = vpop.f32.mrf.mxu0  ;;  %v3175_v42 = vpop.f32.mrf.mxu1 }
 0x3a4   : > { %4129 = vst [vmem:[%s5850_s13 + $0x7e8] sm:$0xff] %v3617_v1  ;;  %4131 = vst [vmem:[%s5850_s13 + $0x7f8] sm:$0xff] %v3619_v47  ;;  %v3624_v9 = vmax.f32 %v2725_v51, 0.0  ;;  %v3626_v33 = vmax.f32 %v3174_v55, 0.0  ;;  %v2727_v0 = vadd.f32 %v2726_v14, %v6231_v23  ;;  %v3176_v20 = vadd.f32 %v3175_v42, %v6231_v23 }
 0x3a5   : > { %v2730_v56 = vpop.f32.mrf.mxu0  ;;  %v3179_v63 = vpop.f32.mrf.mxu1 }
 0x3a6   : > { %4136 = vst [vmem:[%s5850_s13 + $0x820] sm:$0xff] %v3624_v9  ;;  %4138 = vst [vmem:[%s5850_s13 + $0x830] sm:$0xff] %v3626_v33  ;;  %v3625_v45 = vmax.f32 %v2727_v0, 0.0  ;;  %v3627_v50 = vmax.f32 %v3176_v20, 0.0  ;;  %v2731_v5 = vadd.f32 %v2730_v56, %v6243_v16  ;;  %v3180_v44 = vadd.f32 %v3179_v63, %v6243_v16 }
 0x3a7   : > { %v2732_v32 = vpop.f32.mrf.mxu0  ;;  %v3181_v2 = vpop.f32.mrf.mxu1 }
 0x3a8   : > { %4137 = vst [vmem:[%s5850_s13 + $0x828] sm:$0xff] %v3625_v45  ;;  %4139 = vst [vmem:[%s5850_s13 + $0x838] sm:$0xff] %v3627_v50  ;;  %v3632_v61 = vmax.f32 %v2731_v5, 0.0  ;;  %v3634_v23 = vmax.f32 %v3180_v44, 0.0  ;;  %v2733_v31 = vadd.f32 %v2732_v32, %v6243_v16  ;;  %v3182_v8 = vadd.f32 %v3181_v2, %v6243_v16 }
 0x3a9   : > { %v2736_v17 = vpop.f32.mrf.mxu0  ;;  %v3185_v7 = vpop.f32.mrf.mxu1 }
 0x3aa   : > { %4144 = vst [vmem:[%s5850_s13 + $0x860] sm:$0xff] %v3632_v61  ;;  %4146 = vst [vmem:[%s5850_s13 + $0x870] sm:$0xff] %v3634_v23  ;;  %v3633_v49 = vmax.f32 %v2733_v31, 0.0  ;;  %v3635_v36 = vmax.f32 %v3182_v8, 0.0  ;;  %v2737_v6 = vadd.f32 %v2736_v17, %v6255_v29  ;;  %v3186_v21 = vadd.f32 %v3185_v7, %v6255_v29 }
 0x3ab   : > { %v2738_v62 = vpop.f32.mrf.mxu0  ;;  %v3187_v11 = vpop.f32.mrf.mxu1 }
 0x3ac   : > { %4145 = vst [vmem:[%s5850_s13 + $0x868] sm:$0xff] %v3633_v49  ;;  %4147 = vst [vmem:[%s5850_s13 + $0x878] sm:$0xff] %v3635_v36  ;;  %v3640_v46 = vmax.f32 %v2737_v6, 0.0  ;;  %v3642_v16 = vmax.f32 %v3186_v21, 0.0  ;;  %v2739_v10 = vadd.f32 %v2738_v62, %v6255_v29  ;;  %v3188_v38 = vadd.f32 %v3187_v11, %v6255_v29 }
 0x3ad   : > { %v2742_v57 = vpop.f32.mrf.mxu0  ;;  %v3191_v53 = vpop.f32.mrf.mxu1 }
 0x3ae   : > { %4152 = vst [vmem:[%s5850_s13 + $0x8a0] sm:$0xff] %v3640_v46  ;;  %4154 = vst [vmem:[%s5850_s13 + $0x8b0] sm:$0xff] %v3642_v16  ;;  %v3641_v4 = vmax.f32 %v2739_v10, 0.0  ;;  %v3643_v48 = vmax.f32 %v3188_v38, 0.0  ;;  %v2743_v35 = vadd.f32 %v2742_v57, %v6267_v27  ;;  %v3192_v41 = vadd.f32 %v3191_v53, %v6267_v27 }
 0x3af   : > { %v2744_v18 = vpop.f32.mrf.mxu0  ;;  %v3193_v13 = vpop.f32.mrf.mxu1 }
 0x3b0   : > { %4153 = vst [vmem:[%s5850_s13 + $0x8a8] sm:$0xff] %v3641_v4  ;;  %4155 = vst [vmem:[%s5850_s13 + $0x8b8] sm:$0xff] %v3643_v48  ;;  %v3648_v3 = vmax.f32 %v2743_v35, 0.0  ;;  %v3650_v29 = vmax.f32 %v3192_v41, 0.0  ;;  %v2745_v59 = vadd.f32 %v2744_v18, %v6267_v27  ;;  %v3194_v26 = vadd.f32 %v3193_v13, %v6267_v27 }
 0x3b1   : > { %v2748_v15 = vpop.f32.mrf.mxu0  ;;  %v3197_v24 = vpop.f32.mrf.mxu1 }
 0x3b2   : > { %4160 = vst [vmem:[%s5850_s13 + $0x8e0] sm:$0xff] %v3648_v3  ;;  %4162 = vst [vmem:[%s5850_s13 + $0x8f0] sm:$0xff] %v3650_v29  ;;  %v3649_v19 = vmax.f32 %v2745_v59, 0.0  ;;  %v3651_v60 = vmax.f32 %v3194_v26, 0.0  ;;  %v2749_v39 = vadd.f32 %v2748_v15, %v6279_v30  ;;  %v3198_v22 = vadd.f32 %v3197_v24, %v6279_v30 }
 0x3b3   : > { %v2750_v1 = vpop.f32.mrf.mxu0  ;;  %v3199_v47 = vpop.f32.mrf.mxu1 }
 0x3b4   : > { %4161 = vst [vmem:[%s5850_s13 + $0x8e8] sm:$0xff] %v3649_v19  ;;  %4163 = vst [vmem:[%s5850_s13 + $0x8f8] sm:$0xff] %v3651_v60  ;;  %v3656_v51 = vmax.f32 %v2749_v39, 0.0  ;;  %v3658_v27 = vmax.f32 %v3198_v22, 0.0  ;;  %v2751_v55 = vadd.f32 %v2750_v1, %v6279_v30  ;;  %v3200_v14 = vadd.f32 %v3199_v47, %v6279_v30 }
 0x3b5   : > { %v2754_v42 = vpop.f32.mrf.mxu0  ;;  %v3203_v9 = vpop.f32.mrf.mxu1 }
 0x3b6   : > { %4168 = vst [vmem:[%s5850_s13 + $0x920] sm:$0xff] %v3656_v51  ;;  %4170 = vst [vmem:[%s5850_s13 + $0x930] sm:$0xff] %v3658_v27  ;;  %v3657_v33 = vmax.f32 %v2751_v55, 0.0  ;;  %v3659_v0 = vmax.f32 %v3200_v14, 0.0  ;;  %v2755_v20 = vadd.f32 %v2754_v42, %v6291_v12  ;;  %v3204_v56 = vadd.f32 %v3203_v9, %v6291_v12 }
 0x3b7   : > { %v2756_v63 = vpop.f32.mrf.mxu0  ;;  %v3205_v45 = vpop.f32.mrf.mxu1 }
 0x3b8   : > { %4169 = vst [vmem:[%s5850_s13 + $0x928] sm:$0xff] %v3657_v33  ;;  %4171 = vst [vmem:[%s5850_s13 + $0x938] sm:$0xff] %v3659_v0  ;;  %v3664_v50 = vmax.f32 %v2755_v20, 0.0  ;;  %v3666_v30 = vmax.f32 %v3204_v56, 0.0  ;;  %v2757_v5 = vadd.f32 %v2756_v63, %v6291_v12  ;;  %v3206_v44 = vadd.f32 %v3205_v45, %v6291_v12 }
 0x3b9   : > { %v2760_v32 = vpop.f32.mrf.mxu0  ;;  %v3209_v2 = vpop.f32.mrf.mxu1 }
 0x3ba   : > { %4176 = vst [vmem:[%s5850_s13 + $0x960] sm:$0xff] %v3664_v50  ;;  %4178 = vst [vmem:[%s5850_s13 + $0x970] sm:$0xff] %v3666_v30  ;;  %v3665_v61 = vmax.f32 %v2757_v5, 0.0  ;;  %v3667_v23 = vmax.f32 %v3206_v44, 0.0  ;;  %v2761_v31 = vadd.f32 %v2760_v32, %v6303_v54  ;;  %v3210_v8 = vadd.f32 %v3209_v2, %v6303_v54 }
 0x3bb   : > { %v2762_v17 = vpop.f32.mrf.mxu0  ;;  %v3211_v7 = vpop.f32.mrf.mxu1 }
 0x3bc   : > { %4177 = vst [vmem:[%s5850_s13 + $0x968] sm:$0xff] %v3665_v61  ;;  %4179 = vst [vmem:[%s5850_s13 + $0x978] sm:$0xff] %v3667_v23  ;;  %v3672_v49 = vmax.f32 %v2761_v31, 0.0  ;;  %v3674_v12 = vmax.f32 %v3210_v8, 0.0  ;;  %v2763_v36 = vadd.f32 %v2762_v17, %v6303_v54  ;;  %v3212_v6 = vadd.f32 %v3211_v7, %v6303_v54 }
 0x3bd   : > { %v2766_v21 = vpop.f32.mrf.mxu0  ;;  %v3215_v62 = vpop.f32.mrf.mxu1 }
 0x3be   : > { %4184 = vst [vmem:[%s5850_s13 + $0x9a0] sm:$0xff] %v3672_v49  ;;  %4186 = vst [vmem:[%s5850_s13 + $0x9b0] sm:$0xff] %v3674_v12  ;;  %v3673_v11 = vmax.f32 %v2763_v36, 0.0  ;;  %v3675_v46 = vmax.f32 %v3212_v6, 0.0  ;;  %v2767_v16 = vadd.f32 %v2766_v21, %v6315_v58  ;;  %v3216_v10 = vadd.f32 %v3215_v62, %v6315_v58 }
 0x3bf   : > { %v2768_v38 = vpop.f32.mrf.mxu0  ;;  %v3217_v57 = vpop.f32.mrf.mxu1 }
 0x3c0   : > { %4185 = vst [vmem:[%s5850_s13 + $0x9a8] sm:$0xff] %v3673_v11  ;;  %4187 = vst [vmem:[%s5850_s13 + $0x9b8] sm:$0xff] %v3675_v46  ;;  %v3680_v53 = vmax.f32 %v2767_v16, 0.0  ;;  %v3682_v54 = vmax.f32 %v3216_v10, 0.0  ;;  %v2769_v4 = vadd.f32 %v2768_v38, %v6315_v58  ;;  %v3218_v48 = vadd.f32 %v3217_v57, %v6315_v58 }
 0x3c1   : > { %v2772_v35 = vpop.f32.mrf.mxu0  ;;  %v3221_v41 = vpop.f32.mrf.mxu1 }
 0x3c2   : > { %4192 = vst [vmem:[%s5850_s13 + $0x9e0] sm:$0xff] %v3680_v53  ;;  %4194 = vst [vmem:[%s5850_s13 + $0x9f0] sm:$0xff] %v3682_v54  ;;  %v3681_v18 = vmax.f32 %v2769_v4, 0.0  ;;  %v3683_v13 = vmax.f32 %v3218_v48, 0.0  ;;  %v2773_v3 = vadd.f32 %v2772_v35, %v6327_v40  ;;  %v3222_v29 = vadd.f32 %v3221_v41, %v6327_v40 }
 0x3c3   : > { %v2774_v59 = vpop.f32.mrf.mxu0  ;;  %v3223_v26 = vpop.f32.mrf.mxu1 }
 0x3c4   : > { %4193 = vst [vmem:[%s5850_s13 + $0x9e8] sm:$0xff] %v3681_v18  ;;  %4195 = vst [vmem:[%s5850_s13 + $0x9f8] sm:$0xff] %v3683_v13  ;;  %v3688_v15 = vmax.f32 %v2773_v3, 0.0  ;;  %v3690_v58 = vmax.f32 %v3222_v29, 0.0  ;;  %v2775_v24 = vadd.f32 %v2774_v59, %v6327_v40  ;;  %v3224_v19 = vadd.f32 %v3223_v26, %v6327_v40 }
 0x3c5   : > { %v2778_v60 = vpop.f32.mrf.mxu0  ;;  %v3227_v39 = vpop.f32.mrf.mxu1 }
 0x3c6   : > { %4200 = vst [vmem:[%s5850_s13 + $0xa20] sm:$0xff] %v3688_v15  ;;  %4202 = vst [vmem:[%s5850_s13 + $0xa30] sm:$0xff] %v3690_v58  ;;  %v3689_v22 = vmax.f32 %v2775_v24, 0.0  ;;  %v3691_v1 = vmax.f32 %v3224_v19, 0.0  ;;  %v2779_v47 = vadd.f32 %v2778_v60, %v6339_v28  ;;  %v3228_v51 = vadd.f32 %v3227_v39, %v6339_v28 }
 0x3c7   : > { %v2780_v27 = vpop.f32.mrf.mxu0  ;;  %v3229_v55 = vpop.f32.mrf.mxu1 }
 0x3c8   : > { %4201 = vst [vmem:[%s5850_s13 + $0xa28] sm:$0xff] %v3689_v22  ;;  %4203 = vst [vmem:[%s5850_s13 + $0xa38] sm:$0xff] %v3691_v1  ;;  %v3696_v14 = vmax.f32 %v2779_v47, 0.0  ;;  %v3698_v40 = vmax.f32 %v3228_v51, 0.0  ;;  %v2781_v42 = vadd.f32 %v2780_v27, %v6339_v28  ;;  %v3230_v9 = vadd.f32 %v3229_v55, %v6339_v28  ;;  %v7338_v22 = vld [vmem:[#allocation20_spill] sm:$0xff] }
 0x3c9   : > { %v2784_v33 = vpop.f32.mrf.mxu0  ;;  %v3233_v0 = vpop.f32.mrf.mxu1 }
 0x3ca   : > { %4208 = vst [vmem:[%s5850_s13 + $0xa60] sm:$0xff] %v3696_v14  ;;  %4210 = vst [vmem:[%s5850_s13 + $0xa70] sm:$0xff] %v3698_v40  ;;  %v3697_v20 = vmax.f32 %v2781_v42, 0.0  ;;  %v3699_v56 = vmax.f32 %v3230_v9, 0.0  ;;  %v2785_v63 = vadd.f32 %v2784_v33, %v6351_v25  ;;  %v3234_v45 = vadd.f32 %v3233_v0, %v6351_v25 }
 0x3cb   : > { %v2786_v50 = vpop.f32.mrf.mxu0  ;;  %v3235_v30 = vpop.f32.mrf.mxu1 }
 0x3cc   : > { %4209 = vst [vmem:[%s5850_s13 + $0xa68] sm:$0xff] %v3697_v20  ;;  %4211 = vst [vmem:[%s5850_s13 + $0xa78] sm:$0xff] %v3699_v56  ;;  %v3704_v5 = vmax.f32 %v2785_v63, 0.0  ;;  %v3706_v28 = vmax.f32 %v3234_v45, 0.0  ;;  %v2787_v44 = vadd.f32 %v2786_v50, %v6351_v25  ;;  %v3236_v32 = vadd.f32 %v3235_v30, %v6351_v25  ;;  %v7339_v20 = vld [vmem:[#allocation18_spill] sm:$0xff] }
 0x3cd   : > { %v2790_v2 = vpop.f32.mrf.mxu0  ;;  %v3239_v61 = vpop.f32.mrf.mxu1 }
 0x3ce   : > { %4216 = vst [vmem:[%s5850_s13 + $0xaa0] sm:$0xff] %v3704_v5  ;;  %4218 = vst [vmem:[%s5850_s13 + $0xab0] sm:$0xff] %v3706_v28  ;;  %v3705_v23 = vmax.f32 %v2787_v44, 0.0  ;;  %v3707_v31 = vmax.f32 %v3236_v32, 0.0  ;;  %v2791_v8 = vadd.f32 %v2790_v2, %v6363_v43  ;;  %v3240_v17 = vadd.f32 %v3239_v61, %v6363_v43 }
 0x3cf   : > { %v2792_v7 = vpop.f32.mrf.mxu0  ;;  %v3241_v49 = vpop.f32.mrf.mxu1 }
 0x3d0   : > { %4217 = vst [vmem:[%s5850_s13 + $0xaa8] sm:$0xff] %v3705_v23  ;;  %4219 = vst [vmem:[%s5850_s13 + $0xab8] sm:$0xff] %v3707_v31  ;;  %v3712_v12 = vmax.f32 %v2791_v8, 0.0  ;;  %v3714_v25 = vmax.f32 %v3240_v17, 0.0  ;;  %v2793_v36 = vadd.f32 %v2792_v7, %v6363_v43  ;;  %v3242_v6 = vadd.f32 %v3241_v49, %v6363_v43  ;;  %v7340_v31 = vld [vmem:[#allocation19_spill] sm:$0xff] }
 0x3d1   : > { %v2796_v21 = vpop.f32.mrf.mxu0  ;;  %v3245_v62 = vpop.f32.mrf.mxu1 }
 0x3d2   : > { %4224 = vst [vmem:[%s5850_s13 + $0xae0] sm:$0xff] %v3712_v12  ;;  %4226 = vst [vmem:[%s5850_s13 + $0xaf0] sm:$0xff] %v3714_v25  ;;  %v3713_v11 = vmax.f32 %v2793_v36, 0.0  ;;  %v3715_v46 = vmax.f32 %v3242_v6, 0.0  ;;  %v2797_v16 = vadd.f32 %v2796_v21, %v6375_v34  ;;  %v3246_v10 = vadd.f32 %v3245_v62, %v6375_v34 }
 0x3d3   : > { %v2798_v38 = vpop.f32.mrf.mxu0  ;;  %v3247_v57 = vpop.f32.mrf.mxu1 }
 0x3d4   : > { %4225 = vst [vmem:[%s5850_s13 + $0xae8] sm:$0xff] %v3713_v11  ;;  %4227 = vst [vmem:[%s5850_s13 + $0xaf8] sm:$0xff] %v3715_v46  ;;  %v3720_v53 = vmax.f32 %v2797_v16, 0.0  ;;  %v3722_v43 = vmax.f32 %v3246_v10, 0.0  ;;  %v2799_v54 = vadd.f32 %v2798_v38, %v6375_v34  ;;  %v3248_v4 = vadd.f32 %v3247_v57, %v6375_v34  ;;  %v7341_v16 = vld [vmem:[#allocation16_spill] sm:$0xff] }
 0x3d5   : > { %v2802_v48 = vpop.f32.mrf.mxu0  ;;  %v3251_v35 = vpop.f32.mrf.mxu1 }
 0x3d6   : > { %4232 = vst [vmem:[%s5850_s13 + $0xb20] sm:$0xff] %v3720_v53  ;;  %4234 = vst [vmem:[%s5850_s13 + $0xb30] sm:$0xff] %v3722_v43  ;;  %v3721_v41 = vmax.f32 %v2799_v54, 0.0  ;;  %v3723_v18 = vmax.f32 %v3248_v4, 0.0  ;;  %v2803_v13 = vadd.f32 %v2802_v48, %v6387_v52  ;;  %v3252_v3 = vadd.f32 %v3251_v35, %v6387_v52 }
 0x3d7   : > { %v2804_v29 = vpop.f32.mrf.mxu0  ;;  %v3253_v59 = vpop.f32.mrf.mxu1 }
 0x3d8   : > { %4233 = vst [vmem:[%s5850_s13 + $0xb28] sm:$0xff] %v3721_v41  ;;  %4235 = vst [vmem:[%s5850_s13 + $0xb38] sm:$0xff] %v3723_v18  ;;  %v3728_v26 = vmax.f32 %v2803_v13, 0.0  ;;  %v3730_v34 = vmax.f32 %v3252_v3, 0.0  ;;  %v2805_v15 = vadd.f32 %v2804_v29, %v6387_v52  ;;  %v3254_v58 = vadd.f32 %v3253_v59, %v6387_v52  ;;  %v7342_v3 = vld [vmem:[#allocation17_spill] sm:$0xff] }
 0x3d9   : > { %v2808_v24 = vpop.f32.mrf.mxu0  ;;  %v3257_v19 = vpop.f32.mrf.mxu1 }
 0x3da   : > { %4240 = vst [vmem:[%s5850_s13 + $0xb60] sm:$0xff] %v3728_v26  ;;  %4242 = vst [vmem:[%s5850_s13 + $0xb70] sm:$0xff] %v3730_v34  ;;  %v3729_v60 = vmax.f32 %v2805_v15, 0.0  ;;  %v3731_v39 = vmax.f32 %v3254_v58, 0.0  ;;  %v2809_v1 = vadd.f32 %v2808_v24, %v7338_v22  ;;  %v3258_v47 = vadd.f32 %v3257_v19, %v7338_v22 }
 0x3db   : > { %v2810_v51 = vpop.f32.mrf.mxu0  ;;  %v3259_v27 = vpop.f32.mrf.mxu1 }
 0x3dc   : > { %4241 = vst [vmem:[%s5850_s13 + $0xb68] sm:$0xff] %v3729_v60  ;;  %4243 = vst [vmem:[%s5850_s13 + $0xb78] sm:$0xff] %v3731_v39  ;;  %v3736_v55 = vmax.f32 %v2809_v1, 0.0  ;;  %v3738_v52 = vmax.f32 %v3258_v47, 0.0  ;;  %v2811_v14 = vadd.f32 %v2810_v51, %v7338_v22  ;;  %v3260_v40 = vadd.f32 %v3259_v27, %v7338_v22  ;;  %v7343_v47 = vld [vmem:[#allocation14_spill] sm:$0xff] }
 0x3dd   : > { %v2814_v42 = vpop.f32.mrf.mxu0  ;;  %v3263_v9 = vpop.f32.mrf.mxu1 }
 0x3de   : > { %4248 = vst [vmem:[%s5850_s13 + $0xba0] sm:$0xff] %v3736_v55  ;;  %4250 = vst [vmem:[%s5850_s13 + $0xbb0] sm:$0xff] %v3738_v52  ;;  %v3737_v33 = vmax.f32 %v2811_v14, 0.0  ;;  %v3739_v0 = vmax.f32 %v3260_v40, 0.0  ;;  %v2815_v56 = vadd.f32 %v2814_v42, %v7339_v20  ;;  %v3264_v63 = vadd.f32 %v3263_v9, %v7339_v20 }
 0x3df   : > { %v2816_v45 = vpop.f32.mrf.mxu0  ;;  %v3265_v50 = vpop.f32.mrf.mxu1 }
 0x3e0   : > { %4249 = vst [vmem:[%s5850_s13 + $0xba8] sm:$0xff] %v3737_v33  ;;  %4251 = vst [vmem:[%s5850_s13 + $0xbb8] sm:$0xff] %v3739_v0  ;;  %v3744_v30 = vmax.f32 %v2815_v56, 0.0  ;;  %v3746_v5 = vmax.f32 %v3264_v63, 0.0  ;;  %v2817_v28 = vadd.f32 %v2816_v45, %v7339_v20  ;;  %v3266_v44 = vadd.f32 %v3265_v50, %v7339_v20  ;;  %v7344_v63 = vld [vmem:[#allocation15_spill] sm:$0xff] }
 0x3e1   : > { %v2820_v32 = vpop.f32.mrf.mxu0  ;;  %v3269_v2 = vpop.f32.mrf.mxu1 }
 0x3e2   : > { %4256 = vst [vmem:[%s5850_s13 + $0xbe0] sm:$0xff] %v3744_v30  ;;  %4258 = vst [vmem:[%s5850_s13 + $0xbf0] sm:$0xff] %v3746_v5  ;;  %v3745_v61 = vmax.f32 %v2817_v28, 0.0  ;;  %v3747_v23 = vmax.f32 %v3266_v44, 0.0  ;;  %v2821_v8 = vadd.f32 %v2820_v32, %v7340_v31  ;;  %v3270_v17 = vadd.f32 %v3269_v2, %v7340_v31 }
 0x3e3   : > { %v2822_v7 = vpop.f32.mrf.mxu0  ;;  %v3271_v49 = vpop.f32.mrf.mxu1 }
 0x3e4   : > { %4257 = vst [vmem:[%s5850_s13 + $0xbe8] sm:$0xff] %v3745_v61  ;;  %4259 = vst [vmem:[%s5850_s13 + $0xbf8] sm:$0xff] %v3747_v23  ;;  %v3752_v12 = vmax.f32 %v2821_v8, 0.0  ;;  %v3754_v25 = vmax.f32 %v3270_v17, 0.0  ;;  %v2823_v36 = vadd.f32 %v2822_v7, %v7340_v31  ;;  %v3272_v6 = vadd.f32 %v3271_v49, %v7340_v31  ;;  %v7345_v17 = vld [vmem:[#allocation12_spill] sm:$0xff] }
 0x3e5   : > { %v2826_v21 = vpop.f32.mrf.mxu0  ;;  %v3275_v62 = vpop.f32.mrf.mxu1 }
 0x3e6   : > { %4264 = vst [vmem:[%s5850_s13 + $0xc20] sm:$0xff] %v3752_v12  ;;  %4266 = vst [vmem:[%s5850_s13 + $0xc30] sm:$0xff] %v3754_v25  ;;  %v3753_v11 = vmax.f32 %v2823_v36, 0.0  ;;  %v3755_v46 = vmax.f32 %v3272_v6, 0.0  ;;  %v2827_v10 = vadd.f32 %v2826_v21, %v7341_v16  ;;  %v3276_v38 = vadd.f32 %v3275_v62, %v7341_v16 }
 0x3e7   : > { %v2828_v57 = vpop.f32.mrf.mxu0  ;;  %v3277_v53 = vpop.f32.mrf.mxu1 }
 0x3e8   : > { %4265 = vst [vmem:[%s5850_s13 + $0xc28] sm:$0xff] %v3753_v11  ;;  %4267 = vst [vmem:[%s5850_s13 + $0xc38] sm:$0xff] %v3755_v46  ;;  %v3760_v43 = vmax.f32 %v2827_v10, 0.0  ;;  %v3762_v54 = vmax.f32 %v3276_v38, 0.0  ;;  %v2829_v4 = vadd.f32 %v2828_v57, %v7341_v16  ;;  %v3278_v48 = vadd.f32 %v3277_v53, %v7341_v16  ;;  %v7346_v38 = vld [vmem:[#allocation13_spill] sm:$0xff] }
 0x3e9   : > { %v2832_v35 = vpop.f32.mrf.mxu0  ;;  %v3281_v41 = vpop.f32.mrf.mxu1 }
 0x3ea   : > { %4272 = vst [vmem:[%s5850_s13 + $0xc60] sm:$0xff] %v3760_v43  ;;  %4274 = vst [vmem:[%s5850_s13 + $0xc70] sm:$0xff] %v3762_v54  ;;  %v3761_v18 = vmax.f32 %v2829_v4, 0.0  ;;  %v3763_v13 = vmax.f32 %v3278_v48, 0.0  ;;  %v2833_v29 = vadd.f32 %v2832_v35, %v7342_v3  ;;  %v3282_v59 = vadd.f32 %v3281_v41, %v7342_v3 }
 0x3eb   : > { %v2834_v26 = vpop.f32.mrf.mxu0  ;;  %v3283_v34 = vpop.f32.mrf.mxu1 }
 0x3ec   : > { %4273 = vst [vmem:[%s5850_s13 + $0xc68] sm:$0xff] %v3761_v18  ;;  %4275 = vst [vmem:[%s5850_s13 + $0xc78] sm:$0xff] %v3763_v13  ;;  %v3768_v15 = vmax.f32 %v2833_v29, 0.0  ;;  %v3770_v58 = vmax.f32 %v3282_v59, 0.0  ;;  %v2835_v24 = vadd.f32 %v2834_v26, %v7342_v3  ;;  %v3284_v19 = vadd.f32 %v3283_v34, %v7342_v3  ;;  %v7347_v59 = vld [vmem:[#allocation10_spill] sm:$0xff] }
 0x3ed   : > { %v2838_v60 = vpop.f32.mrf.mxu0  ;;  %v3287_v39 = vpop.f32.mrf.mxu1 }
 0x3ee   : > { %4280 = vst [vmem:[%s5850_s13 + $0xca0] sm:$0xff] %v3768_v15  ;;  %4282 = vst [vmem:[%s5850_s13 + $0xcb0] sm:$0xff] %v3770_v58  ;;  %v3769_v22 = vmax.f32 %v2835_v24, 0.0  ;;  %v3771_v1 = vmax.f32 %v3284_v19, 0.0  ;;  %v2839_v51 = vadd.f32 %v2838_v60, %v7343_v47  ;;  %v3288_v27 = vadd.f32 %v3287_v39, %v7343_v47 }
 0x3ef   : > { %v2840_v55 = vpop.f32.mrf.mxu0  ;;  %v3289_v52 = vpop.f32.mrf.mxu1 }
 0x3f0   : > { %4281 = vst [vmem:[%s5850_s13 + $0xca8] sm:$0xff] %v3769_v22  ;;  %4283 = vst [vmem:[%s5850_s13 + $0xcb8] sm:$0xff] %v3771_v1  ;;  %v3776_v14 = vmax.f32 %v2839_v51, 0.0  ;;  %v3778_v40 = vmax.f32 %v3288_v27, 0.0  ;;  %v2841_v42 = vadd.f32 %v2840_v55, %v7343_v47  ;;  %v3290_v9 = vadd.f32 %v3289_v52, %v7343_v47  ;;  %v7348_v27 = vld [vmem:[#allocation11_spill] sm:$0xff] }
 0x3f1   : > { %v2844_v33 = vpop.f32.mrf.mxu0  ;;  %v3293_v0 = vpop.f32.mrf.mxu1 }
 0x3f2   : > { %4288 = vst [vmem:[%s5850_s13 + $0xce0] sm:$0xff] %v3776_v14  ;;  %4290 = vst [vmem:[%s5850_s13 + $0xcf0] sm:$0xff] %v3778_v40  ;;  %v3777_v20 = vmax.f32 %v2841_v42, 0.0  ;;  %v3779_v56 = vmax.f32 %v3290_v9, 0.0  ;;  %v2845_v45 = vadd.f32 %v2844_v33, %v7344_v63  ;;  %v3294_v50 = vadd.f32 %v3293_v0, %v7344_v63 }
 0x3f3   : > { %v2846_v30 = vpop.f32.mrf.mxu0  ;;  %v3295_v5 = vpop.f32.mrf.mxu1 }
 0x3f4   : > { %4289 = vst [vmem:[%s5850_s13 + $0xce8] sm:$0xff] %v3777_v20  ;;  %4291 = vst [vmem:[%s5850_s13 + $0xcf8] sm:$0xff] %v3779_v56  ;;  %v3784_v28 = vmax.f32 %v2845_v45, 0.0  ;;  %v3786_v44 = vmax.f32 %v3294_v50, 0.0  ;;  %v2847_v32 = vadd.f32 %v2846_v30, %v7344_v63  ;;  %v3296_v2 = vadd.f32 %v3295_v5, %v7344_v63  ;;  %v7349_v50 = vld [vmem:[#allocation8_spill] sm:$0xff] }
 0x3f5   : > { %v2850_v61 = vpop.f32.mrf.mxu0  ;;  %v3299_v23 = vpop.f32.mrf.mxu1 }
 0x3f6   : > { %4296 = vst [vmem:[%s5850_s13 + $0xd20] sm:$0xff] %v3784_v28  ;;  %4298 = vst [vmem:[%s5850_s13 + $0xd30] sm:$0xff] %v3786_v44  ;;  %v3785_v31 = vmax.f32 %v2847_v32, 0.0  ;;  %v3787_v8 = vmax.f32 %v3296_v2, 0.0  ;;  %v2851_v7 = vadd.f32 %v2850_v61, %v7345_v17  ;;  %v3300_v49 = vadd.f32 %v3299_v23, %v7345_v17 }
 0x3f7   : > { %v2852_v12 = vpop.f32.mrf.mxu0  ;;  %v3301_v25 = vpop.f32.mrf.mxu1 }
 0x3f8   : > { %4297 = vst [vmem:[%s5850_s13 + $0xd28] sm:$0xff] %v3785_v31  ;;  %4299 = vst [vmem:[%s5850_s13 + $0xd38] sm:$0xff] %v3787_v8  ;;  %v3792_v36 = vmax.f32 %v2851_v7, 0.0  ;;  %v3794_v6 = vmax.f32 %v3300_v49, 0.0  ;;  %v2853_v21 = vadd.f32 %v2852_v12, %v7345_v17  ;;  %v3302_v62 = vadd.f32 %v3301_v25, %v7345_v17  ;;  %v7350_v49 = vld [vmem:[#allocation9_spill] sm:$0xff] }
 0x3f9   : > { %v2856_v11 = vpop.f32.mrf.mxu0  ;;  %v3305_v46 = vpop.f32.mrf.mxu1 }
 0x3fa   : > { %4304 = vst [vmem:[%s5850_s13 + $0xd60] sm:$0xff] %v3792_v36  ;;  %4306 = vst [vmem:[%s5850_s13 + $0xd70] sm:$0xff] %v3794_v6  ;;  %v3793_v16 = vmax.f32 %v2853_v21, 0.0  ;;  %v3795_v10 = vmax.f32 %v3302_v62, 0.0  ;;  %v2857_v57 = vadd.f32 %v2856_v11, %v7346_v38  ;;  %v3306_v53 = vadd.f32 %v3305_v46, %v7346_v38 }
 0x3fb   : > { %v2858_v43 = vpop.f32.mrf.mxu0  ;;  %v3307_v54 = vpop.f32.mrf.mxu1 }
 0x3fc   : > { %4305 = vst [vmem:[%s5850_s13 + $0xd68] sm:$0xff] %v3793_v16  ;;  %4307 = vst [vmem:[%s5850_s13 + $0xd78] sm:$0xff] %v3795_v10  ;;  %v3800_v4 = vmax.f32 %v2857_v57, 0.0  ;;  %v3802_v48 = vmax.f32 %v3306_v53, 0.0  ;;  %v2859_v35 = vadd.f32 %v2858_v43, %v7346_v38  ;;  %v3308_v41 = vadd.f32 %v3307_v54, %v7346_v38  ;;  %v7351_v53 = vld [vmem:[#allocation33_spill] sm:$0xff] }
 0x3fd   : > { %v2862_v18 = vpop.f32.mrf.mxu0  ;;  %v3311_v13 = vpop.f32.mrf.mxu1 }
 0x3fe   : > { %4312 = vst [vmem:[%s5850_s13 + $0xda0] sm:$0xff] %v3800_v4  ;;  %4314 = vst [vmem:[%s5850_s13 + $0xdb0] sm:$0xff] %v3802_v48  ;;  %v3801_v3 = vmax.f32 %v2859_v35, 0.0  ;;  %v3803_v29 = vmax.f32 %v3308_v41, 0.0  ;;  %v2863_v26 = vadd.f32 %v2862_v18, %v7347_v59  ;;  %v3312_v34 = vadd.f32 %v3311_v13, %v7347_v59 }
 0x3ff   : > { %v2864_v15 = vpop.f32.mrf.mxu0  ;;  %v3313_v58 = vpop.f32.mrf.mxu1 }
 0x400   : > { %4313 = vst [vmem:[%s5850_s13 + $0xda8] sm:$0xff] %v3801_v3  ;;  %4315 = vst [vmem:[%s5850_s13 + $0xdb8] sm:$0xff] %v3803_v29  ;;  %v3808_v24 = vmax.f32 %v2863_v26, 0.0  ;;  %v3810_v19 = vmax.f32 %v3312_v34, 0.0  ;;  %v2865_v60 = vadd.f32 %v2864_v15, %v7347_v59  ;;  %v3314_v39 = vadd.f32 %v3313_v58, %v7347_v59  ;;  %v7352_v34 = vld [vmem:[#allocation34_spill] sm:$0xff] }
 0x401   : > { %v2868_v22 = vpop.f32.mrf.mxu0  ;;  %v3317_v1 = vpop.f32.mrf.mxu1 }
 0x402   : > { %4320 = vst [vmem:[%s5850_s13 + $0xde0] sm:$0xff] %v3808_v24  ;;  %4322 = vst [vmem:[%s5850_s13 + $0xdf0] sm:$0xff] %v3810_v19  ;;  %v3809_v47 = vmax.f32 %v2865_v60, 0.0  ;;  %v3811_v51 = vmax.f32 %v3314_v39, 0.0  ;;  %v2869_v55 = vadd.f32 %v2868_v22, %v7348_v27  ;;  %v3318_v52 = vadd.f32 %v3317_v1, %v7348_v27 }
 0x403   : > { %v2870_v14 = vpop.f32.mrf.mxu0  ;;  %v3319_v40 = vpop.f32.mrf.mxu1 }
 0x404   : > { %4321 = vst [vmem:[%s5850_s13 + $0xde8] sm:$0xff] %v3809_v47  ;;  %4323 = vst [vmem:[%s5850_s13 + $0xdf8] sm:$0xff] %v3811_v51  ;;  %v3816_v42 = vmax.f32 %v2869_v55, 0.0  ;;  %v3818_v9 = vmax.f32 %v3318_v52, 0.0  ;;  %v2871_v33 = vadd.f32 %v2870_v14, %v7348_v27  ;;  %v3320_v0 = vadd.f32 %v3319_v40, %v7348_v27  ;;  %v7353_v52 = vld [vmem:[#allocation31_spill] sm:$0xff] }
 0x405   : > { %v2874_v20 = vpop.f32.mrf.mxu0  ;;  %v3323_v56 = vpop.f32.mrf.mxu1 }
 0x406   : > { %4328 = vst [vmem:[%s5850_s13 + $0xe20] sm:$0xff] %v3816_v42  ;;  %4330 = vst [vmem:[%s5850_s13 + $0xe30] sm:$0xff] %v3818_v9  ;;  %v3817_v63 = vmax.f32 %v2871_v33, 0.0  ;;  %v3819_v45 = vmax.f32 %v3320_v0, 0.0  ;;  %v2875_v30 = vadd.f32 %v2874_v20, %v7349_v50  ;;  %v3324_v5 = vadd.f32 %v3323_v56, %v7349_v50 }
 0x407   : > { %v2876_v28 = vpop.f32.mrf.mxu0  ;;  %v3325_v44 = vpop.f32.mrf.mxu1 }
 0x408   : > { %4329 = vst [vmem:[%s5850_s13 + $0xe28] sm:$0xff] %v3817_v63  ;;  %4331 = vst [vmem:[%s5850_s13 + $0xe38] sm:$0xff] %v3819_v45  ;;  %v3824_v32 = vmax.f32 %v2875_v30, 0.0  ;;  %v3826_v2 = vmax.f32 %v3324_v5, 0.0  ;;  %v2877_v61 = vadd.f32 %v2876_v28, %v7349_v50  ;;  %v3326_v23 = vadd.f32 %v3325_v44, %v7349_v50  ;;  %v7354_v5 = vld [vmem:[#allocation32_spill] sm:$0xff] }
 0x409   : > { %v2880_v31 = vpop.f32.mrf.mxu0  ;;  %v3329_v8 = vpop.f32.mrf.mxu1 }
 0x40a   : > { %4336 = vst [vmem:[%s5850_s13 + $0xe60] sm:$0xff] %v3824_v32  ;;  %4338 = vst [vmem:[%s5850_s13 + $0xe70] sm:$0xff] %v3826_v2  ;;  %v3825_v17 = vmax.f32 %v2877_v61, 0.0  ;;  %v3827_v7 = vmax.f32 %v3326_v23, 0.0  ;;  %v2881_v12 = vadd.f32 %v2880_v31, %v7350_v49  ;;  %v3330_v25 = vadd.f32 %v3329_v8, %v7350_v49 }
 0x40b   : > { %v2882_v36 = vpop.f32.mrf.mxu0  ;;  %v3331_v6 = vpop.f32.mrf.mxu1 }
 0x40c   : > { %4337 = vst [vmem:[%s5850_s13 + $0xe68] sm:$0xff] %v3825_v17  ;;  %4339 = vst [vmem:[%s5850_s13 + $0xe78] sm:$0xff] %v3827_v7  ;;  %v3832_v21 = vmax.f32 %v2881_v12, 0.0  ;;  %v3834_v62 = vmax.f32 %v3330_v25, 0.0  ;;  %v2883_v11 = vadd.f32 %v2882_v36, %v7350_v49  ;;  %v3332_v46 = vadd.f32 %v3331_v6, %v7350_v49 }
 0x40d   : > { %v2886_v16 = vpop.f32.mrf.mxu0  ;;  %v3335_v10 = vpop.f32.mrf.mxu1 }
 0x40e   : > { %4344 = vst [vmem:[%s5850_s13 + $0xea0] sm:$0xff] %v3832_v21  ;;  %4346 = vst [vmem:[%s5850_s13 + $0xeb0] sm:$0xff] %v3834_v62  ;;  %v3833_v38 = vmax.f32 %v2883_v11, 0.0  ;;  %v3835_v57 = vmax.f32 %v3332_v46, 0.0  ;;  %v2887_v43 = vadd.f32 %v2886_v16, %v7351_v53  ;;  %v3336_v54 = vadd.f32 %v3335_v10, %v7351_v53 }
 0x40f   : > { %v2888_v4 = vpop.f32.mrf.mxu0  ;;  %v3337_v48 = vpop.f32.mrf.mxu1 }
 0x410   : > { %4345 = vst [vmem:[%s5850_s13 + $0xea8] sm:$0xff] %v3833_v38  ;;  %4347 = vst [vmem:[%s5850_s13 + $0xeb8] sm:$0xff] %v3835_v57  ;;  %v3840_v35 = vmax.f32 %v2887_v43, 0.0  ;;  %v3842_v41 = vmax.f32 %v3336_v54, 0.0  ;;  %v2889_v18 = vadd.f32 %v2888_v4, %v7351_v53  ;;  %v3338_v13 = vadd.f32 %v3337_v48, %v7351_v53 }
 0x411   : > { %v2892_v3 = vpop.f32.mrf.mxu0  ;;  %v3341_v29 = vpop.f32.mrf.mxu1 }
 0x412   : > { %4352 = vst [vmem:[%s5850_s13 + $0xee0] sm:$0xff] %v3840_v35  ;;  %4354 = vst [vmem:[%s5850_s13 + $0xef0] sm:$0xff] %v3842_v41  ;;  %v3841_v59 = vmax.f32 %v2889_v18, 0.0  ;;  %v3843_v26 = vmax.f32 %v3338_v13, 0.0  ;;  %v2893_v15 = vadd.f32 %v2892_v3, %v7352_v34  ;;  %v3342_v58 = vadd.f32 %v3341_v29, %v7352_v34 }
 0x413   : > { %v2894_v24 = vpop.f32.mrf.mxu0  ;;  %v3343_v19 = vpop.f32.mrf.mxu1 }
 0x414   : > { %4353 = vst [vmem:[%s5850_s13 + $0xee8] sm:$0xff] %v3841_v59  ;;  %4355 = vst [vmem:[%s5850_s13 + $0xef8] sm:$0xff] %v3843_v26  ;;  %v3848_v60 = vmax.f32 %v2893_v15, 0.0  ;;  %v3850_v39 = vmax.f32 %v3342_v58, 0.0  ;;  %v2895_v22 = vadd.f32 %v2894_v24, %v7352_v34  ;;  %v3344_v1 = vadd.f32 %v3343_v19, %v7352_v34 }
 0x415   : > { %v2898_v47 = vpop.f32.mrf.mxu0  ;;  %v3347_v51 = vpop.f32.mrf.mxu1 }
 0x416   : > { %4360 = vst [vmem:[%s5850_s13 + $0xf20] sm:$0xff] %v3848_v60  ;;  %4362 = vst [vmem:[%s5850_s13 + $0xf30] sm:$0xff] %v3850_v39  ;;  %v3849_v27 = vmax.f32 %v2895_v22, 0.0  ;;  %v3851_v55 = vmax.f32 %v3344_v1, 0.0  ;;  %v2899_v14 = vadd.f32 %v2898_v47, %v7353_v52  ;;  %v3348_v40 = vadd.f32 %v3347_v51, %v7353_v52 }
 0x417   : > { %v2900_v42 = vpop.f32.mrf.mxu0  ;;  %v3349_v9 = vpop.f32.mrf.mxu1 }
 0x418   : > { %4361 = vst [vmem:[%s5850_s13 + $0xf28] sm:$0xff] %v3849_v27  ;;  %4363 = vst [vmem:[%s5850_s13 + $0xf38] sm:$0xff] %v3851_v55  ;;  %v3856_v33 = vmax.f32 %v2899_v14, 0.0  ;;  %v3858_v0 = vmax.f32 %v3348_v40, 0.0  ;;  %v2901_v20 = vadd.f32 %v2900_v42, %v7353_v52  ;;  %v3350_v56 = vadd.f32 %v3349_v9, %v7353_v52 }
 0x419   : > { %v2904_v63 = vpop.f32.mrf.mxu0  ;;  %v3353_v45 = vpop.f32.mrf.mxu1 }
 0x41a   : > { %4368 = vst [vmem:[%s5850_s13 + $0xf60] sm:$0xff] %v3856_v33  ;;  %4370 = vst [vmem:[%s5850_s13 + $0xf70] sm:$0xff] %v3858_v0  ;;  %v3857_v50 = vmax.f32 %v2901_v20, 0.0  ;;  %v3859_v30 = vmax.f32 %v3350_v56, 0.0  ;;  %v2905_v28 = vadd.f32 %v2904_v63, %v7354_v5  ;;  %v3354_v44 = vadd.f32 %v3353_v45, %v7354_v5 }
 0x41b   : > { %v2906_v32 = vpop.f32.mrf.mxu0  ;;  %v3355_v2 = vpop.f32.mrf.mxu1 }
 0x41c   : > { %4369 = vst [vmem:[%s5850_s13 + $0xf68] sm:$0xff] %v3857_v50  ;;  %4371 = vst [vmem:[%s5850_s13 + $0xf78] sm:$0xff] %v3859_v30  ;;  %v3864_v61 = vmax.f32 %v2905_v28, 0.0  ;;  %v3866_v23 = vmax.f32 %v3354_v44, 0.0  ;;  %v2907_v31 = vadd.f32 %v2906_v32, %v7354_v5  ;;  %v3356_v8 = vadd.f32 %v3355_v2, %v7354_v5 }
 0x41d   : > { %v2910_v17 = vpop.f32.mrf.mxu0  ;;  %v3359_v7 = vpop.f32.mrf.mxu1 }
 0x41e   : > { %4376 = vst [vmem:[%s5850_s13 + $0xfa0] sm:$0xff] %v3864_v61  ;;  %4378 = vst [vmem:[%s5850_s13 + $0xfb0] sm:$0xff] %v3866_v23  ;;  %v3865_v49 = vmax.f32 %v2907_v31, 0.0  ;;  %v3867_v12 = vmax.f32 %v3356_v8, 0.0  ;;  %v2911_v25 = vadd.f32 %v2910_v17, %v6603_v37  ;;  %v3360_v36 = vadd.f32 %v3359_v7, %v6603_v37 }
 0x41f   : > { %v2912_v6 = vpop.f32.mrf.mxu0  ;;  %v3361_v21 = vpop.f32.mrf.mxu1 }
 0x420   : > { %4377 = vst [vmem:[%s5850_s13 + $0xfa8] sm:$0xff] %v3865_v49  ;;  %4379 = vst [vmem:[%s5850_s13 + $0xfb8] sm:$0xff] %v3867_v12  ;;  %v3872_v62 = vmax.f32 %v2911_v25, 0.0  ;;  %v3874_v11 = vmax.f32 %v3360_v36, 0.0  ;;  %v2913_v46 = vadd.f32 %v2912_v6, %v6603_v37  ;;  %v3362_v16 = vadd.f32 %v3361_v21, %v6603_v37 }
 0x422   : > { %4384 = vst [vmem:[%s5850_s13 + $0xfe0] sm:$0xff] %v3872_v62  ;;  %4386 = vst [vmem:[%s5850_s13 + $0xff0] sm:$0xff] %v3874_v11  ;;  %v3873_v10 = vmax.f32 %v2913_v46, 0.0  ;;  %v3875_v38 = vmax.f32 %v3362_v16, 0.0 }
 0x424   : > { %4385 = vst [vmem:[%s5850_s13 + $0xfe8] sm:$0xff] %v3873_v10  ;;  %4387 = vst [vmem:[%s5850_s13 + $0xff8] sm:$0xff] %v3875_v38 }
 0x425   : > { %4761 = shalt.err (!%p4758_p3)
}
 0x426   : > { %s4762_s5 = scalar_lea.hbm %s7166_s9, 65536  ;;  %s4766_s22 = scalar_lea.hbm %s7225_s4, 131072 }
 0x427   : > { %p4763_p5 = scmp.ne.s32.totalorder %s7166_s9, %s4762_s5  ;;  %p4767_p9 = scmp.lt.s32.totalorder %s7166_s9, %s7225_s4 }
 0x428   : > { %p4768_p12 = scmp.lt.s32.totalorder %s4766_s22, %s4762_s5 }
 0x429   : > { %p4764_p6 = pnand %p4763_p5, %p4903_p4 }
 0x42a   : > { %p4769_p10 = por %p4768_p12, %p4767_p9 }
 0x42b   : > { %p4765_p7 = pneg %p4764_p6 }
 0x42d   : > { %p4770_p11 = pnand %p4769_p10, %p4765_p7 }
 0x42f   : > { %4773 = shalt.err (!%p4770_p11)
}
 0x430   : > { %s4836_s29 = smov 1024   ;;  %s4837_s30 = smov 64  }
 0x431   : > { %4588 = dma.vmem_to_hbm [thread:$0]  (%p4903_p4), %s7168_s6, 65536, %s7166_s9, %s7176_s18, %s4836_s29, %s4836_s29, %s4837_s30  }
 0x432 PF: > { %p4600_p13 = scmp.ge.s32.totalorder %s4828_s20, 2  ;;  %s4419_s7 = sand.u32 1, %s4808_s15  }
 0x433   : > { %s4420_s8 = scalar_lea.sflag [#allocation4], %s4419_s7 }
 0x434   : > { %p4595_p0 = pnand %p4600_p13, %p4910_p8 }
 0x436   : > { %p4596_p1 = pneg %p4595_p0 }
 0x438   : > { %4803 = dma.done.wait (%p4596_p1), %s4420_s8, 65536  }
 0x439   : > { %4805 = vsyncadd (%p4596_p1), %s4420_s8, 4294901760  ;;  %s18_s20 = sadd.s32 1, %s4828_s20   ;;  %s7355_s15 = smov %s4812_s16 }
 0x43a   : > { %p15_p2 = scmp.ge.s32.totalorder %s18_s20, 4   ;;  %s7356_s16 = smov %s4816_s17 }
 0x43b   : > { %s7357_s17 = smov %s4916_s28  ;;  %s7358_s18 = smov %s4824_s19 }
 0x43c   : > { %s7359_s19 = smov %s7361_s23  ;;  %17 = sbr.rel (!%p15_p2) target bundleno = 5 (0x5), region = 76 }
 0x441   :  { %4425 = vsyncpa [#allocation3], 1 }
 0x442   :  { %4427 = vsyncpa [#allocation3 + $0x1], 1 }
 0x443   :  { %4428 = vsyncpa [#allocation4], 1 }
 0x444   :  { %4430 = vsyncpa [#allocation4 + $0x1], 1 }

</bundles_post_ra>
